<compile_context>
chip_gen: v7x
topology: tpu7x:2x2x1
jax: 0.10.0
libtpu: 0.0.40
codegen_flags: <defaults>
</compile_context>

<pallas_src>
import functools
import math

import jax
import jax.numpy as jnp
from jax.experimental import pallas as pl
from jax.experimental.pallas import tpu as pltpu

NEG_SLOPE = 0.01      # F.leaky_relu default negative_slope
NEG_BIG = -1e30       # finite "-inf" for masking (avoids inf-inf NaNs in online softmax)


def _gat_kernel(z_ref, s_srcT_ref, s_dst_ref, adj_ref, out_ref,
                m_sc, l_sc, acc_sc, *, num_heads, out_dim):
    """One grid step = (dst-node tile i, src-node tile j); online softmax over j."""
    j = pl.program_id(1)

    @pl.when(j == 0)
    def _init():
        m_sc[...] = jnp.full_like(m_sc, NEG_BIG)
        l_sc[...] = jnp.zeros_like(l_sc)
        acc_sc[...] = jnp.zeros_like(acc_sc)

    adj = adj_ref[...].astype(jnp.float32)            # [TQ, TK] (int8 in HBM)
    edge = adj > 0
    s_dst = s_dst_ref[...]                            # [TQ, H]   f32 (precomputed)
    s_srcT = s_srcT_ref[...]                          # [H, TK]   f32 (precomputed)
    z = z_ref[...]                                    # [TK, H*Dout] bf16 (precomputed)

    for k in range(num_heads):                        # short static loop, fully unrolled
        e = s_dst[:, k:k + 1] + s_srcT[k:k + 1, :]                 # [TQ, TK]
        e = jnp.where(e >= 0, e, NEG_SLOPE * e)                    # leaky_relu
        masked = jnp.where(edge, e, jnp.float32(NEG_BIG))
        m_prev = m_sc[k]                                           # [TQ, 1]
        m_new = jnp.maximum(m_prev, masked.max(axis=1, keepdims=True))
        scale = jnp.exp(m_prev - m_new)                            # rescale old accum
        p = jnp.where(edge, jnp.exp(masked - m_new), 0.0)          # [TQ, TK]
        l_sc[k] = scale * l_sc[k] + p.sum(axis=1, keepdims=True)
        # NOTE: Dout is narrow (MXU lane under-utilization) -- acceptable here;
        # restructure / pad Dout only if profiling shows the MXU binding.
        acc_sc[k] = scale * acc_sc[k] + jnp.dot(
            p.astype(z.dtype), z[:, k * out_dim:(k + 1) * out_dim],
            preferred_element_type=jnp.float32)                    # [TQ, Dout]
        m_sc[k] = m_new

    @pl.when(j == pl.num_programs(1) - 1)
    def _finalize():
        outs = []
        for k in range(num_heads):
            denom = jnp.where(l_sc[k] > 0, l_sc[k], jnp.float32(1.0))
            outs.append(acc_sc[k] / denom)        # zero-in-degree rows stay exactly 0
        # Single store of the already-concatenated ('cat') layout.
        out_ref[...] = jnp.concatenate(outs, axis=1).astype(out_ref.dtype)


def multi_head_gat(h, adj, W, a_src, a_dst, merge="cat", tq=None, tk=None):
    """h: [N, Din]; adj: [N_dst, N_src] 0/1; W: [H, Din, Dout];
    a_src / a_dst: [H, 1, Dout].  Returns [N, H*Dout] for merge='cat'."""
    N, in_dim = h.shape
    H, _, out_dim = W.shape
    HD = H * out_dim

    if tq is None:
        tq = N if N <= 256 else 256       # 256 fills v6e/v7x MXU; still fine on v5e
    if tk is None:
        tk = N if N <= 512 else 512
    assert N % tq == 0 and (tq % 8 == 0 or tq == N), (N, tq)
    assert N % tk == 0 and (tk % 128 == 0 or tk == N), (N, tk)

    # ---- Hoisted projections: computed ONCE with plain XLA, not per grid tile ----
    w_all = jnp.transpose(W, (1, 0, 2)).reshape(in_dim, HD).astype(jnp.float32)
    z_all = jnp.dot(h.astype(jnp.float32), w_all)                          # [N, H*Dout]
    z_heads = z_all.reshape(N, H, out_dim)
    s_src = jnp.einsum('nhd,hd->nh', z_heads, a_src[:, 0, :].astype(jnp.float32))
    s_dst = jnp.einsum('nhd,hd->nh', z_heads, a_dst[:, 0, :].astype(jnp.float32))
    s_srcT = s_src.T                                                       # [H, N]
    z_bf16 = z_all.astype(jnp.bfloat16)    # bf16 MXU inputs, f32 accumulation in-kernel
    adj_i8 = (adj != 0).astype(jnp.int8)   # 4x smaller HBM stream / VMEM tile

    kernel = functools.partial(_gat_kernel, num_heads=H, out_dim=out_dim)

    # VMEM budget: double-buffered tiles + lane-padded scratch, with headroom.
    lane = 128
    tile_bytes = 2 * (tk * HD * 2                        # z tile (bf16)
                      + H * max(tk, lane) * 4            # s_srcT tile
                      + tq * max(H, lane) * 4            # s_dst tile
                      + tq * tk                          # adj tile (int8)
                      + tq * max(HD, lane) * 4)          # out tile
    scratch_bytes = 2 * H * tq * lane * 4 + H * tq * max(out_dim, lane) * 4
    vmem_limit = int(min(max(2 * (tile_bytes + scratch_bytes) + (2 << 20),
                             8 << 20), 64 << 20))

    out = pl.pallas_call(
        kernel,
        out_shape=jax.ShapeDtypeStruct((N, HD), jnp.float32),
        grid_spec=pltpu.PrefetchScalarGridSpec(
            num_scalar_prefetch=0,
            grid=(N // tq, N // tk),             # (dst tiles, src/reduction tiles)
            in_specs=[
                pl.BlockSpec((tk, HD), lambda i, j: (j, 0)),    # z rows for src tile
                pl.BlockSpec((H, tk), lambda i, j: (0, j)),     # s_src^T cols for src tile
                pl.BlockSpec((tq, H), lambda i, j: (i, 0)),     # s_dst rows for dst tile
                pl.BlockSpec((tq, tk), lambda i, j: (i, j)),    # adj tile (int8)
            ],
            out_specs=pl.BlockSpec((tq, HD), lambda i, j: (i, 0)),
            scratch_shapes=[
                pltpu.VMEM((H, tq, 1), jnp.float32),            # running max
                pltpu.VMEM((H, tq, 1), jnp.float32),            # running denom
                pltpu.VMEM((H, tq, out_dim), jnp.float32),      # running weighted z
            ],
        ),
        compiler_params=pltpu.CompilerParams(
            dimension_semantics=("parallel", "arbitrary"),      # dst tiles || , src reduce
            vmem_limit_bytes=vmem_limit,
        ),
    )(z_bf16, s_srcT, s_dst, adj_i8)

    if merge == "cat":
        return out                          # already [N, H*Dout]
    # merge != 'cat' -> scalar mean of all head outputs (torch.mean of stack).
    return jnp.mean(out)


def init_params(key, in_dim, out_dim, num_heads):
    """Xavier-normal init with gain = calculate_gain('relu') = sqrt(2)."""
    gain = math.sqrt(2.0)
    k_w, k_a = jax.random.split(key)
    std_w = gain * math.sqrt(2.0 / (in_dim + out_dim))           # fc.weight [out, in]
    std_a = gain * math.sqrt(2.0 / (2 * out_dim + 1))            # attn_fc.weight [1, 2*out]
    W = jax.random.normal(k_w, (num_heads, in_dim, out_dim), jnp.float32) * std_w
    A = jax.random.normal(k_a, (num_heads, 2 * out_dim), jnp.float32) * std_a
    a_src = A[:, :out_dim].reshape(num_heads, 1, out_dim)
    a_dst = A[:, out_dim:].reshape(num_heads, 1, out_dim)
    return W, a_src, a_dst


def _reference(h, adj, W, a_src, a_dst):
    """Pure-JAX f32 reference of the same dense-GAT math (for validation)."""
    outs = []
    for hh in range(W.shape[0]):
        z = h @ W[hh]
        s_src = (z * a_src[hh]).sum(-1)      # [N]
        s_dst = (z * a_dst[hh]).sum(-1)      # [N]
        scores = s_dst[:, None] + s_src[None, :]
        scores = jnp.where(scores >= 0, scores, NEG_SLOPE * scores)
        masked = jnp.where(adj > 0, scores, NEG_BIG)
        m = masked.max(axis=1, keepdims=True)
        p = jnp.exp(masked - m) * adj
        denom = p.sum(axis=1, keepdims=True)
        alpha = p / jnp.where(denom > 0, denom, 1.0)
        outs.append(alpha @ z)
    return jnp.concatenate(outs, axis=1)


if __name__ == "__main__":
    N, IN_DIM, OUT_DIM, NUM_HEADS = 256, 32, 16, 4

    key = jax.random.PRNGKey(0)
    k_h, k_adj, k_p = jax.random.split(key, 3)

    # Node features.
    h = jax.random.normal(k_h, (N, IN_DIM), jnp.float32)

    # Deterministic random graph with self-loops (every node has >= 1 in-edge).
    adj = (jax.random.uniform(k_adj, (N, N)) < 0.1).astype(jnp.float32)
    adj = jnp.maximum(adj, jnp.eye(N, dtype=jnp.float32))

    W, a_src, a_dst = init_params(k_p, IN_DIM, OUT_DIM, NUM_HEADS)

    # tq=tk=128 -> 2x2 grid: exercises both the parallel dst-tile axis and the
    # online-softmax reduction over source tiles.
    out = multi_head_gat(h, adj, W, a_src, a_dst, merge="cat", tq=128, tk=128)
    out = jax.block_until_ready(out)

    ref = _reference(h, adj, W, a_src, a_dst)
    assert out.shape == (N, NUM_HEADS * OUT_DIM), out.shape
    # 3e-2 tolerance: z / attention probabilities enter the MXU in bf16
    # (f32 accumulation); all softmax math and the reference are f32.
    assert jnp.allclose(out, ref, atol=3e-2, rtol=3e-2), "mismatch vs reference"

    print("KERNEL_OK")
</pallas_src>

<mosaic_0001>
module attributes {stable_mosaic.version = 11 : i64} {
  func.func @_gat_kernel(%arg0: i32, %arg1: i32, %arg2: memref<128x64xbf16, #tpu.memory_space<vmem>>, %arg3: memref<4x128xf32, #tpu.memory_space<vmem>>, %arg4: memref<128x4xf32, #tpu.memory_space<vmem>>, %arg5: memref<128x128xi8, #tpu.memory_space<vmem>>, %arg6: memref<128x64xf32, #tpu.memory_space<vmem>>, %arg7: memref<4x128x1xf32, #tpu.memory_space<vmem>>, %arg8: memref<4x128x1xf32, #tpu.memory_space<vmem>>, %arg9: memref<4x128x16xf32, #tpu.memory_space<vmem>>) attributes {dimension_semantics = [#tpu.dimension_semantics<parallel>, #tpu.dimension_semantics<arbitrary>], iteration_bounds = array<i64: 2, 2>, scalar_prefetch = 0 : i64, scratch_operands = 3 : i64, tpu.core_type = #tpu.core_type<tc>, window_params = [{transform_indices = @transform_0, window_bounds = array<i64: 128, 64>}, {transform_indices = @transform_1, window_bounds = array<i64: 4, 128>}, {transform_indices = @transform_2, window_bounds = array<i64: 128, 4>}, {transform_indices = @transform_3, window_bounds = array<i64: 128, 128>}, {transform_indices = @transform_4, window_bounds = array<i64: 128, 64>}]} {
    %c0_i32 = arith.constant 0 : i32
    %0 = arith.cmpi eq, %arg1, %c0_i32 : i32
    %1 = arith.extui %0 : i1 to i32
    %c0_i32_0 = arith.constant 0 : i32
    %2 = arith.cmpi ne, %1, %c0_i32_0 : i32
    scf.if %2 {
      %cst_106 = arith.constant -1.000000e+30 : f32
      %201 = vector.broadcast %cst_106 : f32 to vector<4x128x1xf32>
      %c0_107 = arith.constant 0 : index
      %c0_108 = arith.constant 0 : index
      %c0_109 = arith.constant 0 : index
      %202 = vector.load %arg7[%c0_107, %c0_108, %c0_109] : memref<4x128x1xf32, #tpu.memory_space<vmem>>, vector<4x128x1xf32>
      tpu.vector_store %arg7[%c0_107, %c0_108, %c0_109], %201 {strides = array<i32>} : memref<4x128x1xf32, #tpu.memory_space<vmem>>, vector<4x128x1xf32>,
      %cst_110 = arith.constant 0.000000e+00 : f32
      %203 = vector.broadcast %cst_110 : f32 to vector<4x128x1xf32>
      %c0_111 = arith.constant 0 : index
      %c0_112 = arith.constant 0 : index
      %c0_113 = arith.constant 0 : index
      %204 = vector.load %arg8[%c0_111, %c0_112, %c0_113] : memref<4x128x1xf32, #tpu.memory_space<vmem>>, vector<4x128x1xf32>
      tpu.vector_store %arg8[%c0_111, %c0_112, %c0_113], %203 {strides = array<i32>} : memref<4x128x1xf32, #tpu.memory_space<vmem>>, vector<4x128x1xf32>,
      %cst_114 = arith.constant 0.000000e+00 : f32
      %205 = vector.broadcast %cst_114 : f32 to vector<4x128x16xf32>
      %c0_115 = arith.constant 0 : index
      %c0_116 = arith.constant 0 : index
      %c0_117 = arith.constant 0 : index
      %206 = vector.load %arg9[%c0_115, %c0_116, %c0_117] : memref<4x128x16xf32, #tpu.memory_space<vmem>>, vector<4x128x16xf32>
      tpu.vector_store %arg9[%c0_115, %c0_116, %c0_117], %205 {strides = array<i32>} : memref<4x128x16xf32, #tpu.memory_space<vmem>>, vector<4x128x16xf32>,
    } else {
    }
    %c0 = arith.constant 0 : index
    %c0_1 = arith.constant 0 : index
    %3 = vector.load %arg5[%c0, %c0_1] : memref<128x128xi8, #tpu.memory_space<vmem>>, vector<128x128xi8>
    %4 = arith.sitofp %3 : vector<128x128xi8> to vector<128x128xf32>
    %cst = arith.constant 0.000000e+00 : f32
    %5 = vector.broadcast %cst : f32 to vector<128x128xf32>
    %6 = arith.cmpf ogt, %4, %5 : vector<128x128xf32>
    %c0_2 = arith.constant 0 : index
    %c0_3 = arith.constant 0 : index
    %7 = vector.load %arg4[%c0_2, %c0_3] : memref<128x4xf32, #tpu.memory_space<vmem>>, vector<128x4xf32>
    %c0_4 = arith.constant 0 : index
    %c0_5 = arith.constant 0 : index
    %8 = vector.load %arg3[%c0_4, %c0_5] : memref<4x128xf32, #tpu.memory_space<vmem>>, vector<4x128xf32>
    %c0_6 = arith.constant 0 : index
    %c0_7 = arith.constant 0 : index
    %9 = vector.load %arg2[%c0_6, %c0_7] : memref<128x64xbf16, #tpu.memory_space<vmem>>, vector<128x64xbf16>
    %10 = vector.extract_strided_slice %7 {offsets = [0, 0], sizes = [128, 1], strides = [1, 1]} : vector<128x4xf32> to vector<128x1xf32>
    %11 = vector.extract_strided_slice %8 {offsets = [0, 0], sizes = [1, 128], strides = [1, 1]} : vector<4x128xf32> to vector<1x128xf32>
    %12 = vector.broadcast %10 : vector<128x1xf32> to vector<128x128xf32>
    %13 = vector.broadcast %11 : vector<1x128xf32> to vector<128x128xf32>
    %14 = arith.addf %12, %13 : vector<128x128xf32>
    %cst_8 = arith.constant 0.000000e+00 : f32
    %15 = vector.broadcast %cst_8 : f32 to vector<128x128xf32>
    %16 = arith.cmpf oge, %14, %15 : vector<128x128xf32>
    %cst_9 = arith.constant 0.00999999977 : f32
    %17 = vector.broadcast %cst_9 : f32 to vector<128x128xf32>
    %18 = arith.mulf %17, %14 : vector<128x128xf32>
    %19 = arith.select %16, %14, %18 : vector<128x128xi1>, vector<128x128xf32>
    %cst_10 = arith.constant -1.000000e+30 : f32
    %20 = vector.broadcast %cst_10 : f32 to vector<128x128xf32>
    %21 = arith.select %6, %19, %20 : vector<128x128xi1>, vector<128x128xf32>
    %c0_11 = arith.constant 0 : index
    %c0_12 = arith.constant 0 : index
    %c0_13 = arith.constant 0 : index
    %22 = vector.load %arg7[%c0_11, %c0_12, %c0_13] : memref<4x128x1xf32, #tpu.memory_space<vmem>>, vector<1x128x1xf32>
    %23 = vector.shape_cast %22 : vector<1x128x1xf32> to vector<128x1xf32>
    %cst_14 = arith.constant dense<0xFF800000> : vector<128xf32>
    %24 = vector.multi_reduction <maximumf>, %21, %cst_14 [1] : vector<128x128xf32> to vector<128xf32>
    %25 = vector.shape_cast %24 : vector<128xf32> to vector<128x1xf32>
    %26 = arith.maximumf %23, %25 : vector<128x1xf32>
    %27 = arith.subf %23, %26 : vector<128x1xf32>
    %28 = math.exp %27 : vector<128x1xf32>
    %29 = vector.broadcast %26 : vector<128x1xf32> to vector<128x128xf32>
    %30 = arith.subf %21, %29 : vector<128x128xf32>
    %31 = math.exp %30 : vector<128x128xf32>
    %cst_15 = arith.constant 0.000000e+00 : f32
    %32 = vector.broadcast %cst_15 : f32 to vector<128x128xf32>
    %33 = arith.select %6, %31, %32 : vector<128x128xi1>, vector<128x128xf32>
    %c0_16 = arith.constant 0 : index
    %c0_17 = arith.constant 0 : index
    %c0_18 = arith.constant 0 : index
    %34 = vector.load %arg8[%c0_16, %c0_17, %c0_18] : memref<4x128x1xf32, #tpu.memory_space<vmem>>, vector<1x128x1xf32>
    %35 = vector.shape_cast %34 : vector<1x128x1xf32> to vector<128x1xf32>
    %36 = arith.mulf %28, %35 : vector<128x1xf32>
    %cst_19 = arith.constant dense<0.000000e+00> : vector<128xf32>
    %37 = vector.multi_reduction <add>, %33, %cst_19 [1] : vector<128x128xf32> to vector<128xf32>
    %38 = vector.shape_cast %37 : vector<128xf32> to vector<128x1xf32>
    %39 = arith.addf %36, %38 : vector<128x1xf32>
    %c0_20 = arith.constant 0 : index
    %c0_21 = arith.constant 0 : index
    %c0_22 = arith.constant 0 : index
    %40 = vector.load %arg8[%c0_20, %c0_21, %c0_22] : memref<4x128x1xf32, #tpu.memory_space<vmem>>, vector<1x128x1xf32>
    %41 = vector.shape_cast %40 : vector<1x128x1xf32> to vector<128x1xf32>
    %42 = vector.shape_cast %39 : vector<128x1xf32> to vector<1x128x1xf32>
    tpu.vector_store %arg8[%c0_20, %c0_21, %c0_22], %42 {strides = array<i32>} : memref<4x128x1xf32, #tpu.memory_space<vmem>>, vector<1x128x1xf32>,
    %c0_23 = arith.constant 0 : index
    %c0_24 = arith.constant 0 : index
    %c0_25 = arith.constant 0 : index
    %43 = vector.load %arg9[%c0_23, %c0_24, %c0_25] : memref<4x128x16xf32, #tpu.memory_space<vmem>>, vector<1x128x16xf32>
    %44 = vector.shape_cast %43 : vector<1x128x16xf32> to vector<128x16xf32>
    %45 = vector.broadcast %28 : vector<128x1xf32> to vector<128x16xf32>
    %46 = arith.mulf %45, %44 : vector<128x16xf32>
    %47 = arith.truncf %33 : vector<128x128xf32> to vector<128x128xbf16>
    %48 = vector.extract_strided_slice %9 {offsets = [0, 0], sizes = [128, 16], strides = [1, 1]} : vector<128x64xbf16> to vector<128x16xbf16>
    %cst_26 = arith.constant dense<0.000000e+00> : vector<128x16xf32>
    %49 = tpu.matmul %47, %48, %cst_26 {dimension_numbers = #tpu.dot_dimension_numbers<[1], [0], [0], [1], [0, 0, 1, 1], [], []>} : vector<128x128xbf16>, vector<128x16xbf16>, vector<128x16xf32> -> vector<128x16xf32>
    %50 = arith.addf %46, %49 : vector<128x16xf32>
    %c0_27 = arith.constant 0 : index
    %c0_28 = arith.constant 0 : index
    %c0_29 = arith.constant 0 : index
    %51 = vector.load %arg9[%c0_27, %c0_28, %c0_29] : memref<4x128x16xf32, #tpu.memory_space<vmem>>, vector<1x128x16xf32>
    %52 = vector.shape_cast %51 : vector<1x128x16xf32> to vector<128x16xf32>
    %53 = vector.shape_cast %50 : vector<128x16xf32> to vector<1x128x16xf32>
    tpu.vector_store %arg9[%c0_27, %c0_28, %c0_29], %53 {strides = array<i32>} : memref<4x128x16xf32, #tpu.memory_space<vmem>>, vector<1x128x16xf32>,
    %c0_30 = arith.constant 0 : index
    %c0_31 = arith.constant 0 : index
    %c0_32 = arith.constant 0 : index
    %54 = vector.load %arg7[%c0_30, %c0_31, %c0_32] : memref<4x128x1xf32, #tpu.memory_space<vmem>>, vector<1x128x1xf32>
    %55 = vector.shape_cast %54 : vector<1x128x1xf32> to vector<128x1xf32>
    %56 = vector.shape_cast %26 : vector<128x1xf32> to vector<1x128x1xf32>
    tpu.vector_store %arg7[%c0_30, %c0_31, %c0_32], %56 {strides = array<i32>} : memref<4x128x1xf32, #tpu.memory_space<vmem>>, vector<1x128x1xf32>,
    %57 = vector.extract_strided_slice %7 {offsets = [0, 1], sizes = [128, 1], strides = [1, 1]} : vector<128x4xf32> to vector<128x1xf32>
    %58 = vector.extract_strided_slice %8 {offsets = [1, 0], sizes = [1, 128], strides = [1, 1]} : vector<4x128xf32> to vector<1x128xf32>
    %59 = vector.broadcast %57 : vector<128x1xf32> to vector<128x128xf32>
    %60 = vector.broadcast %58 : vector<1x128xf32> to vector<128x128xf32>
    %61 = arith.addf %59, %60 : vector<128x128xf32>
    %cst_33 = arith.constant 0.000000e+00 : f32
    %62 = vector.broadcast %cst_33 : f32 to vector<128x128xf32>
    %63 = arith.cmpf oge, %61, %62 : vector<128x128xf32>
    %cst_34 = arith.constant 0.00999999977 : f32
    %64 = vector.broadcast %cst_34 : f32 to vector<128x128xf32>
    %65 = arith.mulf %64, %61 : vector<128x128xf32>
    %66 = arith.select %63, %61, %65 : vector<128x128xi1>, vector<128x128xf32>
    %cst_35 = arith.constant -1.000000e+30 : f32
    %67 = vector.broadcast %cst_35 : f32 to vector<128x128xf32>
    %68 = arith.select %6, %66, %67 : vector<128x128xi1>, vector<128x128xf32>
    %c1 = arith.constant 1 : index
    %c0_36 = arith.constant 0 : index
    %c0_37 = arith.constant 0 : index
    %69 = vector.load %arg7[%c1, %c0_36, %c0_37] : memref<4x128x1xf32, #tpu.memory_space<vmem>>, vector<1x128x1xf32>
    %70 = vector.shape_cast %69 : vector<1x128x1xf32> to vector<128x1xf32>
    %cst_38 = arith.constant dense<0xFF800000> : vector<128xf32>
    %71 = vector.multi_reduction <maximumf>, %68, %cst_38 [1] : vector<128x128xf32> to vector<128xf32>
    %72 = vector.shape_cast %71 : vector<128xf32> to vector<128x1xf32>
    %73 = arith.maximumf %70, %72 : vector<128x1xf32>
    %74 = arith.subf %70, %73 : vector<128x1xf32>
    %75 = math.exp %74 : vector<128x1xf32>
    %76 = vector.broadcast %73 : vector<128x1xf32> to vector<128x128xf32>
    %77 = arith.subf %68, %76 : vector<128x128xf32>
    %78 = math.exp %77 : vector<128x128xf32>
    %cst_39 = arith.constant 0.000000e+00 : f32
    %79 = vector.broadcast %cst_39 : f32 to vector<128x128xf32>
    %80 = arith.select %6, %78, %79 : vector<128x128xi1>, vector<128x128xf32>
    %c1_40 = arith.constant 1 : index
    %c0_41 = arith.constant 0 : index
    %c0_42 = arith.constant 0 : index
    %81 = vector.load %arg8[%c1_40, %c0_41, %c0_42] : memref<4x128x1xf32, #tpu.memory_space<vmem>>, vector<1x128x1xf32>
    %82 = vector.shape_cast %81 : vector<1x128x1xf32> to vector<128x1xf32>
    %83 = arith.mulf %75, %82 : vector<128x1xf32>
    %cst_43 = arith.constant dense<0.000000e+00> : vector<128xf32>
    %84 = vector.multi_reduction <add>, %80, %cst_43 [1] : vector<128x128xf32> to vector<128xf32>
    %85 = vector.shape_cast %84 : vector<128xf32> to vector<128x1xf32>
    %86 = arith.addf %83, %85 : vector<128x1xf32>
    %c1_44 = arith.constant 1 : index
    %c0_45 = arith.constant 0 : index
    %c0_46 = arith.constant 0 : index
    %87 = vector.load %arg8[%c1_44, %c0_45, %c0_46] : memref<4x128x1xf32, #tpu.memory_space<vmem>>, vector<1x128x1xf32>
    %88 = vector.shape_cast %87 : vector<1x128x1xf32> to vector<128x1xf32>
    %89 = vector.shape_cast %86 : vector<128x1xf32> to vector<1x128x1xf32>
    tpu.vector_store %arg8[%c1_44, %c0_45, %c0_46], %89 {strides = array<i32>} : memref<4x128x1xf32, #tpu.memory_space<vmem>>, vector<1x128x1xf32>,
    %c1_47 = arith.constant 1 : index
    %c0_48 = arith.constant 0 : index
    %c0_49 = arith.constant 0 : index
    %90 = vector.load %arg9[%c1_47, %c0_48, %c0_49] : memref<4x128x16xf32, #tpu.memory_space<vmem>>, vector<1x128x16xf32>
    %91 = vector.shape_cast %90 : vector<1x128x16xf32> to vector<128x16xf32>
    %92 = vector.broadcast %75 : vector<128x1xf32> to vector<128x16xf32>
    %93 = arith.mulf %92, %91 : vector<128x16xf32>
    %94 = arith.truncf %80 : vector<128x128xf32> to vector<128x128xbf16>
    %95 = vector.extract_strided_slice %9 {offsets = [0, 16], sizes = [128, 16], strides = [1, 1]} : vector<128x64xbf16> to vector<128x16xbf16>
    %cst_50 = arith.constant dense<0.000000e+00> : vector<128x16xf32>
    %96 = tpu.matmul %94, %95, %cst_50 {dimension_numbers = #tpu.dot_dimension_numbers<[1], [0], [0], [1], [0, 0, 1, 1], [], []>} : vector<128x128xbf16>, vector<128x16xbf16>, vector<128x16xf32> -> vector<128x16xf32>
    %97 = arith.addf %93, %96 : vector<128x16xf32>
    %c1_51 = arith.constant 1 : index
    %c0_52 = arith.constant 0 : index
    %c0_53 = arith.constant 0 : index
    %98 = vector.load %arg9[%c1_51, %c0_52, %c0_53] : memref<4x128x16xf32, #tpu.memory_space<vmem>>, vector<1x128x16xf32>
    %99 = vector.shape_cast %98 : vector<1x128x16xf32> to vector<128x16xf32>
    %100 = vector.shape_cast %97 : vector<128x16xf32> to vector<1x128x16xf32>
    tpu.vector_store %arg9[%c1_51, %c0_52, %c0_53], %100 {strides = array<i32>} : memref<4x128x16xf32, #tpu.memory_space<vmem>>, vector<1x128x16xf32>,
    %c1_54 = arith.constant 1 : index
    %c0_55 = arith.constant 0 : index
    %c0_56 = arith.constant 0 : index
    %101 = vector.load %arg7[%c1_54, %c0_55, %c0_56] : memref<4x128x1xf32, #tpu.memory_space<vmem>>, vector<1x128x1xf32>
    %102 = vector.shape_cast %101 : vector<1x128x1xf32> to vector<128x1xf32>
    %103 = vector.shape_cast %73 : vector<128x1xf32> to vector<1x128x1xf32>
    tpu.vector_store %arg7[%c1_54, %c0_55, %c0_56], %103 {strides = array<i32>} : memref<4x128x1xf32, #tpu.memory_space<vmem>>, vector<1x128x1xf32>,
    %104 = vector.extract_strided_slice %7 {offsets = [0, 2], sizes = [128, 1], strides = [1, 1]} : vector<128x4xf32> to vector<128x1xf32>
    %105 = vector.extract_strided_slice %8 {offsets = [2, 0], sizes = [1, 128], strides = [1, 1]} : vector<4x128xf32> to vector<1x128xf32>
    %106 = vector.broadcast %104 : vector<128x1xf32> to vector<128x128xf32>
    %107 = vector.broadcast %105 : vector<1x128xf32> to vector<128x128xf32>
    %108 = arith.addf %106, %107 : vector<128x128xf32>
    %cst_57 = arith.constant 0.000000e+00 : f32
    %109 = vector.broadcast %cst_57 : f32 to vector<128x128xf32>
    %110 = arith.cmpf oge, %108, %109 : vector<128x128xf32>
    %cst_58 = arith.constant 0.00999999977 : f32
    %111 = vector.broadcast %cst_58 : f32 to vector<128x128xf32>
    %112 = arith.mulf %111, %108 : vector<128x128xf32>
    %113 = arith.select %110, %108, %112 : vector<128x128xi1>, vector<128x128xf32>
    %cst_59 = arith.constant -1.000000e+30 : f32
    %114 = vector.broadcast %cst_59 : f32 to vector<128x128xf32>
    %115 = arith.select %6, %113, %114 : vector<128x128xi1>, vector<128x128xf32>
    %c2 = arith.constant 2 : index
    %c0_60 = arith.constant 0 : index
    %c0_61 = arith.constant 0 : index
    %116 = vector.load %arg7[%c2, %c0_60, %c0_61] : memref<4x128x1xf32, #tpu.memory_space<vmem>>, vector<1x128x1xf32>
    %117 = vector.shape_cast %116 : vector<1x128x1xf32> to vector<128x1xf32>
    %cst_62 = arith.constant dense<0xFF800000> : vector<128xf32>
    %118 = vector.multi_reduction <maximumf>, %115, %cst_62 [1] : vector<128x128xf32> to vector<128xf32>
    %119 = vector.shape_cast %118 : vector<128xf32> to vector<128x1xf32>
    %120 = arith.maximumf %117, %119 : vector<128x1xf32>
    %121 = arith.subf %117, %120 : vector<128x1xf32>
    %122 = math.exp %121 : vector<128x1xf32>
    %123 = vector.broadcast %120 : vector<128x1xf32> to vector<128x128xf32>
    %124 = arith.subf %115, %123 : vector<128x128xf32>
    %125 = math.exp %124 : vector<128x128xf32>
    %cst_63 = arith.constant 0.000000e+00 : f32
    %126 = vector.broadcast %cst_63 : f32 to vector<128x128xf32>
    %127 = arith.select %6, %125, %126 : vector<128x128xi1>, vector<128x128xf32>
    %c2_64 = arith.constant 2 : index
    %c0_65 = arith.constant 0 : index
    %c0_66 = arith.constant 0 : index
    %128 = vector.load %arg8[%c2_64, %c0_65, %c0_66] : memref<4x128x1xf32, #tpu.memory_space<vmem>>, vector<1x128x1xf32>
    %129 = vector.shape_cast %128 : vector<1x128x1xf32> to vector<128x1xf32>
    %130 = arith.mulf %122, %129 : vector<128x1xf32>
    %cst_67 = arith.constant dense<0.000000e+00> : vector<128xf32>
    %131 = vector.multi_reduction <add>, %127, %cst_67 [1] : vector<128x128xf32> to vector<128xf32>
    %132 = vector.shape_cast %131 : vector<128xf32> to vector<128x1xf32>
    %133 = arith.addf %130, %132 : vector<128x1xf32>
    %c2_68 = arith.constant 2 : index
    %c0_69 = arith.constant 0 : index
    %c0_70 = arith.constant 0 : index
    %134 = vector.load %arg8[%c2_68, %c0_69, %c0_70] : memref<4x128x1xf32, #tpu.memory_space<vmem>>, vector<1x128x1xf32>
    %135 = vector.shape_cast %134 : vector<1x128x1xf32> to vector<128x1xf32>
    %136 = vector.shape_cast %133 : vector<128x1xf32> to vector<1x128x1xf32>
    tpu.vector_store %arg8[%c2_68, %c0_69, %c0_70], %136 {strides = array<i32>} : memref<4x128x1xf32, #tpu.memory_space<vmem>>, vector<1x128x1xf32>,
    %c2_71 = arith.constant 2 : index
    %c0_72 = arith.constant 0 : index
    %c0_73 = arith.constant 0 : index
    %137 = vector.load %arg9[%c2_71, %c0_72, %c0_73] : memref<4x128x16xf32, #tpu.memory_space<vmem>>, vector<1x128x16xf32>
    %138 = vector.shape_cast %137 : vector<1x128x16xf32> to vector<128x16xf32>
    %139 = vector.broadcast %122 : vector<128x1xf32> to vector<128x16xf32>
    %140 = arith.mulf %139, %138 : vector<128x16xf32>
    %141 = arith.truncf %127 : vector<128x128xf32> to vector<128x128xbf16>
    %142 = vector.extract_strided_slice %9 {offsets = [0, 32], sizes = [128, 16], strides = [1, 1]} : vector<128x64xbf16> to vector<128x16xbf16>
    %cst_74 = arith.constant dense<0.000000e+00> : vector<128x16xf32>
    %143 = tpu.matmul %141, %142, %cst_74 {dimension_numbers = #tpu.dot_dimension_numbers<[1], [0], [0], [1], [0, 0, 1, 1], [], []>} : vector<128x128xbf16>, vector<128x16xbf16>, vector<128x16xf32> -> vector<128x16xf32>
    %144 = arith.addf %140, %143 : vector<128x16xf32>
    %c2_75 = arith.constant 2 : index
    %c0_76 = arith.constant 0 : index
    %c0_77 = arith.constant 0 : index
    %145 = vector.load %arg9[%c2_75, %c0_76, %c0_77] : memref<4x128x16xf32, #tpu.memory_space<vmem>>, vector<1x128x16xf32>
    %146 = vector.shape_cast %145 : vector<1x128x16xf32> to vector<128x16xf32>
    %147 = vector.shape_cast %144 : vector<128x16xf32> to vector<1x128x16xf32>
    tpu.vector_store %arg9[%c2_75, %c0_76, %c0_77], %147 {strides = array<i32>} : memref<4x128x16xf32, #tpu.memory_space<vmem>>, vector<1x128x16xf32>,
    %c2_78 = arith.constant 2 : index
    %c0_79 = arith.constant 0 : index
    %c0_80 = arith.constant 0 : index
    %148 = vector.load %arg7[%c2_78, %c0_79, %c0_80] : memref<4x128x1xf32, #tpu.memory_space<vmem>>, vector<1x128x1xf32>
    %149 = vector.shape_cast %148 : vector<1x128x1xf32> to vector<128x1xf32>
    %150 = vector.shape_cast %120 : vector<128x1xf32> to vector<1x128x1xf32>
    tpu.vector_store %arg7[%c2_78, %c0_79, %c0_80], %150 {strides = array<i32>} : memref<4x128x1xf32, #tpu.memory_space<vmem>>, vector<1x128x1xf32>,
    %151 = vector.extract_strided_slice %7 {offsets = [0, 3], sizes = [128, 1], strides = [1, 1]} : vector<128x4xf32> to vector<128x1xf32>
    %152 = vector.extract_strided_slice %8 {offsets = [3, 0], sizes = [1, 128], strides = [1, 1]} : vector<4x128xf32> to vector<1x128xf32>
    %153 = vector.broadcast %151 : vector<128x1xf32> to vector<128x128xf32>
    %154 = vector.broadcast %152 : vector<1x128xf32> to vector<128x128xf32>
    %155 = arith.addf %153, %154 : vector<128x128xf32>
    %cst_81 = arith.constant 0.000000e+00 : f32
    %156 = vector.broadcast %cst_81 : f32 to vector<128x128xf32>
    %157 = arith.cmpf oge, %155, %156 : vector<128x128xf32>
    %cst_82 = arith.constant 0.00999999977 : f32
    %158 = vector.broadcast %cst_82 : f32 to vector<128x128xf32>
    %159 = arith.mulf %158, %155 : vector<128x128xf32>
    %160 = arith.select %157, %155, %159 : vector<128x128xi1>, vector<128x128xf32>
    %cst_83 = arith.constant -1.000000e+30 : f32
    %161 = vector.broadcast %cst_83 : f32 to vector<128x128xf32>
    %162 = arith.select %6, %160, %161 : vector<128x128xi1>, vector<128x128xf32>
    %c3 = arith.constant 3 : index
    %c0_84 = arith.constant 0 : index
    %c0_85 = arith.constant 0 : index
    %163 = vector.load %arg7[%c3, %c0_84, %c0_85] : memref<4x128x1xf32, #tpu.memory_space<vmem>>, vector<1x128x1xf32>
    %164 = vector.shape_cast %163 : vector<1x128x1xf32> to vector<128x1xf32>
    %cst_86 = arith.constant dense<0xFF800000> : vector<128xf32>
    %165 = vector.multi_reduction <maximumf>, %162, %cst_86 [1] : vector<128x128xf32> to vector<128xf32>
    %166 = vector.shape_cast %165 : vector<128xf32> to vector<128x1xf32>
    %167 = arith.maximumf %164, %166 : vector<128x1xf32>
    %168 = arith.subf %164, %167 : vector<128x1xf32>
    %169 = math.exp %168 : vector<128x1xf32>
    %170 = vector.broadcast %167 : vector<128x1xf32> to vector<128x128xf32>
    %171 = arith.subf %162, %170 : vector<128x128xf32>
    %172 = math.exp %171 : vector<128x128xf32>
    %cst_87 = arith.constant 0.000000e+00 : f32
    %173 = vector.broadcast %cst_87 : f32 to vector<128x128xf32>
    %174 = arith.select %6, %172, %173 : vector<128x128xi1>, vector<128x128xf32>
    %c3_88 = arith.constant 3 : index
    %c0_89 = arith.constant 0 : index
    %c0_90 = arith.constant 0 : index
    %175 = vector.load %arg8[%c3_88, %c0_89, %c0_90] : memref<4x128x1xf32, #tpu.memory_space<vmem>>, vector<1x128x1xf32>
    %176 = vector.shape_cast %175 : vector<1x128x1xf32> to vector<128x1xf32>
    %177 = arith.mulf %169, %176 : vector<128x1xf32>
    %cst_91 = arith.constant dense<0.000000e+00> : vector<128xf32>
    %178 = vector.multi_reduction <add>, %174, %cst_91 [1] : vector<128x128xf32> to vector<128xf32>
    %179 = vector.shape_cast %178 : vector<128xf32> to vector<128x1xf32>
    %180 = arith.addf %177, %179 : vector<128x1xf32>
    %c3_92 = arith.constant 3 : index
    %c0_93 = arith.constant 0 : index
    %c0_94 = arith.constant 0 : index
    %181 = vector.load %arg8[%c3_92, %c0_93, %c0_94] : memref<4x128x1xf32, #tpu.memory_space<vmem>>, vector<1x128x1xf32>
    %182 = vector.shape_cast %181 : vector<1x128x1xf32> to vector<128x1xf32>
    %183 = vector.shape_cast %180 : vector<128x1xf32> to vector<1x128x1xf32>
    tpu.vector_store %arg8[%c3_92, %c0_93, %c0_94], %183 {strides = array<i32>} : memref<4x128x1xf32, #tpu.memory_space<vmem>>, vector<1x128x1xf32>,
    %c3_95 = arith.constant 3 : index
    %c0_96 = arith.constant 0 : index
    %c0_97 = arith.constant 0 : index
    %184 = vector.load %arg9[%c3_95, %c0_96, %c0_97] : memref<4x128x16xf32, #tpu.memory_space<vmem>>, vector<1x128x16xf32>
    %185 = vector.shape_cast %184 : vector<1x128x16xf32> to vector<128x16xf32>
    %186 = vector.broadcast %169 : vector<128x1xf32> to vector<128x16xf32>
    %187 = arith.mulf %186, %185 : vector<128x16xf32>
    %188 = arith.truncf %174 : vector<128x128xf32> to vector<128x128xbf16>
    %189 = vector.extract_strided_slice %9 {offsets = [0, 48], sizes = [128, 16], strides = [1, 1]} : vector<128x64xbf16> to vector<128x16xbf16>
    %cst_98 = arith.constant dense<0.000000e+00> : vector<128x16xf32>
    %190 = tpu.matmul %188, %189, %cst_98 {dimension_numbers = #tpu.dot_dimension_numbers<[1], [0], [0], [1], [0, 0, 1, 1], [], []>} : vector<128x128xbf16>, vector<128x16xbf16>, vector<128x16xf32> -> vector<128x16xf32>
    %191 = arith.addf %187, %190 : vector<128x16xf32>
    %c3_99 = arith.constant 3 : index
    %c0_100 = arith.constant 0 : index
    %c0_101 = arith.constant 0 : index
    %192 = vector.load %arg9[%c3_99, %c0_100, %c0_101] : memref<4x128x16xf32, #tpu.memory_space<vmem>>, vector<1x128x16xf32>
    %193 = vector.shape_cast %192 : vector<1x128x16xf32> to vector<128x16xf32>
    %194 = vector.shape_cast %191 : vector<128x16xf32> to vector<1x128x16xf32>
    tpu.vector_store %arg9[%c3_99, %c0_100, %c0_101], %194 {strides = array<i32>} : memref<4x128x16xf32, #tpu.memory_space<vmem>>, vector<1x128x16xf32>,
    %c3_102 = arith.constant 3 : index
    %c0_103 = arith.constant 0 : index
    %c0_104 = arith.constant 0 : index
    %195 = vector.load %arg7[%c3_102, %c0_103, %c0_104] : memref<4x128x1xf32, #tpu.memory_space<vmem>>, vector<1x128x1xf32>
    %196 = vector.shape_cast %195 : vector<1x128x1xf32> to vector<128x1xf32>
    %197 = vector.shape_cast %167 : vector<128x1xf32> to vector<1x128x1xf32>
    tpu.vector_store %arg7[%c3_102, %c0_103, %c0_104], %197 {strides = array<i32>} : memref<4x128x1xf32, #tpu.memory_space<vmem>>, vector<1x128x1xf32>,
    %c1_i32 = arith.constant 1 : i32
    %198 = arith.cmpi eq, %arg1, %c1_i32 : i32
    %199 = arith.extui %198 : i1 to i32
    %c0_i32_105 = arith.constant 0 : i32
    %200 = arith.cmpi ne, %199, %c0_i32_105 : i32
    scf.if %200 {
      %c0_106 = arith.constant 0 : index
      %c0_107 = arith.constant 0 : index
      %c0_108 = arith.constant 0 : index
      %201 = vector.load %arg8[%c0_106, %c0_107, %c0_108] : memref<4x128x1xf32, #tpu.memory_space<vmem>>, vector<1x128x1xf32>
      %202 = vector.shape_cast %201 : vector<1x128x1xf32> to vector<128x1xf32>
      %cst_109 = arith.constant 0.000000e+00 : f32
      %203 = vector.broadcast %cst_109 : f32 to vector<128x1xf32>
      %204 = arith.cmpf ogt, %202, %203 : vector<128x1xf32>
      %c0_110 = arith.constant 0 : index
      %c0_111 = arith.constant 0 : index
      %c0_112 = arith.constant 0 : index
      %205 = vector.load %arg8[%c0_110, %c0_111, %c0_112] : memref<4x128x1xf32, #tpu.memory_space<vmem>>, vector<1x128x1xf32>
      %206 = vector.shape_cast %205 : vector<1x128x1xf32> to vector<128x1xf32>
      %cst_113 = arith.constant 1.000000e+00 : f32
      %207 = vector.broadcast %cst_113 : f32 to vector<128x1xf32>
      %208 = arith.select %204, %206, %207 : vector<128x1xi1>, vector<128x1xf32>
      %c0_114 = arith.constant 0 : index
      %c0_115 = arith.constant 0 : index
      %c0_116 = arith.constant 0 : index
      %209 = vector.load %arg9[%c0_114, %c0_115, %c0_116] : memref<4x128x16xf32, #tpu.memory_space<vmem>>, vector<1x128x16xf32>
      %210 = vector.shape_cast %209 : vector<1x128x16xf32> to vector<128x16xf32>
      %211 = vector.broadcast %208 : vector<128x1xf32> to vector<128x16xf32>
      %212 = arith.divf %210, %211 : vector<128x16xf32>
      %c1_117 = arith.constant 1 : index
      %c0_118 = arith.constant 0 : index
      %c0_119 = arith.constant 0 : index
      %213 = vector.load %arg8[%c1_117, %c0_118, %c0_119] : memref<4x128x1xf32, #tpu.memory_space<vmem>>, vector<1x128x1xf32>
      %214 = vector.shape_cast %213 : vector<1x128x1xf32> to vector<128x1xf32>
      %cst_120 = arith.constant 0.000000e+00 : f32
      %215 = vector.broadcast %cst_120 : f32 to vector<128x1xf32>
      %216 = arith.cmpf ogt, %214, %215 : vector<128x1xf32>
      %c1_121 = arith.constant 1 : index
      %c0_122 = arith.constant 0 : index
      %c0_123 = arith.constant 0 : index
      %217 = vector.load %arg8[%c1_121, %c0_122, %c0_123] : memref<4x128x1xf32, #tpu.memory_space<vmem>>, vector<1x128x1xf32>
      %218 = vector.shape_cast %217 : vector<1x128x1xf32> to vector<128x1xf32>
      %cst_124 = arith.constant 1.000000e+00 : f32
      %219 = vector.broadcast %cst_124 : f32 to vector<128x1xf32>
      %220 = arith.select %216, %218, %219 : vector<128x1xi1>, vector<128x1xf32>
      %c1_125 = arith.constant 1 : index
      %c0_126 = arith.constant 0 : index
      %c0_127 = arith.constant 0 : index
      %221 = vector.load %arg9[%c1_125, %c0_126, %c0_127] : memref<4x128x16xf32, #tpu.memory_space<vmem>>, vector<1x128x16xf32>
      %222 = vector.shape_cast %221 : vector<1x128x16xf32> to vector<128x16xf32>
      %223 = vector.broadcast %220 : vector<128x1xf32> to vector<128x16xf32>
      %224 = arith.divf %222, %223 : vector<128x16xf32>
      %c2_128 = arith.constant 2 : index
      %c0_129 = arith.constant 0 : index
      %c0_130 = arith.constant 0 : index
      %225 = vector.load %arg8[%c2_128, %c0_129, %c0_130] : memref<4x128x1xf32, #tpu.memory_space<vmem>>, vector<1x128x1xf32>
      %226 = vector.shape_cast %225 : vector<1x128x1xf32> to vector<128x1xf32>
      %cst_131 = arith.constant 0.000000e+00 : f32
      %227 = vector.broadcast %cst_131 : f32 to vector<128x1xf32>
      %228 = arith.cmpf ogt, %226, %227 : vector<128x1xf32>
      %c2_132 = arith.constant 2 : index
      %c0_133 = arith.constant 0 : index
      %c0_134 = arith.constant 0 : index
      %229 = vector.load %arg8[%c2_132, %c0_133, %c0_134] : memref<4x128x1xf32, #tpu.memory_space<vmem>>, vector<1x128x1xf32>
      %230 = vector.shape_cast %229 : vector<1x128x1xf32> to vector<128x1xf32>
      %cst_135 = arith.constant 1.000000e+00 : f32
      %231 = vector.broadcast %cst_135 : f32 to vector<128x1xf32>
      %232 = arith.select %228, %230, %231 : vector<128x1xi1>, vector<128x1xf32>
      %c2_136 = arith.constant 2 : index
      %c0_137 = arith.constant 0 : index
      %c0_138 = arith.constant 0 : index
      %233 = vector.load %arg9[%c2_136, %c0_137, %c0_138] : memref<4x128x16xf32, #tpu.memory_space<vmem>>, vector<1x128x16xf32>
      %234 = vector.shape_cast %233 : vector<1x128x16xf32> to vector<128x16xf32>
      %235 = vector.broadcast %232 : vector<128x1xf32> to vector<128x16xf32>
      %236 = arith.divf %234, %235 : vector<128x16xf32>
      %c3_139 = arith.constant 3 : index
      %c0_140 = arith.constant 0 : index
      %c0_141 = arith.constant 0 : index
      %237 = vector.load %arg8[%c3_139, %c0_140, %c0_141] : memref<4x128x1xf32, #tpu.memory_space<vmem>>, vector<1x128x1xf32>
      %238 = vector.shape_cast %237 : vector<1x128x1xf32> to vector<128x1xf32>
      %cst_142 = arith.constant 0.000000e+00 : f32
      %239 = vector.broadcast %cst_142 : f32 to vector<128x1xf32>
      %240 = arith.cmpf ogt, %238, %239 : vector<128x1xf32>
      %c3_143 = arith.constant 3 : index
      %c0_144 = arith.constant 0 : index
      %c0_145 = arith.constant 0 : index
      %241 = vector.load %arg8[%c3_143, %c0_144, %c0_145] : memref<4x128x1xf32, #tpu.memory_space<vmem>>, vector<1x128x1xf32>
      %242 = vector.shape_cast %241 : vector<1x128x1xf32> to vector<128x1xf32>
      %cst_146 = arith.constant 1.000000e+00 : f32
      %243 = vector.broadcast %cst_146 : f32 to vector<128x1xf32>
      %244 = arith.select %240, %242, %243 : vector<128x1xi1>, vector<128x1xf32>
      %c3_147 = arith.constant 3 : index
      %c0_148 = arith.constant 0 : index
      %c0_149 = arith.constant 0 : index
      %245 = vector.load %arg9[%c3_147, %c0_148, %c0_149] : memref<4x128x16xf32, #tpu.memory_space<vmem>>, vector<1x128x16xf32>
      %246 = vector.shape_cast %245 : vector<1x128x16xf32> to vector<128x16xf32>
      %247 = vector.broadcast %244 : vector<128x1xf32> to vector<128x16xf32>
      %248 = arith.divf %246, %247 : vector<128x16xf32>
      %249 = tpu.concatenate %212, %224, %236, %248 in 1 : vector<128x16xf32>, vector<128x16xf32>, vector<128x16xf32>, vector<128x16xf32> -> vector<128x64xf32>
      %c0_150 = arith.constant 0 : index
      %c0_151 = arith.constant 0 : index
      %250 = vector.load %arg6[%c0_150, %c0_151] : memref<128x64xf32, #tpu.memory_space<vmem>>, vector<128x64xf32>
      tpu.vector_store %arg6[%c0_150, %c0_151], %249 {strides = array<i32>} : memref<128x64xf32, #tpu.memory_space<vmem>>, vector<128x64xf32>,
    } else {
    }
    return
  }
  func.func @transform_0(%arg0: i32, %arg1: i32) -> (i32, i32) {
    %c0_i32 = arith.constant 0 : i32
    %c0_i32_0 = arith.constant 0 : i32
    return %arg1, %c0_i32 : i32, i32
  }
  func.func @transform_1(%arg0: i32, %arg1: i32) -> (i32, i32) {
    %c0_i32 = arith.constant 0 : i32
    %c0_i32_0 = arith.constant 0 : i32
    return %c0_i32, %arg1 : i32, i32
  }
  func.func @transform_2(%arg0: i32, %arg1: i32) -> (i32, i32) {
    %c0_i32 = arith.constant 0 : i32
    %c0_i32_0 = arith.constant 0 : i32
    return %arg0, %c0_i32 : i32, i32
  }
  func.func @transform_3(%arg0: i32, %arg1: i32) -> (i32, i32) {
    %c0_i32 = arith.constant 0 : i32
    return %arg0, %arg1 : i32, i32
  }
  func.func @transform_4(%arg0: i32, %arg1: i32) -> (i32, i32) {
    %c0_i32 = arith.constant 0 : i32
    %c0_i32_0 = arith.constant 0 : i32
    return %arg0, %c0_i32 : i32, i32
  }
}

</mosaic_0001>

<bundles_post_ra>
// kernel: tpu_custom_call.1
= control target key start
LH: loop header
LB: loop body
LE: loop exit
PB: predicated region body
PF: predicated region fallthrough
CT: control target
= control target key end

     0   :  { %s5815_s15 = smov 0   ;;  %s5817_s16 = smov 0   ;;  %s8830_s0 = inlined_call_operand.vmem [shape: bf16[256,64], index: 0, kind: input, shape index: {}]   ;;  %s8831_s1 = inlined_call_operand.vmem [shape: f32[4,256], index: 1, kind: input, shape index: {}]   ;;  %s8832_s2 = inlined_call_operand.vmem [shape: f32[256,4], index: 2, kind: input, shape index: {}]   ;;  %s8833_s3 = inlined_call_operand.vmem [shape: s8[256,256], index: 3, kind: input, shape index: {}]   ;;  %s8834_s4 = inlined_call_operand.vmem [shape: f32[256,64], index: 4, kind: output, shape index: {}]  }
   0x1   :  { %s5819_s17 = smov 0   ;;  %s5821_s18 = smov 0  }
   0x2   :  { %s5823_s19 = smov 0   ;;  %s5825_s20 = smov 0  }
   0x3   :  { %s5827_s21 = smov 0  }
   0x4 LB: > { %s23_s22 = sadd.s32 1, %s5767_s19  ;;  %s26_s23 = sadd.s32 1, %s5771_s20  ;;  %s5775_s21 = sphi %s5827_s21, %s14_s21   ;;  %s5771_s20 = sphi %s5825_s20, %s9637_s20   ;;  %s5767_s19 = sphi %s5823_s19, %s9636_s19   ;;  %s5763_s18 = sphi %s5821_s18, %s9635_s18   ;;  %s5759_s17 = sphi %s5819_s17, %s9634_s17   ;;  %s5755_s16 = sphi %s5817_s16, %s9633_s16   ;;  %s5751_s15 = sphi %s5815_s15, %s9632_s15  }
   0x5   : > { %p24_p0 = scmp.ge.s32.totalorder %s23_s22, 2  ;;  %p120_p1 = scmp.ne.s32.totalorder %s5755_s16, %s5751_s15 }
   0x6   : > { %p121_p2 = scmp.eq.s32.totalorder %s5775_s21, 0  ;;  %s113_s27 = sadd.s32 1, %s5755_s16 }
   0x7   : > { %s9639_s22 = smov (%p24_p0, %s23_s22), 0  ;;  %s9641_s23 = smov (!%p24_p0, %s26_s23), %s5771_s20 }
   0x8   : > { %p122_p3 = por %p121_p2, %p120_p1  ;;  %p28_p4 = scmp.ge.s32.totalorder %s9641_s23, 2 }
   0x9   : > { %s109_s24 = ssub.s32 %s5767_s19, %s9639_s22  ;;  %p4897_p6 = scmp.ge.s32.totalorder %s5775_s21, 4 }
   0xa   : > { %s9643_s23 = smov (%p28_p4, %s9641_s23), 0 }
   0xb   : > { %s108_s25 = ssub.s32 %s5771_s20, %s9643_s23  ;;  %172 = sbr.rel (%p4897_p6) target bundleno = 26 (0x1a), region = 16 }
   0xc   : > { %s110_s26 = sor.u32 %s109_s24, %s108_s25 }
   0xd   : > { %p111_p5 = scmp.eq.s32.totalorder %s110_s26, 0 }
   0xf   : > { %s5866_s28 = scalar_select %p111_p5, %s5755_s16, %s113_s27  }
  0x12   : > { %200 = sbr.rel (!%p122_p3) target bundleno = 26 (0x1a), region = 32  ;;  %s202_s29 = sand.u32 (%p122_p3), 1, %s5755_s16  }
  0x13   : > { %s5019_s30 = sshll.u32 (%p122_p3), %s5771_s20, 3  ;;  %s4898_s5 = sshll.u32 (%p122_p3), %s202_s29, 5 }
  0x14   : > { %s207_s6 = sadd.s32 (%p122_p3), %s5767_s19, %s5019_s30  ;;  %s204_s11 = scalar_lea.vmem (%p122_p3), [#allocation5], %s4898_s5 }
  0x15   : > { %s4901_s7 = sshll.u32 (%p122_p3), %s207_s6, 3 }
  0x16   : > { %s209_s10 = scalar_lea.vmem (%p122_p3), %s8833_s3, %s4901_s7 }
  0x17   : > { %v243_v0 = vld [vmem:[%s209_s10] sm:$0xff] (%p122_p3)  ;;  %v245_v1 = vld [vmem:[%s209_s10 + $0x10] sm:$0xff] (%p122_p3) }
  0x18   : > { %v247_v2 = vld [vmem:[%s209_s10 + $0x20] sm:$0xff] (%p122_p3)  ;;  %244 = vst [vmem:[%s204_s11] sm:$0xff] (%p122_p3), %v243_v0  ;;  %246 = vst [vmem:[%s204_s11 + $0x8] sm:$0xff] (%p122_p3), %v245_v1  ;;  %v249_v3 = vld [vmem:[%s209_s10 + $0x30] sm:$0xff] (%p122_p3) }
  0x19   : > { %248 = vst [vmem:[%s204_s11 + $0x10] sm:$0xff] %v247_v2  ;;  %250 = vst [vmem:[%s204_s11 + $0x18] sm:$0xff] %v249_v3 }
  0x1a PF: > { %p4902_p7 = scmp.ge.s32.totalorder %s5775_s21, 1  ;;  %p255_p8 = scmp.lt.s32.totalorder %s5775_s21, 5 }
  0x1c   : > { %p256_p9 = pnand %p4902_p7, %p255_p8 }
  0x1e   : > { %259 = sbr.rel (%p256_p9) target bundleno = 2224 (0x8b0), region = 70 }
  0x25   : > { %s262_s12 = sand.u32 1, %s5751_s15   ;;  %s4904_s13 = sshll.u32 %s5759_s17, 4 }
  0x26   : > { %s4903_s14 = sshll.u32 %s262_s12, 5  ;;  %p302_p10 = scmp.lt.s32.totalorder %s4904_s13, 31 }
  0x27   : > { %p307_p11 = scmp.lt.s32.totalorder %s5759_s17, 1  ;;  %s4907_s26 = sshll.u32 %s5763_s18, 4 }
  0x28   : > { %s9645_s13 = smov (!%p302_p10, %s4904_s13), 31  ;;  %p312_p12 = scmp.lt.s32.totalorder %s4907_s26, 31 }
  0x29   : > { %s308_s24 = scalar_select %p307_p11, %s5759_s17, 1 }
  0x2a   : > { %s4905_s25 = sshll.u32 %s9645_s13, 2  ;;  %s9647_s26 = smov (!%p312_p12, %s4907_s26), 31 }
  0x2b   : > { %s5885_s30 = scalar_lea.vmem %s8830_s0, %s4905_s25  ;;  %s4906_s5 = sshll.u32 %s308_s24, 2 }
  0x2c   : > { %s5890_s8 = scalar_lea.vmem %s8831_s1, %s4906_s5  ;;  %s4908_s15 = sshll.u32 %s9647_s26, 3 }
  0x2d   : > { %s5895_s11 = scalar_lea.vmem %s8832_s2, %s4908_s15  ;;  %s5900_s13 = scalar_lea.vmem %s8834_s4, %s4908_s15 }
  0x2e   : > { %s5902_s25 = scalar_lea.vmem [#allocation5], %s4903_s14  ;;  %p4911_p13 = scmp.ne.s32.totalorder %s5759_s17, 0 }
  0x2f   : > { %vm329_vm0 = vcmask (!%p4911_p13), 7168   ;;  %vm458_vm1 = vcmask (!%p4911_p13), 130048   ;;  %v5777_v4 = vmov (!%p4911_p13), -1e+30   ;;  %v5778_v5 = vmov (!%p4911_p13), 0.0  }
  0x30   : > { %328 = sbr.rel (%p4911_p13) target bundleno = 144 (0x90), region = 78  ;;  %330 = vst.msk [vmem:[#allocation2] sm:$0xff] (!%p4911_p13), %vm329_vm0, %v5777_v4  ;;  %331 = vst.msk [vmem:[#allocation2 + $0x8] sm:$0xff] (!%p4911_p13), %vm329_vm0, %v5777_v4 }
  0x31   : > { %332 = vst.msk [vmem:[#allocation2 + $0x10] sm:$0xff] (!%p4911_p13), %vm329_vm0, %v5777_v4  ;;  %333 = vst.msk [vmem:[#allocation2 + $0x18] sm:$0xff] (!%p4911_p13), %vm329_vm0, %v5777_v4 }
  0x32   : > { %334 = vst.msk [vmem:[#allocation2 + $0x20] sm:$0xff] (!%p4911_p13), %vm329_vm0, %v5777_v4  ;;  %335 = vst.msk [vmem:[#allocation2 + $0x28] sm:$0xff] (!%p4911_p13), %vm329_vm0, %v5777_v4 }
  0x33   : > { %336 = vst.msk [vmem:[#allocation2 + $0x30] sm:$0xff] (!%p4911_p13), %vm329_vm0, %v5777_v4  ;;  %337 = vst.msk [vmem:[#allocation2 + $0x38] sm:$0xff] (!%p4911_p13), %vm329_vm0, %v5777_v4 }
  0x34   : > { %338 = vst.msk [vmem:[#allocation2 + $0x40] sm:$0xff] (!%p4911_p13), %vm329_vm0, %v5777_v4  ;;  %339 = vst.msk [vmem:[#allocation2 + $0x48] sm:$0xff] (!%p4911_p13), %vm329_vm0, %v5777_v4 }
  0x35   : > { %340 = vst.msk [vmem:[#allocation2 + $0x50] sm:$0xff] (!%p4911_p13), %vm329_vm0, %v5777_v4  ;;  %341 = vst.msk [vmem:[#allocation2 + $0x58] sm:$0xff] (!%p4911_p13), %vm329_vm0, %v5777_v4 }
  0x36   : > { %342 = vst.msk [vmem:[#allocation2 + $0x60] sm:$0xff] (!%p4911_p13), %vm329_vm0, %v5777_v4  ;;  %343 = vst.msk [vmem:[#allocation2 + $0x68] sm:$0xff] (!%p4911_p13), %vm329_vm0, %v5777_v4 }
  0x37   : > { %344 = vst.msk [vmem:[#allocation2 + $0x70] sm:$0xff] %vm329_vm0, %v5777_v4  ;;  %345 = vst.msk [vmem:[#allocation2 + $0x78] sm:$0xff] %vm329_vm0, %v5777_v4 }
  0x38   : > { %346 = vst.msk [vmem:[#allocation2 + $0x80] sm:$0xff] %vm329_vm0, %v5777_v4  ;;  %347 = vst.msk [vmem:[#allocation2 + $0x88] sm:$0xff] %vm329_vm0, %v5777_v4 }
  0x39   : > { %348 = vst.msk [vmem:[#allocation2 + $0x90] sm:$0xff] %vm329_vm0, %v5777_v4  ;;  %349 = vst.msk [vmem:[#allocation2 + $0x98] sm:$0xff] %vm329_vm0, %v5777_v4 }
  0x3a   : > { %350 = vst.msk [vmem:[#allocation2 + $0xa0] sm:$0xff] %vm329_vm0, %v5777_v4  ;;  %351 = vst.msk [vmem:[#allocation2 + $0xa8] sm:$0xff] %vm329_vm0, %v5777_v4 }
  0x3b   : > { %352 = vst.msk [vmem:[#allocation2 + $0xb0] sm:$0xff] %vm329_vm0, %v5777_v4  ;;  %353 = vst.msk [vmem:[#allocation2 + $0xb8] sm:$0xff] %vm329_vm0, %v5777_v4 }
  0x3c   : > { %354 = vst.msk [vmem:[#allocation2 + $0xc0] sm:$0xff] %vm329_vm0, %v5777_v4  ;;  %355 = vst.msk [vmem:[#allocation2 + $0xc8] sm:$0xff] %vm329_vm0, %v5777_v4 }
  0x3d   : > { %356 = vst.msk [vmem:[#allocation2 + $0xd0] sm:$0xff] %vm329_vm0, %v5777_v4  ;;  %357 = vst.msk [vmem:[#allocation2 + $0xd8] sm:$0xff] %vm329_vm0, %v5777_v4 }
  0x3e   : > { %358 = vst.msk [vmem:[#allocation2 + $0xe0] sm:$0xff] %vm329_vm0, %v5777_v4  ;;  %359 = vst.msk [vmem:[#allocation2 + $0xe8] sm:$0xff] %vm329_vm0, %v5777_v4 }
  0x3f   : > { %360 = vst.msk [vmem:[#allocation2 + $0xf0] sm:$0xff] %vm329_vm0, %v5777_v4  ;;  %361 = vst.msk [vmem:[#allocation2 + $0xf8] sm:$0xff] %vm329_vm0, %v5777_v4 }
  0x40   : > { %362 = vst.msk [vmem:[#allocation2 + $0x100] sm:$0xff] %vm329_vm0, %v5777_v4  ;;  %363 = vst.msk [vmem:[#allocation2 + $0x108] sm:$0xff] %vm329_vm0, %v5777_v4 }
  0x41   : > { %364 = vst.msk [vmem:[#allocation2 + $0x110] sm:$0xff] %vm329_vm0, %v5777_v4  ;;  %365 = vst.msk [vmem:[#allocation2 + $0x118] sm:$0xff] %vm329_vm0, %v5777_v4 }
  0x42   : > { %366 = vst.msk [vmem:[#allocation2 + $0x120] sm:$0xff] %vm329_vm0, %v5777_v4  ;;  %367 = vst.msk [vmem:[#allocation2 + $0x128] sm:$0xff] %vm329_vm0, %v5777_v4 }
  0x43   : > { %368 = vst.msk [vmem:[#allocation2 + $0x130] sm:$0xff] %vm329_vm0, %v5777_v4  ;;  %369 = vst.msk [vmem:[#allocation2 + $0x138] sm:$0xff] %vm329_vm0, %v5777_v4 }
  0x44   : > { %370 = vst.msk [vmem:[#allocation2 + $0x140] sm:$0xff] %vm329_vm0, %v5777_v4  ;;  %371 = vst.msk [vmem:[#allocation2 + $0x148] sm:$0xff] %vm329_vm0, %v5777_v4 }
  0x45   : > { %372 = vst.msk [vmem:[#allocation2 + $0x150] sm:$0xff] %vm329_vm0, %v5777_v4  ;;  %373 = vst.msk [vmem:[#allocation2 + $0x158] sm:$0xff] %vm329_vm0, %v5777_v4 }
  0x46   : > { %374 = vst.msk [vmem:[#allocation2 + $0x160] sm:$0xff] %vm329_vm0, %v5777_v4  ;;  %375 = vst.msk [vmem:[#allocation2 + $0x168] sm:$0xff] %vm329_vm0, %v5777_v4 }
  0x47   : > { %376 = vst.msk [vmem:[#allocation2 + $0x170] sm:$0xff] %vm329_vm0, %v5777_v4  ;;  %377 = vst.msk [vmem:[#allocation2 + $0x178] sm:$0xff] %vm329_vm0, %v5777_v4 }
  0x48   : > { %378 = vst.msk [vmem:[#allocation2 + $0x180] sm:$0xff] %vm329_vm0, %v5777_v4  ;;  %379 = vst.msk [vmem:[#allocation2 + $0x188] sm:$0xff] %vm329_vm0, %v5777_v4 }
  0x49   : > { %380 = vst.msk [vmem:[#allocation2 + $0x190] sm:$0xff] %vm329_vm0, %v5777_v4  ;;  %381 = vst.msk [vmem:[#allocation2 + $0x198] sm:$0xff] %vm329_vm0, %v5777_v4 }
  0x4a   : > { %382 = vst.msk [vmem:[#allocation2 + $0x1a0] sm:$0xff] %vm329_vm0, %v5777_v4  ;;  %383 = vst.msk [vmem:[#allocation2 + $0x1a8] sm:$0xff] %vm329_vm0, %v5777_v4 }
  0x4b   : > { %384 = vst.msk [vmem:[#allocation2 + $0x1b0] sm:$0xff] %vm329_vm0, %v5777_v4  ;;  %385 = vst.msk [vmem:[#allocation2 + $0x1b8] sm:$0xff] %vm329_vm0, %v5777_v4 }
  0x4c   : > { %386 = vst.msk [vmem:[#allocation2 + $0x1c0] sm:$0xff] %vm329_vm0, %v5777_v4  ;;  %387 = vst.msk [vmem:[#allocation2 + $0x1c8] sm:$0xff] %vm329_vm0, %v5777_v4 }
  0x4d   : > { %388 = vst.msk [vmem:[#allocation2 + $0x1d0] sm:$0xff] %vm329_vm0, %v5777_v4  ;;  %389 = vst.msk [vmem:[#allocation2 + $0x1d8] sm:$0xff] %vm329_vm0, %v5777_v4 }
  0x4e   : > { %390 = vst.msk [vmem:[#allocation2 + $0x1e0] sm:$0xff] %vm329_vm0, %v5777_v4  ;;  %391 = vst.msk [vmem:[#allocation2 + $0x1e8] sm:$0xff] %vm329_vm0, %v5777_v4 }
  0x4f   : > { %392 = vst.msk [vmem:[#allocation2 + $0x1f0] sm:$0xff] %vm329_vm0, %v5777_v4  ;;  %393 = vst.msk [vmem:[#allocation2 + $0x1f8] sm:$0xff] %vm329_vm0, %v5777_v4 }
  0x50   : > { %394 = vst.msk [vmem:[#allocation3] sm:$0xff] %vm329_vm0, %v5778_v5  ;;  %395 = vst.msk [vmem:[#allocation3 + $0x8] sm:$0xff] %vm329_vm0, %v5778_v5 }
  0x51   : > { %396 = vst.msk [vmem:[#allocation3 + $0x10] sm:$0xff] %vm329_vm0, %v5778_v5  ;;  %397 = vst.msk [vmem:[#allocation3 + $0x18] sm:$0xff] %vm329_vm0, %v5778_v5 }
  0x52   : > { %398 = vst.msk [vmem:[#allocation3 + $0x20] sm:$0xff] %vm329_vm0, %v5778_v5  ;;  %399 = vst.msk [vmem:[#allocation3 + $0x28] sm:$0xff] %vm329_vm0, %v5778_v5 }
  0x53   : > { %400 = vst.msk [vmem:[#allocation3 + $0x30] sm:$0xff] %vm329_vm0, %v5778_v5  ;;  %401 = vst.msk [vmem:[#allocation3 + $0x38] sm:$0xff] %vm329_vm0, %v5778_v5 }
  0x54   : > { %402 = vst.msk [vmem:[#allocation3 + $0x40] sm:$0xff] %vm329_vm0, %v5778_v5  ;;  %403 = vst.msk [vmem:[#allocation3 + $0x48] sm:$0xff] %vm329_vm0, %v5778_v5 }
  0x55   : > { %404 = vst.msk [vmem:[#allocation3 + $0x50] sm:$0xff] %vm329_vm0, %v5778_v5  ;;  %405 = vst.msk [vmem:[#allocation3 + $0x58] sm:$0xff] %vm329_vm0, %v5778_v5 }
  0x56   : > { %406 = vst.msk [vmem:[#allocation3 + $0x60] sm:$0xff] %vm329_vm0, %v5778_v5  ;;  %407 = vst.msk [vmem:[#allocation3 + $0x68] sm:$0xff] %vm329_vm0, %v5778_v5 }
  0x57   : > { %408 = vst.msk [vmem:[#allocation3 + $0x70] sm:$0xff] %vm329_vm0, %v5778_v5  ;;  %409 = vst.msk [vmem:[#allocation3 + $0x78] sm:$0xff] %vm329_vm0, %v5778_v5 }
  0x58   : > { %410 = vst.msk [vmem:[#allocation3 + $0x80] sm:$0xff] %vm329_vm0, %v5778_v5  ;;  %411 = vst.msk [vmem:[#allocation3 + $0x88] sm:$0xff] %vm329_vm0, %v5778_v5 }
  0x59   : > { %412 = vst.msk [vmem:[#allocation3 + $0x90] sm:$0xff] %vm329_vm0, %v5778_v5  ;;  %413 = vst.msk [vmem:[#allocation3 + $0x98] sm:$0xff] %vm329_vm0, %v5778_v5 }
  0x5a   : > { %414 = vst.msk [vmem:[#allocation3 + $0xa0] sm:$0xff] %vm329_vm0, %v5778_v5  ;;  %415 = vst.msk [vmem:[#allocation3 + $0xa8] sm:$0xff] %vm329_vm0, %v5778_v5 }
  0x5b   : > { %416 = vst.msk [vmem:[#allocation3 + $0xb0] sm:$0xff] %vm329_vm0, %v5778_v5  ;;  %417 = vst.msk [vmem:[#allocation3 + $0xb8] sm:$0xff] %vm329_vm0, %v5778_v5 }
  0x5c   : > { %418 = vst.msk [vmem:[#allocation3 + $0xc0] sm:$0xff] %vm329_vm0, %v5778_v5  ;;  %419 = vst.msk [vmem:[#allocation3 + $0xc8] sm:$0xff] %vm329_vm0, %v5778_v5 }
  0x5d   : > { %420 = vst.msk [vmem:[#allocation3 + $0xd0] sm:$0xff] %vm329_vm0, %v5778_v5  ;;  %421 = vst.msk [vmem:[#allocation3 + $0xd8] sm:$0xff] %vm329_vm0, %v5778_v5 }
  0x5e   : > { %422 = vst.msk [vmem:[#allocation3 + $0xe0] sm:$0xff] %vm329_vm0, %v5778_v5  ;;  %423 = vst.msk [vmem:[#allocation3 + $0xe8] sm:$0xff] %vm329_vm0, %v5778_v5 }
  0x5f   : > { %424 = vst.msk [vmem:[#allocation3 + $0xf0] sm:$0xff] %vm329_vm0, %v5778_v5  ;;  %425 = vst.msk [vmem:[#allocation3 + $0xf8] sm:$0xff] %vm329_vm0, %v5778_v5 }
  0x60   : > { %426 = vst.msk [vmem:[#allocation3 + $0x100] sm:$0xff] %vm329_vm0, %v5778_v5  ;;  %427 = vst.msk [vmem:[#allocation3 + $0x108] sm:$0xff] %vm329_vm0, %v5778_v5 }
  0x61   : > { %428 = vst.msk [vmem:[#allocation3 + $0x110] sm:$0xff] %vm329_vm0, %v5778_v5  ;;  %429 = vst.msk [vmem:[#allocation3 + $0x118] sm:$0xff] %vm329_vm0, %v5778_v5 }
  0x62   : > { %430 = vst.msk [vmem:[#allocation3 + $0x120] sm:$0xff] %vm329_vm0, %v5778_v5  ;;  %431 = vst.msk [vmem:[#allocation3 + $0x128] sm:$0xff] %vm329_vm0, %v5778_v5 }
  0x63   : > { %432 = vst.msk [vmem:[#allocation3 + $0x130] sm:$0xff] %vm329_vm0, %v5778_v5  ;;  %433 = vst.msk [vmem:[#allocation3 + $0x138] sm:$0xff] %vm329_vm0, %v5778_v5 }
  0x64   : > { %434 = vst.msk [vmem:[#allocation3 + $0x140] sm:$0xff] %vm329_vm0, %v5778_v5  ;;  %435 = vst.msk [vmem:[#allocation3 + $0x148] sm:$0xff] %vm329_vm0, %v5778_v5 }
  0x65   : > { %436 = vst.msk [vmem:[#allocation3 + $0x150] sm:$0xff] %vm329_vm0, %v5778_v5  ;;  %437 = vst.msk [vmem:[#allocation3 + $0x158] sm:$0xff] %vm329_vm0, %v5778_v5 }
  0x66   : > { %438 = vst.msk [vmem:[#allocation3 + $0x160] sm:$0xff] %vm329_vm0, %v5778_v5  ;;  %439 = vst.msk [vmem:[#allocation3 + $0x168] sm:$0xff] %vm329_vm0, %v5778_v5 }
  0x67   : > { %440 = vst.msk [vmem:[#allocation3 + $0x170] sm:$0xff] %vm329_vm0, %v5778_v5  ;;  %441 = vst.msk [vmem:[#allocation3 + $0x178] sm:$0xff] %vm329_vm0, %v5778_v5 }
  0x68   : > { %442 = vst.msk [vmem:[#allocation3 + $0x180] sm:$0xff] %vm329_vm0, %v5778_v5  ;;  %443 = vst.msk [vmem:[#allocation3 + $0x188] sm:$0xff] %vm329_vm0, %v5778_v5 }
  0x69   : > { %444 = vst.msk [vmem:[#allocation3 + $0x190] sm:$0xff] %vm329_vm0, %v5778_v5  ;;  %445 = vst.msk [vmem:[#allocation3 + $0x198] sm:$0xff] %vm329_vm0, %v5778_v5 }
  0x6a   : > { %446 = vst.msk [vmem:[#allocation3 + $0x1a0] sm:$0xff] %vm329_vm0, %v5778_v5  ;;  %447 = vst.msk [vmem:[#allocation3 + $0x1a8] sm:$0xff] %vm329_vm0, %v5778_v5 }
  0x6b   : > { %448 = vst.msk [vmem:[#allocation3 + $0x1b0] sm:$0xff] %vm329_vm0, %v5778_v5  ;;  %449 = vst.msk [vmem:[#allocation3 + $0x1b8] sm:$0xff] %vm329_vm0, %v5778_v5 }
  0x6c   : > { %450 = vst.msk [vmem:[#allocation3 + $0x1c0] sm:$0xff] %vm329_vm0, %v5778_v5  ;;  %451 = vst.msk [vmem:[#allocation3 + $0x1c8] sm:$0xff] %vm329_vm0, %v5778_v5 }
  0x6d   : > { %452 = vst.msk [vmem:[#allocation3 + $0x1d0] sm:$0xff] %vm329_vm0, %v5778_v5  ;;  %453 = vst.msk [vmem:[#allocation3 + $0x1d8] sm:$0xff] %vm329_vm0, %v5778_v5 }
  0x6e   : > { %454 = vst.msk [vmem:[#allocation3 + $0x1e0] sm:$0xff] %vm329_vm0, %v5778_v5  ;;  %455 = vst.msk [vmem:[#allocation3 + $0x1e8] sm:$0xff] %vm329_vm0, %v5778_v5 }
  0x6f   : > { %456 = vst.msk [vmem:[#allocation3 + $0x1f0] sm:$0xff] %vm329_vm0, %v5778_v5  ;;  %457 = vst.msk [vmem:[#allocation3 + $0x1f8] sm:$0xff] %vm329_vm0, %v5778_v5 }
  0x70   : > { %459 = vst.msk [vmem:[#allocation4] sm:$0xff] %vm458_vm1, %v5778_v5  ;;  %460 = vst.msk [vmem:[#allocation4 + $0x8] sm:$0xff] %vm458_vm1, %v5778_v5 }
  0x71   : > { %461 = vst.msk [vmem:[#allocation4 + $0x10] sm:$0xff] %vm458_vm1, %v5778_v5  ;;  %462 = vst.msk [vmem:[#allocation4 + $0x18] sm:$0xff] %vm458_vm1, %v5778_v5 }
  0x72   : > { %463 = vst.msk [vmem:[#allocation4 + $0x20] sm:$0xff] %vm458_vm1, %v5778_v5  ;;  %464 = vst.msk [vmem:[#allocation4 + $0x28] sm:$0xff] %vm458_vm1, %v5778_v5 }
  0x73   : > { %465 = vst.msk [vmem:[#allocation4 + $0x30] sm:$0xff] %vm458_vm1, %v5778_v5  ;;  %466 = vst.msk [vmem:[#allocation4 + $0x38] sm:$0xff] %vm458_vm1, %v5778_v5 }
  0x74   : > { %467 = vst.msk [vmem:[#allocation4 + $0x40] sm:$0xff] %vm458_vm1, %v5778_v5  ;;  %468 = vst.msk [vmem:[#allocation4 + $0x48] sm:$0xff] %vm458_vm1, %v5778_v5 }
  0x75   : > { %469 = vst.msk [vmem:[#allocation4 + $0x50] sm:$0xff] %vm458_vm1, %v5778_v5  ;;  %470 = vst.msk [vmem:[#allocation4 + $0x58] sm:$0xff] %vm458_vm1, %v5778_v5 }
  0x76   : > { %471 = vst.msk [vmem:[#allocation4 + $0x60] sm:$0xff] %vm458_vm1, %v5778_v5  ;;  %472 = vst.msk [vmem:[#allocation4 + $0x68] sm:$0xff] %vm458_vm1, %v5778_v5 }
  0x77   : > { %473 = vst.msk [vmem:[#allocation4 + $0x70] sm:$0xff] %vm458_vm1, %v5778_v5  ;;  %474 = vst.msk [vmem:[#allocation4 + $0x78] sm:$0xff] %vm458_vm1, %v5778_v5 }
  0x78   : > { %475 = vst.msk [vmem:[#allocation4 + $0x80] sm:$0xff] %vm458_vm1, %v5778_v5  ;;  %476 = vst.msk [vmem:[#allocation4 + $0x88] sm:$0xff] %vm458_vm1, %v5778_v5 }
  0x79   : > { %477 = vst.msk [vmem:[#allocation4 + $0x90] sm:$0xff] %vm458_vm1, %v5778_v5  ;;  %478 = vst.msk [vmem:[#allocation4 + $0x98] sm:$0xff] %vm458_vm1, %v5778_v5 }
  0x7a   : > { %479 = vst.msk [vmem:[#allocation4 + $0xa0] sm:$0xff] %vm458_vm1, %v5778_v5  ;;  %480 = vst.msk [vmem:[#allocation4 + $0xa8] sm:$0xff] %vm458_vm1, %v5778_v5 }
  0x7b   : > { %481 = vst.msk [vmem:[#allocation4 + $0xb0] sm:$0xff] %vm458_vm1, %v5778_v5  ;;  %482 = vst.msk [vmem:[#allocation4 + $0xb8] sm:$0xff] %vm458_vm1, %v5778_v5 }
  0x7c   : > { %483 = vst.msk [vmem:[#allocation4 + $0xc0] sm:$0xff] %vm458_vm1, %v5778_v5  ;;  %484 = vst.msk [vmem:[#allocation4 + $0xc8] sm:$0xff] %vm458_vm1, %v5778_v5 }
  0x7d   : > { %485 = vst.msk [vmem:[#allocation4 + $0xd0] sm:$0xff] %vm458_vm1, %v5778_v5  ;;  %486 = vst.msk [vmem:[#allocation4 + $0xd8] sm:$0xff] %vm458_vm1, %v5778_v5 }
  0x7e   : > { %487 = vst.msk [vmem:[#allocation4 + $0xe0] sm:$0xff] %vm458_vm1, %v5778_v5  ;;  %488 = vst.msk [vmem:[#allocation4 + $0xe8] sm:$0xff] %vm458_vm1, %v5778_v5 }
  0x7f   : > { %489 = vst.msk [vmem:[#allocation4 + $0xf0] sm:$0xff] %vm458_vm1, %v5778_v5  ;;  %490 = vst.msk [vmem:[#allocation4 + $0xf8] sm:$0xff] %vm458_vm1, %v5778_v5 }
  0x80   : > { %491 = vst.msk [vmem:[#allocation4 + $0x100] sm:$0xff] %vm458_vm1, %v5778_v5  ;;  %492 = vst.msk [vmem:[#allocation4 + $0x108] sm:$0xff] %vm458_vm1, %v5778_v5 }
  0x81   : > { %493 = vst.msk [vmem:[#allocation4 + $0x110] sm:$0xff] %vm458_vm1, %v5778_v5  ;;  %494 = vst.msk [vmem:[#allocation4 + $0x118] sm:$0xff] %vm458_vm1, %v5778_v5 }
  0x82   : > { %495 = vst.msk [vmem:[#allocation4 + $0x120] sm:$0xff] %vm458_vm1, %v5778_v5  ;;  %496 = vst.msk [vmem:[#allocation4 + $0x128] sm:$0xff] %vm458_vm1, %v5778_v5 }
  0x83   : > { %497 = vst.msk [vmem:[#allocation4 + $0x130] sm:$0xff] %vm458_vm1, %v5778_v5  ;;  %498 = vst.msk [vmem:[#allocation4 + $0x138] sm:$0xff] %vm458_vm1, %v5778_v5 }
  0x84   : > { %499 = vst.msk [vmem:[#allocation4 + $0x140] sm:$0xff] %vm458_vm1, %v5778_v5  ;;  %500 = vst.msk [vmem:[#allocation4 + $0x148] sm:$0xff] %vm458_vm1, %v5778_v5 }
  0x85   : > { %501 = vst.msk [vmem:[#allocation4 + $0x150] sm:$0xff] %vm458_vm1, %v5778_v5  ;;  %502 = vst.msk [vmem:[#allocation4 + $0x158] sm:$0xff] %vm458_vm1, %v5778_v5 }
  0x86   : > { %503 = vst.msk [vmem:[#allocation4 + $0x160] sm:$0xff] %vm458_vm1, %v5778_v5  ;;  %504 = vst.msk [vmem:[#allocation4 + $0x168] sm:$0xff] %vm458_vm1, %v5778_v5 }
  0x87   : > { %505 = vst.msk [vmem:[#allocation4 + $0x170] sm:$0xff] %vm458_vm1, %v5778_v5  ;;  %506 = vst.msk [vmem:[#allocation4 + $0x178] sm:$0xff] %vm458_vm1, %v5778_v5 }
  0x88   : > { %507 = vst.msk [vmem:[#allocation4 + $0x180] sm:$0xff] %vm458_vm1, %v5778_v5  ;;  %508 = vst.msk [vmem:[#allocation4 + $0x188] sm:$0xff] %vm458_vm1, %v5778_v5 }
  0x89   : > { %509 = vst.msk [vmem:[#allocation4 + $0x190] sm:$0xff] %vm458_vm1, %v5778_v5  ;;  %510 = vst.msk [vmem:[#allocation4 + $0x198] sm:$0xff] %vm458_vm1, %v5778_v5 }
  0x8a   : > { %511 = vst.msk [vmem:[#allocation4 + $0x1a0] sm:$0xff] %vm458_vm1, %v5778_v5  ;;  %512 = vst.msk [vmem:[#allocation4 + $0x1a8] sm:$0xff] %vm458_vm1, %v5778_v5 }
  0x8b   : > { %513 = vst.msk [vmem:[#allocation4 + $0x1b0] sm:$0xff] %vm458_vm1, %v5778_v5  ;;  %514 = vst.msk [vmem:[#allocation4 + $0x1b8] sm:$0xff] %vm458_vm1, %v5778_v5 }
  0x8c   : > { %515 = vst.msk [vmem:[#allocation4 + $0x1c0] sm:$0xff] %vm458_vm1, %v5778_v5  ;;  %516 = vst.msk [vmem:[#allocation4 + $0x1c8] sm:$0xff] %vm458_vm1, %v5778_v5 }
  0x8d   : > { %517 = vst.msk [vmem:[#allocation4 + $0x1d0] sm:$0xff] %vm458_vm1, %v5778_v5  ;;  %518 = vst.msk [vmem:[#allocation4 + $0x1d8] sm:$0xff] %vm458_vm1, %v5778_v5 }
  0x8e   : > { %519 = vst.msk [vmem:[#allocation4 + $0x1e0] sm:$0xff] %vm458_vm1, %v5778_v5  ;;  %520 = vst.msk [vmem:[#allocation4 + $0x1e8] sm:$0xff] %vm458_vm1, %v5778_v5 }
  0x8f   : > { %521 = vst.msk [vmem:[#allocation4 + $0x1f0] sm:$0xff] %vm458_vm1, %v5778_v5  ;;  %522 = vst.msk [vmem:[#allocation4 + $0x1f8] sm:$0xff] %vm458_vm1, %v5778_v5 }
  0x90 PF: > { %v575_v6 = vld [vmem:[%s5895_s11] sm:$0xff]  ;;  %v577_v7 = vld [vmem:[%s5895_s11 + $0x10] sm:$0xff]  ;;  %v5779_v8 = vmov 1   ;;  %v8841_v9 = vmov 0   ;;  %v578_v10 = vld [vmem:[%s5895_s11 + $0x18] sm:$0xff]  ;;  %v688_v33 = vlaneseq  ;;  %s5782_s14 = smov 112  }
  0x91   : > { %5282 = vset.pattern.permute.xlu0 %v5779_v8  ;;  %5281 = vset.pattern.permute.xlu1 %v8841_v9  ;;  %v580_v11 = vld [vmem:[%s5895_s11 + $0x28] sm:$0xff]  ;;  %v582_v12 = vld [vmem:[%s5895_s11 + $0x38] sm:$0xff]  ;;  %v579_v18 = vld [vmem:[%s5895_s11 + $0x20] sm:$0xff]  ;;  %s5784_s24 = smov 96   ;;  %s5785_s26 = smov 80  }
  0x92   : > { %1440 = vperm.xlu0 %5282, %v575_v6   ;;  %620 = vperm.xlu1 %5281, %v577_v7   ;;  %v584_v13 = vld [vmem:[%s5895_s11 + $0x48] sm:$0xff]  ;;  %v586_v14 = vld [vmem:[%s5895_s11 + $0x58] sm:$0xff]  ;;  %v581_v19 = vld [vmem:[%s5895_s11 + $0x30] sm:$0xff]  ;;  %v6320_v35 = vshrl.u32 %v688_v33, 7  ;;  %p5016_p0 = scmp.ne.s32.totalorder %s5759_s17, 1 }
  0x93   : > { %v588_v15 = vld [vmem:[%s5895_s11 + $0x68] sm:$0xff]  ;;  %v590_v16 = vld [vmem:[%s5895_s11 + $0x78] sm:$0xff]  ;;  %v583_v20 = vld [vmem:[%s5895_s11 + $0x40] sm:$0xff]  ;;  %s5787_s17 = smov (!%p5016_p0), 16   ;;  %s5788_s27 = smov (!%p5016_p0), 32  }
  0x94   : > { %v576_v17 = vld [vmem:[%s5895_s11 + $0x8] sm:$0xff]  ;;  %v585_v21 = vld [vmem:[%s5895_s11 + $0x50] sm:$0xff]  ;;  %v587_v22 = vld [vmem:[%s5895_s11 + $0x60] sm:$0xff]  ;;  %9026 = vst [vmem:[#allocation6_spill] sm:$0xff] %v6320_v35  ;;  %v690_v38 = vsub.s32 0, %v6320_v35  ;;  %v1505_v58 = vsub.s32 1, %v6320_v35 }
  0x95   : > { %v589_v23 = vld [vmem:[%s5895_s11 + $0x70] sm:$0xff]  ;;  %v523_v39 = vld [vmem:[%s5902_s25] sm:$0xff]  ;;  %v6341_v51 = vld [vmem:[%s5902_s25 + $0x8] sm:$0xff]  ;;  %s5789_s29 = smov (!%p5016_p0), 48  }
  0x96   : > { %1452 = vperm.xlu0 %5282, %v578_v10   ;;  %625 = vperm.xlu1 %5281, %v578_v10   ;;  %v591_v40 = vld [vmem:[%s5890_s8] sm:$0xf]  ;;  %v527_v44 = vunpack.c.0.s8 %v523_v39  ;;  %v529_v45 = vunpack.c.2.s8 %v523_v39  ;;  %v528_v46 = vunpack.c.1.s8 %v523_v39  ;;  %v531_v54 = vunpack.c.0.s8 %v6341_v51 }
  0x97   : > { %v6331_v42 = vrot.slane %v591_v40, %v690_v38  ;;  %v530_v61 = vunpack.c.3.s8 %v523_v39  ;;  %v532_v62 = vunpack.c.1.s8 %v6341_v51  ;;  %v533_v5 = vunpack.c.2.s8 %v6341_v51  ;;  %v5297_v35 = vld [vmem:[%s5885_s30 + $0x20] sm:$0xff]  }
  0x98   : > { %v6336_v49 = vcvt.s32.f32 %v527_v44  ;;  %v6338_v50 = vcvt.s32.f32 %v529_v45  ;;  %v6344_v53 = vcvt.s32.f32 %v528_v46  ;;  %v6356_v1 = vcvt.s32.f32 %v531_v54 }
  0x9a   : > { %1460 = vperm.xlu0 %5282, %v580_v11   ;;  %635 = vperm.xlu1 %5281, %v580_v11   ;;  %9027 = vst [vmem:[#allocation7_spill] sm:$0xff] %v6336_v49  ;;  %vm559_vm4 = vcmp.gt.f32.partialorder %v6336_v49, 0.0  ;;  %vm561_vm5 = vcmp.gt.f32.partialorder %v6338_v50, 0.0  ;;  %vm8942_vm6 = vcmp.gt.f32.partialorder %v6344_v53, 0.0  ;;  %9028 = vst [vmem:[#allocation8_spill] sm:$0xff] %v6356_v1  ;;  %vm8896_vm9 = vcmp.gt.f32.partialorder %v6356_v1, 0.0 }
  0x9e   : > { %1468 = vperm.xlu0 %5282, %v582_v12   ;;  %645 = vperm.xlu1 %5281, %v582_v12   ;;  %v6369_v12 = vcvt.s32.f32 %v530_v61 }
  0xa0   : > { %vm8919_vm11 = vcmp.gt.f32.partialorder %v6369_v12, 0.0 }
  0xa2   : > { %1476 = vperm.xlu0 %5282, %v584_v13   ;;  %655 = vperm.xlu1 %5281, %v584_v13   ;;  %v6371_v13 = vcvt.s32.f32 %v532_v62 }
  0xa4   : > { %9029 = vst [vmem:[#allocation9_spill] sm:$0xff] %v6371_v13  ;;  %vm8894_vm13 = vcmp.gt.f32.partialorder %v6371_v13, 0.0 }
  0xa6   : > { %1484 = vperm.xlu0 %5282, %v586_v14   ;;  %665 = vperm.xlu1 %5281, %v586_v14   ;;  %v6374_v14 = vld [vmem:[%s5902_s25 + $0x10] sm:$0xff] }
  0xa7   : > { %v537_v33 = vunpack.c.2.s8 %v6374_v14 }
  0xa9   : > { %v6417_v54 = vcvt.s32.f32 %v537_v33 }
  0xaa   : > { %1492 = vperm.xlu0 %5282, %v588_v15   ;;  %675 = vperm.xlu1 %5281, %v588_v15  }
  0xae   : > { %1500 = vperm.xlu0 %5282, %v590_v16   ;;  %685 = vperm.xlu1 %5281, %v590_v16  }
  0xb2   : > { %5284 = vset.pattern.permute.xlu0 %v8841_v9  ;;  %5283 = vset.pattern.permute.xlu1 %v5779_v8  ;;  %v6365_v8 = vrot.slane %v591_v40, %v1505_v58 }
  0xb3   : > { %610 = vperm.xlu0 %5284, %v575_v6   ;;  %1444 = vperm.xlu1 %5283, %v576_v17  }
  0xb7   : > { %615 = vperm.xlu0 %5284, %v576_v17   ;;  %1448 = vperm.xlu1 %5283, %v577_v7   ;;  %v535_v17 = vunpack.c.0.s8 %v6374_v14 }
  0xb9   : > { %v6399_v40 = vcvt.s32.f32 %v535_v17 }
  0xbb   : > { %630 = vperm.xlu0 %5284, %v579_v18   ;;  %1456 = vperm.xlu1 %5283, %v579_v18   ;;  %vm8836_vm1 = vcmp.gt.f32.partialorder %v6399_v40, 0.0 }
  0xbf   : > { %640 = vperm.xlu0 %5284, %v581_v19   ;;  %1464 = vperm.xlu1 %5283, %v581_v19  }
  0xc3   : > { %650 = vperm.xlu0 %5284, %v583_v20   ;;  %1472 = vperm.xlu1 %5283, %v583_v20  }
  0xc7   : > { %660 = vperm.xlu0 %5284, %v585_v21   ;;  %1480 = vperm.xlu1 %5283, %v585_v21   ;;  %v6387_v21 = vcvt.s32.f32 %v533_v5 }
  0xc9   : > { %vm8895_vm14 = vcmp.gt.f32.partialorder %v6387_v21, 0.0 }
  0xcb   : > { %670 = vperm.xlu0 %5284, %v587_v22   ;;  %1488 = vperm.xlu1 %5283, %v587_v22  }
  0xcf   : > { %680 = vperm.xlu0 %5284, %v589_v23   ;;  %1496 = vperm.xlu1 %5283, %v589_v23  }
  0xd3   : > { %5285 = vset.pattern.permute.xlu1 %v8841_v9  ;;  %v6652_v9 = vld [vmem:[#allocation2 + $0x30] sm:$0xff] }
 0x111   : > { %v6308_v24 = vpop.permute.xlu0 %1440  ;;  %v621_v25 = vpop.permute.xlu1 %620 }
 0x112   : > { %v694_v47 = vadd.f32 %v6331_v42, %v621_v25 }
 0x114   : > { %v726_v57 = vmul.f32 0.01, %v694_v47  ;;  %vm710_vm3 = vcmp.ge.f32.partialorder %v694_v47, 0.0 }
 0x115   : > { %v6310_v26 = vpop.permute.xlu0 %1452  ;;  %v626_v27 = vpop.permute.xlu1 %625 }
 0x116   : > { %v695_v55 = vadd.f32 %v6331_v42, %v626_v27  ;;  %v742_v3 = vsel %vm710_vm3, %v694_v47, %v726_v57  ;;  %v6421_v57 = vld [vmem:[%s5902_s25 + $0x18] sm:$0xff] }
 0x117   : > { %v6385_v19 = vsel %vm561_vm5, %v742_v3, -1e+30  ;;  %v541_v17 = vunpack.c.2.s8 %v6421_v57 }
 0x118   : > { %v727_v4 = vmul.f32 0.01, %v695_v55  ;;  %vm711_vm8 = vcmp.ge.f32.partialorder %v695_v55, 0.0 }
 0x119   : > { %v6312_v28 = vpop.permute.xlu0 %1460  ;;  %v636_v29 = vpop.permute.xlu1 %635 }
 0x11a   : > { %v697_v6 = vadd.f32 %v6331_v42, %v636_v29  ;;  %v743_v20 = vsel %vm711_vm8, %v695_v55, %v727_v4  ;;  %v534_v29 = vunpack.c.3.s8 %v6341_v51  ;;  %v536_v55 = vunpack.c.1.s8 %v6374_v14 }
 0x11b   : > { %v6409_v46 = vsel %vm8919_vm11, %v743_v20, -1e+30  ;;  %vm8835_vm8 = vcmp.gt.f32.partialorder %v6417_v54, 0.0 }
 0x11c   : > { %v729_v25 = vmul.f32 0.01, %v697_v6  ;;  %vm713_vm12 = vcmp.ge.f32.partialorder %v697_v6, 0.0 }
 0x11d   : > { %v6314_v30 = vpop.permute.xlu0 %1468  ;;  %v646_v32 = vpop.permute.xlu1 %645 }
 0x11e   : > { %v699_v22 = vadd.f32 %v6331_v42, %v646_v32 }
 0x120   : > { %v731_v51 = vmul.f32 0.01, %v699_v22  ;;  %vm715_vm0 = vcmp.ge.f32.partialorder %v699_v22, 0.0 }
 0x121   : > { %v6316_v31 = vpop.permute.xlu0 %1476  ;;  %v6322_v36 = vpop.permute.xlu1 %655 }
 0x122   : > { %v701_v44 = vadd.f32 %v6331_v42, %v6322_v36  ;;  %v747_v5 = vsel %vm715_vm0, %v699_v22, %v731_v51 }
 0x124   : > { %vm717_vm3 = vcmp.ge.f32.partialorder %v701_v44, 0.0 }
 0x125   : > { %v6318_v34 = vpop.permute.xlu0 %1484  ;;  %v6333_v43 = vpop.permute.xlu1 %665 }
 0x126   : > { %v703_v61 = vadd.f32 %v6331_v42, %v6333_v43 }
 0x129   : > { %v6324_v37 = vpop.permute.xlu0 %1492  ;;  %v6348_v56 = vpop.permute.xlu1 %675 }
 0x12d   : > { %v6329_v41 = vpop.permute.xlu0 %1500  ;;  %v6367_v10 = vpop.permute.xlu1 %685 }
 0x132   : > { %v611_v48 = vpop.permute.xlu0 %610  ;;  %v6395_v38 = vpop.permute.xlu1 %1444 }
 0x133   : > { %v692_v52 = vadd.f32 %v6331_v42, %v611_v48  ;;  %v745_v48 = vsel %vm713_vm12, %v697_v6, %v729_v25  ;;  %v6443_v6 = vcvt.s32.f32 %v536_v55  ;;  %v735_v25 = vmul.f32 0.01, %v703_v61 }
 0x134   : > { %vm719_vm12 = vcmp.ge.f32.partialorder %v703_v61, 0.0 }
 0x135   : > { %vm708_vm2 = vcmp.ge.f32.partialorder %v692_v52, 0.0  ;;  %v724_v59 = vmul.f32 0.01, %v692_v52  ;;  %v751_v55 = vsel %vm719_vm12, %v703_v61, %v735_v25 }
 0x136   : > { %v616_v60 = vpop.permute.xlu0 %615  ;;  %v6436_v3 = vpop.permute.xlu1 %1448 }
 0x137   : > { %v693_v63 = vadd.f32 %v6331_v42, %v616_v60  ;;  %v740_v0 = vsel %vm708_vm2, %v692_v52, %v724_v59  ;;  %v6415_v52 = vcvt.s32.f32 %v534_v29  ;;  %v539_v60 = vunpack.c.0.s8 %v6421_v57 }
 0x138   : > { %v6360_v2 = vsel %vm559_vm4, %v740_v0, -1e+30  ;;  %v733_v0 = vmul.f32 0.01, %v701_v44  ;;  %v1509_v25 = vadd.f32 %v6365_v8, %v6436_v3 }
 0x139   : > { %788 = vmax.xlane.f32.xlu0 %v6360_v2  ;;  %vm709_vm7 = vcmp.ge.f32.partialorder %v693_v63, 0.0  ;;  %v725_v7 = vmul.f32 0.01, %v693_v63  ;;  %9030 = vst [vmem:[#allocation10_spill] sm:$0xff] %v6415_v52 }
 0x13a   : > { %v631_v11 = vpop.permute.xlu0 %630 }
 0x13b   : > { %v696_v15 = vadd.f32 %v6331_v42, %v631_v11  ;;  %v741_v16 = vsel %vm709_vm7, %v693_v63, %v725_v7  ;;  %v6434_v63 = vsel %vm8894_vm13, %v745_v48, -1e+30  ;;  %vm8840_vm7 = vcmp.gt.f32.partialorder %v6415_v52, 0.0 }
 0x13c   : > { %v6381_v18 = vsel %vm8942_vm6, %v741_v16, -1e+30  ;;  %v538_v7 = vunpack.c.3.s8 %v6374_v14  ;;  %v6447_v16 = vcvt.s32.f32 %v539_v60  ;;  %v6456_v22 = vsel %vm8840_vm7, %v747_v5, -1e+30 }
 0x13d   : > { %790 = vmax.xlane.f32.xlu1 %v6381_v18  ;;  %792 = vmax.xlane.f32.xlu0 %v6385_v19  ;;  %vm712_vm10 = vcmp.ge.f32.partialorder %v696_v15, 0.0  ;;  %v728_v23 = vmul.f32 0.01, %v696_v15  ;;  %v705_v14 = vadd.f32 %v6331_v42, %v6348_v56  ;;  %v6468_v56 = vcvt.s32.f32 %v541_v17 }
 0x13e   : > { %v641_v27 = vpop.permute.xlu0 %640  ;;  %v6463_v33 = vcvt.s32.f32 %v538_v7  ;;  %vm8839_vm0 = vcmp.gt.f32.partialorder %v6447_v16, 0.0  ;;  %v1507_v48 = vadd.f32 %v6365_v8, %v6308_v24 }
 0x13f   : > { %v698_v39 = vadd.f32 %v6331_v42, %v641_v27  ;;  %v744_v32 = vsel %vm712_vm10, %v696_v15, %v728_v23  ;;  %v749_v23 = vsel %vm717_vm3, %v701_v44, %v733_v0  ;;  %9031 = vst [vmem:[#allocation11_spill] sm:$0xff] %v6468_v56  ;;  %v737_v60 = vmul.f32 0.01, %v705_v14 }
 0x140   : > { %v6405_v45 = vsel %vm8896_vm9, %v744_v32, -1e+30  ;;  %v1457_v32 = vpop.permute.xlu1 %1456  ;;  %vm8897_vm3 = vcmp.gt.f32.partialorder %v6463_v33, 0.0  ;;  %vm8838_vm12 = vcmp.gt.f32.partialorder %v6468_v56, 0.0 }
 0x141   : > { %796 = vmax.xlane.f32.xlu1 %v6405_v45  ;;  %794 = vmax.xlane.f32.xlu0 %v6409_v46  ;;  %vm714_vm15 = vcmp.ge.f32.partialorder %v698_v39, 0.0  ;;  %v730_v47 = vmul.f32 0.01, %v698_v39 }
 0x142   : > { %v651_v36 = vpop.permute.xlu0 %650 }
 0x143   : > { %v700_v58 = vadd.f32 %v6331_v42, %v651_v36  ;;  %v746_v59 = vsel %vm714_vm15, %v698_v39, %v730_v47  ;;  %vm8837_vm15 = vcmp.gt.f32.partialorder %v6443_v6, 0.0  ;;  %v540_v39 = vunpack.c.1.s8 %v6421_v57 }
 0x144   : > { %v6430_v62 = vsel %vm8895_vm14, %v746_v59, -1e+30  ;;  %v6478_v36 = vsel %vm8837_vm15, %v749_v23, -1e+30 }
 0x145   : > { %800 = vmax.xlane.f32.xlu1 %v6430_v62  ;;  %798 = vmax.xlane.f32.xlu0 %v6434_v63  ;;  %vm716_vm2 = vcmp.ge.f32.partialorder %v700_v58, 0.0  ;;  %v732_v4 = vmul.f32 0.01, %v700_v58  ;;  %v6485_v0 = vcvt.s32.f32 %v540_v39 }
 0x146   : > { %v661_v43 = vpop.permute.xlu0 %660 }
 0x147   : > { %v702_v11 = vadd.f32 %v6331_v42, %v661_v43  ;;  %v748_v15 = vsel %vm716_vm2, %v700_v58, %v732_v4  ;;  %v707_v58 = vadd.f32 %v6331_v42, %v6367_v10  ;;  %9032 = vst [vmem:[#allocation12_spill] sm:$0xff] %v6485_v0  ;;  %v542_v4 = vunpack.c.3.s8 %v6421_v57 }
 0x148   : > { %v6452_v20 = vsel %vm8836_vm1, %v748_v15, -1e+30  ;;  %v1508_v10 = vadd.f32 %v6365_v8, %v6395_v38  ;;  %v1510_v43 = vadd.f32 %v6365_v8, %v6310_v26  ;;  %v1539_v57 = vmul.f32 0.01, %v1507_v48  ;;  %v1465_v15 = vpop.permute.xlu1 %1464 }
 0x149   : > { %804 = vmax.xlane.f32.xlu1 %v6452_v20  ;;  %802 = vmax.xlane.f32.xlu0 %v6456_v22  ;;  %vm718_vm10 = vcmp.ge.f32.partialorder %v702_v11, 0.0  ;;  %v734_v27 = vmul.f32 0.01, %v702_v11  ;;  %v739_v17 = vmul.f32 0.01, %v707_v58  ;;  %vm1523_vm1 = vcmp.ge.f32.partialorder %v1507_v48, 0.0 }
 0x14a   : > { %v671_v29 = vpop.permute.xlu0 %670  ;;  %vm723_vm15 = vcmp.ge.f32.partialorder %v707_v58, 0.0  ;;  %v6505_v23 = vcvt.s32.f32 %v542_v4  ;;  %v1542_v3 = vmul.f32 0.01, %v1510_v43 }
 0x14b   : > { %v704_v44 = vadd.f32 %v6331_v42, %v671_v29  ;;  %v750_v47 = vsel %vm718_vm10, %v702_v11, %v734_v27  ;;  %vm721_vm10 = vcmp.ge.f32.partialorder %v705_v14, 0.0  ;;  %v6500_v11 = vsel %vm8897_vm3, %v751_v55, -1e+30 }
 0x14c   : > { %v6474_v51 = vsel %vm8835_vm8, %v750_v47, -1e+30  ;;  %v753_v38 = vsel %vm721_vm10, %v705_v14, %v737_v60  ;;  %vm8941_vm8 = vcmp.gt.f32.partialorder %v6485_v0, 0.0  ;;  %9033 = vst [vmem:[#allocation13_spill] sm:$0xff] %v6505_v23  ;;  %v1540_v27 = vmul.f32 0.01, %v1508_v10  ;;  %v1473_v55 = vpop.permute.xlu1 %1472 }
 0x14d   : > { %808 = vmax.xlane.f32.xlu1 %v6474_v51  ;;  %806 = vmax.xlane.f32.xlu0 %v6478_v36  ;;  %vm720_vm2 = vcmp.ge.f32.partialorder %v704_v44, 0.0  ;;  %v736_v59 = vmul.f32 0.01, %v704_v44  ;;  %v6515_v39 = vsel %vm8941_vm8, %v753_v38, -1e+30  ;;  %vm1524_vm10 = vcmp.ge.f32.partialorder %v1508_v10, 0.0 }
 0x14e   : > { %v681_v24 = vpop.permute.xlu0 %680  ;;  %v1512_v14 = vadd.f32 %v6365_v8, %v6312_v28  ;;  %v755_v47 = vsel %vm723_vm15, %v707_v58, %v739_v17  ;;  %v1511_v60 = vadd.f32 %v6365_v8, %v1457_v32  ;;  %v1516_v38 = vadd.f32 %v6365_v8, %v6316_v31 }
 0x14f   : > { %v706_v61 = vadd.f32 %v6331_v42, %v681_v24  ;;  %v752_v5 = vsel %vm720_vm2, %v704_v44, %v736_v59  ;;  %v1555_v44 = vsel %vm1523_vm1, %v1507_v48, %v1539_v57  ;;  %v1556_v59 = vsel %vm1524_vm10, %v1508_v10, %v1540_v27 }
 0x150   : > { %v6496_v7 = vsel %vm8839_vm0, %v752_v5, -1e+30  ;;  %v1541_v24 = vmul.f32 0.01, %v1509_v25  ;;  %v6525_v4 = vsel %vm559_vm4, %v1555_v44, -1e+30  ;;  %v1514_v48 = vadd.f32 %v6365_v8, %v6314_v30  ;;  %v1481_v30 = vpop.permute.xlu1 %1480 }
 0x151   : > { %812 = vmax.xlane.f32.xlu1 %v6496_v7  ;;  %810 = vmax.xlane.f32.xlu0 %v6500_v11  ;;  %vm722_vm2 = vcmp.ge.f32.partialorder %v706_v61, 0.0  ;;  %v738_v42 = vmul.f32 0.01, %v706_v61  ;;  %vm1525_vm0 = vcmp.ge.f32.partialorder %v1509_v25, 0.0  ;;  %vm1528_vm1 = vcmp.ge.f32.partialorder %v1512_v14, 0.0 }
 0x152   : > { %v6537_v32 = vsel %vm8942_vm6, %v1556_v59, -1e+30  ;;  %v1557_v5 = vsel %vm1525_vm0, %v1509_v25, %v1541_v24  ;;  %v1513_v10 = vadd.f32 %v6365_v8, %v1465_v15  ;;  %v1543_v57 = vmul.f32 0.01, %v1511_v60 }
 0x153   : > { %v754_v26 = vsel %vm722_vm2, %v706_v61, %v738_v42  ;;  %vm1526_vm2 = vcmp.ge.f32.partialorder %v1510_v43, 0.0  ;;  %v1544_v61 = vmul.f32 0.01, %v1512_v14  ;;  %vm1527_vm15 = vcmp.ge.f32.partialorder %v1511_v60, 0.0 }
 0x154   : > { %v6511_v29 = vsel %vm8838_vm12, %v754_v26, -1e+30  ;;  %vm8940_vm12 = vcmp.gt.f32.partialorder %v6505_v23, 0.0  ;;  %v1558_v58 = vsel %vm1526_vm2, %v1510_v43, %v1542_v3  ;;  %v1546_v17 = vmul.f32 0.01, %v1514_v48 }
 0x155   : > { %816 = vmax.xlane.f32.xlu1 %v6511_v29  ;;  %814 = vmax.xlane.f32.xlu0 %v6515_v39  ;;  %v6529_v28 = vsel %vm8940_vm12, %v755_v47, -1e+30  ;;  %v6542_v42 = vsel %vm8919_vm11, %v1558_v58, -1e+30  ;;  %v1560_v43 = vsel %vm1528_vm1, %v1512_v14, %v1544_v61  ;;  %vm1530_vm10 = vcmp.ge.f32.partialorder %v1514_v48, 0.0 }
 0x156   : > { %9034 = vst [vmem:[#allocation14_spill] sm:$0xff] %v6542_v42  ;;  %v6550_v15 = vsel %vm561_vm5, %v1557_v5, -1e+30  ;;  %v1559_v26 = vsel %vm1527_vm15, %v1511_v60, %v1543_v57  ;;  %v1515_v25 = vadd.f32 %v6365_v8, %v1473_v55  ;;  %v1545_v27 = vmul.f32 0.01, %v1513_v10  ;;  %v1489_v55 = vpop.permute.xlu1 %1488 }
 0x157   : > { %9035 = vst [vmem:[#allocation15_spill] sm:$0xff] %v6550_v15  ;;  %v6555_v44 = vsel %vm8894_vm13, %v1560_v43, -1e+30  ;;  %vm1529_vm0 = vcmp.ge.f32.partialorder %v1513_v10, 0.0  ;;  %v1518_v31 = vadd.f32 %v6365_v8, %v6318_v34  ;;  %v1562_v14 = vsel %vm1530_vm10, %v1514_v48, %v1546_v17 }
 0x158   : > { %9036 = vst [vmem:[#allocation16_spill] sm:$0xff] %v6555_v44  ;;  %v1548_v47 = vmul.f32 0.01, %v1516_v38  ;;  %vm1532_vm2 = vcmp.ge.f32.partialorder %v1516_v38, 0.0  ;;  %v6563_v3 = vsel %vm8896_vm9, %v1559_v26, -1e+30  ;;  %v1561_v59 = vsel %vm1529_vm0, %v1513_v10, %v1545_v27 }
 0x159   : > { %1604 = vmax.xlane.f32.xlu1 %v6525_v4  ;;  %818 = vmax.xlane.f32.xlu0 %v6529_v28  ;;  %9037 = vst [vmem:[#allocation17_spill] sm:$0xff] %v6563_v3  ;;  %v1517_v60 = vadd.f32 %v6365_v8, %v1481_v30  ;;  %v1547_v24 = vmul.f32 0.01, %v1515_v25  ;;  %v6568_v58 = vsel %vm8840_vm7, %v1562_v14, -1e+30  ;;  %vm1531_vm1 = vcmp.ge.f32.partialorder %v1515_v25, 0.0 }
 0x15a   : > { %9038 = vst [vmem:[#allocation18_spill] sm:$0xff] %v6568_v58  ;;  %v1520_v34 = vadd.f32 %v6365_v8, %v6324_v37  ;;  %v1564_v48 = vsel %vm1532_vm2, %v1516_v38, %v1548_v47  ;;  %v1550_v61 = vmul.f32 0.01, %v1518_v31  ;;  %vm1534_vm15 = vcmp.ge.f32.partialorder %v1518_v31, 0.0  ;;  %v1497_v37 = vpop.permute.xlu1 %1496 }
 0x15b   : > { %v6576_v5 = vsel %vm8895_vm14, %v1561_v59, -1e+30  ;;  %v1563_v10 = vsel %vm1531_vm1, %v1515_v25, %v1547_v24  ;;  %v1519_v57 = vadd.f32 %v6365_v8, %v1489_v55  ;;  %v1549_v30 = vmul.f32 0.01, %v1517_v60 }
 0x15c   : > { %9039 = vst [vmem:[#allocation19_spill] sm:$0xff] %v6576_v5  ;;  %vm9040_vm10 = vcmp.gt.f32.partialorder %v6443_v6, 0.0  ;;  %vm1533_vm0 = vcmp.ge.f32.partialorder %v1517_v60, 0.0  ;;  %v1522_v38 = vadd.f32 %v6365_v8, %v6329_v41  ;;  %v1566_v17 = vsel %vm1534_vm15, %v1518_v31, %v1550_v61 }
 0x15d   : > { %1610 = vmax.xlane.f32.xlu1 %v6542_v42  ;;  %1606 = vmax.xlane.f32.xlu0 %v6537_v32  ;;  %v6581_v43 = vsel %vm9040_vm10, %v1564_v48, -1e+30  ;;  %v1552_v26 = vmul.f32 0.01, %v1520_v34  ;;  %vm1536_vm2 = vcmp.ge.f32.partialorder %v1520_v34, 0.0  ;;  %vm9042_vm1 = vcmp.gt.f32.partialorder %v6399_v40, 0.0 }
 0x15e   : > { %9041 = vst [vmem:[#allocation20_spill] sm:$0xff] %v6581_v43  ;;  %v6589_v25 = vsel %vm9042_vm1, %v1563_v10, -1e+30  ;;  %v1565_v27 = vsel %vm1533_vm0, %v1517_v60, %v1549_v30  ;;  %v1521_v14 = vadd.f32 %v6365_v8, %v1497_v37  ;;  %v1551_v47 = vmul.f32 0.01, %v1519_v57  ;;  %v5293_v30 = vld [vmem:[%s5885_s30] sm:$0xff]  }
 0x15f   : > { %9043 = vst [vmem:[#allocation21_spill] sm:$0xff] %v6589_v25  ;;  %v6594_v55 = vsel %vm8897_vm3, %v1566_v17, -1e+30  ;;  %vm1535_vm10 = vcmp.ge.f32.partialorder %v1519_v57, 0.0  ;;  %v1568_v41 = vsel %vm1536_vm2, %v1520_v34, %v1552_v26  ;;  %v1554_v31 = vmul.f32 0.01, %v1522_v38  ;;  %5084 = vmatprep.subr.bf16.mxu0 %v5293_v30 }
 0x160   : > { %9044 = vst [vmem:[#allocation22_spill] sm:$0xff] %v6594_v55  ;;  %vm1538_vm15 = vcmp.ge.f32.partialorder %v1522_v38, 0.0  ;;  %vm9045_vm7 = vcmp.gt.f32.partialorder %v6417_v54, 0.0  ;;  %v1567_v8 = vsel %vm1535_vm10, %v1519_v57, %v1551_v47  ;;  %v1553_v60 = vmul.f32 0.01, %v1521_v14  ;;  %v5294_v37 = vld [vmem:[%s5885_s30 + $0x8] sm:$0xff]   ;;  %5085 = vmatpush3.bf16.msra.mxu0 %v5293_v30  ;;  %vm7009_vm10 = vmpackc.low %vm8942_vm6, %vm559_vm4 }
 0x161   : > { %1614 = vmax.xlane.f32.xlu1 %v6555_v44  ;;  %1608 = vmax.xlane.f32.xlu0 %v6550_v15  ;;  %v6600_v59 = vsel %vm9045_vm7, %v1565_v27, -1e+30  ;;  %v6604_v24 = vsel %vm8941_vm8, %v1568_v41, -1e+30  ;;  %vm1537_vm0 = vcmp.ge.f32.partialorder %v1521_v14, 0.0  ;;  %v1570_v34 = vsel %vm1538_vm15, %v1522_v38, %v1554_v31  ;;  %v6625_v38 = vld [vmem:[#allocation2] sm:$0xff]  ;;  %vm7017_vm15 = vmpackc.low %vm8919_vm11, %vm561_vm5 }
 0x162   : > { %9046 = vst [vmem:[#allocation23_spill] sm:$0xff] %v6600_v59  ;;  %9047 = vst [vmem:[#allocation24_spill] sm:$0xff] %v6604_v24  ;;  %vm9048_vm2 = vcmp.gt.f32.partialorder %v6447_v16, 0.0  ;;  %v1569_v61 = vsel %vm1537_vm0, %v1521_v14, %v1553_v60  ;;  %v6614_v10 = vsel %vm8940_vm12, %v1570_v34, -1e+30  ;;  %vm9051_vm7 = vcmp.gt.f32.partialorder %v6468_v56, 0.0  ;;  %5086 = vmatprep.subr.bf16.mxu0 %v5294_v37 }
 0x163   : > { %v6610_v48 = vsel %vm9048_vm2, %v1567_v8, -1e+30  ;;  %9050 = vst [vmem:[#allocation26_spill] sm:$0xff] %v6614_v10  ;;  %v6620_v57 = vsel %vm9051_vm7, %v1569_v61, -1e+30  ;;  %vm8893_vm1 = vcmask 7168   ;;  %vm7035_vm0 = vmpackc.low %vm8894_vm13, %vm8896_vm9 }
 0x164   : > { %9049 = vst [vmem:[#allocation25_spill] sm:$0xff] %v6610_v48  ;;  %9052 = vst [vmem:[#allocation27_spill] sm:$0xff] %v6620_v57  ;;  %5087 = vmatpush3.bf16.msra.mxu0 %v5294_v37  ;;  %v773_v27 = vld [vmem:[#allocation2 + $0x8] sm:$0xff]  ;;  %v6630_v14 = vld [vmem:[#allocation2 + $0x10] sm:$0xff]  ;;  %vm9096_vm2 = vcmp.gt.f32.partialorder %v6415_v52, 0.0 }
 0x165   : > { %1618 = vmax.xlane.f32.xlu1 %v6568_v58  ;;  %1612 = vmax.xlane.f32.xlu0 %v6563_v3  ;;  %v5295_v47 = vld [vmem:[%s5885_s30 + $0x10] sm:$0xff]   ;;  %v6639_v34 = vld [vmem:[#allocation2 + $0x20] sm:$0xff]  ;;  %v6641_v61 = vld [vmem:[#allocation2 + $0x18] sm:$0xff] }
 0x166   : > { %5088 = vmatprep.subr.bf16.mxu0 %v5295_v47  ;;  %v5296_v30 = vld [vmem:[%s5885_s30 + $0x18] sm:$0xff]   ;;  %v6682_v58 = vld [vmem:[#allocation2 + $0x48] sm:$0xff]  ;;  %v6727_v3 = vld [vmem:[#allocation2 + $0x70] sm:$0xff] }
 0x167   : > { %v6705_v44 = vld [vmem:[#allocation2 + $0x58] sm:$0xff]  ;;  %v6729_v42 = vld [vmem:[#allocation2 + $0x68] sm:$0xff]  ;;  %vm7051_vm7 = vmpackc.low %vm9096_vm2, %vm8895_vm14 }
 0x168   : > { %5089 = vmatpush3.bf16.msra.mxu0 %v5295_v47  ;;  %v6654_v47 = vld [vmem:[#allocation2 + $0x28] sm:$0xff] }
 0x169   : > { %1622 = vmax.xlane.f32.xlu1 %v6581_v43  ;;  %1616 = vmax.xlane.f32.xlu0 %v6576_v5  ;;  %v6703_v5 = vld [vmem:[#allocation2 + $0x60] sm:$0xff]  ;;  %v6772_v15 = vld [vmem:[#allocation2 + $0x88] sm:$0xff] }
 0x16a   : > { %5090 = vmatprep.subr.bf16.mxu0 %v5296_v30  ;;  %9057 = vst [vmem:[#allocation32_spill] sm:$0xff] %v6772_v15 }
 0x16c   : > { %5091 = vmatpush3.bf16.msra.mxu0 %v5296_v30  ;;  %v6667_v30 = vld [vmem:[#allocation2 + $0x38] sm:$0xff] }
 0x16d   : > { %1626 = vmax.xlane.f32.xlu1 %v6594_v55  ;;  %1620 = vmax.xlane.f32.xlu0 %v6589_v25 }
 0x16e   : > { %5092 = vmatprep.subr.bf16.mxu0 %v5297_v35 }
 0x170   : > { %5093 = vmatpush3.bf16.msra.mxu0 %v5297_v35  ;;  %v6680_v35 = vld [vmem:[#allocation2 + $0x50] sm:$0xff] }
 0x171   : > { %1630 = vmax.xlane.f32.xlu1 %v6604_v24  ;;  %1624 = vmax.xlane.f32.xlu0 %v6600_v59  ;;  %v5298_v59 = vld [vmem:[%s5885_s30 + $0x28] sm:$0xff]  }
 0x172   : > { %5094 = vmatprep.subr.bf16.mxu0 %v5298_v59 }
 0x174   : > { %5095 = vmatpush3.bf16.msra.mxu0 %v5298_v59 }
 0x175   : > { %1634 = vmax.xlane.f32.xlu1 %v6614_v10  ;;  %1628 = vmax.xlane.f32.xlu0 %v6610_v48  ;;  %v6665_v10 = vld [vmem:[#allocation2 + $0x40] sm:$0xff] }
 0x179   : > { %1632 = vmax.xlane.f32.xlu0 %v6620_v57 }
 0x1c6   : > { %v789_v17 = vpop.xlane.xlu0 %788 }
 0x1c7   : > { %v6628_v26 = vmax.f32 %v6625_v38, %v789_v17 }
 0x1c9   : > { %1423 = vst.msk [vmem:[#allocation2] sm:$0xff] %vm8893_vm1, %v6628_v26  ;;  %886 = vperm.xlu1 %5285, %v6628_v26   ;;  %v836_v43 = vsub.f32 %v6625_v38, %v6628_v26 }
 0x1ca   : > { %v791_v41 = vpop.xlane.xlu1 %790  ;;  %v793_v31 = vpop.xlane.xlu0 %792 }
 0x1cb   : > { %v821_v8 = vmax.f32 %v773_v27, %v791_v41  ;;  %v6637_v60 = vmax.f32 %v6630_v14, %v793_v31 }
 0x1cd   : > { %1424 = vst.msk [vmem:[#allocation2 + $0x8] sm:$0xff] %vm8893_vm1, %v821_v8  ;;  %1425 = vst.msk [vmem:[#allocation2 + $0x10] sm:$0xff] %vm8893_vm1, %v6637_v60  ;;  %891 = vperm.xlu0 %5284, %v821_v8   ;;  %896 = vperm.xlu1 %5285, %v6637_v60  }
 0x1ce   : > { %v797_v37 = vpop.xlane.xlu1 %796  ;;  %v795_v17 = vpop.xlane.xlu0 %794 }
 0x1cf   : > { %v824_v41 = vmax.f32 %v6639_v34, %v797_v37  ;;  %v6650_v31 = vmax.f32 %v6641_v61, %v795_v17 }
 0x1d1   : > { %1427 = vst.msk [vmem:[#allocation2 + $0x20] sm:$0xff] %vm8893_vm1, %v824_v41  ;;  %1426 = vst.msk [vmem:[#allocation2 + $0x18] sm:$0xff] %vm8893_vm1, %v6650_v31  ;;  %906 = vperm.xlu0 %5284, %v824_v41   ;;  %901 = vperm.xlu1 %5285, %v6650_v31  }
 0x1d2   : > { %v801_v37 = vpop.xlane.xlu1 %800  ;;  %v799_v57 = vpop.xlane.xlu0 %798 }
 0x1d3   : > { %v826_v17 = vmax.f32 %v6652_v9, %v801_v37  ;;  %v6663_v48 = vmax.f32 %v6654_v47, %v799_v57  ;;  %v837_v37 = vsub.f32 %v773_v27, %v821_v8  ;;  %v840_v8 = vsub.f32 %v6639_v34, %v824_v41  ;;  %v6717_v41 = vld [vmem:[%s5885_s30 + $0x38] sm:$0xff]  }
 0x1d4   : > { %v838_v34 = vsub.f32 %v6630_v14, %v6637_v60  ;;  %9054 = vst [vmem:[#allocation29_spill] sm:$0xff] %v6717_v41 }
 0x1d5   : > { %1429 = vst.msk [vmem:[#allocation2 + $0x30] sm:$0xff] %vm8893_vm1, %v826_v17  ;;  %1428 = vst.msk [vmem:[#allocation2 + $0x28] sm:$0xff] %vm8893_vm1, %v6663_v48  ;;  %916 = vperm.xlu0 %5284, %v826_v17   ;;  %911 = vperm.xlu1 %5285, %v6663_v48   ;;  %v854_v27 = vmul.f32 1.442695, %v837_v37  ;;  %v852_v37 = vmul.f32 1.442695, %v836_v43 }
 0x1d6   : > { %v805_v24 = vpop.xlane.xlu1 %804  ;;  %v803_v57 = vpop.xlane.xlu0 %802 }
 0x1d7   : > { %v6675_v25 = vmax.f32 %v6665_v10, %v805_v24  ;;  %v6678_v55 = vmax.f32 %v6667_v30, %v803_v57  ;;  %v6693_v24 = vld [vmem:[%s5885_s30 + $0x30] sm:$0xff]   ;;  %5301 = vpow2.f32 %v854_v27  ;;  %v856_v27 = vmul.f32 1.442695, %v838_v34 }
 0x1d8   : > { %9053 = vst [vmem:[#allocation28_spill] sm:$0xff] %v6693_v24  ;;  %5096 = vmatprep.subr.bf16.mxu0 %v6693_v24  ;;  %5303 = vpow2.f32 %v852_v37 }
 0x1d9   : > { %1431 = vst.msk [vmem:[#allocation2 + $0x40] sm:$0xff] %vm8893_vm1, %v6675_v25  ;;  %1430 = vst.msk [vmem:[#allocation2 + $0x38] sm:$0xff] %vm8893_vm1, %v6678_v55  ;;  %926 = vperm.xlu0 %5284, %v6675_v25   ;;  %921 = vperm.xlu1 %5285, %v6678_v55  }
 0x1da   : > { %v809_v59 = vpop.xlane.xlu1 %808  ;;  %v807_v57 = vpop.xlane.xlu0 %806  ;;  %5097 = vmatpush3.bf16.msra.mxu0 %v6693_v24 }
 0x1db   : > { %v6697_v38 = vmax.f32 %v6680_v35, %v809_v59  ;;  %v6700_v26 = vmax.f32 %v6682_v58, %v807_v57  ;;  %v860_v59 = vmul.f32 1.442695, %v840_v8  ;;  %v842_v57 = vsub.f32 %v6652_v9, %v826_v17  ;;  %5098 = vmatprep.subr.bf16.mxu0 %v6717_v41 }
 0x1dc   : > { %v839_v9 = vsub.f32 %v6641_v61, %v6650_v31  ;;  %v841_v31 = vsub.f32 %v6654_v47, %v6663_v48 }
 0x1dd   : > { %1433 = vst.msk [vmem:[#allocation2 + $0x50] sm:$0xff] %vm8893_vm1, %v6697_v38  ;;  %1432 = vst.msk [vmem:[#allocation2 + $0x48] sm:$0xff] %vm8893_vm1, %v6700_v26  ;;  %936 = vperm.xlu0 %5284, %v6697_v38   ;;  %931 = vperm.xlu1 %5285, %v6700_v26   ;;  %5305 = vpow2.f32 %v860_v59  ;;  %v864_v17 = vmul.f32 1.442695, %v842_v57  ;;  %v846_v48 = vsub.f32 %v6680_v35, %v6697_v38  ;;  %v6796_v35 = vld [vmem:[#allocation2 + $0xa8] sm:$0xff] }
 0x1de   : > { %v813_v43 = vpop.xlane.xlu1 %812  ;;  %v811_v24 = vpop.xlane.xlu0 %810  ;;  %5099 = vmatpush3.bf16.msra.mxu0 %v6717_v41  ;;  %v6752_v41 = vld [vmem:[#allocation2 + $0x78] sm:$0xff]  ;;  %5307 = vpow2.f32 %v856_v27  ;;  %v858_v59 = vmul.f32 1.442695, %v839_v9  ;;  %9058 = vst [vmem:[#allocation33_spill] sm:$0xff] %v6796_v35 }
 0x1df   : > { %v6721_v14 = vmax.f32 %v6703_v5, %v813_v43  ;;  %v6724_v60 = vmax.f32 %v6705_v44, %v811_v24  ;;  %v844_v24 = vsub.f32 %v6665_v10, %v6675_v25  ;;  %v6750_v43 = vld [vmem:[#allocation2 + $0x80] sm:$0xff]  ;;  %5309 = vpow2.f32 %v864_v17  ;;  %v9152_v0 = vld [vmem:[#allocation28_spill] sm:$0xff] }
 0x1e0   : > { %9055 = vst [vmem:[#allocation30_spill] sm:$0xff] %v6750_v43  ;;  %5311 = vpow2.f32 %v858_v59  ;;  %v843_v17 = vsub.f32 %v6667_v30, %v6678_v55  ;;  %v872_v38 = vmul.f32 1.442695, %v846_v48 }
 0x1e1   : > { %1435 = vst.msk [vmem:[#allocation2 + $0x60] sm:$0xff] %vm8893_vm1, %v6721_v14  ;;  %1434 = vst.msk [vmem:[#allocation2 + $0x58] sm:$0xff] %vm8893_vm1, %v6724_v60  ;;  %946 = vperm.xlu0 %5284, %v6721_v14   ;;  %941 = vperm.xlu1 %5285, %v6724_v60   ;;  %v868_v25 = vmul.f32 1.442695, %v844_v24  ;;  %v6768_v9 = vpop.eup %5301  ;;  %v848_v24 = vsub.f32 %v6703_v5, %v6721_v14  ;;  %v845_v5 = vsub.f32 %v6682_v58, %v6700_v26 }
 0x1e2   : > { %v817_v8 = vpop.xlane.xlu1 %816  ;;  %v815_v37 = vpop.xlane.xlu0 %814  ;;  %v866_v48 = vmul.f32 1.442695, %v843_v17 }
 0x1e3   : > { %v6743_v34 = vmax.f32 %v6727_v3, %v817_v8  ;;  %v6746_v61 = vmax.f32 %v6729_v42, %v815_v37  ;;  %v862_v8 = vmul.f32 1.442695, %v841_v31  ;;  %v6770_v37 = vld [vmem:[#allocation2 + $0x98] sm:$0xff]  ;;  %5313 = vpow2.f32 %v868_v25  ;;  %v6786_v30 = vpop.eup %5303  ;;  %v6798_v25 = vld [vmem:[#allocation2 + $0x90] sm:$0xff] }
 0x1e4   : > { %9056 = vst [vmem:[#allocation31_spill] sm:$0xff] %v6770_v37  ;;  %9059 = vst [vmem:[#allocation34_spill] sm:$0xff] %v6798_v25  ;;  %v876_v17 = vmul.f32 1.442695, %v848_v24  ;;  %v847_v24 = vsub.f32 %v6705_v44, %v6724_v60  ;;  %v6876_v60 = vld [vmem:[#allocation2 + $0xd8] sm:$0xff] }
 0x1e5   : > { %1437 = vst.msk [vmem:[#allocation2 + $0x70] sm:$0xff] %vm8893_vm1, %v6743_v34  ;;  %1436 = vst.msk [vmem:[#allocation2 + $0x68] sm:$0xff] %vm8893_vm1, %v6746_v61  ;;  %956 = vperm.xlu0 %5284, %v6743_v34   ;;  %951 = vperm.xlu1 %5285, %v6746_v61   ;;  %5315 = vpow2.f32 %v862_v8  ;;  %v850_v58 = vsub.f32 %v6727_v3, %v6743_v34  ;;  %v6824_v8 = vld [vmem:[#allocation2 + $0xb8] sm:$0xff]  ;;  %v6850_v34 = vld [vmem:[#allocation2 + $0xc8] sm:$0xff] }
 0x1e6   : > { %v1605_v10 = vpop.xlane.xlu1 %1604  ;;  %v819_v47 = vpop.xlane.xlu0 %818  ;;  %5317 = vpow2.f32 %v872_v38  ;;  %9061 = vst [vmem:[#allocation36_spill] sm:$0xff] %v6824_v8  ;;  %v870_v38 = vmul.f32 1.442695, %v845_v5  ;;  %9064 = vst [vmem:[#allocation39_spill] sm:$0xff] %v6850_v34 }
 0x1e7   : > { %v6763_v57 = vmax.f32 %v6750_v43, %v1605_v10  ;;  %v6766_v27 = vmax.f32 %v6752_v41, %v819_v47  ;;  %v6794_v47 = vpop.eup %5305  ;;  %5319 = vpow2.f32 %v866_v48  ;;  %v880_v48 = vmul.f32 1.442695, %v850_v58  ;;  %9069 = vst [vmem:[#allocation44_spill] sm:$0xff] %v6876_v60 }
 0x1e8   : > { %5321 = vpow2.f32 %v876_v17  ;;  %v874_v58 = vmul.f32 1.442695, %v847_v24 }
 0x1e9   : > { %2215 = vst.msk [vmem:[#allocation2 + $0x80] sm:$0xff] %vm8893_vm1, %v6763_v57  ;;  %1438 = vst.msk [vmem:[#allocation2 + $0x78] sm:$0xff] %vm8893_vm1, %v6766_v27  ;;  %1148 = vperm.xlu0 %5284, %v6768_v9   ;;  %961 = vperm.xlu1 %5285, %v6766_v27   ;;  %5323 = vpow2.f32 %v870_v38  ;;  %v849_v38 = vsub.f32 %v6729_v42, %v6746_v61  ;;  %v6902_v42 = vld [vmem:[#allocation2 + $0xe8] sm:$0xff] }
 0x1ea   : > { %v1611_v31 = vpop.xlane.xlu1 %1610  ;;  %v1607_v55 = vpop.xlane.xlu0 %1606  ;;  %5325 = vpow2.f32 %v880_v48  ;;  %v851_v48 = vsub.f32 %v6752_v41, %v6766_v27  ;;  %9075 = vst [vmem:[#allocation50_spill] sm:$0xff] %v6902_v42  ;;  %v6928_v41 = vld [vmem:[#allocation2 + $0xe0] sm:$0xff] }
 0x1eb   : > { %v6789_v59 = vmax.f32 %v6770_v37, %v1611_v31  ;;  %v6792_v10 = vmax.f32 %v6772_v15, %v1607_v55  ;;  %v6814_v55 = vpop.eup %5307  ;;  %v6826_v15 = vld [vmem:[#allocation2 + $0xa0] sm:$0xff]  ;;  %5327 = vpow2.f32 %v874_v58  ;;  %v878_v61 = vmul.f32 1.442695, %v849_v38  ;;  %9082 = vst [vmem:[#allocation57_spill] sm:$0xff] %v6928_v41 }
 0x1ec   : > { %v6822_v43 = vpop.eup %5309  ;;  %9062 = vst [vmem:[#allocation37_spill] sm:$0xff] %v6826_v15  ;;  %v882_v27 = vmul.f32 1.442695, %v851_v48 }
 0x1ed   : > { %2218 = vst.msk [vmem:[#allocation2 + $0x98] sm:$0xff] %vm8893_vm1, %v6789_v59  ;;  %1163 = vperm.xlu0 %5284, %v6794_v47   ;;  %1143 = vperm.xlu1 %5285, %v6786_v30   ;;  %2216 = vst.msk [vmem:[#allocation2 + $0x88] sm:$0xff] %vm8893_vm1, %v6792_v10  ;;  %5329 = vpow2.f32 %v878_v61 }
 0x1ee   : > { %v1615_v26 = vpop.xlane.xlu1 %1614  ;;  %v1609_v31 = vpop.xlane.xlu0 %1608  ;;  %9060 = vst [vmem:[#allocation35_spill] sm:$0xff] %v6822_v43  ;;  %5331 = vpow2.f32 %v882_v27 }
 0x1ef   : > { %v6817_v14 = vmax.f32 %v6796_v35, %v1615_v26  ;;  %v6820_v37 = vmax.f32 %v6798_v25, %v1609_v31  ;;  %v6840_v31 = vpop.eup %5311  ;;  %v6852_v25 = vld [vmem:[#allocation2 + $0xb0] sm:$0xff] }
 0x1f0   : > { %9065 = vst [vmem:[#allocation40_spill] sm:$0xff] %v6852_v25 }
 0x1f1   : > { %2220 = vst.msk [vmem:[#allocation2 + $0xa8] sm:$0xff] %vm8893_vm1, %v6817_v14  ;;  %1173 = vperm.xlu0 %5284, %v6822_v43   ;;  %1153 = vperm.xlu1 %5285, %v6814_v55   ;;  %2217 = vst.msk [vmem:[#allocation2 + $0x90] sm:$0xff] %vm8893_vm1, %v6820_v37  ;;  %v6848_v43 = vpop.eup %5313 }
 0x1f2   : > { %v1619_v5 = vpop.xlane.xlu1 %1618  ;;  %v1613_v26 = vpop.xlane.xlu0 %1612  ;;  %9063 = vst [vmem:[#allocation38_spill] sm:$0xff] %v6848_v43 }
 0x1f3   : > { %v6843_v3 = vmax.f32 %v6824_v8, %v1619_v5  ;;  %v6846_v35 = vmax.f32 %v6826_v15, %v1613_v26  ;;  %v6864_v17 = vpop.eup %5315  ;;  %v6878_v15 = vld [vmem:[#allocation2 + $0xc0] sm:$0xff] }
 0x1f4   : > { %9066 = vst [vmem:[#allocation41_spill] sm:$0xff] %v6864_v17  ;;  %9070 = vst [vmem:[#allocation45_spill] sm:$0xff] %v6878_v15 }
 0x1f5   : > { %2222 = vst.msk [vmem:[#allocation2 + $0xb8] sm:$0xff] %vm8893_vm1, %v6843_v3  ;;  %1183 = vperm.xlu0 %5284, %v6848_v43   ;;  %1158 = vperm.xlu1 %5285, %v6840_v31   ;;  %2219 = vst.msk [vmem:[#allocation2 + $0xa0] sm:$0xff] %vm8893_vm1, %v6846_v35  ;;  %v6874_v43 = vpop.eup %5317 }
 0x1f6   : > { %v1623_v5 = vpop.xlane.xlu1 %1622  ;;  %v1617_v26 = vpop.xlane.xlu0 %1616  ;;  %9068 = vst [vmem:[#allocation43_spill] sm:$0xff] %v6874_v43 }
 0x1f7   : > { %v6869_v44 = vmax.f32 %v6850_v34, %v1623_v5  ;;  %v6872_v8 = vmax.f32 %v6852_v25, %v1617_v26  ;;  %v6892_v24 = vpop.eup %5319  ;;  %v6904_v25 = vld [vmem:[#allocation2 + $0xd0] sm:$0xff] }
 0x1f8   : > { %9071 = vst [vmem:[#allocation46_spill] sm:$0xff] %v6892_v24  ;;  %9076 = vst [vmem:[#allocation51_spill] sm:$0xff] %v6904_v25 }
 0x1f9   : > { %9067 = vst [vmem:[#allocation42_spill] sm:$0xff] %v6869_v44  ;;  %2224 = vst.msk [vmem:[#allocation2 + $0xc8] sm:$0xff] %vm8893_vm1, %v6869_v44  ;;  %1193 = vperm.xlu0 %5284, %v6874_v43   ;;  %1168 = vperm.xlu1 %5285, %v6864_v17   ;;  %v6900_v17 = vpop.eup %5321 }
 0x1fa   : > { %2221 = vst.msk [vmem:[#allocation2 + $0xb0] sm:$0xff] %vm8893_vm1, %v6872_v8  ;;  %v1627_v5 = vpop.xlane.xlu1 %1626  ;;  %v1621_v26 = vpop.xlane.xlu0 %1620  ;;  %9074 = vst [vmem:[#allocation49_spill] sm:$0xff] %v6900_v17 }
 0x1fb   : > { %v6895_v34 = vmax.f32 %v6876_v60, %v1627_v5  ;;  %v6898_v43 = vmax.f32 %v6878_v15, %v1621_v26  ;;  %v6916_v26 = vpop.eup %5323 }
 0x1fc   : > { %9077 = vst [vmem:[#allocation52_spill] sm:$0xff] %v6916_v26 }
 0x1fd   : > { %9072 = vst [vmem:[#allocation47_spill] sm:$0xff] %v6895_v34  ;;  %9073 = vst [vmem:[#allocation48_spill] sm:$0xff] %v6898_v43  ;;  %1203 = vperm.xlu0 %5284, %v6900_v17   ;;  %1178 = vperm.xlu1 %5285, %v6892_v24   ;;  %v6924_v17 = vpop.eup %5325  ;;  %v6926_v24 = vld [vmem:[#allocation2 + $0xf8] sm:$0xff] }
 0x1fe   : > { %2226 = vst.msk [vmem:[#allocation2 + $0xd8] sm:$0xff] %vm8893_vm1, %v6895_v34  ;;  %2223 = vst.msk [vmem:[#allocation2 + $0xc0] sm:$0xff] %vm8893_vm1, %v6898_v43  ;;  %v1631_v38 = vpop.xlane.xlu1 %1630  ;;  %v1625_v5 = vpop.xlane.xlu0 %1624 }
 0x1ff   : > { %v6919_v58 = vmax.f32 %v6902_v42, %v1631_v38  ;;  %v6922_v60 = vmax.f32 %v6904_v25, %v1625_v5  ;;  %9080 = vst [vmem:[#allocation55_spill] sm:$0xff] %v6924_v17  ;;  %9081 = vst [vmem:[#allocation56_spill] sm:$0xff] %v6926_v24  ;;  %v6946_v42 = vpop.eup %5327 }
 0x200   : > { %v6963_v48 = vpop.eup %5329 }
 0x201   : > { %9078 = vst [vmem:[#allocation53_spill] sm:$0xff] %v6919_v58  ;;  %9079 = vst [vmem:[#allocation54_spill] sm:$0xff] %v6922_v60  ;;  %1213 = vperm.xlu0 %5284, %v6924_v17   ;;  %1188 = vperm.xlu1 %5285, %v6916_v26   ;;  %v6948_v17 = vld [vmem:[#allocation2 + $0xf0] sm:$0xff]  ;;  %v6971_v27 = vpop.eup %5331 }
 0x202   : > { %2228 = vst.msk [vmem:[#allocation2 + $0xe8] sm:$0xff] %vm8893_vm1, %v6919_v58  ;;  %2225 = vst.msk [vmem:[#allocation2 + $0xd0] sm:$0xff] %vm8893_vm1, %v6922_v60  ;;  %v1635_v38 = vpop.xlane.xlu1 %1634  ;;  %v1629_v5 = vpop.xlane.xlu0 %1628 }
 0x203   : > { %v6941_v15 = vmax.f32 %v6926_v24, %v1635_v38  ;;  %v6944_v61 = vmax.f32 %v6928_v41, %v1629_v5  ;;  %9085 = vst [vmem:[#allocation60_spill] sm:$0xff] %v6948_v17 }
 0x205   : > { %9083 = vst [vmem:[#allocation58_spill] sm:$0xff] %v6941_v15  ;;  %9084 = vst [vmem:[#allocation59_spill] sm:$0xff] %v6944_v61  ;;  %1702 = vperm.xlu0 %5284, %v6763_v57   ;;  %1198 = vperm.xlu1 %5285, %v6946_v42  }
 0x206   : > { %2230 = vst.msk [vmem:[#allocation2 + $0xf8] sm:$0xff] %vm8893_vm1, %v6941_v15  ;;  %2227 = vst.msk [vmem:[#allocation2 + $0xe0] sm:$0xff] %vm8893_vm1, %v6944_v61  ;;  %v1633_v38 = vpop.xlane.xlu0 %1632 }
 0x207   : > { %v6961_v5 = vmax.f32 %v6948_v17, %v1633_v38 }
 0x209   : > { %9086 = vst [vmem:[#allocation61_spill] sm:$0xff] %v6961_v5  ;;  %1747 = vperm.xlu0 %5284, %v6869_v44   ;;  %1208 = vperm.xlu1 %5285, %v6963_v48   ;;  %2229 = vst.msk [vmem:[#allocation2 + $0xf0] sm:$0xff] %vm8893_vm1, %v6961_v5 }
 0x20a   : > { %vm9100_vm1 = vmmov %vm9096_vm2 }
 0x20d   : > { %1757 = vperm.xlu0 %5284, %v6895_v34   ;;  %1218 = vperm.xlu1 %5285, %v6971_v27  }
 0x211   : > { %1767 = vperm.xlu0 %5284, %v6919_v58   ;;  %1707 = vperm.xlu1 %5285, %v6792_v10  }
 0x215   : > { %1777 = vperm.xlu0 %5284, %v6941_v15   ;;  %1712 = vperm.xlu1 %5285, %v6820_v37  }
 0x219   : > { %1717 = vperm.xlu1 %5285, %v6789_v59  }
 0x21d   : > { %1722 = vperm.xlu1 %5285, %v6846_v35  }
 0x221   : > { %1727 = vperm.xlu1 %5285, %v6817_v14  }
 0x225   : > { %1732 = vperm.xlu1 %5285, %v6872_v8  }
 0x229   : > { %1737 = vperm.xlu1 %5285, %v6843_v3  }
 0x22d   : > { %1742 = vperm.xlu1 %5285, %v6898_v43  }
 0x231   : > { %1752 = vperm.xlu1 %5285, %v6922_v60  }
 0x235   : > { %1762 = vperm.xlu1 %5285, %v6944_v61  }
 0x239   : > { %1772 = vperm.xlu1 %5285, %v6961_v5  }
 0x248   : > { %v887_v38 = vpop.permute.xlu1 %886 }
 0x249   : > { %v964_v26 = vsub.f32 %v6360_v2, %v887_v38 }
 0x24b   : > { %v980_v17 = vmul.f32 1.442695, %v964_v26 }
 0x24c   : > { %v897_v15 = vpop.permute.xlu1 %896  ;;  %v892_v24 = vpop.permute.xlu0 %891 }
 0x24d   : > { %5333 = vpow2.f32 %v980_v17  ;;  %v966_v41 = vsub.f32 %v6385_v19, %v897_v15  ;;  %v965_v58 = vsub.f32 %v6381_v18, %v892_v24 }
 0x24f   : > { %v984_v25 = vmul.f32 1.442695, %v966_v41  ;;  %v982_v34 = vmul.f32 1.442695, %v965_v58 }
 0x250   : > { %v902_v43 = vpop.permute.xlu1 %901  ;;  %v907_v44 = vpop.permute.xlu0 %906 }
 0x251   : > { %5335 = vpow2.f32 %v984_v25  ;;  %v967_v61 = vsub.f32 %v6409_v46, %v902_v43  ;;  %v968_v5 = vsub.f32 %v6405_v45, %v907_v44 }
 0x252   : > { %5337 = vpow2.f32 %v982_v34 }
 0x253   : > { %v986_v60 = vmul.f32 1.442695, %v967_v61  ;;  %v988_v2 = vmul.f32 1.442695, %v968_v5 }
 0x254   : > { %v912_v26 = vpop.permute.xlu1 %911  ;;  %v917_v38 = vpop.permute.xlu0 %916 }
 0x255   : > { %5339 = vpow2.f32 %v986_v60  ;;  %v969_v17 = vsub.f32 %v6434_v63, %v912_v26  ;;  %v970_v19 = vsub.f32 %v6430_v62, %v917_v38 }
 0x256   : > { %5341 = vpow2.f32 %v988_v2 }
 0x257   : > { %v5334_v18 = vpop.eup %5333  ;;  %v990_v15 = vmul.f32 1.442695, %v969_v17  ;;  %v992_v24 = vmul.f32 1.442695, %v970_v19 }
 0x258   : > { %v922_v58 = vpop.permute.xlu1 %921  ;;  %v927_v25 = vpop.permute.xlu0 %926  ;;  %v1012_v46 = vsel %vm559_vm4, %v5334_v18, 0.0 }
 0x259   : > { %5343 = vpow2.f32 %v990_v15  ;;  %v971_v45 = vsub.f32 %v6456_v22, %v922_v58  ;;  %v972_v43 = vsub.f32 %v6452_v20, %v927_v25  ;;  %1060 = vadd.xlane.f32.xlu0 %v1012_v46  ;;  %v9087_v22 = vmov 0 }
 0x25a   : > { %5345 = vpow2.f32 %v992_v24  ;;  %v9088_v22 = vsel %vm7009_vm10, 4294967295, %v9087_v22 }
 0x25b   : > { %v5336_v34 = vpop.eup %5335  ;;  %v994_v63 = vmul.f32 1.442695, %v971_v45  ;;  %v996_v44 = vmul.f32 1.442695, %v972_v43  ;;  %9089 = vst [vmem:[#allocation62_spill] sm:$0xff] %v9088_v22 }
 0x25c   : > { %v5338_v62 = vpop.eup %5337  ;;  %v932_v60 = vpop.permute.xlu1 %931  ;;  %v1014_v61 = vsel %vm561_vm5, %v5336_v34, 0.0 }
 0x25d   : > { %v937_v41 = vpop.permute.xlu0 %936  ;;  %5347 = vpow2.f32 %v994_v63  ;;  %v973_v5 = vsub.f32 %v6478_v36, %v932_v60  ;;  %1064 = vadd.xlane.f32.xlu0 %v1014_v61  ;;  %v1013_v20 = vsel %vm8942_vm6, %v5338_v62, 0.0  ;;  %v4921_v26 = vpack.c.bf16 %v5338_v62, %v5334_v18 }
 0x25e   : > { %v974_v2 = vsub.f32 %v6474_v51, %v937_v41  ;;  %5349 = vpow2.f32 %v996_v44  ;;  %1062 = vadd.xlane.f32.xlu1 %v1013_v20  ;;  %v9090_v51 = vmov 0 }
 0x25f   : > { %v5340_v38 = vpop.eup %5339  ;;  %v998_v17 = vmul.f32 1.442695, %v973_v5  ;;  %v9091_v51 = vsel %vm7017_vm15, 4294967295, %v9090_v51  ;;  %5100 = vmatprep.mubr.msk.bf16.mxu0 %vm7009_vm10, %v4921_v26 }
 0x260   : > { %v1000_v36 = vmul.f32 1.442695, %v974_v2  ;;  %9092 = vst [vmem:[#allocation63_spill] sm:$0xff] %v9091_v51  ;;  %v5342_v19 = vpop.eup %5341  ;;  %v942_v15 = vpop.permute.xlu1 %941  ;;  %v1015_v18 = vsel %vm8919_vm11, %v5340_v38, 0.0  ;;  %v4924_v58 = vpack.c.bf16 %v5340_v38, %v5336_v34 }
 0x261   : > { %v947_v24 = vpop.permute.xlu0 %946  ;;  %5351 = vpow2.f32 %v998_v17  ;;  %v975_v25 = vsub.f32 %v6500_v11, %v942_v15  ;;  %1066 = vadd.xlane.f32.xlu0 %v1015_v18  ;;  %v1016_v45 = vsel %vm8896_vm9, %v5342_v19, 0.0  ;;  %v9093_v11 = vmov 0 }
 0x262   : > { %v976_v46 = vsub.f32 %v6496_v7, %v947_v24  ;;  %5353 = vpow2.f32 %v1000_v36  ;;  %1068 = vadd.xlane.f32.xlu1 %v1016_v45  ;;  %5101 = vmatmul.mubr.msk.bf16.vlgmr.msra.gmra.mrb[0].mxu0 %vm7017_vm15, %v4924_v58  ;;  %v9094_v11 = vsel %vm7035_vm0, 4294967295, %v9093_v11  ;;  %vm9108_vm9 = vcmp.gt.f32.partialorder %v6417_v54, 0.0 }
 0x263   : > { %v5344_v43 = vpop.eup %5343  ;;  %v1002_v63 = vmul.f32 1.442695, %v975_v25  ;;  %9095 = vst [vmem:[#allocation64_spill] sm:$0xff] %v9094_v11 }
 0x264   : > { %v1004_v44 = vmul.f32 1.442695, %v976_v46  ;;  %v5346_v7 = vpop.eup %5345  ;;  %v952_v34 = vpop.permute.xlu1 %951  ;;  %v1017_v60 = vsel %vm8894_vm13, %v5344_v43, 0.0  ;;  %v4927_v41 = vpack.c.bf16 %v5344_v43, %v5342_v19  ;;  %vm9101_vm13 = vcmp.gt.f32.partialorder %v6399_v40, 0.0 }
 0x265   : > { %v957_v62 = vpop.permute.xlu0 %956  ;;  %5355 = vpow2.f32 %v1002_v63  ;;  %v977_v61 = vsub.f32 %v6515_v39, %v952_v34  ;;  %1070 = vadd.xlane.f32.xlu0 %v1017_v60  ;;  %v1018_v2 = vsel %vm8895_vm14, %v5346_v7, 0.0  ;;  %v9097_v39 = vmov 0  ;;  %vm9102_vm2 = vmmov %vm9101_vm13 }
 0x266   : > { %v978_v5 = vsub.f32 %v6511_v29, %v957_v62  ;;  %5357 = vpow2.f32 %v1004_v44  ;;  %1072 = vadd.xlane.f32.xlu1 %v1018_v2  ;;  %5104 = vmatprep.mubr.msk.bf16.mxu0 %vm7035_vm0, %v4927_v41  ;;  %v9098_v39 = vsel %vm7051_vm7, 4294967295, %v9097_v39  ;;  %vm9103_vm14 = vcmp.gt.f32.partialorder %v6443_v6, 0.0 }
 0x267   : > { %v5348_v20 = vpop.eup %5347  ;;  %v1006_v26 = vmul.f32 1.442695, %v977_v61  ;;  %9099 = vst [vmem:[#allocation65_spill] sm:$0xff] %v9098_v39  ;;  %v9104_v46 = vmov 0  ;;  %v9110_v60 = vmov 0 }
 0x268   : > { %v1008_v38 = vmul.f32 1.442695, %v978_v5  ;;  %v5350_v29 = vpop.eup %5349  ;;  %v962_v17 = vpop.permute.xlu1 %961  ;;  %v1019_v19 = vsel %vm9100_vm1, %v5348_v20, 0.0  ;;  %v4930_v15 = vpack.c.bf16 %v5348_v20, %v5346_v7  ;;  %vm7068_vm1 = vmpackc.low %vm9103_vm14, %vm9102_vm2 }
 0x269   : > { %v7055_v36 = vpop.permute.xlu0 %1148  ;;  %5359 = vpow2.f32 %v1006_v26  ;;  %v979_v24 = vsub.f32 %v6529_v28, %v962_v17  ;;  %1074 = vadd.xlane.f32.xlu0 %v1019_v19  ;;  %v1020_v18 = vsel %vm9101_vm13, %v5350_v29, 0.0  ;;  %v9105_v46 = vsel %vm7068_vm1, 4294967295, %v9104_v46  ;;  %vm9107_vm13 = vmmov %vm9103_vm14 }
 0x26a   : > { %5361 = vpow2.f32 %v1008_v38  ;;  %1076 = vadd.xlane.f32.xlu1 %v1020_v18  ;;  %5105 = vmatmul.mubr.msk.bf16.gmra.mrb[4].mxu0 %vm7051_vm7, %v4930_v15  ;;  %9106 = vst [vmem:[#allocation66_spill] sm:$0xff] %v9105_v46  ;;  %v5781_v28 = vmov 2   ;;  %vm9109_vm14 = vmmov %vm9108_vm9  ;;  %v9126_v46 = vld [vmem:[#allocation15_spill] sm:$0xff] }
 0x26b   : > { %v5352_v58 = vpop.eup %5351  ;;  %v1010_v25 = vmul.f32 1.442695, %v979_v24  ;;  %5286 = vset.pattern.permute.xlu1 %v5781_v28  ;;  %5287 = vset.pattern.permute.xlu0 %v5781_v28  ;;  %vm7086_vm2 = vmpackc.low %vm8897_vm3, %vm9109_vm14  ;;  %v9120_v28 = vmov 0 }
 0x26c   : > { %v5354_v45 = vpop.eup %5353  ;;  %v7072_v43 = vpop.permute.xlu1 %1143  ;;  %v1021_v44 = vsel %vm9107_vm13, %v5352_v58, 0.0  ;;  %v4933_v7 = vpack.c.bf16 %v5352_v58, %v5350_v29  ;;  %v9111_v60 = vsel %vm7086_vm2, 4294967295, %v9110_v60  ;;  %v9115_v29 = vmov 0 }
 0x26d   : > { %v7074_v63 = vpop.permute.xlu0 %1163  ;;  %5363 = vpow2.f32 %v1010_v25  ;;  %1078 = vadd.xlane.f32.xlu0 %v1021_v44  ;;  %v1022_v34 = vsel %vm9108_vm9, %v5354_v45, 0.0  ;;  %9112 = vst [vmem:[#allocation67_spill] sm:$0xff] %v9111_v60  ;;  %vm9113_vm9 = vcmp.gt.f32.partialorder %v6447_v16, 0.0 }
 0x26e   : > { %1080 = vadd.xlane.f32.xlu1 %v1022_v34  ;;  %5108 = vmatprep.mubr.msk.bf16.mxu0 %vm7068_vm1, %v4933_v7  ;;  %vm9114_vm13 = vmmov %vm9113_vm9 }
 0x26f   : > { %v5356_v62 = vpop.eup %5355  ;;  %vm7104_vm14 = vmpackc.low %vm8941_vm8, %vm9114_vm13 }
 0x270   : > { %v5358_v41 = vpop.eup %5357  ;;  %v7090_v61 = vpop.permute.xlu1 %1153  ;;  %v1023_v2 = vsel %vm8897_vm3, %v5356_v62, 0.0  ;;  %v4936_v20 = vpack.c.bf16 %v5356_v62, %v5354_v45  ;;  %v9116_v29 = vsel %vm7104_vm14, 4294967295, %v9115_v29 }
 0x271   : > { %v7092_v5 = vpop.permute.xlu0 %1173  ;;  %1082 = vadd.xlane.f32.xlu0 %v1023_v2  ;;  %v1024_v26 = vsel %vm9113_vm9, %v5358_v41, 0.0  ;;  %9117 = vst [vmem:[#allocation68_spill] sm:$0xff] %v9116_v29  ;;  %vm9118_vm9 = vcmp.gt.f32.partialorder %v6468_v56, 0.0 }
 0x272   : > { %1084 = vadd.xlane.f32.xlu1 %v1024_v26  ;;  %5109 = vmatmul.mubr.msk.bf16.gmra.mrb[8].mxu0 %vm7086_vm2, %v4936_v20  ;;  %vm9119_vm13 = vmmov %vm9118_vm9 }
 0x273   : > { %v5360_v38 = vpop.eup %5359  ;;  %vm7122_vm3 = vmpackc.low %vm8940_vm12, %vm9119_vm13  ;;  %vm9138_vm13 = vcmp.gt.f32.partialorder %v6371_v13, 0.0 }
 0x274   : > { %v5362_v17 = vpop.eup %5361  ;;  %v7108_v19 = vpop.permute.xlu1 %1158  ;;  %v1025_v24 = vsel %vm8941_vm8, %v5360_v38, 0.0  ;;  %v4939_v18 = vpack.c.bf16 %v5360_v38, %v5358_v41  ;;  %v9121_v28 = vsel %vm7122_vm3, 4294967295, %v9120_v28 }
 0x275   : > { %v7110_v15 = vpop.permute.xlu0 %1183  ;;  %1086 = vadd.xlane.f32.xlu0 %v1025_v24  ;;  %v1026_v58 = vsel %vm9118_vm9, %v5362_v17, 0.0  ;;  %9122 = vst [vmem:[#allocation69_spill] sm:$0xff] %v9121_v28  ;;  %vm9135_vm9 = vcmp.gt.f32.partialorder %v6356_v1, 0.0 }
 0x276   : > { %1088 = vadd.xlane.f32.xlu1 %v1026_v58  ;;  %5112 = vmatprep.mubr.msk.bf16.mxu0 %vm7104_vm14, %v4939_v18 }
 0x277   : > { %v5364_v25 = vpop.eup %5363 }
 0x278   : > { %v7126_v45 = vpop.permute.xlu1 %1168  ;;  %v1027_v7 = vsel %vm8940_vm12, %v5364_v25, 0.0  ;;  %v4942_v34 = vpack.c.bf16 %v5364_v25, %v5362_v17 }
 0x279   : > { %v7128_v44 = vpop.permute.xlu0 %1193  ;;  %1090 = vadd.xlane.f32.xlu0 %v1027_v7 }
 0x27a   : > { %5113 = vmatmul.mubr.msk.bf16.gmra.mrb[12].mxu0 %vm7122_vm3, %v4942_v34 }
 0x27c   : > { %v7134_v62 = vpop.permute.xlu1 %1178 }
 0x27d   : > { %v7136_v41 = vpop.permute.xlu0 %1203 }
 0x27e   : > { %9123 = vst [vmem:[#allocation70_spill] sm:$0xff] %v7136_v41 }
 0x280   : > { %v7138_v2 = vpop.permute.xlu1 %1188 }
 0x281   : > { %v7140_v20 = vpop.permute.xlu0 %1213 }
 0x284   : > { %v7142_v26 = vpop.permute.xlu1 %1198 }
 0x285   : > { %v1703_v38 = vpop.permute.xlu0 %1702 }
 0x286   : > { %v1780_v24 = vsub.f32 %v6525_v4, %v1703_v38 }
 0x288   : > { %v1796_v18 = vmul.f32 1.442695, %v1780_v24  ;;  %v7145_v58 = vpop.permute.xlu1 %1208  ;;  %v9127_v24 = vld [vmem:[#allocation14_spill] sm:$0xff] }
 0x289   : > { %9124 = vst [vmem:[#allocation71_spill] sm:$0xff] %v7145_v58  ;;  %v9128_v58 = vld [vmem:[#allocation17_spill] sm:$0xff] }
 0x28a   : > { %5365 = vpow2.f32 %v1796_v18 }
 0x28c   : > { %v7147_v17 = vpop.permute.xlu1 %1218 }
 0x28d   : > { %9125 = vst [vmem:[#allocation72_spill] sm:$0xff] %v7147_v17 }
 0x290   : > { %v1708_v25 = vpop.permute.xlu1 %1707 }
 0x291   : > { %v1781_v7 = vsub.f32 %v6537_v32, %v1708_v25  ;;  %v1748_v25 = vpop.permute.xlu0 %1747 }
 0x293   : > { %v1798_v28 = vmul.f32 1.442695, %v1781_v7 }
 0x294   : > { %v5366_v34 = vpop.eup %5365  ;;  %v1713_v29 = vpop.permute.xlu1 %1712 }
 0x295   : > { %v1828_v60 = vsel %vm559_vm4, %v5366_v34, 0.0  ;;  %5367 = vpow2.f32 %v1798_v28  ;;  %v1782_v39 = vsub.f32 %v9126_v46, %v1713_v29  ;;  %v9129_v46 = vld [vmem:[#allocation16_spill] sm:$0xff]  ;;  %v1758_v29 = vpop.permute.xlu0 %1757 }
 0x296   : > { %1877 = vadd.xlane.f32.xlu1 %v1828_v60 }
 0x297   : > { %v1800_v4 = vmul.f32 1.442695, %v1782_v39 }
 0x298   : > { %v1718_v38 = vpop.permute.xlu1 %1717 }
 0x299   : > { %5369 = vpow2.f32 %v1800_v4  ;;  %v1783_v18 = vsub.f32 %v9127_v24, %v1718_v38  ;;  %v9131_v4 = vld [vmem:[#allocation19_spill] sm:$0xff] }
 0x29b   : > { %v1802_v11 = vmul.f32 1.442695, %v1783_v18 }
 0x29c   : > { %v1723_v51 = vpop.permute.xlu1 %1722 }
 0x29d   : > { %5371 = vpow2.f32 %v1802_v11  ;;  %v1784_v32 = vsub.f32 %v9128_v58, %v1723_v51 }
 0x29f   : > { %v5368_v7 = vpop.eup %5367  ;;  %v1804_v17 = vmul.f32 1.442695, %v1784_v32 }
 0x2a0   : > { %v1728_v41 = vpop.permute.xlu1 %1727  ;;  %v1829_v28 = vsel %vm8942_vm6, %v5368_v7, 0.0  ;;  %v4945_v49 = vpack.c.bf16 %v5368_v7, %v5366_v34  ;;  %v9133_v7 = vld [vmem:[#allocation18_spill] sm:$0xff] }
 0x2a1   : > { %5373 = vpow2.f32 %v1804_v17  ;;  %v1785_v39 = vsub.f32 %v9129_v46, %v1728_v41  ;;  %1879 = vadd.xlane.f32.xlu0 %v1829_v28  ;;  %v9132_v41 = vld [vmem:[#allocation20_spill] sm:$0xff]  ;;  %v1768_v46 = vpop.permute.xlu0 %1767 }
 0x2a2   : > { %5132 = vmatprep.mubr.msk.bf16.mxu1 %vm7009_vm10, %v4945_v49  ;;  %v1789_v34 = vsub.f32 %v9132_v41, %v1748_v25  ;;  %v9136_v41 = vld [vmem:[#allocation21_spill] sm:$0xff] }
 0x2a3   : > { %v7160_v60 = vpop.eup %5369  ;;  %v1806_v11 = vmul.f32 1.442695, %v1785_v39 }
 0x2a4   : > { %9130 = vst [vmem:[#allocation15_spill] sm:$0xff] %v7160_v60  ;;  %v1733_v51 = vpop.permute.xlu1 %1732  ;;  %v1830_v58 = vsel %vm561_vm5, %v7160_v60, 0.0 }
 0x2a5   : > { %5375 = vpow2.f32 %v1806_v11  ;;  %v1786_v38 = vsub.f32 %v9131_v4, %v1733_v51  ;;  %1881 = vadd.xlane.f32.xlu0 %v1830_v58  ;;  %v1814_v11 = vmul.f32 1.442695, %v1789_v34  ;;  %v9134_v51 = vld [vmem:[#allocation22_spill] sm:$0xff]  ;;  %v1778_v34 = vpop.permute.xlu0 %1777 }
 0x2a6   : > { %v1791_v58 = vsub.f32 %v9134_v51, %v1758_v29  ;;  %v9139_v51 = vld [vmem:[#allocation23_spill] sm:$0xff] }
 0x2a7   : > { %v7166_v17 = vpop.eup %5371  ;;  %v1808_v24 = vmul.f32 1.442695, %v1786_v38 }
 0x2a8   : > { %v1738_v18 = vpop.permute.xlu1 %1737  ;;  %v1831_v49 = vsel %vm8919_vm11, %v7166_v17, 0.0  ;;  %vm9147_vm11 = vcmp.gt.f32.partialorder %v6417_v54, 0.0 }
 0x2a9   : > { %5377 = vpow2.f32 %v1808_v24  ;;  %v1787_v28 = vsub.f32 %v9133_v7, %v1738_v18  ;;  %1883 = vadd.xlane.f32.xlu1 %v1831_v49  ;;  %v1818_v18 = vmul.f32 1.442695, %v1791_v58  ;;  %v9137_v49 = vld [vmem:[#allocation24_spill] sm:$0xff]  ;;  %v9140_v58 = vld [vmem:[#allocation26_spill] sm:$0xff] }
 0x2aa   : > { %v1793_v7 = vsub.f32 %v9137_v49, %v1768_v46  ;;  %v1795_v46 = vsub.f32 %v9140_v58, %v1778_v34  ;;  %v9142_v49 = vld [vmem:[#allocation25_spill] sm:$0xff] }
 0x2ab   : > { %v7175_v39 = vpop.eup %5373  ;;  %v1810_v25 = vmul.f32 1.442695, %v1787_v28  ;;  %v1028_v28 = vld [vmem:[#allocation3] sm:$0xff] }
 0x2ac   : > { %v1743_v4 = vpop.permute.xlu1 %1742  ;;  %v1832_v38 = vsel %vm9135_vm9, %v7175_v39, 0.0  ;;  %vm9141_vm9 = vcmp.gt.f32.partialorder %v6387_v21, 0.0  ;;  %v1044_v23 = vmul.f32 %v6786_v30, %v1028_v28  ;;  %v1031_v30 = vld [vmem:[#allocation3 + $0x18] sm:$0xff] }
 0x2ad   : > { %5379 = vpow2.f32 %v1810_v25  ;;  %v1788_v22 = vsub.f32 %v9136_v41, %v1743_v4  ;;  %1885 = vadd.xlane.f32.xlu0 %v1832_v38 }
 0x2ae   : > { %5381 = vpow2.f32 %v1814_v11  ;;  %v1822_v11 = vmul.f32 1.442695, %v1793_v7  ;;  %v5560_v7 = vld [vmem:[%s5885_s30 + $0x20] sm:$0xff]  }
 0x2af   : > { %v7182_v24 = vpop.eup %5375  ;;  %v1812_v32 = vmul.f32 1.442695, %v1788_v22 }
 0x2b0   : > { %v1753_v60 = vpop.permute.xlu1 %1752  ;;  %v1833_v29 = vsel %vm9138_vm13, %v7182_v24, 0.0  ;;  %vm9143_vm13 = vcmp.gt.f32.partialorder %v6415_v52, 0.0 }
 0x2b1   : > { %5383 = vpow2.f32 %v1812_v32  ;;  %v1790_v25 = vsub.f32 %v9139_v51, %v1753_v60  ;;  %1887 = vadd.xlane.f32.xlu1 %v1833_v29  ;;  %v1826_v60 = vmul.f32 1.442695, %v1795_v46 }
 0x2b2   : > { %5385 = vpow2.f32 %v1818_v18 }
 0x2b3   : > { %v7191_v4 = vpop.eup %5377  ;;  %v1816_v22 = vmul.f32 1.442695, %v1790_v25  ;;  %v9144_v25 = vld [vmem:[#allocation27_spill] sm:$0xff] }
 0x2b4   : > { %v1763_v38 = vpop.permute.xlu1 %1762  ;;  %v1834_v41 = vsel %vm9141_vm9, %v7191_v4, 0.0  ;;  %vm9145_vm9 = vcmp.gt.f32.partialorder %v6399_v40, 0.0 }
 0x2b5   : > { %5387 = vpow2.f32 %v1816_v22  ;;  %v1792_v13 = vsub.f32 %v9142_v49, %v1763_v38  ;;  %1889 = vadd.xlane.f32.xlu0 %v1834_v41 }
 0x2b6   : > { %5389 = vpow2.f32 %v1822_v11 }
 0x2b7   : > { %v7198_v32 = vpop.eup %5379  ;;  %v1820_v29 = vmul.f32 1.442695, %v1792_v13 }
 0x2b8   : > { %v1773_v51 = vpop.permute.xlu1 %1772  ;;  %v1835_v18 = vsel %vm9143_vm13, %v7198_v32, 0.0  ;;  %v7205_v34 = vpop.eup %5381  ;;  %vm9146_vm13 = vcmp.gt.f32.partialorder %v6443_v6, 0.0 }
 0x2b9   : > { %5391 = vpow2.f32 %v1820_v29  ;;  %v1794_v58 = vsub.f32 %v9144_v25, %v1773_v51  ;;  %1891 = vadd.xlane.f32.xlu1 %v1835_v18  ;;  %v1837_v46 = vsel %vm9146_vm13, %v7205_v34, 0.0  ;;  %vm9149_vm13 = vcmp.gt.f32.partialorder %v6447_v16, 0.0 }
 0x2ba   : > { %5393 = vpow2.f32 %v1826_v60 }
 0x2bb   : > { %v7208_v22 = vpop.eup %5383  ;;  %v1824_v11 = vmul.f32 1.442695, %v1794_v58 }
 0x2bc   : > { %v1836_v13 = vsel %vm9145_vm9, %v7208_v22, 0.0  ;;  %v7218_v41 = vpop.eup %5385  ;;  %vm9148_vm9 = vcmp.gt.f32.partialorder %v6463_v33, 0.0 }
 0x2bd   : > { %5395 = vpow2.f32 %v1824_v11  ;;  %1893 = vadd.xlane.f32.xlu0 %v1836_v13  ;;  %1895 = vadd.xlane.f32.xlu1 %v1837_v46  ;;  %v1839_v29 = vsel %vm9148_vm9, %v7218_v41, 0.0  ;;  %v5557_v13 = vld [vmem:[%s5885_s30] sm:$0xff]   ;;  %vm9153_vm9 = vcmask 7168  }
 0x2bf   : > { %v7220_v49 = vpop.eup %5387 }
 0x2c0   : > { %v1838_v60 = vsel %vm9147_vm11, %v7220_v49, 0.0  ;;  %v7230_v18 = vpop.eup %5389  ;;  %vm9151_vm11 = vcmp.gt.f32.partialorder %v6468_v56, 0.0  ;;  %v5561_v56 = vld [vmem:[%s5885_s30 + $0x18] sm:$0xff]  }
 0x2c1   : > { %1897 = vadd.xlane.f32.xlu0 %v1838_v60  ;;  %1899 = vadd.xlane.f32.xlu1 %v1839_v29  ;;  %v1841_v11 = vsel %vm8941_vm8, %v7230_v18, 0.0  ;;  %vm9238_vm8 = vmmov %vm9153_vm9 }
 0x2c3   : > { %v7232_v25 = vpop.eup %5391 }
 0x2c4   : > { %v1840_v58 = vsel %vm9149_vm13, %v7232_v25, 0.0  ;;  %v7242_v46 = vpop.eup %5393  ;;  %vm9155_vm13 = vmmov %vm9153_vm9 }
 0x2c5   : > { %1901 = vadd.xlane.f32.xlu0 %v1840_v58  ;;  %1903 = vadd.xlane.f32.xlu1 %v1841_v11  ;;  %v1843_v51 = vsel %vm8940_vm12, %v7242_v46, 0.0  ;;  %v5558_v58 = vld [vmem:[%s5885_s30 + $0x10] sm:$0xff]   ;;  %v5559_v11 = vld [vmem:[%s5885_s30 + $0x8] sm:$0xff]   ;;  %vm9236_vm12 = vmmov %vm9153_vm9 }
 0x2c7   : > { %v7244_v60 = vpop.eup %5395 }
 0x2c8   : > { %9150 = vst [vmem:[#allocation14_spill] sm:$0xff] %v7244_v60  ;;  %v1842_v29 = vsel %vm9151_vm11, %v7244_v60, 0.0  ;;  %v5562_v60 = vld [vmem:[%s5885_s30 + $0x28] sm:$0xff]   ;;  %vm9156_vm11 = vmmov %vm9153_vm9 }
 0x2c9   : > { %1905 = vadd.xlane.f32.xlu0 %v1842_v29  ;;  %1907 = vadd.xlane.f32.xlu1 %v1843_v51  ;;  %v1030_v51 = vld [vmem:[#allocation3 + $0x10] sm:$0xff] }
 0x2da   : > { %2062 = vrot.lane.b32.xlu1 %v5557_v13, %s5782_s14  ;;  %v1029_v13 = vld [vmem:[#allocation3 + $0x8] sm:$0xff] }
 0x2de   : > { %2066 = vrot.lane.b32.xlu1 %v5558_v58, %s5782_s14  ;;  %v1046_v58 = vmul.f32 %v6814_v55, %v1030_v51  ;;  %v7275_v55 = vld [vmem:[%s5895_s11 + $0x10] sm:$0xff] }
 0x2df   : > { %2064 = vrot.lane.b32.xlu0 %v5559_v11, %s5782_s14  ;;  %v7266_v11 = vld [vmem:[%s5895_s11] sm:$0xff]  ;;  %9157 = vst [vmem:[#allocation17_spill] sm:$0xff] %v7275_v55 }
 0x2e2   : > { %2070 = vrot.lane.b32.xlu1 %v5560_v7, %s5782_s14  ;;  %v1045_v7 = vmul.f32 %v6768_v9, %v1029_v13  ;;  %v1033_v13 = vld [vmem:[#allocation3 + $0x28] sm:$0xff] }
 0x2e3   : > { %2068 = vrot.lane.b32.xlu0 %v5561_v56, %s5782_s14 }
 0x2e6   : > { %2074 = vrot.lane.b32.xlu1 %v9152_v0, %s5782_s14  ;;  %v1061_v29 = vpop.xlane.xlu0 %1060 }
 0x2e7   : > { %v1092_v38 = vadd.f32 %v1061_v29, %v1044_v23  ;;  %2072 = vrot.lane.b32.xlu0 %v5562_v60, %s5782_s14  ;;  %v9154_v23 = vld [vmem:[#allocation29_spill] sm:$0xff]  ;;  %v1032_v60 = vld [vmem:[#allocation3 + $0x20] sm:$0xff] }
 0x2e8   : > { %v1048_v9 = vmul.f32 %v6794_v47, %v1032_v60  ;;  %v9161_v47 = vld [vmem:[#allocation35_spill] sm:$0xff]  ;;  %v7287_v60 = vld [vmem:[%s5895_s11 + $0x18] sm:$0xff] }
 0x2e9   : > { %1109 = vst.msk [vmem:[#allocation3] sm:$0xff] %vm9153_vm9, %v1092_v38  ;;  %v1047_v38 = vmul.f32 %v6840_v31, %v1031_v30  ;;  %v9159_v30 = vld [vmem:[#allocation41_spill] sm:$0xff]  ;;  %9162 = vst [vmem:[#allocation19_spill] sm:$0xff] %v7287_v60 }
 0x2ea   : > { %2232 = vperm.xlu1 %5286, %v7266_v11   ;;  %v1065_v56 = vpop.xlane.xlu0 %1064 }
 0x2eb   : > { %v1063_v0 = vpop.xlane.xlu1 %1062  ;;  %v1094_v28 = vadd.f32 %v1065_v56, %v1046_v58  ;;  %2076 = vrot.lane.b32.xlu0 %v9154_v23, %s5782_s14  ;;  %v7279_v23 = vld [vmem:[%s5895_s11 + $0x8] sm:$0xff] }
 0x2ec   : > { %v1093_v29 = vadd.f32 %v1063_v0, %v1045_v7  ;;  %9158 = vst [vmem:[#allocation16_spill] sm:$0xff] %v7279_v23  ;;  %v1034_v7 = vld [vmem:[#allocation3 + $0x30] sm:$0xff]  ;;  %v1049_v0 = vmul.f32 %v9159_v30, %v1033_v13  ;;  %v7299_v30 = vld [vmem:[%s5895_s11 + $0x28] sm:$0xff] }
 0x2ed   : > { %1111 = vst.msk [vmem:[#allocation3 + $0x10] sm:$0xff] %vm9155_vm13, %v1094_v28  ;;  %vm9160_vm13 = vmmov %vm9153_vm9  ;;  %v1050_v28 = vmul.f32 %v9161_v47, %v1034_v7  ;;  %v9166_v7 = vld [vmem:[#allocation38_spill] sm:$0xff]  ;;  %v1037_v47 = vld [vmem:[#allocation3 + $0x48] sm:$0xff] }
 0x2ee   : > { %1110 = vst.msk [vmem:[#allocation3 + $0x8] sm:$0xff] %vm9156_vm11, %v1093_v29  ;;  %2240 = vperm.xlu1 %5286, %v7275_v55   ;;  %v1067_v51 = vpop.xlane.xlu0 %1066  ;;  %vm9164_vm11 = vmmov %vm9153_vm9 }
 0x2ef   : > { %v1069_v58 = vpop.xlane.xlu1 %1068  ;;  %v1095_v56 = vadd.f32 %v1067_v51, %v1047_v38  ;;  %2236 = vperm.xlu0 %5287, %v7279_v23   ;;  %v1035_v38 = vld [vmem:[#allocation3 + $0x38] sm:$0xff]  ;;  %v7291_v23 = vld [vmem:[%s5895_s11 + $0x20] sm:$0xff]  ;;  %9167 = vst [vmem:[#allocation18_spill] sm:$0xff] %v7299_v30 }
 0x2f0   : > { %v1096_v31 = vadd.f32 %v1069_v58, %v1048_v9  ;;  %9163 = vst [vmem:[#allocation20_spill] sm:$0xff] %v7291_v23  ;;  %v1036_v9 = vld [vmem:[#allocation3 + $0x40] sm:$0xff] }
 0x2f1   : > { %1112 = vst.msk [vmem:[#allocation3 + $0x18] sm:$0xff] %vm9153_vm9, %v1095_v56  ;;  %v9165_v58 = vld [vmem:[#allocation46_spill] sm:$0xff] }
 0x2f2   : > { %1113 = vst.msk [vmem:[#allocation3 + $0x20] sm:$0xff] %vm9160_vm13, %v1096_v31  ;;  %2244 = vperm.xlu1 %5286, %v7287_v60   ;;  %v1071_v29 = vpop.xlane.xlu0 %1070  ;;  %v1051_v56 = vmul.f32 %v9165_v58, %v1035_v38  ;;  %v1052_v31 = vmul.f32 %v9166_v7, %v1036_v9  ;;  %v7303_v60 = vld [vmem:[%s5895_s11 + $0x30] sm:$0xff]  ;;  %vm9169_vm13 = vmmov %vm9153_vm9  ;;  %v9172_v9 = vld [vmem:[#allocation43_spill] sm:$0xff] }
 0x2f3   : > { %v1073_v51 = vpop.xlane.xlu1 %1072  ;;  %v1097_v55 = vadd.f32 %v1071_v29, %v1049_v0  ;;  %2248 = vperm.xlu0 %5287, %v7291_v23   ;;  %9168 = vst [vmem:[#allocation22_spill] sm:$0xff] %v7303_v60  ;;  %v9170_v38 = vld [vmem:[#allocation52_spill] sm:$0xff]  ;;  %v7311_v58 = vld [vmem:[%s5895_s11 + $0x38] sm:$0xff] }
 0x2f4   : > { %v1098_v13 = vadd.f32 %v1073_v51, %v1050_v28  ;;  %v1053_v51 = vmul.f32 %v9170_v38, %v1037_v47  ;;  %v1039_v7 = vld [vmem:[#allocation3 + $0x58] sm:$0xff] }
 0x2f5   : > { %1114 = vst.msk [vmem:[#allocation3 + $0x28] sm:$0xff] %vm9164_vm11, %v1097_v55  ;;  %v1038_v55 = vld [vmem:[#allocation3 + $0x50] sm:$0xff]  ;;  %vm9171_vm11 = vmmov %vm9153_vm9  ;;  %v1055_v47 = vmul.f32 %v6946_v42, %v1039_v7  ;;  %v9177_v7 = vld [vmem:[#allocation55_spill] sm:$0xff] }
 0x2f6   : > { %1115 = vst.msk [vmem:[#allocation3 + $0x30] sm:$0xff] %vm9153_vm9, %v1098_v13  ;;  %2252 = vperm.xlu1 %5286, %v7299_v30   ;;  %v1075_v0 = vpop.xlane.xlu0 %1074  ;;  %v1054_v13 = vmul.f32 %v9172_v9, %v1038_v55  ;;  %v5571_v30 = vld [vmem:[%s5895_s11 + $0x40] sm:$0xff]  ;;  %v1041_v9 = vld [vmem:[#allocation3 + $0x68] sm:$0xff] }
 0x2f7   : > { %v1077_v29 = vpop.xlane.xlu1 %1076  ;;  %v1099_v23 = vadd.f32 %v1075_v0, %v1051_v56  ;;  %2256 = vperm.xlu0 %5287, %v7303_v60  }
 0x2f8   : > { %v1100_v28 = vadd.f32 %v1077_v29, %v1052_v31  ;;  %v1040_v31 = vld [vmem:[#allocation3 + $0x60] sm:$0xff]  ;;  %v9174_v29 = vld [vmem:[#allocation49_spill] sm:$0xff] }
 0x2f9   : > { %1116 = vst.msk [vmem:[#allocation3 + $0x38] sm:$0xff] %vm9169_vm13, %v1099_v23  ;;  %vm9173_vm13 = vmmov %vm9153_vm9  ;;  %v1056_v55 = vmul.f32 %v9174_v29, %v1040_v31  ;;  %v7332_v31 = vld [vmem:[%s5895_s11 + $0x58] sm:$0xff] }
 0x2fa   : > { %1117 = vst.msk [vmem:[#allocation3 + $0x40] sm:$0xff] %vm9171_vm11, %v1100_v28  ;;  %2260 = vperm.xlu1 %5286, %v7311_v58   ;;  %v1079_v56 = vpop.xlane.xlu0 %1078  ;;  %v7320_v28 = vld [vmem:[%s5895_s11 + $0x48] sm:$0xff]  ;;  %vm9176_vm11 = vmmov %vm9153_vm9 }
 0x2fb   : > { %v1081_v0 = vpop.xlane.xlu1 %1080  ;;  %v1101_v60 = vadd.f32 %v1079_v56, %v1053_v51  ;;  %2264 = vperm.xlu0 %5287, %v5571_v30   ;;  %v7324_v56 = vld [vmem:[%s5895_s11 + $0x50] sm:$0xff]  ;;  %9178 = vst [vmem:[#allocation24_spill] sm:$0xff] %v7332_v31 }
 0x2fc   : > { %v1102_v23 = vadd.f32 %v1081_v0, %v1054_v13  ;;  %9175 = vst [vmem:[#allocation21_spill] sm:$0xff] %v7324_v56  ;;  %v1057_v13 = vmul.f32 %v6963_v48, %v1041_v9  ;;  %v5576_v9 = vld [vmem:[%s5895_s11 + $0x68] sm:$0xff] }
 0x2fd   : > { %1118 = vst.msk [vmem:[#allocation3 + $0x48] sm:$0xff] %vm9153_vm9, %v1101_v60  ;;  %v1042_v60 = vld [vmem:[#allocation3 + $0x70] sm:$0xff] }
 0x2fe   : > { %1119 = vst.msk [vmem:[#allocation3 + $0x50] sm:$0xff] %vm9173_vm13, %v1102_v23  ;;  %2268 = vperm.xlu1 %5286, %v7320_v28   ;;  %v1083_v38 = vpop.xlane.xlu0 %1082  ;;  %v1058_v0 = vmul.f32 %v9177_v7, %v1042_v60  ;;  %vm9180_vm13 = vmmov %vm9153_vm9  ;;  %v9183_v7 = vmov 0  }
 0x2ff   : > { %v1085_v51 = vpop.xlane.xlu1 %1084  ;;  %v1103_v30 = vadd.f32 %v1083_v38, %v1055_v47  ;;  %2272 = vperm.xlu0 %5287, %v7324_v56   ;;  %v1043_v47 = vld [vmem:[#allocation3 + $0x78] sm:$0xff] }
 0x300   : > { %v1104_v42 = vadd.f32 %v1085_v51, %v1056_v55  ;;  %v7336_v55 = vld [vmem:[%s5895_s11 + $0x60] sm:$0xff]  ;;  %v1059_v48 = vmul.f32 %v6971_v27, %v1043_v47  ;;  %v9186_v47 = vld [vmem:[#allocation32_spill] sm:$0xff] }
 0x301   : > { %1120 = vst.msk [vmem:[#allocation3 + $0x58] sm:$0xff] %vm9176_vm11, %v1103_v30  ;;  %9179 = vst [vmem:[#allocation23_spill] sm:$0xff] %v7336_v55 }
 0x302   : > { %1121 = vst.msk [vmem:[#allocation3 + $0x60] sm:$0xff] %vm9153_vm9, %v1104_v42  ;;  %2276 = vperm.xlu1 %5286, %v7332_v31   ;;  %v1087_v23 = vpop.xlane.xlu0 %1086  ;;  %vm9181_vm11 = vmmov %vm9153_vm9  ;;  %v7344_v42 = vld [vmem:[%s5895_s11 + $0x70] sm:$0xff]  ;;  %v9207_v31 = vld [vmem:[#allocation45_spill] sm:$0xff] }
 0x303   : > { %v1089_v29 = vpop.xlane.xlu1 %1088  ;;  %v1105_v38 = vadd.f32 %v1087_v23, %v1057_v13  ;;  %2280 = vperm.xlu0 %5287, %v7336_v55   ;;  %9182 = vst [vmem:[#allocation26_spill] sm:$0xff] %v7344_v42  ;;  %v5578_v13 = vld [vmem:[%s5895_s11 + $0x78] sm:$0xff]  ;;  %v8935_v55 = vmov 3  }
 0x304   : > { %v1106_v51 = vadd.f32 %v1089_v29, %v1058_v0  ;;  %v9184_v0 = vld [vmem:[#allocation30_spill] sm:$0xff]  ;;  %v9187_v29 = vsub.f32 %v9186_v47, %v6792_v10 }
 0x305   : > { %1122 = vst.msk [vmem:[#allocation3 + $0x68] sm:$0xff] %vm9180_vm13, %v1105_v38  ;;  %v9185_v23 = vsub.f32 %v9184_v0, %v6763_v57  ;;  %v9191_v57 = vld [vmem:[#allocation31_spill] sm:$0xff]  ;;  %vm9193_vm13 = vmmov %vm9153_vm9 }
 0x306   : > { %1123 = vst.msk [vmem:[#allocation3 + $0x70] sm:$0xff] %vm9181_vm11, %v1106_v51  ;;  %2284 = vperm.xlu1 %5286, %v5576_v9   ;;  %v1091_v30 = vpop.xlane.xlu0 %1090  ;;  %v1670_v38 = vmul.f32 1.442695, %v9187_v29  ;;  %v9189_v9 = vld [vmem:[#allocation34_spill] sm:$0xff]  ;;  %v9192_v0 = vsub.f32 %v9191_v57, %v6789_v59  ;;  %v1846_v29 = vld [vmem:[#allocation3 + $0x88] sm:$0xff]  ;;  %vm9200_vm11 = vmmov %vm9153_vm9 }
 0x307   : > { %v1107_v60 = vadd.f32 %v1091_v30, %v1059_v48  ;;  %2288 = vperm.xlu0 %5287, %v7344_v42   ;;  %v1668_v27 = vmul.f32 1.442695, %v9185_v23  ;;  %v1845_v48 = vld [vmem:[#allocation3 + $0x80] sm:$0xff]  ;;  %v9190_v30 = vsub.f32 %v9189_v9, %v6820_v37  ;;  %v9194_v23 = vld [vmem:[#allocation37_spill] sm:$0xff] }
 0x308   : > { %v1674_v10 = vmul.f32 1.442695, %v9192_v0  ;;  %v1127_v0 = vld [vmem:[#allocation4 + $0x10] sm:$0xff] }
 0x309   : > { %1124 = vst.msk [vmem:[#allocation3 + $0x78] sm:$0xff] %vm9153_vm9, %v1107_v60  ;;  %5397 = vpow2.f32 %v1668_v27  ;;  %v1672_v60 = vmul.f32 1.442695, %v9190_v30  ;;  %v9195_v27 = vsub.f32 %v9194_v23, %v6846_v35  ;;  %v1125_v23 = vld [vmem:[#allocation4] sm:$0xff] }
 0x30a   : > { %2292 = vperm.xlu1 %5286, %v5578_v13   ;;  %5399 = vpow2.f32 %v1670_v38  ;;  %v9196_v38 = vld [vmem:[#allocation33_spill] sm:$0xff] }
 0x30b   : > { %5289 = vset.pattern.permute.xlu0 %v8935_v55  ;;  %5401 = vpow2.f32 %v1672_v60  ;;  %v1676_v37 = vmul.f32 1.442695, %v9195_v27  ;;  %v1847_v60 = vld [vmem:[#allocation3 + $0x90] sm:$0xff] }
 0x30c   : > { %5403 = vpow2.f32 %v1674_v10 }
 0x30d   : > { %5405 = vpow2.f32 %v1676_v37  ;;  %v1848_v37 = vld [vmem:[#allocation3 + $0x98] sm:$0xff] }
 0x30e   : > { %5288 = vset.pattern.permute.xlu1 %v9183_v7 }
 0x313   : > { %v7356_v51 = vpop.eup %5397 }
 0x314   : > { %9188 = vst [vmem:[#allocation25_spill] sm:$0xff] %v7356_v51  ;;  %v1861_v13 = vmul.f32 %v7356_v51, %v1845_v48  ;;  %v7370_v47 = vpop.eup %5399 }
 0x315   : > { %v1862_v9 = vmul.f32 %v7370_v47, %v1846_v29  ;;  %v7376_v59 = vpop.eup %5401  ;;  %v1128_v29 = vld [vmem:[#allocation4 + $0x18] sm:$0xff] }
 0x316   : > { %v1863_v10 = vmul.f32 %v7376_v59, %v1847_v60 }
 0x323   : > { %v1878_v7 = vpop.xlane.xlu1 %1877 }
 0x324   : > { %v1909_v42 = vadd.f32 %v1878_v7, %v1861_v13  ;;  %v9197_v7 = vsub.f32 %v9196_v38, %v6817_v14  ;;  %v9198_v13 = vld [vmem:[#allocation40_spill] sm:$0xff]  ;;  %v7383_v14 = vpop.eup %5403 }
 0x325   : > { %v9199_v35 = vsub.f32 %v9198_v13, %v6872_v8  ;;  %9201 = vst [vmem:[#allocation27_spill] sm:$0xff] %v7383_v14  ;;  %v1223_v8 = vmul.f32 %v7090_v61, %v1127_v0  ;;  %v1221_v13 = vmul.f32 %v7072_v43, %v1125_v23 }
 0x326   : > { %1925 = vst.msk [vmem:[#allocation3 + $0x80] sm:$0xff] %vm9193_vm13, %v1909_v42  ;;  %v1678_v48 = vmul.f32 1.442695, %v9197_v7  ;;  %v9202_v7 = vld [vmem:[#allocation36_spill] sm:$0xff]  ;;  %vm8943_vm13 = vcmask 130048  }
 0x327   : > { %v1680_v57 = vmul.f32 1.442695, %v9199_v35  ;;  %v7392_v35 = vpop.eup %5405 }
 0x328   : > { %5407 = vpow2.f32 %v1678_v48 }
 0x329   : > { %5409 = vpow2.f32 %v1680_v57  ;;  %v9204_v57 = vld [vmem:[#allocation39_spill] sm:$0xff] }
 0x32e   : > { %v1880_v30 = vpop.xlane.xlu0 %1879 }
 0x32f   : > { %v1910_v42 = vadd.f32 %v1880_v30, %v1862_v9  ;;  %v9203_v9 = vsub.f32 %v9202_v7, %v6843_v3  ;;  %v1126_v30 = vld [vmem:[#allocation4 + $0x8] sm:$0xff]  ;;  %v1849_v7 = vld [vmem:[#allocation3 + $0xa0] sm:$0xff] }
 0x330   : > { %v1222_v43 = vmul.f32 %v7055_v36, %v1126_v30  ;;  %v1865_v36 = vmul.f32 %v7392_v35, %v1849_v7  ;;  %v1129_v30 = vld [vmem:[#allocation4 + $0x20] sm:$0xff]  ;;  %v1130_v7 = vld [vmem:[#allocation4 + $0x28] sm:$0xff] }
 0x331   : > { %1926 = vst.msk [vmem:[#allocation3 + $0x88] sm:$0xff] %vm9200_vm11, %v1910_v42  ;;  %v1682_v48 = vmul.f32 1.442695, %v9203_v9  ;;  %v1864_v42 = vmul.f32 %v7383_v14, %v1848_v37  ;;  %v9205_v9 = vld [vmem:[#allocation42_spill] sm:$0xff]  ;;  %v9208_v37 = vld [vmem:[#allocation48_spill] sm:$0xff]  ;;  %vm9210_vm11 = vmmov %vm9153_vm9 }
 0x332   : > { %v1882_v27 = vpop.xlane.xlu0 %1881  ;;  %v9206_v51 = vsub.f32 %v9204_v57, %v9205_v9  ;;  %v9209_v14 = vsub.f32 %v9207_v31, %v9208_v37  ;;  %v1850_v31 = vld [vmem:[#allocation3 + $0xa8] sm:$0xff]  ;;  %v9215_v9 = vld [vmem:[#allocation54_spill] sm:$0xff] }
 0x333   : > { %v1911_v38 = vadd.f32 %v1882_v27, %v1863_v10  ;;  %v1224_v10 = vmul.f32 %v7108_v19, %v1128_v29  ;;  %5411 = vpow2.f32 %v1682_v48  ;;  %v9214_v57 = vld [vmem:[#allocation51_spill] sm:$0xff] }
 0x334   : > { %v1686_v61 = vmul.f32 1.442695, %v9206_v51  ;;  %v1684_v56 = vmul.f32 1.442695, %v9209_v14  ;;  %v1132_v14 = vld [vmem:[#allocation4 + $0x38] sm:$0xff] }
 0x335   : > { %1927 = vst.msk [vmem:[#allocation3 + $0x90] sm:$0xff] %vm9153_vm9, %v1911_v38  ;;  %v5102_v60 = vpop.f32.mrb[0].mxu0 }
 0x336   : > { %v1392_v27 = vadd.f32 %v5102_v60, %v1223_v8  ;;  %v1327_v55 = vpop.f32.mrb[1].mxu0  ;;  %v1884_v3 = vpop.xlane.xlu1 %1883  ;;  %v1131_v8 = vld [vmem:[#allocation4 + $0x30] sm:$0xff]  ;;  %5413 = vpow2.f32 %v1686_v61 }
 0x337   : > { %v1390_v0 = vadd.f32 %v1327_v55, %v1221_v13  ;;  %v1912_v23 = vadd.f32 %v1884_v3, %v1864_v42  ;;  %v5103_v38 = vpop.f32.mrb[2].mxu0  ;;  %v7406_v55 = vpop.eup %5407  ;;  %v9211_v60 = vld [vmem:[#allocation44_spill] sm:$0xff]  ;;  %v9212_v42 = vld [vmem:[#allocation47_spill] sm:$0xff]  ;;  %5415 = vpow2.f32 %v1684_v56  ;;  %v1227_v3 = vmul.f32 %v7092_v5, %v1131_v8 }
 0x338   : > { %1409 = vst.msk [vmem:[#allocation4 + $0x10] sm:$0xff] %vm8943_vm13, %v1392_v27  ;;  %v1393_v19 = vadd.f32 %v5103_v38, %v1224_v10  ;;  %v1330_v29 = vpop.f32.mrb[3].mxu0  ;;  %v9213_v10 = vsub.f32 %v9211_v60, %v9212_v42  ;;  %v1866_v38 = vmul.f32 %v7406_v55, %v1850_v31  ;;  %v7420_v37 = vpop.eup %5409  ;;  %v1851_v5 = vld [vmem:[#allocation3 + $0xb0] sm:$0xff]  ;;  %v1226_v8 = vmul.f32 %v7126_v45, %v1130_v7 }
 0x339   : > { %1407 = vst.msk [vmem:[#allocation4] sm:$0xff] %vm8943_vm13, %v1390_v0  ;;  %v1391_v51 = vadd.f32 %v1330_v29, %v1222_v43  ;;  %v9216_v43 = vsub.f32 %v9214_v57, %v9215_v9  ;;  %v1135_v9 = vld [vmem:[#allocation4 + $0x50] sm:$0xff] }
 0x33a   : > { %1928 = vst.msk [vmem:[#allocation3 + $0x98] sm:$0xff] %vm9210_vm11, %v1912_v23  ;;  %v1886_v48 = vpop.xlane.xlu0 %1885  ;;  %v1690_v27 = vmul.f32 1.442695, %v9213_v10  ;;  %v1225_v23 = vmul.f32 %v7074_v63, %v1129_v30  ;;  %v9217_v63 = vld [vmem:[#allocation50_spill] sm:$0xff]  ;;  %v9218_v30 = vld [vmem:[#allocation53_spill] sm:$0xff]  ;;  %vm9223_vm11 = vmmov %vm9153_vm9 }
 0x33b   : > { %1410 = vst.msk [vmem:[#allocation4 + $0x18] sm:$0xff] %vm8943_vm13, %v1393_v19  ;;  %1408 = vst.msk [vmem:[#allocation4 + $0x8] sm:$0xff] %vm8943_vm13, %v1391_v51  ;;  %v1913_v13 = vadd.f32 %v1886_v48, %v1865_v36  ;;  %v1688_v0 = vmul.f32 1.442695, %v9216_v43  ;;  %v1228_v19 = vmul.f32 %v7134_v62, %v1132_v14  ;;  %v9220_v62 = vld [vmem:[#allocation57_spill] sm:$0xff]  ;;  %v9221_v14 = vld [vmem:[#allocation59_spill] sm:$0xff] }
 0x33c   : > { %5417 = vpow2.f32 %v1690_v27  ;;  %v1867_v27 = vmul.f32 %v7420_v37, %v1851_v5  ;;  %v1133_v43 = vld [vmem:[#allocation4 + $0x40] sm:$0xff] }
 0x33d   : > { %1929 = vst.msk [vmem:[#allocation3 + $0xa0] sm:$0xff] %vm9153_vm9, %v1913_v13  ;;  %v5106_v61 = vpop.f32.mrb[4].mxu0  ;;  %v9219_v13 = vsub.f32 %v9217_v63, %v9218_v30  ;;  %5419 = vpow2.f32 %v1688_v0  ;;  %v7434_v7 = vpop.eup %5411  ;;  %v1136_v0 = vld [vmem:[#allocation4 + $0x58] sm:$0xff] }
 0x33e   : > { %v1396_v29 = vadd.f32 %v5106_v61, %v1227_v3  ;;  %v1343_v56 = vpop.f32.mrb[5].mxu0  ;;  %v1888_v51 = vpop.xlane.xlu1 %1887  ;;  %v9222_v3 = vsub.f32 %v9220_v62, %v9221_v14  ;;  %v1852_v61 = vld [vmem:[#allocation3 + $0xb8] sm:$0xff]  ;;  %v1232_v62 = vmul.f32 %v7142_v26, %v1136_v0 }
 0x33f   : > { %v1394_v36 = vadd.f32 %v1343_v56, %v1225_v23  ;;  %v1914_v48 = vadd.f32 %v1888_v51, %v1866_v38  ;;  %v5107_v60 = vpop.f32.mrb[6].mxu0  ;;  %v1694_v42 = vmul.f32 1.442695, %v9219_v13  ;;  %v1229_v13 = vmul.f32 %v7110_v15, %v1133_v43 }
 0x340   : > { %1413 = vst.msk [vmem:[#allocation4 + $0x30] sm:$0xff] %vm8943_vm13, %v1396_v29  ;;  %v1397_v31 = vadd.f32 %v5107_v60, %v1228_v19  ;;  %v1346_v10 = vpop.f32.mrb[7].mxu0  ;;  %v1692_v57 = vmul.f32 1.442695, %v9222_v3  ;;  %v9224_v19 = vld [vmem:[#allocation56_spill] sm:$0xff]  ;;  %v9225_v29 = vld [vmem:[#allocation58_spill] sm:$0xff]  ;;  %v7442_v5 = vpop.eup %5413 }
 0x341   : > { %1411 = vst.msk [vmem:[#allocation4 + $0x20] sm:$0xff] %vm8943_vm13, %v1394_v36  ;;  %v1395_v45 = vadd.f32 %v1346_v10, %v1226_v8  ;;  %5421 = vpow2.f32 %v1694_v42  ;;  %v9226_v56 = vsub.f32 %v9224_v19, %v9225_v29  ;;  %v1231_v8 = vmul.f32 %v7128_v44, %v1135_v9  ;;  %v1134_v36 = vld [vmem:[#allocation4 + $0x48] sm:$0xff]  ;;  %v9228_v60 = vld [vmem:[#allocation61_spill] sm:$0xff]  ;;  %v7450_v10 = vpop.eup %5415  ;;  %v1137_v29 = vld [vmem:[#allocation4 + $0x60] sm:$0xff] }
 0x342   : > { %1930 = vst.msk [vmem:[#allocation3 + $0xa8] sm:$0xff] %vm9223_vm11, %v1914_v48  ;;  %v1890_v23 = vpop.xlane.xlu0 %1889  ;;  %5423 = vpow2.f32 %v1692_v57  ;;  %v9227_v48 = vld [vmem:[#allocation60_spill] sm:$0xff]  ;;  %v1868_v42 = vmul.f32 %v7434_v7, %v1852_v61  ;;  %v1854_v9 = vld [vmem:[#allocation3 + $0xc8] sm:$0xff]  ;;  %v1853_v57 = vld [vmem:[#allocation3 + $0xc0] sm:$0xff] }
 0x343   : > { %1414 = vst.msk [vmem:[#allocation4 + $0x38] sm:$0xff] %vm8943_vm13, %v1397_v31  ;;  %1412 = vst.msk [vmem:[#allocation4 + $0x28] sm:$0xff] %vm8943_vm13, %v1395_v45  ;;  %v1915_v38 = vadd.f32 %v1890_v23, %v1867_v27  ;;  %v1698_v51 = vmul.f32 1.442695, %v9226_v56  ;;  %v9229_v63 = vsub.f32 %v9227_v48, %v9228_v60  ;;  %v1230_v45 = vmul.f32 %v7138_v2, %v1134_v36  ;;  %v1139_v61 = vld [vmem:[#allocation4 + $0x70] sm:$0xff]  ;;  %v1140_v48 = vld [vmem:[#allocation4 + $0x78] sm:$0xff] }
 0x344   : > { %vm9230_vm11 = vmmov %vm9153_vm9  ;;  %v1870_v0 = vmul.f32 %v7442_v5, %v1854_v9  ;;  %v9233_v9 = vld [vmem:[#allocation72_spill] sm:$0xff] }
 0x345   : > { %v1696_v30 = vmul.f32 1.442695, %v9229_v63  ;;  %1931 = vst.msk [vmem:[#allocation3 + $0xb0] sm:$0xff] %vm9153_vm9, %v1915_v38  ;;  %v5110_v31 = vpop.f32.mrb[8].mxu0  ;;  %5425 = vpow2.f32 %v1698_v51  ;;  %v1869_v38 = vmul.f32 %v7450_v10, %v1853_v57  ;;  %v1236_v57 = vmul.f32 %v9233_v9, %v1140_v48  ;;  %v1859_v9 = vld [vmem:[#allocation3 + $0xf0] sm:$0xff] }
 0x346   : > { %v1400_v44 = vadd.f32 %v5110_v31, %v1231_v8  ;;  %v1359_v14 = vpop.f32.mrb[9].mxu0  ;;  %v1892_v3 = vpop.xlane.xlu1 %1891  ;;  %v1856_v8 = vld [vmem:[#allocation3 + $0xd8] sm:$0xff]  ;;  %v1138_v31 = vld [vmem:[#allocation4 + $0x68] sm:$0xff] }
 0x347   : > { %v1398_v27 = vadd.f32 %v1359_v14, %v1229_v13  ;;  %v1916_v23 = vadd.f32 %v1892_v3, %v1868_v42  ;;  %v5111_v19 = vpop.f32.mrb[10].mxu0  ;;  %5427 = vpow2.f32 %v1696_v30  ;;  %v7459_v2 = vpop.eup %5417  ;;  %v1855_v30 = vld [vmem:[#allocation3 + $0xd0] sm:$0xff]  ;;  %v1235_v13 = vmul.f32 %v7140_v20, %v1139_v61  ;;  %v9231_v42 = vld [vmem:[#allocation70_spill] sm:$0xff]  ;;  %v1858_v20 = vld [vmem:[#allocation3 + $0xe8] sm:$0xff] }
 0x348   : > { %1417 = vst.msk [vmem:[#allocation4 + $0x50] sm:$0xff] %vm8943_vm13, %v1400_v44  ;;  %v1401_v15 = vadd.f32 %v5111_v19, %v1232_v62  ;;  %v1362_v43 = vpop.f32.mrb[11].mxu0  ;;  %v7462_v36 = vpop.eup %5419  ;;  %v1233_v62 = vmul.f32 %v9231_v42, %v1137_v29  ;;  %v1872_v14 = vmul.f32 %v7459_v2, %v1856_v8  ;;  %v1860_v42 = vld [vmem:[#allocation3 + $0xf8] sm:$0xff] }
 0x349   : > { %1415 = vst.msk [vmem:[#allocation4 + $0x40] sm:$0xff] %vm8943_vm13, %v1398_v27  ;;  %v1399_v26 = vadd.f32 %v1362_v43, %v1230_v45  ;;  %v1871_v19 = vmul.f32 %v7462_v36, %v1855_v30  ;;  %v9234_v43 = vld [vmem:[#allocation71_spill] sm:$0xff] }
 0x34a   : > { %1932 = vst.msk [vmem:[#allocation3 + $0xb8] sm:$0xff] %vm9230_vm11, %v1916_v23  ;;  %v1896_v56 = vpop.xlane.xlu1 %1895  ;;  %v1894_v51 = vpop.xlane.xlu0 %1893  ;;  %vm9232_vm11 = vmmov %vm9153_vm9  ;;  %v1234_v61 = vmul.f32 %v9234_v43, %v1138_v31 }
 0x34b   : > { %1418 = vst.msk [vmem:[#allocation4 + $0x58] sm:$0xff] %vm8943_vm13, %v1401_v15  ;;  %1416 = vst.msk [vmem:[#allocation4 + $0x48] sm:$0xff] %vm8943_vm13, %v1399_v26  ;;  %v1918_v60 = vadd.f32 %v1896_v56, %v1870_v0  ;;  %v1917_v63 = vadd.f32 %v1894_v51, %v1869_v38  ;;  %v7470_v3 = vpop.eup %5421  ;;  %v1857_v56 = vld [vmem:[#allocation3 + $0xe0] sm:$0xff] }
 0x34c   : > { %v7474_v15 = vpop.eup %5423 }
 0x34d   : > { %1934 = vst.msk [vmem:[#allocation3 + $0xc8] sm:$0xff] %vm9153_vm9, %v1918_v60  ;;  %v5114_v44 = vpop.f32.mrb[12].mxu0  ;;  %v1873_v31 = vmul.f32 %v7474_v15, %v1857_v56 }
 0x34e   : > { %1933 = vst.msk [vmem:[#allocation3 + $0xc0] sm:$0xff] %vm9232_vm11, %v1917_v63  ;;  %v1404_v45 = vadd.f32 %v5114_v44, %v1235_v13  ;;  %v1375_v27 = vpop.f32.mrb[13].mxu0  ;;  %v1900_v23 = vpop.xlane.xlu1 %1899  ;;  %v1874_v63 = vmul.f32 %v7470_v3, %v1858_v20  ;;  %vm9235_vm11 = vmmov %vm9153_vm9 }
 0x34f   : > { %v1402_v26 = vadd.f32 %v1375_v27, %v1233_v62  ;;  %v1920_v0 = vadd.f32 %v1900_v23, %v1872_v14  ;;  %v1898_v38 = vpop.xlane.xlu0 %1897  ;;  %v5115_v29 = vpop.f32.mrb[14].mxu0 }
 0x350   : > { %1421 = vst.msk [vmem:[#allocation4 + $0x70] sm:$0xff] %vm8943_vm13, %v1404_v45  ;;  %v1919_v51 = vadd.f32 %v1898_v38, %v1871_v19  ;;  %v1405_v8 = vadd.f32 %v5115_v29, %v1236_v57  ;;  %v1378_v48 = vpop.f32.mrb[15].mxu0  ;;  %v7481_v30 = vpop.eup %5425 }
 0x351   : > { %1419 = vst.msk [vmem:[#allocation4 + $0x60] sm:$0xff] %vm8943_vm13, %v1402_v26  ;;  %v1403_v60 = vadd.f32 %v1378_v48, %v1234_v61  ;;  %v7486_v62 = vpop.eup %5427  ;;  %v1876_v45 = vmul.f32 %v7481_v30, %v1860_v42 }
 0x352   : > { %1936 = vst.msk [vmem:[#allocation3 + $0xd8] sm:$0xff] %vm9153_vm9, %v1920_v0  ;;  %v1904_v13 = vpop.xlane.xlu1 %1903  ;;  %v1875_v23 = vmul.f32 %v7486_v62, %v1859_v9 }
 0x353   : > { %1935 = vst.msk [vmem:[#allocation3 + $0xd0] sm:$0xff] %vm9235_vm11, %v1919_v51  ;;  %v1922_v44 = vadd.f32 %v1904_v13, %v1874_v63  ;;  %v1902_v14 = vpop.xlane.xlu0 %1901  ;;  %vm9237_vm11 = vmmov %vm9153_vm9  ;;  %v9239_v51 = vld [vmem:[#allocation6_spill] sm:$0xff] }
 0x354   : > { %1422 = vst.msk [vmem:[#allocation4 + $0x78] sm:$0xff] %vm8943_vm13, %v1405_v8  ;;  %1420 = vst.msk [vmem:[#allocation4 + $0x68] sm:$0xff] %vm8943_vm13, %v1403_v60  ;;  %v1921_v57 = vadd.f32 %v1902_v14, %v1873_v31  ;;  %v2297_v8 = vsub.s32 2, %v9239_v51  ;;  %v7497_v60 = vld [vmem:[%s5890_s8] sm:$0xf] }
 0x355   : > { %1938 = vst.msk [vmem:[#allocation3 + $0xe8] sm:$0xff] %vm9153_vm9, %v1922_v44 }
 0x356   : > { %1937 = vst.msk [vmem:[#allocation3 + $0xe0] sm:$0xff] %vm9236_vm12, %v1921_v57  ;;  %v1908_v27 = vpop.xlane.xlu1 %1907  ;;  %v7500_v63 = vrot.slane %v7497_v60, %v2297_v8 }
 0x357   : > { %v1924_v19 = vadd.f32 %v1908_v27, %v1876_v45  ;;  %v1906_v20 = vpop.xlane.xlu0 %1905 }
 0x358   : > { %v1923_v43 = vadd.f32 %v1906_v20, %v1875_v23 }
 0x359   : > { %1940 = vst.msk [vmem:[#allocation3 + $0xf8] sm:$0xff] %vm9237_vm11, %v1924_v19 }
 0x35a   : > { %1939 = vst.msk [vmem:[#allocation3 + $0xf0] sm:$0xff] %vm9238_vm8, %v1923_v43  ;;  %v2063_v61 = vpop.permute.xlu1 %2062 }
 0x35b   : > { %5116 = vmatprep.subr.bf16.mxu1 %v2063_v61  ;;  %v2065_v26 = vpop.permute.xlu0 %2064 }
 0x35c   : > { %5117 = vmatpush3.bf16.msra.mxu1 %v2063_v61 }
 0x35d   : > { %5118 = vmatprep.subr.bf16.mxu1 %v2065_v26 }
 0x35e   : > { %v2067_v0 = vpop.permute.xlu1 %2066 }
 0x35f   : > { %v2069_v38 = vpop.permute.xlu0 %2068 }
 0x360   : > { %5119 = vmatpush3.bf16.msra.mxu1 %v2065_v26 }
 0x361   : > { %5120 = vmatprep.subr.bf16.mxu1 %v2067_v0 }
 0x362   : > { %v2071_v29 = vpop.permute.xlu1 %2070 }
 0x363   : > { %v2073_v56 = vpop.permute.xlu0 %2072 }
 0x364   : > { %5121 = vmatpush3.bf16.msra.mxu1 %v2067_v0 }
 0x365   : > { %5122 = vmatprep.subr.bf16.mxu1 %v2069_v38 }
 0x366   : > { %v2075_v48 = vpop.permute.xlu1 %2074 }
 0x367   : > { %v2077_v13 = vpop.permute.xlu0 %2076 }
 0x368   : > { %5123 = vmatpush3.bf16.msra.mxu1 %v2069_v38 }
 0x369   : > { %5124 = vmatprep.subr.bf16.mxu1 %v2071_v29 }
 0x36a   : > { %v2233_v31 = vpop.permute.xlu1 %2232 }
 0x36b   : > { %v2299_v42 = vadd.f32 %v7500_v63, %v2233_v31 }
 0x36c   : > { %5125 = vmatpush3.bf16.msra.mxu1 %v2071_v29 }
 0x36d   : > { %v2331_v44 = vmul.f32 0.01, %v2299_v42  ;;  %5126 = vmatprep.subr.bf16.mxu1 %v2073_v56  ;;  %vm2315_vm8 = vcmp.ge.f32.partialorder %v2299_v42, 0.0 }
 0x36e   : > { %v2241_v14 = vpop.permute.xlu1 %2240  ;;  %v2237_v9 = vpop.permute.xlu0 %2236 }
 0x36f   : > { %v2301_v57 = vadd.f32 %v7500_v63, %v2241_v14  ;;  %v2300_v45 = vadd.f32 %v7500_v63, %v2237_v9  ;;  %v2347_v27 = vsel %vm2315_vm8, %v2299_v42, %v2331_v44 }
 0x370   : > { %5127 = vmatpush3.bf16.msra.mxu1 %v2073_v56  ;;  %v7507_v19 = vsel %vm559_vm4, %v2347_v27, -1e+30 }
 0x371   : > { %v2333_v20 = vmul.f32 0.01, %v2301_v57  ;;  %v2332_v43 = vmul.f32 0.01, %v2300_v45  ;;  %2396 = vmax.xlane.f32.xlu0 %v7507_v19  ;;  %5128 = vmatprep.subr.bf16.mxu1 %v2075_v48  ;;  %vm2317_vm12 = vcmp.ge.f32.partialorder %v2301_v57, 0.0  ;;  %vm2316_vm9 = vcmp.ge.f32.partialorder %v2300_v45, 0.0 }
 0x372   : > { %v2245_v61 = vpop.permute.xlu1 %2244  ;;  %v2249_v26 = vpop.permute.xlu0 %2248 }
 0x373   : > { %v2302_v0 = vadd.f32 %v7500_v63, %v2245_v61  ;;  %v2303_v38 = vadd.f32 %v7500_v63, %v2249_v26  ;;  %v2349_v29 = vsel %vm2317_vm12, %v2301_v57, %v2333_v20  ;;  %v2348_v8 = vsel %vm2316_vm9, %v2300_v45, %v2332_v43 }
 0x374   : > { %5129 = vmatpush3.bf16.msra.mxu1 %v2075_v48  ;;  %v7514_v56 = vsel %vm561_vm5, %v2349_v29, -1e+30  ;;  %v7518_v31 = vsel %vm8942_vm6, %v2348_v8, -1e+30  ;;  %vm9241_vm12 = vcmp.gt.f32.partialorder %v6369_v12, 0.0  ;;  %vm9242_vm9 = vcmp.gt.f32.partialorder %v6356_v1, 0.0 }
 0x375   : > { %v2334_v42 = vmul.f32 0.01, %v2302_v0  ;;  %v2335_v44 = vmul.f32 0.01, %v2303_v38  ;;  %2400 = vmax.xlane.f32.xlu0 %v7514_v56  ;;  %2398 = vmax.xlane.f32.xlu1 %v7518_v31  ;;  %vm2318_vm11 = vcmp.ge.f32.partialorder %v2302_v0, 0.0  ;;  %vm2319_vm8 = vcmp.ge.f32.partialorder %v2303_v38, 0.0 }
 0x376   : > { %v2253_v14 = vpop.permute.xlu1 %2252  ;;  %v2257_v9 = vpop.permute.xlu0 %2256  ;;  %5130 = vmatprep.subr.bf16.mxu1 %v2077_v13  ;;  %v9244_v8 = vld [vmem:[#allocation15_spill] sm:$0xff] }
 0x377   : > { %v2304_v48 = vadd.f32 %v7500_v63, %v2253_v14  ;;  %v2305_v57 = vadd.f32 %v7500_v63, %v2257_v9  ;;  %v2350_v45 = vsel %vm2318_vm11, %v2302_v0, %v2334_v42  ;;  %v2351_v27 = vsel %vm2319_vm8, %v2303_v38, %v2335_v44 }
 0x378   : > { %5131 = vmatpush3.bf16.msra.mxu1 %v2077_v13  ;;  %v7526_v20 = vsel %vm9241_vm12, %v2350_v45, -1e+30  ;;  %v7530_v43 = vsel %vm9242_vm9, %v2351_v27, -1e+30  ;;  %v9245_v42 = vpack.c.bf16 %v7166_v17, %v9244_v8  ;;  %v9247_v45 = vpack.c.bf16 %v7182_v24, %v7175_v39 }
 0x379   : > { %9243 = vst [vmem:[#allocation28_spill] sm:$0xff] %v7530_v43  ;;  %v2336_v61 = vmul.f32 0.01, %v2304_v48  ;;  %v2337_v26 = vmul.f32 0.01, %v2305_v57  ;;  %2402 = vmax.xlane.f32.xlu0 %v7526_v20  ;;  %2404 = vmax.xlane.f32.xlu1 %v7530_v43  ;;  %vm2320_vm6 = vcmp.ge.f32.partialorder %v2304_v48, 0.0 }
 0x37a   : > { %vm2321_vm13 = vcmp.ge.f32.partialorder %v2305_v57, 0.0  ;;  %v2261_v29 = vpop.permute.xlu1 %2260  ;;  %v2265_v0 = vpop.permute.xlu0 %2264  ;;  %v9249_v43 = vld [vmem:[#allocation9_spill] sm:$0xff]  ;;  %vm9252_vm8 = vcmp.gt.f32.partialorder %v6387_v21, 0.0  ;;  %vm9254_vm12 = vcmp.gt.f32.partialorder %v6415_v52, 0.0  ;;  %vm9256_vm9 = vcmp.gt.f32.partialorder %v6399_v40, 0.0 }
 0x37b   : > { %v2306_v13 = vadd.f32 %v7500_v63, %v2261_v29  ;;  %v2307_v38 = vadd.f32 %v7500_v63, %v2265_v0  ;;  %5133 = vmatmul.mubr.msk.bf16.vlgmr.msra.gmra.mrb[0].mxu1 %vm7017_vm15, %v9245_v42  ;;  %v2352_v14 = vsel %vm2320_vm6, %v2304_v48, %v2336_v61  ;;  %v2353_v9 = vsel %vm2321_vm13, %v2305_v57, %v2337_v26 }
 0x37c   : > { %5136 = vmatprep.mubr.msk.bf16.mxu1 %vm7035_vm0, %v9247_v45  ;;  %vm9250_vm11 = vcmp.gt.f32.partialorder %v9249_v43, 0.0  ;;  %v7552_v29 = vsel %vm9252_vm8, %v2353_v9, -1e+30 }
 0x37d   : > { %v7548_v1 = vsel %vm9250_vm11, %v2352_v14, -1e+30  ;;  %9253 = vst [vmem:[#allocation41_spill] sm:$0xff] %v7552_v29  ;;  %v2338_v17 = vmul.f32 0.01, %v2306_v13  ;;  %2408 = vmax.xlane.f32.xlu1 %v7552_v29  ;;  %vm2322_vm6 = vcmp.ge.f32.partialorder %v2306_v13, 0.0 }
 0x37e   : > { %9251 = vst [vmem:[#allocation29_spill] sm:$0xff] %v7548_v1  ;;  %v2339_v0 = vmul.f32 0.01, %v2307_v38  ;;  %2406 = vmax.xlane.f32.xlu0 %v7548_v1  ;;  %vm2323_vm13 = vcmp.ge.f32.partialorder %v2307_v38, 0.0  ;;  %v2269_v39 = vpop.permute.xlu1 %2268  ;;  %v2273_v24 = vpop.permute.xlu0 %2272 }
 0x37f   : > { %v2308_v48 = vadd.f32 %v7500_v63, %v2269_v39  ;;  %v2309_v57 = vadd.f32 %v7500_v63, %v2273_v24  ;;  %v2354_v61 = vsel %vm2322_vm6, %v2306_v13, %v2338_v17  ;;  %v9258_v17 = vpack.c.bf16 %v7198_v32, %v7191_v4 }
 0x380   : > { %v2355_v26 = vsel %vm2323_vm13, %v2307_v38, %v2339_v0  ;;  %v7560_v8 = vsel %vm9254_vm12, %v2354_v61, -1e+30  ;;  %vm9262_vm6 = vcmp.gt.f32.partialorder %v6443_v6, 0.0  ;;  %vm9264_vm13 = vcmp.gt.f32.partialorder %v6417_v54, 0.0  ;;  %v9277_v0 = vld [vmem:[#allocation11_spill] sm:$0xff] }
 0x381   : > { %9255 = vst [vmem:[#allocation35_spill] sm:$0xff] %v7560_v8  ;;  %v7564_v42 = vsel %vm9256_vm9, %v2355_v26, -1e+30  ;;  %v2340_v14 = vmul.f32 0.01, %v2308_v48  ;;  %vm2324_vm11 = vcmp.ge.f32.partialorder %v2308_v48, 0.0  ;;  %v9260_v26 = vpack.c.bf16 %v7205_v34, %v7208_v22 }
 0x382   : > { %9257 = vst [vmem:[#allocation46_spill] sm:$0xff] %v7564_v42  ;;  %v2341_v9 = vmul.f32 0.01, %v2309_v57  ;;  %2410 = vmax.xlane.f32.xlu0 %v7560_v8  ;;  %2412 = vmax.xlane.f32.xlu1 %v7564_v42  ;;  %vm2325_vm8 = vcmp.ge.f32.partialorder %v2309_v57, 0.0  ;;  %v2277_v45 = vpop.permute.xlu1 %2276  ;;  %v2281_v39 = vpop.permute.xlu0 %2280  ;;  %v1943_v8 = vld [vmem:[#allocation4 + $0x88] sm:$0xff] }
 0x383   : > { %v2310_v13 = vadd.f32 %v7500_v63, %v2277_v45  ;;  %v2311_v38 = vadd.f32 %v7500_v63, %v2281_v39  ;;  %5137 = vmatmul.mubr.msk.bf16.gmra.mrb[4].mxu1 %vm7051_vm7, %v9258_v17  ;;  %v2356_v24 = vsel %vm2324_vm11, %v2308_v48, %v2340_v14  ;;  %vm9266_vm11 = vcmp.gt.f32.partialorder %v6463_v33, 0.0 }
 0x384   : > { %v2357_v61 = vsel %vm2325_vm8, %v2309_v57, %v2341_v9  ;;  %5140 = vmatprep.mubr.msk.bf16.mxu1 %vm7068_vm1, %v9260_v26  ;;  %v7582_v44 = vsel %vm9262_vm6, %v2356_v24, -1e+30  ;;  %vm9268_vm8 = vcmp.gt.f32.partialorder %v6447_v16, 0.0 }
 0x385   : > { %9263 = vst [vmem:[#allocation38_spill] sm:$0xff] %v7582_v44  ;;  %v7586_v45 = vsel %vm9264_vm13, %v2357_v61, -1e+30  ;;  %v2342_v4 = vmul.f32 0.01, %v2310_v13  ;;  %vm2326_vm12 = vcmp.ge.f32.partialorder %v2310_v13, 0.0 }
 0x386   : > { %9265 = vst [vmem:[#allocation52_spill] sm:$0xff] %v7586_v45  ;;  %v2343_v32 = vmul.f32 0.01, %v2311_v38  ;;  %2414 = vmax.xlane.f32.xlu0 %v7582_v44  ;;  %2416 = vmax.xlane.f32.xlu1 %v7586_v45  ;;  %vm2327_vm9 = vcmp.ge.f32.partialorder %v2311_v38, 0.0  ;;  %v2285_v34 = vpop.permute.xlu1 %2284  ;;  %v2289_v22 = vpop.permute.xlu0 %2288  ;;  %v1944_v45 = vld [vmem:[#allocation4 + $0x90] sm:$0xff] }
 0x387   : > { %v2312_v48 = vadd.f32 %v7500_v63, %v2285_v34  ;;  %v2313_v57 = vadd.f32 %v7500_v63, %v2289_v22  ;;  %v2358_v14 = vsel %vm2326_vm12, %v2310_v13, %v2342_v4  ;;  %v9272_v22 = vpack.c.bf16 %v7230_v18, %v7232_v25  ;;  %v9283_v25 = vld [vmem:[#allocation14_spill] sm:$0xff] }
 0x388   : > { %v2359_v9 = vsel %vm2327_vm9, %v2311_v38, %v2343_v32  ;;  %v7594_v39 = vsel %vm9266_vm11, %v2358_v14, -1e+30  ;;  %v9270_v38 = vpack.c.bf16 %v7218_v41, %v7220_v49  ;;  %vm9278_vm9 = vcmp.gt.f32.partialorder %v9277_v0, 0.0 }
 0x389   : > { %9267 = vst [vmem:[#allocation43_spill] sm:$0xff] %v7594_v39  ;;  %v7598_v17 = vsel %vm9268_vm8, %v2359_v9, -1e+30  ;;  %v2344_v24 = vmul.f32 0.01, %v2312_v48  ;;  %vm2328_vm6 = vcmp.ge.f32.partialorder %v2312_v48, 0.0 }
 0x38a   : > { %9269 = vst [vmem:[#allocation49_spill] sm:$0xff] %v7598_v17  ;;  %v2345_v61 = vmul.f32 0.01, %v2313_v57  ;;  %2418 = vmax.xlane.f32.xlu0 %v7594_v39  ;;  %2420 = vmax.xlane.f32.xlu1 %v7598_v17  ;;  %vm2329_vm13 = vcmp.ge.f32.partialorder %v2313_v57, 0.0  ;;  %v2293_v26 = vpop.permute.xlu1 %2292  ;;  %v9274_v9 = vld [vmem:[#allocation12_spill] sm:$0xff] }
 0x38b   : > { %v2314_v13 = vadd.f32 %v7500_v63, %v2293_v26  ;;  %5141 = vmatmul.mubr.msk.bf16.gmra.mrb[8].mxu1 %vm7086_vm2, %v9270_v38  ;;  %v2360_v32 = vsel %vm2328_vm6, %v2312_v48, %v2344_v24  ;;  %vm9275_vm12 = vcmp.gt.f32.partialorder %v9274_v9, 0.0  ;;  %v9280_v48 = vld [vmem:[#allocation13_spill] sm:$0xff]  ;;  %vm9301_vm6 = vcmask 7168  }
 0x38c   : > { %v2361_v34 = vsel %vm2329_vm13, %v2313_v57, %v2345_v61  ;;  %5144 = vmatprep.mubr.msk.bf16.mxu1 %vm7104_vm14, %v9272_v22  ;;  %v7615_v27 = vsel %vm9275_vm12, %v2360_v32, -1e+30  ;;  %vm9281_vm8 = vcmp.gt.f32.partialorder %v9280_v48, 0.0  ;;  %v9284_v57 = vpack.c.bf16 %v7242_v46, %v9283_v25  ;;  %v9286_v61 = vld [vmem:[#allocation16_spill] sm:$0xff]  ;;  %v9287_v26 = vld [vmem:[#allocation17_spill] sm:$0xff]  ;;  %v9288_v46 = vld [vmem:[#allocation19_spill] sm:$0xff] }
 0x38d   : > { %9276 = vst [vmem:[#allocation55_spill] sm:$0xff] %v7615_v27  ;;  %v7619_v63 = vsel %vm9278_vm9, %v2361_v34, -1e+30  ;;  %v2346_v41 = vmul.f32 0.01, %v2314_v13  ;;  %vm2330_vm11 = vcmp.ge.f32.partialorder %v2314_v13, 0.0  ;;  %vm9306_vm13 = vmmov %vm9301_vm6 }
 0x38e   : > { %9279 = vst [vmem:[#allocation30_spill] sm:$0xff] %v7619_v63  ;;  %2422 = vmax.xlane.f32.xlu0 %v7615_v27  ;;  %2424 = vmax.xlane.f32.xlu1 %v7619_v63  ;;  %v7668_v32 = vld [vmem:[#allocation2 + $0x108] sm:$0xff]  ;;  %v7670_v34 = vld [vmem:[#allocation2 + $0x110] sm:$0xff]  ;;  %v7685_v22 = vld [vmem:[#allocation2 + $0x118] sm:$0xff] }
 0x38f   : > { %v2362_v49 = vsel %vm2330_vm11, %v2314_v13, %v2346_v41  ;;  %v9297_v13 = vld [vmem:[#allocation25_spill] sm:$0xff]  ;;  %9299 = vst [vmem:[#allocation34_spill] sm:$0xff] %v7668_v32  ;;  %9300 = vst [vmem:[#allocation31_spill] sm:$0xff] %v7670_v34 }
 0x390   : > { %v7625_v18 = vsel %vm9281_vm8, %v2362_v49, -1e+30  ;;  %9305 = vst [vmem:[#allocation36_spill] sm:$0xff] %v7685_v22  ;;  %vm9307_vm12 = vmmov %vm9301_vm6  ;;  %v7751_v41 = vld [vmem:[#allocation2 + $0x158] sm:$0xff] }
 0x391   : > { %9282 = vst [vmem:[#allocation32_spill] sm:$0xff] %v7625_v18  ;;  %vm9311_vm9 = vmmov %vm9301_vm6 }
 0x392   : > { %2426 = vmax.xlane.f32.xlu0 %v7625_v18  ;;  %vm9312_vm11 = vmmov %vm9301_vm6  ;;  %9323 = vst [vmem:[#allocation53_spill] sm:$0xff] %v7751_v41 }
 0x393   : > { %5145 = vmatmul.mubr.msk.bf16.gmra.mrb[12].mxu1 %vm7122_vm3, %v9284_v57  ;;  %vm9315_vm8 = vmmov %vm9301_vm6 }
 0x39f   : > { %1965 = vperm.xlu1 %5288, %v7370_v47   ;;  %v9289_v47 = vld [vmem:[#allocation20_spill] sm:$0xff] }
 0x3a3   : > { %1970 = vperm.xlu1 %5288, %v7376_v59   ;;  %v9290_v59 = vld [vmem:[#allocation18_spill] sm:$0xff] }
 0x3a7   : > { %1980 = vperm.xlu1 %5288, %v7392_v35   ;;  %v9292_v35 = vld [vmem:[#allocation21_spill] sm:$0xff] }
 0x3a8   : > { %3024 = vperm.xlu0 %5289, %v7266_v11   ;;  %v9291_v11 = vld [vmem:[#allocation22_spill] sm:$0xff] }
 0x3ab   : > { %1990 = vperm.xlu1 %5288, %v7420_v37   ;;  %v9293_v37 = vld [vmem:[#allocation24_spill] sm:$0xff] }
 0x3ac   : > { %3028 = vperm.xlu0 %5289, %v9286_v61  }
 0x3af   : > { %2000 = vperm.xlu1 %5288, %v7450_v10   ;;  %v9294_v10 = vld [vmem:[#allocation23_spill] sm:$0xff] }
 0x3b0   : > { %3032 = vperm.xlu0 %5289, %v9287_v26  }
 0x3b3   : > { %2010 = vperm.xlu1 %5288, %v7462_v36   ;;  %v9295_v36 = vld [vmem:[#allocation26_spill] sm:$0xff] }
 0x3b4   : > { %3036 = vperm.xlu0 %5289, %v9288_v46   ;;  %v7703_v46 = vld [vmem:[#allocation2 + $0x130] sm:$0xff] }
 0x3b5   : > { %9309 = vst [vmem:[#allocation42_spill] sm:$0xff] %v7703_v46 }
 0x3b7   : > { %2020 = vperm.xlu1 %5288, %v7474_v15   ;;  %v9296_v15 = vmov 0  }
 0x3b8   : > { %3040 = vperm.xlu0 %5289, %v9289_v47   ;;  %v7705_v47 = vld [vmem:[#allocation2 + $0x128] sm:$0xff] }
 0x3b9   : > { %9310 = vst [vmem:[#allocation45_spill] sm:$0xff] %v7705_v47 }
 0x3bb   : > { %2030 = vperm.xlu1 %5288, %v7486_v62   ;;  %v9298_v62 = vld [vmem:[#allocation27_spill] sm:$0xff] }
 0x3bc   : > { %3044 = vperm.xlu0 %5289, %v9290_v59  }
 0x3c0   : > { %3048 = vperm.xlu0 %5289, %v9291_v11  }
 0x3c4   : > { %3052 = vperm.xlu0 %5289, %v7311_v58   ;;  %v7663_v58 = vld [vmem:[#allocation2 + $0x100] sm:$0xff] }
 0x3c8   : > { %3060 = vperm.xlu0 %5289, %v7320_v28  }
 0x3cc   : > { %3064 = vperm.xlu0 %5289, %v9292_v35  }
 0x3d0   : > { %3068 = vperm.xlu0 %5289, %v9293_v37  }
 0x3d4   : > { %3072 = vperm.xlu0 %5289, %v9294_v10  }
 0x3d8   : > { %3080 = vperm.xlu0 %5289, %v9295_v36   ;;  %v7720_v36 = vld [vmem:[#allocation2 + $0x140] sm:$0xff] }
 0x3d9   : > { %9313 = vst [vmem:[#allocation48_spill] sm:$0xff] %v7720_v36 }
 0x3dc   : > { %5291 = vset.pattern.permute.xlu0 %v9296_v15 }
 0x3dd   : > { %1960 = vperm.xlu0 %5291, %v9297_v13   ;;  %v7722_v13 = vld [vmem:[#allocation2 + $0x138] sm:$0xff] }
 0x3de   : > { %9314 = vst [vmem:[#allocation44_spill] sm:$0xff] %v7722_v13 }
 0x3e1   : > { %1975 = vperm.xlu0 %5291, %v9298_v62   ;;  %v9316_v62 = vmov 3  }
 0x3e5   : > { %1985 = vperm.xlu0 %5291, %v7406_v55  }
 0x3e9   : > { %1995 = vperm.xlu0 %5291, %v7434_v7  }
 0x3ed   : > { %2005 = vperm.xlu0 %5291, %v7442_v5  }
 0x3f1   : > { %2015 = vperm.xlu0 %5291, %v7459_v2  }
 0x3f5   : > { %2025 = vperm.xlu0 %5291, %v7470_v3  }
 0x3f9   : > { %2035 = vperm.xlu0 %5291, %v7481_v30   ;;  %v7683_v30 = vld [vmem:[#allocation2 + $0x120] sm:$0xff] }
 0x3fa   : > { %9304 = vst [vmem:[#allocation40_spill] sm:$0xff] %v7683_v30 }
 0x3fe   : > { %v2397_v28 = vpop.xlane.xlu0 %2396 }
 0x3ff   : > { %v7666_v38 = vmax.f32 %v7663_v58, %v2397_v28 }
 0x401   : > { %3007 = vst.msk [vmem:[#allocation2 + $0x100] sm:$0xff] %vm9301_vm6, %v7666_v38  ;;  %2494 = vperm.xlu1 %5288, %v7666_v38  }
 0x402   : > { %v2399_v7 = vpop.xlane.xlu1 %2398  ;;  %v2401_v5 = vpop.xlane.xlu0 %2400 }
 0x403   : > { %v7678_v2 = vmax.f32 %v7668_v32, %v2399_v7  ;;  %v7681_v3 = vmax.f32 %v7670_v34, %v2401_v5 }
 0x405   : > { %9302 = vst [vmem:[#allocation37_spill] sm:$0xff] %v7678_v2  ;;  %9303 = vst [vmem:[#allocation33_spill] sm:$0xff] %v7681_v3  ;;  %2499 = vperm.xlu0 %5291, %v7678_v2   ;;  %2504 = vperm.xlu1 %5288, %v7681_v3  }
 0x406   : > { %3008 = vst.msk [vmem:[#allocation2 + $0x108] sm:$0xff] %vm9306_vm13, %v7678_v2  ;;  %v2405_v25 = vpop.xlane.xlu1 %2404  ;;  %v2403_v57 = vpop.xlane.xlu0 %2402  ;;  %vm9319_vm13 = vmmov %vm9301_vm6 }
 0x407   : > { %3009 = vst.msk [vmem:[#allocation2 + $0x110] sm:$0xff] %vm9307_vm12, %v7681_v3  ;;  %v7698_v61 = vmax.f32 %v7683_v30, %v2405_v25  ;;  %v7701_v26 = vmax.f32 %v7685_v22, %v2403_v57  ;;  %v7735_v57 = vld [vmem:[#allocation2 + $0x150] sm:$0xff]  ;;  %vm9320_vm12 = vmmov %vm9301_vm6 }
 0x408   : > { %9317 = vst [vmem:[#allocation47_spill] sm:$0xff] %v7735_v57 }
 0x409   : > { %9308 = vst [vmem:[#allocation39_spill] sm:$0xff] %v7701_v26  ;;  %3011 = vst.msk [vmem:[#allocation2 + $0x120] sm:$0xff] %vm9311_vm9, %v7698_v61  ;;  %2509 = vperm.xlu1 %5288, %v7701_v26  }
 0x40a   : > { %3010 = vst.msk [vmem:[#allocation2 + $0x118] sm:$0xff] %vm9312_vm11, %v7701_v26  ;;  %v2409_v11 = vpop.xlane.xlu1 %2408  ;;  %vm9324_vm9 = vmmov %vm9301_vm6 }
 0x40b   : > { %v2407_v35 = vpop.xlane.xlu0 %2406  ;;  %v7715_v37 = vmax.f32 %v7703_v46, %v2409_v11  ;;  %v7737_v11 = vld [vmem:[#allocation2 + $0x148] sm:$0xff]  ;;  %vm9325_vm11 = vmmov %vm9301_vm6  ;;  %v3089_v46 = vsub.s32 3, %v9239_v51 }
 0x40c   : > { %v7718_v10 = vmax.f32 %v7705_v47, %v2407_v35  ;;  %9318 = vst [vmem:[#allocation51_spill] sm:$0xff] %v7737_v11 }
 0x40d   : > { %3013 = vst.msk [vmem:[#allocation2 + $0x130] sm:$0xff] %vm9315_vm8, %v7715_v37  ;;  %5290 = vset.pattern.permute.xlu1 %v9316_v62  ;;  %vm9329_vm8 = vmmov %vm9301_vm6 }
 0x40e   : > { %3012 = vst.msk [vmem:[#allocation2 + $0x128] sm:$0xff] %vm9301_vm6, %v7718_v10 }
 0x40f   : > { %v2413_v28 = vpop.xlane.xlu1 %2412  ;;  %v2411_v7 = vpop.xlane.xlu0 %2410 }
 0x410   : > { %v7730_v5 = vmax.f32 %v7720_v36, %v2413_v28  ;;  %v7733_v25 = vmax.f32 %v7722_v13, %v2411_v7  ;;  %v7749_v7 = vld [vmem:[#allocation2 + $0x160] sm:$0xff] }
 0x411   : > { %9322 = vst [vmem:[#allocation50_spill] sm:$0xff] %v7749_v7 }
 0x412   : > { %3015 = vst.msk [vmem:[#allocation2 + $0x140] sm:$0xff] %vm9319_vm13, %v7730_v5  ;;  %vm9333_vm13 = vmmov %vm9301_vm6 }
 0x413   : > { %3014 = vst.msk [vmem:[#allocation2 + $0x138] sm:$0xff] %vm9320_vm12, %v7733_v25  ;;  %v2417_v35 = vpop.xlane.xlu1 %2416  ;;  %v2415_v62 = vpop.xlane.xlu0 %2414  ;;  %vm9334_vm12 = vmmov %vm9301_vm6 }
 0x414   : > { %v7744_v59 = vmax.f32 %v7735_v57, %v2417_v35  ;;  %v7747_v28 = vmax.f32 %v7737_v11, %v2415_v62  ;;  %v7763_v62 = vld [vmem:[#allocation2 + $0x170] sm:$0xff]  ;;  %v7765_v57 = vld [vmem:[#allocation2 + $0x168] sm:$0xff] }
 0x415   : > { %9327 = vst [vmem:[#allocation59_spill] sm:$0xff] %v7763_v62  ;;  %9328 = vst [vmem:[#allocation56_spill] sm:$0xff] %v7765_v57 }
 0x416   : > { %9321 = vst [vmem:[#allocation54_spill] sm:$0xff] %v7744_v59  ;;  %3017 = vst.msk [vmem:[#allocation2 + $0x150] sm:$0xff] %vm9324_vm9, %v7744_v59 }
 0x417   : > { %3016 = vst.msk [vmem:[#allocation2 + $0x148] sm:$0xff] %vm9325_vm11, %v7747_v28  ;;  %v2421_v49 = vpop.xlane.xlu1 %2420  ;;  %v2419_v55 = vpop.xlane.xlu0 %2418  ;;  %vm9336_vm9 = vmmov %vm9301_vm6 }
 0x418   : > { %v7758_v36 = vmax.f32 %v7749_v7, %v2421_v49  ;;  %v7761_v35 = vmax.f32 %v7751_v41, %v2419_v55  ;;  %v7777_v55 = vld [vmem:[#allocation2 + $0x178] sm:$0xff] }
 0x419   : > { %9332 = vst [vmem:[#allocation61_spill] sm:$0xff] %v7777_v55 }
 0x41a   : > { %9326 = vst [vmem:[#allocation57_spill] sm:$0xff] %v7758_v36  ;;  %3019 = vst.msk [vmem:[#allocation2 + $0x160] sm:$0xff] %vm9329_vm8, %v7758_v36 }
 0x41b   : > { %3018 = vst.msk [vmem:[#allocation2 + $0x158] sm:$0xff] %vm9301_vm6, %v7761_v35  ;;  %v2425_v11 = vpop.xlane.xlu1 %2424  ;;  %v2423_v13 = vpop.xlane.xlu0 %2422 }
 0x41c   : > { %v7772_v47 = vmax.f32 %v7763_v62, %v2425_v11  ;;  %v7775_v49 = vmax.f32 %v7765_v57, %v2423_v13  ;;  %v7790_v13 = vrot.slane %v7497_v60, %v3089_v46 }
 0x41e   : > { %9330 = vst [vmem:[#allocation58_spill] sm:$0xff] %v7772_v47  ;;  %9331 = vst [vmem:[#allocation60_spill] sm:$0xff] %v7775_v49 }
 0x41f   : > { %3021 = vst.msk [vmem:[#allocation2 + $0x170] sm:$0xff] %vm9333_vm13, %v7772_v47  ;;  %v2427_v7 = vpop.xlane.xlu0 %2426  ;;  %v1966_v60 = vpop.permute.xlu1 %1965  ;;  %vm9339_vm13 = vcmask 130048  }
 0x420   : > { %3020 = vst.msk [vmem:[#allocation2 + $0x168] sm:$0xff] %vm9334_vm12, %v7775_v49  ;;  %v7784_v41 = vmax.f32 %v7777_v55, %v2427_v7  ;;  %v2039_v34 = vmul.f32 %v1966_v60, %v1943_v8  ;;  %vm9340_vm12 = vcmp.gt.f32.partialorder %v6369_v12, 0.0 }
 0x422   : > { %9335 = vst [vmem:[#allocation70_spill] sm:$0xff] %v7784_v41  ;;  %3022 = vst.msk [vmem:[#allocation2 + $0x178] sm:$0xff] %vm9336_vm9, %v7784_v41 }
 0x423   : > { %v1971_v4 = vpop.permute.xlu1 %1970 }
 0x424   : > { %v2040_v44 = vmul.f32 %v1971_v4, %v1944_v45  ;;  %v1948_v4 = vld [vmem:[#allocation4 + $0xb0] sm:$0xff] }
 0x427   : > { %v3025_v11 = vpop.permute.xlu0 %3024  ;;  %v1981_v17 = vpop.permute.xlu1 %1980 }
 0x428   : > { %v3091_v62 = vadd.f32 %v7790_v13, %v3025_v11 }
 0x42a   : > { %v3123_v57 = vmul.f32 0.01, %v3091_v62  ;;  %vm3107_vm11 = vcmp.ge.f32.partialorder %v3091_v62, 0.0 }
 0x42b   : > { %v7793_v30 = vpop.permute.xlu0 %3028 }
 0x42c   : > { %v3139_v24 = vsel %vm3107_vm11, %v3091_v62, %v3123_v57  ;;  %vm9342_vm11 = vmmov %vm9339_vm13 }
 0x42d   : > { %v7797_v7 = vsel %vm559_vm4, %v3139_v24, -1e+30  ;;  %v1991_v24 = vpop.permute.xlu1 %1990 }
 0x42e   : > { %9337 = vst [vmem:[#allocation72_spill] sm:$0xff] %v7797_v7  ;;  %3188 = vmax.xlane.f32.xlu0 %v7797_v7 }
 0x42f   : > { %v3033_v51 = vpop.permute.xlu0 %3032 }
 0x430   : > { %v3093_v57 = vadd.f32 %v7790_v13, %v3033_v51 }
 0x431   : > { %v2001_v22 = vpop.permute.xlu1 %2000 }
 0x432   : > { %v3125_v42 = vmul.f32 0.01, %v3093_v57  ;;  %vm3109_vm8 = vcmp.ge.f32.partialorder %v3093_v57, 0.0 }
 0x433   : > { %v3037_v55 = vpop.permute.xlu0 %3036 }
 0x434   : > { %v3094_v62 = vadd.f32 %v7790_v13, %v3037_v55  ;;  %v3141_v32 = vsel %vm3109_vm8, %v3093_v57, %v3125_v42 }
 0x435   : > { %v7814_v47 = vsel %vm561_vm5, %v3141_v32, -1e+30  ;;  %v2044_v32 = vmul.f32 %v1991_v24, %v1948_v4  ;;  %v1952_v4 = vld [vmem:[#allocation4 + $0xd0] sm:$0xff] }
 0x436   : > { %v3126_v39 = vmul.f32 0.01, %v3094_v62  ;;  %vm3110_vm6 = vcmp.ge.f32.partialorder %v3094_v62, 0.0  ;;  %9338 = vst [vmem:[#allocation71_spill] sm:$0xff] %v7814_v47  ;;  %3192 = vmax.xlane.f32.xlu0 %v7814_v47 }
 0x437   : > { %v7800_v14 = vpop.permute.xlu0 %3040 }
 0x438   : > { %v3142_v3 = vsel %vm3110_vm6, %v3094_v62, %v3126_v39  ;;  %vm9343_vm6 = vcmp.gt.f32.partialorder %v9249_v43, 0.0 }
 0x43b   : > { %v3045_v46 = vpop.permute.xlu0 %3044 }
 0x43c   : > { %v3096_v7 = vadd.f32 %v7790_v13, %v3045_v46 }
 0x43e   : > { %v3128_v29 = vmul.f32 0.01, %v3096_v7  ;;  %vm3112_vm9 = vcmp.ge.f32.partialorder %v3096_v7, 0.0 }
 0x43f   : > { %v7802_v63 = vpop.permute.xlu0 %3048 }
 0x440   : > { %v3144_v39 = vsel %vm3112_vm9, %v3096_v7, %v3128_v29  ;;  %vm9346_vm9 = vmmov %vm9342_vm11 }
 0x443   : > { %v3053_v11 = vpop.permute.xlu0 %3052 }
 0x444   : > { %v3098_v51 = vadd.f32 %v7790_v13, %v3053_v11 }
 0x446   : > { %v3130_v8 = vmul.f32 0.01, %v3098_v51  ;;  %vm3114_vm8 = vcmp.ge.f32.partialorder %v3098_v51, 0.0 }
 0x447   : > { %v3061_v18 = vpop.permute.xlu0 %3060 }
 0x448   : > { %v3100_v42 = vadd.f32 %v7790_v13, %v3061_v18  ;;  %v3146_v7 = vsel %vm3114_vm8, %v3098_v51, %v3130_v8 }
 0x44a   : > { %v3132_v57 = vmul.f32 0.01, %v3100_v42 }
 0x44b   : > { %v7807_v27 = vpop.permute.xlu0 %3064 }
 0x44e   : > { %v5134_v1 = vpop.f32.mrb[0].mxu1 }
 0x44f   : > { %v3069_v26 = vpop.permute.xlu0 %3068  ;;  %v2185_v2 = vadd.f32 %v5134_v1, %v2040_v44  ;;  %v2120_v55 = vpop.f32.mrb[1].mxu1  ;;  %v7822_v1 = vsel %vm9340_vm12, %v3142_v3, -1e+30  ;;  %v1946_v44 = vld [vmem:[#allocation4 + $0xa0] sm:$0xff]  ;;  %v7831_v3 = vsel %vm9343_vm6, %v3144_v39, -1e+30  ;;  %vm9345_vm12 = vmmov %vm9342_vm11 }
 0x450   : > { %v7810_v46 = vpop.f32.mrb[2].mxu1  ;;  %9341 = vst [vmem:[#allocation6_spill] sm:$0xff] %v7822_v1  ;;  %3194 = vmax.xlane.f32.xlu0 %v7822_v1  ;;  %9344 = vst [vmem:[#allocation7_spill] sm:$0xff] %v7831_v3  ;;  %v3102_v62 = vadd.f32 %v7790_v13, %v3069_v26  ;;  %v1950_v26 = vld [vmem:[#allocation4 + $0xc0] sm:$0xff]  ;;  %vm9348_vm6 = vcmp.gt.f32.partialorder %v6443_v6, 0.0 }
 0x451   : > { %2201 = vst.msk [vmem:[#allocation4 + $0x90] sm:$0xff] %vm9339_vm13, %v2185_v2  ;;  %v2123_v45 = vpop.f32.mrb[3].mxu1  ;;  %v2011_v2 = vpop.permute.xlu1 %2010  ;;  %vm3116_vm13 = vcmp.ge.f32.partialorder %v3100_v42, 0.0 }
 0x452   : > { %v2184_v36 = vadd.f32 %v2123_v45, %v2039_v34  ;;  %v2042_v34 = vmul.f32 %v1981_v17, %v1946_v44  ;;  %v1942_v17 = vld [vmem:[#allocation4 + $0x80] sm:$0xff]  ;;  %v3134_v39 = vmul.f32 0.01, %v3102_v62  ;;  %v3148_v51 = vsel %vm3116_vm13, %v3100_v42, %v3132_v57  ;;  %vm9350_vm13 = vmmov %vm9346_vm9 }
 0x453   : > { %v7818_v59 = vpop.permute.xlu0 %3072  ;;  %vm3118_vm8 = vcmp.ge.f32.partialorder %v3102_v62, 0.0 }
 0x454   : > { %2200 = vst.msk [vmem:[#allocation4 + $0x88] sm:$0xff] %vm9342_vm11, %v2184_v36  ;;  %3198 = vmax.xlane.f32.xlu0 %v7831_v3  ;;  %vm9347_vm11 = vcmp.gt.f32.partialorder %v6415_v52, 0.0  ;;  %v3150_v43 = vsel %vm3118_vm8, %v3102_v62, %v3134_v39  ;;  %vm9352_vm8 = vmmov %vm9346_vm9  ;;  %v1949_v39 = vld [vmem:[#allocation4 + $0xb8] sm:$0xff] }
 0x455   : > { %v7839_v44 = vsel %vm9347_vm11, %v3146_v7, -1e+30  ;;  %v2021_v8 = vpop.permute.xlu1 %2020  ;;  %vm9351_vm11 = vcmp.gt.f32.partialorder %v6463_v33, 0.0 }
 0x456   : > { %v5138_v60 = vpop.f32.mrb[4].mxu1  ;;  %v7853_v62 = vsel %vm9351_vm11, %v3150_v43, -1e+30 }
 0x457   : > { %v7827_v11 = vpop.permute.xlu0 %3080  ;;  %v2189_v18 = vadd.f32 %v5138_v60, %v2044_v32  ;;  %v2136_v29 = vpop.f32.mrb[5].mxu1  ;;  %v2048_v60 = vmul.f32 %v2011_v2, %v1952_v4  ;;  %v1947_v4 = vld [vmem:[#allocation4 + $0xa8] sm:$0xff] }
 0x458   : > { %v2187_v36 = vadd.f32 %v2136_v29, %v2042_v34  ;;  %v5139_v45 = vpop.f32.mrb[6].mxu1  ;;  %3202 = vmax.xlane.f32.xlu0 %v7839_v44  ;;  %v2046_v29 = vmul.f32 %v2001_v22, %v1950_v26  ;;  %v1956_v22 = vld [vmem:[#allocation4 + $0xf0] sm:$0xff] }
 0x459   : > { %2205 = vst.msk [vmem:[#allocation4 + $0xb0] sm:$0xff] %vm9345_vm12, %v2189_v18  ;;  %v2139_v24 = vpop.f32.mrb[7].mxu1  ;;  %v1945_v18 = vld [vmem:[#allocation4 + $0x98] sm:$0xff]  ;;  %vm9349_vm12 = vmmov %vm9346_vm9 }
 0x45a   : > { %2203 = vst.msk [vmem:[#allocation4 + $0xa0] sm:$0xff] %vm9346_vm9, %v2187_v36  ;;  %v7844_v36 = vsel %vm9348_vm6, %v3148_v51, -1e+30  ;;  %vm9353_vm6 = vmmov %vm9352_vm8 }
 0x45b   : > { %vm9357_vm11 = vmmov %vm9353_vm6 }
 0x45c   : > { %v1961_v32 = vpop.permute.xlu0 %1960  ;;  %3206 = vmax.xlane.f32.xlu0 %v7844_v36 }
 0x45d   : > { %v2038_v34 = vmul.f32 %v1961_v32, %v1942_v17 }
 0x45e   : > { %v5142_v47 = vpop.f32.mrb[8].mxu1 }
 0x45f   : > { %v2183_v3 = vadd.f32 %v2120_v55, %v2038_v34  ;;  %v2193_v7 = vadd.f32 %v5142_v47, %v2048_v60  ;;  %v2152_v1 = vpop.f32.mrb[9].mxu1  ;;  %v2031_v55 = vpop.permute.xlu1 %2030 }
 0x460   : > { %v1976_v52 = vpop.permute.xlu0 %1975  ;;  %v2191_v42 = vadd.f32 %v2152_v1, %v2046_v29  ;;  %v5143_v17 = vpop.f32.mrb[10].mxu1  ;;  %v2052_v26 = vmul.f32 %v2031_v55, %v1956_v22  ;;  %3210 = vmax.xlane.f32.xlu0 %v7853_v62 }
 0x461   : > { %2199 = vst.msk [vmem:[#allocation4 + $0x80] sm:$0xff] %vm9349_vm12, %v2183_v3  ;;  %v2041_v57 = vmul.f32 %v1976_v52, %v1945_v18  ;;  %v2155_v2 = vpop.f32.mrb[11].mxu1  ;;  %v1954_v3 = vld [vmem:[#allocation4 + $0xe0] sm:$0xff]  ;;  %vm9354_vm12 = vmmov %vm9353_vm6 }
 0x462   : > { %2209 = vst.msk [vmem:[#allocation4 + $0xd0] sm:$0xff] %vm9350_vm13, %v2193_v7  ;;  %v2050_v32 = vmul.f32 %v2021_v8, %v1954_v3  ;;  %vm9355_vm13 = vmmov %vm9353_vm6  ;;  %v1953_v8 = vld [vmem:[#allocation4 + $0xd8] sm:$0xff] }
 0x463   : > { %2207 = vst.msk [vmem:[#allocation4 + $0xc0] sm:$0xff] %vm9346_vm9, %v2191_v42  ;;  %v2186_v47 = vadd.f32 %v7810_v46, %v2041_v57  ;;  %v1951_v57 = vld [vmem:[#allocation4 + $0xc8] sm:$0xff]  ;;  %vm9356_vm9 = vmmov %vm9353_vm6 }
 0x464   : > { %v1986_v1 = vpop.permute.xlu0 %1985 }
 0x465   : > { %2202 = vst.msk [vmem:[#allocation4 + $0x98] sm:$0xff] %vm9352_vm8, %v2186_v47  ;;  %v2043_v52 = vmul.f32 %v1986_v1, %v1947_v4  ;;  %v1955_v1 = vld [vmem:[#allocation4 + $0xe8] sm:$0xff]  ;;  %vm9358_vm8 = vmmov %vm9353_vm6 }
 0x466   : > { %v5146_v34 = vpop.f32.mrb[12].mxu1 }
 0x467   : > { %v2188_v51 = vadd.f32 %v2139_v24, %v2043_v52  ;;  %v2197_v60 = vadd.f32 %v5146_v34, %v2052_v26  ;;  %v2168_v18 = vpop.f32.mrb[13].mxu1 }
 0x468   : > { %v1996_v29 = vpop.permute.xlu0 %1995  ;;  %v2195_v46 = vadd.f32 %v2168_v18, %v2050_v32  ;;  %v5147_v7 = vpop.f32.mrb[14].mxu1  ;;  %v1957_v32 = vld [vmem:[#allocation4 + $0xf8] sm:$0xff] }
 0x469   : > { %2204 = vst.msk [vmem:[#allocation4 + $0xa8] sm:$0xff] %vm9353_vm6, %v2188_v51  ;;  %v2045_v43 = vmul.f32 %v1996_v29, %v1949_v39  ;;  %v2171_v42 = vpop.f32.mrb[15].mxu1 }
 0x46a   : > { %2213 = vst.msk [vmem:[#allocation4 + $0xf0] sm:$0xff] %vm9354_vm12, %v2197_v60  ;;  %vm9359_vm12 = vmmov %vm9353_vm6 }
 0x46b   : > { %2211 = vst.msk [vmem:[#allocation4 + $0xe0] sm:$0xff] %vm9355_vm13, %v2195_v46  ;;  %v2190_v4 = vadd.f32 %v5139_v45, %v2045_v43 }
 0x46c   : > { %v2006_v22 = vpop.permute.xlu0 %2005 }
 0x46d   : > { %2206 = vst.msk [vmem:[#allocation4 + $0xb8] sm:$0xff] %vm9356_vm9, %v2190_v4  ;;  %v2047_v24 = vmul.f32 %v2006_v22, %v1951_v57 }
 0x46f   : > { %v2192_v55 = vadd.f32 %v2155_v2, %v2047_v24 }
 0x470   : > { %v2016_v47 = vpop.permute.xlu0 %2015 }
 0x471   : > { %2208 = vst.msk [vmem:[#allocation4 + $0xc8] sm:$0xff] %vm9357_vm11, %v2192_v55  ;;  %v2049_v3 = vmul.f32 %v2016_v47, %v1953_v8  ;;  %vm9361_vm11 = vcmp.gt.f32.partialorder %v6344_v53, 0.0 }
 0x473   : > { %v2194_v52 = vadd.f32 %v5143_v17, %v2049_v3 }
 0x474   : > { %v2026_v26 = vpop.permute.xlu0 %2025 }
 0x475   : > { %2210 = vst.msk [vmem:[#allocation4 + $0xd8] sm:$0xff] %vm9358_vm8, %v2194_v52  ;;  %v2051_v39 = vmul.f32 %v2026_v26, %v1955_v1  ;;  %v5580_v1 = vld [vmem:[%s5895_s11 + $0x40] sm:$0xff]  ;;  %v5581_v52 = vld [vmem:[%s5895_s11 + $0x68] sm:$0xff]  ;;  %v5582_v26 = vld [vmem:[%s5895_s11 + $0x78] sm:$0xff] }
 0x477   : > { %v2196_v51 = vadd.f32 %v2171_v42, %v2051_v39  ;;  %v3092_v39 = vadd.f32 %v7790_v13, %v7793_v30  ;;  %v9362_v30 = vld [vmem:[#allocation8_spill] sm:$0xff] }
 0x478   : > { %v2036_v34 = vpop.permute.xlu0 %2035 }
 0x479   : > { %2212 = vst.msk [vmem:[#allocation4 + $0xe8] sm:$0xff] %vm9353_vm6, %v2196_v51  ;;  %v2053_v45 = vmul.f32 %v2036_v34, %v1957_v32  ;;  %v3124_v32 = vmul.f32 0.01, %v3092_v39  ;;  %v3095_v51 = vadd.f32 %v7790_v13, %v7800_v14  ;;  %vm3108_vm13 = vcmp.ge.f32.partialorder %v3092_v39, 0.0 }
 0x47a   : > { %vm9363_vm6 = vcmp.gt.f32.partialorder %v9362_v30, 0.0 }
 0x47b   : > { %v2198_v60 = vadd.f32 %v5147_v7, %v2053_v45  ;;  %v3127_v34 = vmul.f32 0.01, %v3095_v51  ;;  %v3097_v45 = vadd.f32 %v7790_v13, %v7802_v63  ;;  %vm3111_vm9 = vcmp.ge.f32.partialorder %v3095_v51, 0.0 }
 0x47d   : > { %2214 = vst.msk [vmem:[#allocation4 + $0xf8] sm:$0xff] %vm9359_vm12, %v2198_v60  ;;  %v3140_v60 = vsel %vm3108_vm13, %v3092_v39, %v3124_v32  ;;  %vm3113_vm8 = vcmp.ge.f32.partialorder %v3097_v45, 0.0  ;;  %vm9364_vm12 = vcmp.gt.f32.partialorder %v6387_v21, 0.0  ;;  %vm9367_vm13 = vcmask 7168   ;;  %v7942_v39 = vld [vmem:[#allocation2 + $0x1c8] sm:$0xff] }
 0x47e   : > { %9380 = vst [vmem:[#allocation22_spill] sm:$0xff] %v7942_v39 }
 0x480   : > { %v2495_v2 = vpop.permute.xlu1 %2494 }
 0x481   : > { %v2572_v18 = vsub.f32 %v7507_v19, %v2495_v2  ;;  %v7894_v2 = vsel %vm9361_vm11, %v3140_v60, -1e+30 }
 0x483   : > { %v2588_v29 = vmul.f32 1.442695, %v2572_v18  ;;  %v3129_v18 = vmul.f32 0.01, %v3097_v45 }
 0x484   : > { %v2505_v46 = vpop.permute.xlu1 %2504  ;;  %v2500_v43 = vpop.permute.xlu0 %2499 }
 0x485   : > { %5429 = vpow2.f32 %v2588_v29  ;;  %v2574_v17 = vsub.f32 %v7514_v56, %v2505_v46  ;;  %v2573_v57 = vsub.f32 %v7518_v31, %v2500_v43  ;;  %v3145_v14 = vsel %vm3113_vm8, %v3097_v45, %v3129_v18  ;;  %v7907_v46 = vld [vmem:[#allocation2 + $0x180] sm:$0xff] }
 0x486   : > { %v7904_v63 = vsel %vm9364_vm12, %v3145_v14, -1e+30  ;;  %9365 = vst [vmem:[#allocation15_spill] sm:$0xff] %v7907_v46  ;;  %v9386_v18 = vsub.f32 %v7663_v58, %v7666_v38  ;;  %v3103_v58 = vadd.f32 %v7790_v13, %v7818_v59 }
 0x487   : > { %v2590_v4 = vmul.f32 1.442695, %v2573_v57  ;;  %v2592_v42 = vmul.f32 1.442695, %v2574_v17  ;;  %v7914_v57 = vld [vmem:[#allocation2 + $0x190] sm:$0xff] }
 0x488   : > { %v2510_v22 = vpop.permute.xlu1 %2509  ;;  %9368 = vst [vmem:[#allocation11_spill] sm:$0xff] %v7914_v57 }
 0x489   : > { %v2575_v24 = vsub.f32 %v7526_v20, %v2510_v22  ;;  %5431 = vpow2.f32 %v2590_v4  ;;  %v7919_v22 = vld [vmem:[#allocation2 + $0x198] sm:$0xff] }
 0x48a   : > { %5433 = vpow2.f32 %v2592_v42  ;;  %9370 = vst [vmem:[#allocation14_spill] sm:$0xff] %v7919_v22 }
 0x48b   : > { %v2594_v7 = vmul.f32 1.442695, %v2575_v24 }
 0x48d   : > { %5435 = vpow2.f32 %v2594_v7 }
 0x48f   : > { %v5430_v19 = vpop.eup %5429 }
 0x490   : > { %v2620_v8 = vsel %vm559_vm4, %v5430_v19, 0.0 }
 0x491   : > { %2669 = vadd.xlane.f32.xlu1 %v2620_v8 }
 0x493   : > { %v7871_v56 = vpop.eup %5431 }
 0x494   : > { %v4969_v31 = vpack.c.bf16 %v7871_v56, %v5430_v19  ;;  %v7874_v55 = vpop.eup %5433  ;;  %v7928_v19 = vld [vmem:[#allocation2 + $0x1a8] sm:$0xff] }
 0x495   : > { %9374 = vst [vmem:[#allocation17_spill] sm:$0xff] %v7928_v19 }
 0x496   : > { %5164 = vmatprep.mubr.msk.bf16.mxu0 %vm7009_vm10, %v4969_v31 }
 0x497   : > { %v7876_v47 = vpop.eup %5435 }
 0x4a2   : > { %3056 = vperm.xlu1 %5290, %v5580_v1   ;;  %v7935_v1 = vld [vmem:[#allocation2 + $0x1b8] sm:$0xff] }
 0x4a3   : > { %9377 = vst [vmem:[#allocation20_spill] sm:$0xff] %v7935_v1 }
 0x4a6   : > { %3076 = vperm.xlu1 %5290, %v5581_v52  }
 0x4aa   : > { %3084 = vperm.xlu1 %5290, %v5582_v26  }
 0x4ae   : > { %5292 = vset.pattern.permute.xlu1 %v9296_v15  ;;  %v3143_v15 = vsel %vm3111_vm9, %v3095_v51, %v3127_v34  ;;  %vm9371_vm9 = vmmov %vm9367_vm13  ;;  %v7949_v34 = vld [vmem:[#allocation2 + $0x1d8] sm:$0xff] }
 0x4af   : > { %v7899_v29 = vsel %vm9363_vm6, %v3143_v15, -1e+30  ;;  %vm9373_vm11 = vmmov %vm9371_vm9  ;;  %9383 = vst [vmem:[#allocation24_spill] sm:$0xff] %v7949_v34  ;;  %v2460_v15 = vmul.f32 1.442695, %v9386_v18 }
 0x4b0   : > { %vm9376_vm8 = vmmov %vm9371_vm9 }
 0x4b1   : > { %vm9379_vm6 = vmmov %vm9376_vm8  ;;  %5437 = vpow2.f32 %v2460_v15 }
 0x4b2   : > { %vm9382_vm12 = vmmov %vm9379_vm6 }
 0x4bb   : > { %v3189_v43 = vpop.xlane.xlu0 %3188  ;;  %v7959_v14 = vpop.eup %5437 }
 0x4bc   : > { %v7910_v17 = vmax.f32 %v7907_v46, %v3189_v43  ;;  %v2637_v43 = vld [vmem:[#allocation3 + $0x100] sm:$0xff] }
 0x4be   : > { %9366 = vst [vmem:[#allocation12_spill] sm:$0xff] %v7910_v17  ;;  %3799 = vst.msk [vmem:[#allocation2 + $0x180] sm:$0xff] %vm9367_vm13, %v7910_v17 }
 0x4bf   : > { %vm9385_vm13 = vmmov %vm9379_vm6 }
 0x4c3   : > { %v3193_v4 = vpop.xlane.xlu0 %3192 }
 0x4c4   : > { %v7917_v42 = vmax.f32 %v7914_v57, %v3193_v4  ;;  %v2653_v4 = vmul.f32 %v7959_v14, %v2637_v43  ;;  %v8091_v57 = vld [vmem:[#allocation2 + $0x1d0] sm:$0xff] }
 0x4c6   : > { %9369 = vst [vmem:[#allocation13_spill] sm:$0xff] %v7917_v42  ;;  %3801 = vst.msk [vmem:[#allocation2 + $0x190] sm:$0xff] %vm9371_vm9, %v7917_v42 }
 0x4c7   : > { %vm9387_vm9 = vmmov %vm9379_vm6 }
 0x4ce   : > { %3190 = vmax.xlane.f32.xlu1 %v7894_v2 }
 0x4d2   : > { %3196 = vmax.xlane.f32.xlu1 %v7899_v29 }
 0x4d6   : > { %3200 = vmax.xlane.f32.xlu1 %v7904_v63 }
 0x4dd   : > { %v3195_v24 = vpop.xlane.xlu0 %3194 }
 0x4de   : > { %v7924_v7 = vmax.f32 %v7919_v22, %v3195_v24  ;;  %v9411_v22 = vld [vmem:[#allocation34_spill] sm:$0xff] }
 0x4df   : > { %9419 = vst [vmem:[#allocation34_spill] sm:$0xff] %v8091_v57 }
 0x4e0   : > { %9372 = vst [vmem:[#allocation16_spill] sm:$0xff] %v7924_v7  ;;  %3802 = vst.msk [vmem:[#allocation2 + $0x198] sm:$0xff] %vm9373_vm11, %v7924_v7 }
 0x4e1   : > { %v3199_v8 = vpop.xlane.xlu0 %3198 }
 0x4e2   : > { %v7931_v31 = vmax.f32 %v7928_v19, %v3199_v8  ;;  %v5588_v19 = vld [vmem:[%s5885_s30 + $0x28] sm:$0xff]  }
 0x4e4   : > { %9375 = vst [vmem:[#allocation19_spill] sm:$0xff] %v7931_v31  ;;  %3804 = vst.msk [vmem:[#allocation2 + $0x1a8] sm:$0xff] %vm9376_vm8, %v7931_v31 }
 0x4e5   : > { %v3203_v52 = vpop.xlane.xlu0 %3202 }
 0x4e6   : > { %v7938_v26 = vmax.f32 %v7935_v1, %v3203_v52  ;;  %v3101_v52 = vadd.f32 %v7790_v13, %v7807_v27  ;;  %v5585_v1 = vld [vmem:[%s5885_s30 + $0x18] sm:$0xff]  }
 0x4e8   : > { %9378 = vst [vmem:[#allocation18_spill] sm:$0xff] %v7938_v26  ;;  %3806 = vst.msk [vmem:[#allocation2 + $0x1b8] sm:$0xff] %vm9379_vm6, %v7938_v26  ;;  %v3133_v38 = vmul.f32 0.01, %v3101_v52  ;;  %vm3117_vm8 = vcmp.ge.f32.partialorder %v3101_v52, 0.0  ;;  %vm9388_vm6 = vcmp.gt.f32.partialorder %v6399_v40, 0.0 }
 0x4e9   : > { %v3207_v32 = vpop.xlane.xlu0 %3206 }
 0x4ea   : > { %v7945_v51 = vmax.f32 %v7942_v39, %v3207_v32  ;;  %v3149_v59 = vsel %vm3117_vm8, %v3101_v52, %v3133_v38 }
 0x4ec   : > { %9381 = vst [vmem:[#allocation21_spill] sm:$0xff] %v7945_v51  ;;  %3808 = vst.msk [vmem:[#allocation2 + $0x1c8] sm:$0xff] %vm9382_vm12, %v7945_v51 }
 0x4ed   : > { %v3211_v45 = vpop.xlane.xlu0 %3210 }
 0x4ee   : > { %v7952_v60 = vmax.f32 %v7949_v34, %v3211_v45 }
 0x4f0   : > { %9384 = vst [vmem:[#allocation23_spill] sm:$0xff] %v7952_v60  ;;  %3810 = vst.msk [vmem:[#allocation2 + $0x1d8] sm:$0xff] %vm9385_vm13, %v7952_v60  ;;  %vm3119_vm13 = vcmp.ge.f32.partialorder %v3103_v58, 0.0 }
 0x51e   : > { %v2670_v24 = vpop.xlane.xlu1 %2669 }
 0x51f   : > { %v2701_v8 = vadd.f32 %v2670_v24, %v2653_v4  ;;  %v3135_v4 = vmul.f32 0.01, %v3103_v58  ;;  %v3105_v24 = vadd.f32 %v7790_v13, %v7827_v11 }
 0x521   : > { %2717 = vst.msk [vmem:[#allocation3 + $0x100] sm:$0xff] %vm9387_vm9, %v2701_v8  ;;  %vm9389_vm9 = vcmp.gt.f32.partialorder %v6417_v54, 0.0  ;;  %v3151_v52 = vsel %vm3119_vm13, %v3103_v58, %v3135_v4  ;;  %vm9393_vm13 = vcmp.gt.f32.partialorder %v9277_v0, 0.0 }
 0x522   : > { %v3057_v32 = vpop.permute.xlu1 %3056 }
 0x523   : > { %v3099_v45 = vadd.f32 %v7790_v13, %v3057_v32 }
 0x525   : > { %v3131_v18 = vmul.f32 0.01, %v3099_v45  ;;  %vm3115_vm11 = vcmp.ge.f32.partialorder %v3099_v45, 0.0 }
 0x526   : > { %v3077_v15 = vpop.permute.xlu1 %3076 }
 0x527   : > { %v3104_v43 = vadd.f32 %v7790_v13, %v3077_v15  ;;  %v3147_v3 = vsel %vm3115_vm11, %v3099_v45, %v3131_v18  ;;  %v7979_v45 = vsel %vm9389_vm9, %v3149_v59, -1e+30  ;;  %vm9390_vm11 = vcmp.gt.f32.partialorder %v9274_v9, 0.0 }
 0x528   : > { %v7971_v27 = vsel %vm9388_vm6, %v3147_v3, -1e+30  ;;  %v3137_v18 = vmul.f32 0.01, %v3105_v24  ;;  %vm3121_vm6 = vcmp.ge.f32.partialorder %v3105_v24, 0.0  ;;  %vm9392_vm9 = vcmp.gt.f32.partialorder %v6447_v16, 0.0 }
 0x529   : > { %v3136_v8 = vmul.f32 0.01, %v3104_v43  ;;  %3204 = vmax.xlane.f32.xlu1 %v7971_v27  ;;  %vm3120_vm12 = vcmp.ge.f32.partialorder %v3104_v43, 0.0  ;;  %v7993_v15 = vsel %vm9392_vm9, %v3151_v52, -1e+30 }
 0x52a   : > { %v3085_v32 = vpop.permute.xlu1 %3084 }
 0x52b   : > { %v3106_v34 = vadd.f32 %v7790_v13, %v3085_v32  ;;  %v3152_v39 = vsel %vm3120_vm12, %v3104_v43, %v3136_v8  ;;  %vm9391_vm12 = vcmp.gt.f32.partialorder %v9280_v48, 0.0  ;;  %v2622_v43 = vsel %vm561_vm5, %v7874_v55, 0.0  ;;  %v8026_v32 = vld [vmem:[#allocation2 + $0x1a0] sm:$0xff] }
 0x52c   : > { %v7983_v3 = vsel %vm9390_vm11, %v3152_v39, -1e+30  ;;  %v3153_v39 = vsel %vm3121_vm6, %v3105_v24, %v3137_v18  ;;  %vm9394_vm11 = vcmp.gt.f32.partialorder %v6344_v53, 0.0  ;;  %v5583_v24 = vld [vmem:[%s5885_s30] sm:$0xff]   ;;  %9398 = vst [vmem:[#allocation27_spill] sm:$0xff] %v8026_v32  ;;  %vm9399_vm6 = vcmask 7168  }
 0x52d   : > { %v3138_v11 = vmul.f32 0.01, %v3106_v34  ;;  %3208 = vmax.xlane.f32.xlu1 %v7979_v45  ;;  %3214 = vmax.xlane.f32.xlu0 %v7983_v3  ;;  %vm3122_vm8 = vcmp.ge.f32.partialorder %v3106_v34, 0.0  ;;  %v2621_v58 = vsel %vm9394_vm11, %v7871_v56, 0.0  ;;  %v8018_v56 = vld [vmem:[#allocation2 + $0x188] sm:$0xff]  ;;  %vm9406_vm9 = vmmov %vm9399_vm6  ;;  %v5587_v18 = vld [vmem:[%s5885_s30 + $0x10] sm:$0xff]  }
 0x52e   : > { %9396 = vst [vmem:[#allocation26_spill] sm:$0xff] %v8018_v56  ;;  %vm9426_vm11 = vmmov %vm9399_vm6 }
 0x52f   : > { %v3154_v38 = vsel %vm3122_vm8, %v3106_v34, %v3138_v11  ;;  %v8002_v34 = vsel %vm9393_vm13, %v3153_v39, -1e+30  ;;  %vm9395_vm8 = vcmp.gt.f32.partialorder %v6369_v12, 0.0  ;;  %v5584_v11 = vld [vmem:[%s5885_s30 + $0x8] sm:$0xff]   ;;  %v8038_v39 = vld [vmem:[#allocation2 + $0x1b0] sm:$0xff]  ;;  %vm9421_vm13 = vmmov %vm9399_vm6 }
 0x530   : > { %v7989_v13 = vsel %vm9391_vm12, %v3154_v38, -1e+30  ;;  %v2623_v4 = vsel %vm9395_vm8, %v7876_v47, 0.0  ;;  %9401 = vst [vmem:[#allocation8_spill] sm:$0xff] %v8038_v39  ;;  %vm9403_vm12 = vmmov %vm9399_vm6 }
 0x531   : > { %3218 = vmax.xlane.f32.xlu0 %v7989_v13  ;;  %3212 = vmax.xlane.f32.xlu1 %v7993_v15  ;;  %vm9427_vm8 = vmmov %vm9399_vm6 }
 0x535   : > { %2673 = vadd.xlane.f32.xlu0 %v2622_v43  ;;  %3216 = vmax.xlane.f32.xlu1 %v8002_v34  ;;  %v9402_v43 = vld [vmem:[#allocation54_spill] sm:$0xff] }
 0x539   : > { %2671 = vadd.xlane.f32.xlu1 %v2621_v58  ;;  %v9407_v58 = vld [vmem:[#allocation58_spill] sm:$0xff] }
 0x53d   : > { %2675 = vadd.xlane.f32.xlu1 %v2623_v4 }
 0x54b   : > { %2539 = vperm.xlu0 %5291, %v7747_v28  }
 0x54e   : > { %2514 = vperm.xlu1 %5292, %v7698_v61  }
 0x54f   : > { %2549 = vperm.xlu0 %5291, %v7761_v35  }
 0x552   : > { %2519 = vperm.xlu1 %5292, %v7718_v10  }
 0x553   : > { %2559 = vperm.xlu0 %5291, %v7775_v49  }
 0x556   : > { %2524 = vperm.xlu1 %5292, %v7715_v37  }
 0x557   : > { %2569 = vperm.xlu0 %5291, %v7784_v41  }
 0x55a   : > { %2529 = vperm.xlu1 %5292, %v7733_v25  }
 0x55b   : > { %2854 = vrot.lane.b32.xlu0 %v5583_v24, %s5784_s24  ;;  %v3191_v8 = vpop.xlane.xlu1 %3190 }
 0x55c   : > { %v8024_v59 = vmax.f32 %v8018_v56, %v3191_v8 }
 0x55e   : > { %9397 = vst [vmem:[#allocation25_spill] sm:$0xff] %v8024_v59  ;;  %2534 = vperm.xlu1 %5292, %v7730_v5   ;;  %3800 = vst.msk [vmem:[#allocation2 + $0x188] sm:$0xff] %vm9399_vm6, %v8024_v59 }
 0x55f   : > { %3648 = vrot.lane.b32.xlu0 %v5584_v11, %s5785_s26  ;;  %v3197_v52 = vpop.xlane.xlu1 %3196 }
 0x560   : > { %v8036_v38 = vmax.f32 %v8026_v32, %v3197_v52  ;;  %v9405_v52 = vld [vmem:[#allocation57_spill] sm:$0xff] }
 0x562   : > { %9400 = vst [vmem:[#allocation62_spill] sm:$0xff] %v8036_v38  ;;  %2544 = vperm.xlu1 %5292, %v9402_v43   ;;  %3803 = vst.msk [vmem:[#allocation2 + $0x1a0] sm:$0xff] %vm9403_vm12, %v8036_v38 }
 0x563   : > { %3291 = vperm.xlu0 %5291, %v8024_v59   ;;  %v3201_v4 = vpop.xlane.xlu1 %3200  ;;  %vm9432_vm12 = vmmov %vm9399_vm6  ;;  %v9441_v59 = vld [vmem:[#allocation29_spill] sm:$0xff] }
 0x564   : > { %v8047_v8 = vmax.f32 %v8038_v39, %v3201_v4  ;;  %v5586_v4 = vld [vmem:[%s5885_s30 + $0x20] sm:$0xff]  }
 0x566   : > { %9404 = vst [vmem:[#allocation54_spill] sm:$0xff] %v8047_v8  ;;  %2554 = vperm.xlu1 %5292, %v9405_v52   ;;  %3805 = vst.msk [vmem:[#allocation2 + $0x1b0] sm:$0xff] %vm9406_vm9, %v8047_v8 }
 0x567   : > { %3301 = vperm.xlu0 %5291, %v7924_v7   ;;  %v9412_v7 = vld [vmem:[#allocation37_spill] sm:$0xff]  ;;  %vm9435_vm9 = vmmov %vm9399_vm6 }
 0x56a   : > { %2564 = vperm.xlu1 %5292, %v9407_v58   ;;  %v9444_v58 = vld [vmem:[#allocation35_spill] sm:$0xff] }
 0x56b   : > { %2860 = vrot.lane.b32.xlu0 %v5585_v1, %s5784_s24 }
 0x56e   : > { %3646 = vrot.lane.b32.xlu1 %v5583_v24, %s5785_s26  ;;  %v9408_v24 = vld [vmem:[#allocation31_spill] sm:$0xff] }
 0x56f   : > { %3306 = vperm.xlu0 %5291, %v8036_v38   ;;  %v9413_v38 = vsub.f32 %v9411_v22, %v9412_v7 }
 0x572   : > { %2856 = vrot.lane.b32.xlu1 %v5584_v11, %s5784_s24  ;;  %v9409_v11 = vld [vmem:[#allocation33_spill] sm:$0xff] }
 0x573   : > { %2862 = vrot.lane.b32.xlu0 %v5586_v4, %s5784_s24 }
 0x576   : > { %3286 = vperm.xlu1 %5292, %v7910_v17  }
 0x577   : > { %3321 = vperm.xlu0 %5291, %v7938_v26   ;;  %v9410_v26 = vsub.f32 %v9408_v24, %v9409_v11  ;;  %v8108_v24 = vld [vmem:[#allocation2 + $0x1f8] sm:$0xff] }
 0x578   : > { %9425 = vst [vmem:[#allocation74_spill] sm:$0xff] %v8108_v24 }
 0x579   : > { %v2464_v39 = vmul.f32 1.442695, %v9410_v26  ;;  %v8093_v26 = vld [vmem:[#allocation2 + $0x1e8] sm:$0xff] }
 0x57a   : > { %2858 = vrot.lane.b32.xlu1 %v5587_v18, %s5784_s24  ;;  %9420 = vst [vmem:[#allocation37_spill] sm:$0xff] %v8093_v26 }
 0x57b   : > { %2864 = vrot.lane.b32.xlu0 %v5588_v19, %s5784_s24  ;;  %5439 = vpow2.f32 %v2464_v39  ;;  %v8106_v39 = vld [vmem:[#allocation2 + $0x1e0] sm:$0xff] }
 0x57c   : > { %9424 = vst [vmem:[#allocation73_spill] sm:$0xff] %v8106_v39 }
 0x57e   : > { %3296 = vperm.xlu1 %5292, %v7917_v42  }
 0x582   : > { %3650 = vrot.lane.b32.xlu1 %v5587_v18, %s5785_s26  ;;  %v2462_v18 = vmul.f32 1.442695, %v9413_v38 }
 0x584   : > { %5441 = vpow2.f32 %v2462_v18  ;;  %v8129_v18 = vld [vmem:[#allocation2 + $0x1f0] sm:$0xff] }
 0x585   : > { %9431 = vst [vmem:[#allocation78_spill] sm:$0xff] %v8129_v18 }
 0x586   : > { %3652 = vrot.lane.b32.xlu1 %v5585_v1, %s5785_s26  ;;  %v8083_v1 = vld [vmem:[#allocation2 + $0x1c0] sm:$0xff] }
 0x587   : > { %9414 = vst [vmem:[#allocation31_spill] sm:$0xff] %v8083_v1 }
 0x58a   : > { %3311 = vperm.xlu1 %5292, %v7931_v31  }
 0x58e   : > { %3316 = vperm.xlu1 %5292, %v8047_v8  }
 0x592   : > { %3654 = vrot.lane.b32.xlu1 %v5586_v4, %s5785_s26  ;;  %v9416_v4 = vld [vmem:[#allocation36_spill] sm:$0xff] }
 0x596   : > { %3656 = vrot.lane.b32.xlu1 %v5588_v19, %s5785_s26  ;;  %v9417_v19 = vld [vmem:[#allocation39_spill] sm:$0xff] }
 0x597   : > { %v9418_v32 = vsub.f32 %v9416_v4, %v9417_v19  ;;  %v5589_v4 = vld [vmem:[%s5885_s30 + $0x30] sm:$0xff]  }
 0x59a   : > { %3331 = vperm.xlu1 %5292, %v7945_v51   ;;  %v2466_v51 = vmul.f32 1.442695, %v9418_v32 }
 0x59c   : > { %5443 = vpow2.f32 %v2466_v51  ;;  %v8121_v51 = vpop.eup %5439 }
 0x59d   : > { %9428 = vst [vmem:[#allocation75_spill] sm:$0xff] %v8121_v51 }
 0x5b6   : > { %v3205_v31 = vpop.xlane.xlu1 %3204 }
 0x5b7   : > { %v8086_v8 = vmax.f32 %v8083_v1, %v3205_v31 }
 0x5b9   : > { %9415 = vst [vmem:[#allocation33_spill] sm:$0xff] %v8086_v8  ;;  %3807 = vst.msk [vmem:[#allocation2 + $0x1c0] sm:$0xff] %vm9421_vm13, %v8086_v8  ;;  %3326 = vperm.xlu0 %5291, %v8086_v8  }
 0x5ba   : > { %v3209_v7 = vpop.xlane.xlu1 %3208  ;;  %v3215_v31 = vpop.xlane.xlu0 %3214  ;;  %vm9436_vm13 = vmmov %vm9399_vm6 }
 0x5bb   : > { %v8101_v38 = vmax.f32 %v8091_v57, %v3209_v7  ;;  %v8104_v32 = vmax.f32 %v8093_v26, %v3215_v31  ;;  %v2639_v31 = vld [vmem:[#allocation3 + $0x110] sm:$0xff] }
 0x5bd   : > { %9422 = vst [vmem:[#allocation36_spill] sm:$0xff] %v8101_v38  ;;  %9423 = vst [vmem:[#allocation39_spill] sm:$0xff] %v8104_v32  ;;  %2866 = vrot.lane.b32.xlu0 %v5589_v4, %s5784_s24  ;;  %3336 = vperm.xlu1 %5292, %v8101_v38  }
 0x5be   : > { %3809 = vst.msk [vmem:[#allocation2 + $0x1d0] sm:$0xff] %vm9426_vm11, %v8101_v38  ;;  %v3213_v19 = vpop.xlane.xlu1 %3212  ;;  %v3219_v7 = vpop.xlane.xlu0 %3218  ;;  %vm9438_vm11 = vmmov %vm9399_vm6 }
 0x5bf   : > { %3812 = vst.msk [vmem:[#allocation2 + $0x1e8] sm:$0xff] %vm9427_vm8, %v8104_v32  ;;  %v8124_v11 = vmax.f32 %v8106_v39, %v3213_v19  ;;  %v8127_v22 = vmax.f32 %v8108_v24, %v3219_v7  ;;  %v2655_v19 = vmul.f32 %v8121_v51, %v2639_v31  ;;  %v8142_v7 = vpop.eup %5441  ;;  %v2638_v39 = vld [vmem:[#allocation3 + $0x108] sm:$0xff]  ;;  %vm9439_vm8 = vmmov %vm9399_vm6 }
 0x5c0   : > { %9433 = vst [vmem:[#allocation79_spill] sm:$0xff] %v8142_v7  ;;  %v2654_v31 = vmul.f32 %v8142_v7, %v2638_v39  ;;  %v8156_v24 = vpop.eup %5443 }
 0x5c1   : > { %9429 = vst [vmem:[#allocation76_spill] sm:$0xff] %v8124_v11  ;;  %9430 = vst [vmem:[#allocation77_spill] sm:$0xff] %v8127_v22  ;;  %3658 = vrot.lane.b32.xlu1 %v5589_v4, %s5785_s26  ;;  %3341 = vperm.xlu0 %5291, %v7952_v60   ;;  %v5590_v4 = vld [vmem:[%s5885_s30 + $0x38] sm:$0xff]  }
 0x5c2   : > { %3811 = vst.msk [vmem:[#allocation2 + $0x1e0] sm:$0xff] %vm9399_vm6, %v8124_v11  ;;  %v3217_v57 = vpop.xlane.xlu1 %3216  ;;  %v2674_v26 = vpop.xlane.xlu0 %2673  ;;  %9437 = vst [vmem:[#allocation81_spill] sm:$0xff] %v8156_v24  ;;  %v2640_v60 = vld [vmem:[#allocation3 + $0x118] sm:$0xff]  ;;  %vm9452_vm6 = vcmp.gt.f32.partialorder %v9362_v30, 0.0 }
 0x5c3   : > { %3814 = vst.msk [vmem:[#allocation2 + $0x1f8] sm:$0xff] %vm9432_vm12, %v8127_v22  ;;  %v8145_v8 = vmax.f32 %v8129_v18, %v3217_v57  ;;  %v2703_v1 = vadd.f32 %v2674_v26, %v2655_v19  ;;  %vm9453_vm12 = vcmp.gt.f32.partialorder %v6387_v21, 0.0 }
 0x5c5   : > { %9434 = vst [vmem:[#allocation80_spill] sm:$0xff] %v8145_v8  ;;  %3813 = vst.msk [vmem:[#allocation2 + $0x1f0] sm:$0xff] %vm9435_vm9, %v8145_v8  ;;  %3660 = vrot.lane.b32.xlu1 %v5590_v4, %s5785_s26  ;;  %2868 = vrot.lane.b32.xlu0 %v5590_v4, %s5784_s24 }
 0x5c6   : > { %2719 = vst.msk [vmem:[#allocation3 + $0x110] sm:$0xff] %vm9436_vm13, %v2703_v1  ;;  %v2672_v57 = vpop.xlane.xlu1 %2671  ;;  %v2656_v1 = vmul.f32 %v8156_v24, %v2640_v60 }
 0x5c7   : > { %v2702_v26 = vadd.f32 %v2672_v57, %v2654_v31  ;;  %v9440_v31 = vld [vmem:[#allocation28_spill] sm:$0xff] }
 0x5c9   : > { %2718 = vst.msk [vmem:[#allocation3 + $0x108] sm:$0xff] %vm9438_vm11, %v2702_v26  ;;  %3346 = vperm.xlu0 %5291, %v8124_v11   ;;  %3351 = vperm.xlu1 %5292, %v8104_v32   ;;  %vm9458_vm11 = vcmp.gt.f32.partialorder %v6399_v40, 0.0 }
 0x5ca   : > { %v2676_v19 = vpop.xlane.xlu1 %2675  ;;  %v2540_v38 = vpop.permute.xlu0 %2539 }
 0x5cb   : > { %v2704_v18 = vadd.f32 %v2676_v19, %v2656_v1  ;;  %v9442_v1 = vld [vmem:[#allocation41_spill] sm:$0xff]  ;;  %v9443_v19 = vld [vmem:[#allocation38_spill] sm:$0xff] }
 0x5cd   : > { %2720 = vst.msk [vmem:[#allocation3 + $0x118] sm:$0xff] %vm9439_vm8, %v2704_v18  ;;  %3356 = vperm.xlu0 %5291, %v8145_v8   ;;  %3361 = vperm.xlu1 %5292, %v8127_v22   ;;  %v2581_v8 = vsub.f32 %v9443_v19, %v2540_v38  ;;  %vm9460_vm8 = vcmp.gt.f32.partialorder %v6443_v6, 0.0 }
 0x5ce   : > { %v2515_v39 = vpop.permute.xlu1 %2514  ;;  %v2550_v4 = vpop.permute.xlu0 %2549 }
 0x5cf   : > { %v2576_v57 = vsub.f32 %v9440_v31, %v2515_v39  ;;  %v2606_v31 = vmul.f32 1.442695, %v2581_v8 }
 0x5d1   : > { %v2596_v26 = vmul.f32 1.442695, %v2576_v57  ;;  %v9445_v57 = vld [vmem:[#allocation43_spill] sm:$0xff] }
 0x5d2   : > { %v2520_v42 = vpop.permute.xlu1 %2519  ;;  %v2560_v11 = vpop.permute.xlu0 %2559 }
 0x5d3   : > { %v2577_v32 = vsub.f32 %v9441_v59, %v2520_v42  ;;  %5445 = vpow2.f32 %v2596_v26  ;;  %v2583_v42 = vsub.f32 %v9445_v57, %v2550_v4  ;;  %v9448_v4 = vld [vmem:[#allocation52_spill] sm:$0xff] }
 0x5d4   : > { %v9449_v57 = vld [vmem:[#allocation32_spill] sm:$0xff] }
 0x5d5   : > { %v2598_v56 = vmul.f32 1.442695, %v2577_v32 }
 0x5d6   : > { %v2525_v60 = vpop.permute.xlu1 %2524  ;;  %v2570_v46 = vpop.permute.xlu0 %2569 }
 0x5d7   : > { %5447 = vpow2.f32 %v2598_v56  ;;  %v2578_v18 = vsub.f32 %v9442_v1, %v2525_v60  ;;  %v9446_v56 = vld [vmem:[#allocation46_spill] sm:$0xff] }
 0x5d9   : > { %v2600_v17 = vmul.f32 1.442695, %v2578_v18 }
 0x5da   : > { %v2530_v22 = vpop.permute.xlu1 %2529  ;;  %v2855_v41 = vpop.permute.xlu0 %2854 }
 0x5db   : > { %v2579_v24 = vsub.f32 %v9444_v58, %v2530_v22  ;;  %5148 = vmatprep.subr.bf16.mxu0 %v2855_v41  ;;  %5449 = vpow2.f32 %v2600_v17  ;;  %v2610_v58 = vmul.f32 1.442695, %v2583_v42  ;;  %v9447_v22 = vld [vmem:[#allocation55_spill] sm:$0xff] }
 0x5dc   : > { %5149 = vmatpush3.bf16.msra.mxu0 %v2855_v41  ;;  %v2585_v41 = vsub.f32 %v9447_v22, %v2560_v11 }
 0x5dd   : > { %v2602_v39 = vmul.f32 1.442695, %v2579_v24  ;;  %v8174_v60 = vpop.eup %5445 }
 0x5de   : > { %v2535_v59 = vpop.permute.xlu1 %2534  ;;  %v8171_v32 = vpop.permute.xlu0 %3648 }
 0x5df   : > { %5451 = vpow2.f32 %v2602_v39  ;;  %v2580_v26 = vsub.f32 %v9446_v56, %v2535_v59  ;;  %v2614_v39 = vmul.f32 1.442695, %v2585_v41  ;;  %v2587_v59 = vsub.f32 %v9449_v57, %v2570_v46  ;;  %v9451_v46 = vld [vmem:[#allocation30_spill] sm:$0xff] }
 0x5e0   : > { %5453 = vpow2.f32 %v2606_v31  ;;  %v9450_v31 = vld [vmem:[#allocation49_spill] sm:$0xff] }
 0x5e1   : > { %v8176_v38 = vpop.eup %5447  ;;  %v2604_v1 = vmul.f32 1.442695, %v2580_v26 }
 0x5e2   : > { %v2545_v24 = vpop.permute.xlu1 %2544  ;;  %v3292_v8 = vpop.permute.xlu0 %3291 }
 0x5e3   : > { %5455 = vpow2.f32 %v2604_v1  ;;  %v2582_v18 = vsub.f32 %v9448_v4, %v2545_v24  ;;  %v2618_v1 = vmul.f32 1.442695, %v2587_v59  ;;  %v2624_v4 = vsel %vm9452_vm6, %v8174_v60, 0.0 }
 0x5e4   : > { %5457 = vpow2.f32 %v2610_v58  ;;  %vm9461_vm6 = vcmp.gt.f32.partialorder %v6417_v54, 0.0 }
 0x5e5   : > { %v2608_v19 = vmul.f32 1.442695, %v2582_v18  ;;  %v8186_v11 = vpop.eup %5449 }
 0x5e6   : > { %v2555_v56 = vpop.permute.xlu1 %2554  ;;  %v8183_v49 = vpop.permute.xlu0 %3301 }
 0x5e7   : > { %5459 = vpow2.f32 %v2608_v19  ;;  %v2584_v42 = vsub.f32 %v9450_v31, %v2555_v56  ;;  %v3365_v56 = vsub.f32 %v7894_v2, %v3292_v8 }
 0x5e8   : > { %5461 = vpow2.f32 %v2614_v39 }
 0x5e9   : > { %v8188_v26 = vpop.eup %5451  ;;  %v2612_v22 = vmul.f32 1.442695, %v2584_v42 }
 0x5ea   : > { %v2565_v17 = vpop.permute.xlu1 %2564  ;;  %v8190_v24 = vpop.permute.xlu0 %2860 }
 0x5eb   : > { %5463 = vpow2.f32 %v2612_v22  ;;  %v2586_v41 = vsub.f32 %v9451_v46, %v2565_v17  ;;  %v8198_v18 = vpop.eup %5453  ;;  %v2626_v17 = vsel %vm9453_vm12, %v8186_v11, 0.0  ;;  %v9454_v22 = vld [vmem:[#allocation9_spill] sm:$0xff]  ;;  %vm9462_vm12 = vcmp.gt.f32.partialorder %v6463_v33, 0.0 }
 0x5ec   : > { %2677 = vadd.xlane.f32.xlu0 %v2624_v4  ;;  %5465 = vpow2.f32 %v2618_v1  ;;  %vm9455_vm9 = vcmp.gt.f32.partialorder %v9454_v22, 0.0  ;;  %v3382_v4 = vmul.f32 1.442695, %v3365_v56 }
 0x5ed   : > { %v8200_v19 = vpop.eup %5455  ;;  %v2616_v39 = vmul.f32 1.442695, %v2586_v41  ;;  %v2625_v1 = vsel %vm9455_vm9, %v8176_v38, 0.0  ;;  %v9459_v41 = vld [vmem:[#allocation72_spill] sm:$0xff]  ;;  %vm9463_vm9 = vcmp.gt.f32.partialorder %v6447_v16, 0.0 }
 0x5ee   : > { %v3647_v57 = vpop.permute.xlu1 %3646  ;;  %v3307_v31 = vpop.permute.xlu0 %3306 }
 0x5ef   : > { %5467 = vpow2.f32 %v2616_v39  ;;  %5180 = vmatprep.subr.bf16.mxu1 %v3647_v57  ;;  %v8208_v42 = vpop.eup %5457  ;;  %v3368_v2 = vsub.f32 %v7899_v29, %v3307_v31  ;;  %v9456_v39 = vld [vmem:[#allocation10_spill] sm:$0xff] }
 0x5f0   : > { %2681 = vadd.xlane.f32.xlu0 %v2626_v17  ;;  %5181 = vmatpush3.bf16.msra.mxu1 %v3647_v57  ;;  %vm9457_vm13 = vcmp.gt.f32.partialorder %v9456_v39, 0.0  ;;  %v2628_v57 = vsel %vm9458_vm11, %v8200_v19, 0.0  ;;  %5469 = vpow2.f32 %v3382_v4  ;;  %vm9467_vm11 = vcmp.gt.f32.partialorder %v9277_v0, 0.0 }
 0x5f1   : > { %v8213_v46 = vpop.eup %5459  ;;  %2679 = vadd.xlane.f32.xlu1 %v2625_v1  ;;  %5182 = vmatprep.subr.bf16.mxu1 %v8171_v32  ;;  %v2627_v17 = vsel %vm9457_vm13, %v8188_v26, 0.0  ;;  %v3388_v29 = vmul.f32 1.442695, %v3368_v2  ;;  %vm9466_vm13 = vcmp.gt.f32.partialorder %v9274_v9, 0.0 }
 0x5f2   : > { %v2857_v8 = vpop.permute.xlu1 %2856  ;;  %v8222_v59 = vpop.eup %5461 }
 0x5f3   : > { %5150 = vmatprep.subr.bf16.mxu0 %v2857_v8  ;;  %v2863_v2 = vpop.permute.xlu0 %2862  ;;  %5471 = vpow2.f32 %v3388_v29  ;;  %v2633_v7 = vsel %vm9466_vm13, %v8222_v59, 0.0  ;;  %vm9476_vm13 = vcmp.gt.f32.partialorder %v6443_v6, 0.0 }
 0x5f4   : > { %2683 = vadd.xlane.f32.xlu0 %v2627_v17  ;;  %5151 = vmatpush3.bf16.msra.mxu0 %v2857_v8  ;;  %v2629_v17 = vsel %vm9460_vm8, %v8198_v18, 0.0  ;;  %v2630_v8 = vsel %vm9461_vm6, %v8213_v46, 0.0  ;;  %vm9468_vm8 = vcmp.gt.f32.partialorder %v9280_v48, 0.0  ;;  %vm9469_vm6 = vcmp.gt.f32.partialorder %v6344_v53, 0.0 }
 0x5f5   : > { %v8227_v1 = vpop.eup %5463  ;;  %2685 = vadd.xlane.f32.xlu1 %v2628_v57  ;;  %5183 = vmatpush3.bf16.msra.mxu1 %v8171_v32 }
 0x5f6   : > { %v3287_v56 = vpop.permute.xlu1 %3286  ;;  %v8236_v52 = vpop.eup %5465 }
 0x5f7   : > { %v3364_v58 = vsub.f32 %v9459_v41, %v3287_v56  ;;  %v2631_v56 = vsel %vm9462_vm12, %v8208_v42, 0.0  ;;  %v3322_v41 = vpop.permute.xlu0 %3321  ;;  %vm9470_vm12 = vcmp.gt.f32.partialorder %v9362_v30, 0.0 }
 0x5f8   : > { %2687 = vadd.xlane.f32.xlu0 %v2629_v17  ;;  %v2632_v17 = vsel %vm9463_vm9, %v8227_v1, 0.0  ;;  %vm9475_vm9 = vcmp.gt.f32.partialorder %v9456_v39, 0.0 }
 0x5f9   : > { %v8241_v32 = vpop.eup %5467  ;;  %v3380_v57 = vmul.f32 1.442695, %v3364_v58  ;;  %2689 = vadd.xlane.f32.xlu1 %v2630_v8  ;;  %v9464_v58 = vld [vmem:[#allocation6_spill] sm:$0xff] }
 0x5fa   : > { %v2859_v4 = vpop.permute.xlu1 %2858  ;;  %v3367_v8 = vsub.f32 %v9464_v58, %v8183_v49 }
 0x5fb   : > { %5473 = vpow2.f32 %v3380_v57  ;;  %5152 = vmatprep.subr.bf16.mxu0 %v2859_v4  ;;  %v9465_v57 = vld [vmem:[#allocation71_spill] sm:$0xff] }
 0x5fc   : > { %2691 = vadd.xlane.f32.xlu0 %v2631_v56  ;;  %5153 = vmatpush3.bf16.msra.mxu0 %v2859_v4  ;;  %v2634_v56 = vsel %vm9467_vm11, %v8241_v32, 0.0  ;;  %v5470_v4 = vpop.eup %5469  ;;  %v3386_v49 = vmul.f32 1.442695, %v3367_v8  ;;  %vm9477_vm11 = vcmp.gt.f32.partialorder %v6399_v40, 0.0 }
 0x5fd   : > { %2693 = vadd.xlane.f32.xlu1 %v2632_v17  ;;  %5154 = vmatprep.subr.bf16.mxu0 %v8190_v24  ;;  %v3413_v51 = vsel %vm9469_vm6, %v5470_v4, 0.0  ;;  %vm9495_vm6 = vcmp.gt.f32.partialorder %v9277_v0, 0.0  ;;  %v9500_v0 = vld [vmem:[#allocation45_spill] sm:$0xff] }
 0x5fe   : > { %v3297_v29 = vpop.permute.xlu1 %3296 }
 0x5ff   : > { %v3366_v31 = vsub.f32 %v9465_v57, %v3297_v29  ;;  %v2635_v29 = vsel %vm9468_vm8, %v8236_v52, 0.0  ;;  %v2865_v57 = vpop.permute.xlu0 %2864  ;;  %vm9482_vm8 = vcmp.gt.f32.partialorder %v6417_v54, 0.0 }
 0x600   : > { %2695 = vadd.xlane.f32.xlu0 %v2633_v7  ;;  %5155 = vmatpush3.bf16.msra.mxu0 %v8190_v24  ;;  %v8265_v7 = vpop.eup %5471 }
 0x601   : > { %v3384_v17 = vmul.f32 1.442695, %v3366_v31  ;;  %2697 = vadd.xlane.f32.xlu1 %v2634_v56  ;;  %5156 = vmatprep.subr.bf16.mxu0 %v2863_v2  ;;  %v3416_v53 = vsel %vm9470_vm12, %v8265_v7, 0.0 }
 0x602   : > { %v3651_v58 = vpop.permute.xlu1 %3650 }
 0x603   : > { %5475 = vpow2.f32 %v3384_v17  ;;  %5184 = vmatprep.subr.bf16.mxu1 %v3651_v58  ;;  %v3371_v17 = vsub.f32 %v7839_v44, %v3322_v41 }
 0x604   : > { %2699 = vadd.xlane.f32.xlu0 %v2635_v29  ;;  %5185 = vmatpush3.bf16.msra.mxu1 %v3651_v58  ;;  %5477 = vpow2.f32 %v3386_v49 }
 0x605   : > { %v5474_v24 = vpop.eup %5473  ;;  %3463 = vadd.xlane.f32.xlu1 %v3413_v51  ;;  %5157 = vmatpush3.bf16.msra.mxu0 %v2863_v2  ;;  %v9471_v2 = vld [vmem:[#allocation7_spill] sm:$0xff] }
 0x606   : > { %v3653_v31 = vpop.permute.xlu1 %3652  ;;  %v3412_v8 = vsel %vm559_vm4, %v5474_v24, 0.0  ;;  %v4993_v56 = vpack.c.bf16 %v5470_v4, %v5474_v24  ;;  %5158 = vmatprep.subr.bf16.mxu0 %v2865_v57  ;;  %v3394_v4 = vmul.f32 1.442695, %v3371_v17  ;;  %vm9472_vm4 = vcmp.gt.f32.partialorder %v6369_v12, 0.0 }
 0x607   : > { %5186 = vmatprep.subr.bf16.mxu1 %v3653_v31 }
 0x608   : > { %3461 = vadd.xlane.f32.xlu0 %v3412_v8  ;;  %5196 = vmatprep.mubr.msk.bf16.mxu1 %vm7009_vm10, %v4993_v56  ;;  %vm9474_vm10 = vcmp.gt.f32.partialorder %v6387_v21, 0.0 }
 0x609   : > { %3469 = vadd.xlane.f32.xlu1 %v3416_v53  ;;  %5187 = vmatpush3.bf16.msra.mxu1 %v3653_v31 }
 0x60a   : > { %v3312_v51 = vpop.permute.xlu1 %3311  ;;  %5159 = vmatpush3.bf16.msra.mxu0 %v2865_v57 }
 0x60b   : > { %v3369_v23 = vsub.f32 %v9471_v2, %v3312_v51 }
 0x60d   : > { %v8278_v49 = vpop.eup %5475  ;;  %v3390_v58 = vmul.f32 1.442695, %v3369_v23 }
 0x60e   : > { %v3317_v29 = vpop.permute.xlu1 %3316  ;;  %v3414_v20 = vsel %vm561_vm5, %v8278_v49, 0.0  ;;  %v8283_v24 = vpop.eup %5477  ;;  %vm9473_vm5 = vcmp.gt.f32.partialorder %v9454_v22, 0.0 }
 0x60f   : > { %5479 = vpow2.f32 %v3390_v58  ;;  %v3370_v44 = vsub.f32 %v7904_v63, %v3317_v29  ;;  %3465 = vadd.xlane.f32.xlu0 %v3414_v20  ;;  %v3415_v57 = vsel %vm9472_vm4, %v8283_v24, 0.0 }
 0x610   : > { %5481 = vpow2.f32 %v3394_v4 }
 0x611   : > { %v3392_v30 = vmul.f32 1.442695, %v3370_v44 }
 0x612   : > { %v3655_v41 = vpop.permute.xlu1 %3654 }
 0x613   : > { %5483 = vpow2.f32 %v3392_v30  ;;  %3467 = vadd.xlane.f32.xlu0 %v3415_v57  ;;  %5188 = vmatprep.subr.bf16.mxu1 %v3655_v41 }
 0x614   : > { %5189 = vmatpush3.bf16.msra.mxu1 %v3655_v41 }
 0x616   : > { %v3657_v31 = vpop.permute.xlu1 %3656 }
 0x617   : > { %5190 = vmatprep.subr.bf16.mxu1 %v3657_v31 }
 0x618   : > { %5191 = vmatpush3.bf16.msra.mxu1 %v3657_v31 }
 0x619   : > { %v5480_v50 = vpop.eup %5479 }
 0x61a   : > { %v3332_v8 = vpop.permute.xlu1 %3331  ;;  %v3417_v63 = vsel %vm9473_vm5, %v5480_v50, 0.0  ;;  %v8291_v56 = vpop.eup %5481 }
 0x61b   : > { %v3373_v53 = vsub.f32 %v7844_v36, %v3332_v8  ;;  %3471 = vadd.xlane.f32.xlu0 %v3417_v63  ;;  %v3419_v2 = vsel %vm9475_vm9, %v8291_v56, 0.0 }
 0x61d   : > { %v8294_v17 = vpop.eup %5483  ;;  %v3398_v12 = vmul.f32 1.442695, %v3373_v53 }
 0x61e   : > { %v3418_v51 = vsel %vm9474_vm10, %v8294_v17, 0.0 }
 0x61f   : > { %5485 = vpow2.f32 %v3398_v12  ;;  %3473 = vadd.xlane.f32.xlu1 %v3418_v51  ;;  %3475 = vadd.xlane.f32.xlu0 %v3419_v2 }
 0x629   : > { %v8302_v22 = vpop.eup %5485 }
 0x62a   : > { %v3421_v36 = vsel %vm9476_vm13, %v8302_v22, 0.0 }
 0x62b   : > { %3479 = vadd.xlane.f32.xlu0 %v3421_v36  ;;  %v9479_v36 = vpack.c.bf16 %v7876_v47, %v7874_v55 }
 0x638   : > { %v3327_v23 = vpop.permute.xlu0 %3326 }
 0x639   : > { %v3372_v4 = vsub.f32 %v7971_v27, %v3327_v23 }
 0x63b   : > { %v3396_v58 = vmul.f32 1.442695, %v3372_v4 }
 0x63c   : > { %v3337_v21 = vpop.permute.xlu1 %3336  ;;  %v2867_v29 = vpop.permute.xlu0 %2866 }
 0x63d   : > { %5487 = vpow2.f32 %v3396_v58  ;;  %v3374_v39 = vsub.f32 %v7979_v45, %v3337_v21  ;;  %5160 = vmatprep.subr.bf16.mxu0 %v2867_v29  ;;  %v4996_v45 = vpack.c.bf16 %v8283_v24, %v8278_v49  ;;  %v9506_v49 = vld [vmem:[#allocation75_spill] sm:$0xff] }
 0x63e   : > { %5161 = vmatpush3.bf16.msra.mxu0 %v2867_v29 }
 0x63f   : > { %v3400_v20 = vmul.f32 1.442695, %v3374_v39 }
 0x640   : > { %v3659_v44 = vpop.permute.xlu1 %3658  ;;  %v3342_v30 = vpop.permute.xlu0 %3341 }
 0x641   : > { %5489 = vpow2.f32 %v3400_v20  ;;  %v3375_v41 = vsub.f32 %v7853_v62, %v3342_v30  ;;  %5192 = vmatprep.subr.bf16.mxu1 %v3659_v44  ;;  %v4999_v62 = vpack.c.bf16 %v5480_v50, %v8265_v7 }
 0x642   : > { %5193 = vmatpush3.bf16.msra.mxu1 %v3659_v44 }
 0x643   : > { %v3402_v6 = vmul.f32 1.442695, %v3375_v41  ;;  %v9519_v41 = vld [vmem:[#allocation15_spill] sm:$0xff] }
 0x644   : > { %v3661_v57 = vpop.permute.xlu1 %3660  ;;  %v2869_v31 = vpop.permute.xlu0 %2868 }
 0x645   : > { %5491 = vpow2.f32 %v3402_v6  ;;  %5162 = vmatprep.subr.bf16.mxu0 %v2869_v31  ;;  %5194 = vmatprep.subr.bf16.mxu1 %v3661_v57 }
 0x646   : > { %5163 = vmatpush3.bf16.msra.mxu0 %v2869_v31  ;;  %5195 = vmatpush3.bf16.msra.mxu1 %v3661_v57  ;;  %v9499_v57 = vld [vmem:[#allocation42_spill] sm:$0xff] }
 0x647   : > { %v5488_v27 = vpop.eup %5487  ;;  %v2450_v31 = vsub.f32 %v9499_v57, %v7715_v37 }
 0x648   : > { %v3352_v8 = vpop.permute.xlu1 %3351  ;;  %v3347_v63 = vpop.permute.xlu0 %3346  ;;  %v3420_v53 = vsel %vm9477_vm11, %v5488_v27, 0.0  ;;  %v5005_v29 = vpack.c.bf16 %v8302_v22, %v5488_v27  ;;  %v2449_v27 = vsub.f32 %v9500_v0, %v7718_v10  ;;  %v9504_v10 = vld [vmem:[#allocation47_spill] sm:$0xff] }
 0x649   : > { %v3377_v12 = vsub.f32 %v7983_v3, %v3352_v8  ;;  %v3376_v51 = vsub.f32 %v7993_v15, %v3347_v63  ;;  %5197 = vmatmul.mubr.msk.bf16.vlgmr.msra.gmra.mrb[16].mxu1 %vm7017_vm15, %v4996_v45  ;;  %3477 = vadd.xlane.f32.xlu1 %v3420_v53  ;;  %v9481_v3 = vpack.c.bf16 %v8176_v38, %v8174_v60  ;;  %v2472_v45 = vmul.f32 1.442695, %v2450_v31  ;;  %v9501_v8 = vld [vmem:[#allocation44_spill] sm:$0xff] }
 0x64a   : > { %5165 = vmatmul.mubr.msk.bf16.vlgmr.msra.gmra.mrb[16].mxu0 %vm7017_vm15, %v9479_v36  ;;  %5200 = vmatprep.mubr.msk.bf16.mxu1 %vm7035_vm0, %v4999_v62  ;;  %v5002_v60 = vpack.c.bf16 %v8291_v56, %v8294_v17  ;;  %vm9483_vm15 = vcmp.gt.f32.partialorder %v6463_v33, 0.0  ;;  %v9487_v33 = vpack.c.bf16 %v8198_v18, %v8200_v19  ;;  %v9491_v18 = vpack.c.bf16 %v8208_v42, %v8213_v46 }
 0x64b   : > { %v5490_v40 = vpop.eup %5489  ;;  %v3406_v24 = vmul.f32 1.442695, %v3377_v12  ;;  %v3404_v7 = vmul.f32 1.442695, %v3376_v51  ;;  %5168 = vmatprep.mubr.msk.bf16.mxu0 %vm7035_vm0, %v9481_v3  ;;  %vm9488_vm0 = vcmp.gt.f32.partialorder %v9274_v9, 0.0  ;;  %v9492_v9 = vpack.c.bf16 %v8222_v59, %v8227_v1  ;;  %v9498_v1 = vld [vmem:[#allocation40_spill] sm:$0xff] }
 0x64c   : > { %v3362_v15 = vpop.permute.xlu1 %3361  ;;  %v3357_v50 = vpop.permute.xlu0 %3356  ;;  %v3422_v55 = vsel %vm9482_vm8, %v5490_v40, 0.0  ;;  %v9497_v59 = vpack.c.bf16 %v8236_v52, %v8241_v32  ;;  %v2448_v6 = vsub.f32 %v9498_v1, %v7698_v61  ;;  %v2451_v63 = vsub.f32 %v9501_v8, %v7733_v25  ;;  %v9502_v52 = vld [vmem:[#allocation48_spill] sm:$0xff]  ;;  %v9503_v61 = vld [vmem:[#allocation51_spill] sm:$0xff]  ;;  %v9505_v25 = vld [vmem:[#allocation53_spill] sm:$0xff] }
 0x64d   : > { %5493 = vpow2.f32 %v3406_v24  ;;  %v3379_v47 = vsub.f32 %v7989_v13, %v3362_v15  ;;  %v3378_v23 = vsub.f32 %v8002_v34, %v3357_v50  ;;  %3481 = vadd.xlane.f32.xlu1 %v3422_v55  ;;  %v9485_v13 = vpack.c.bf16 %v8188_v26, %v8186_v11  ;;  %v9508_v24 = vld [vmem:[#allocation57_spill] sm:$0xff]  ;;  %v2641_v3 = vld [vmem:[#allocation3 + $0x120] sm:$0xff]  ;;  %v9510_v50 = vld [vmem:[#allocation60_spill] sm:$0xff] }
 0x64e   : > { %5495 = vpow2.f32 %v3404_v7  ;;  %v2470_v53 = vmul.f32 1.442695, %v2449_v27  ;;  %v2452_v32 = vsub.f32 %v9502_v52, %v7730_v5  ;;  %v2474_v62 = vmul.f32 1.442695, %v2451_v63  ;;  %v9507_v5 = vld [vmem:[#allocation79_spill] sm:$0xff] }
 0x64f   : > { %v5492_v4 = vpop.eup %5491  ;;  %v3410_v58 = vmul.f32 1.442695, %v3379_v47  ;;  %v3408_v21 = vmul.f32 1.442695, %v3378_v23  ;;  %v2453_v12 = vsub.f32 %v9503_v61, %v7747_v28  ;;  %v2454_v51 = vsub.f32 %v9504_v10, %v9402_v43  ;;  %v9509_v28 = vld [vmem:[#allocation50_spill] sm:$0xff]  ;;  %v9511_v43 = vld [vmem:[#allocation56_spill] sm:$0xff] }
 0x650   : > { %v3423_v38 = vsel %vm9483_vm15, %v5492_v4, 0.0  ;;  %v5008_v17 = vpack.c.bf16 %v5492_v4, %v5490_v40  ;;  %v2476_v37 = vmul.f32 1.442695, %v2452_v32  ;;  %v2455_v36 = vsub.f32 %v9505_v25, %v7761_v35  ;;  %v9512_v47 = vld [vmem:[#allocation81_spill] sm:$0xff]  ;;  %v9513_v23 = vld [vmem:[#allocation58_spill] sm:$0xff]  ;;  %v9514_v4 = vld [vmem:[#allocation59_spill] sm:$0xff] }
 0x651   : > { %5497 = vpow2.f32 %v3410_v58  ;;  %5201 = vmatmul.mubr.msk.bf16.gmra.mrb[20].mxu1 %vm7051_vm7, %v5002_v60  ;;  %3483 = vadd.xlane.f32.xlu0 %v3423_v38  ;;  %v2478_v2 = vmul.f32 1.442695, %v2453_v12  ;;  %v2480_v40 = vmul.f32 1.442695, %v2454_v51  ;;  %v2456_v7 = vsub.f32 %v9509_v28, %v9508_v24  ;;  %v2642_v34 = vld [vmem:[#allocation3 + $0x128] sm:$0xff]  ;;  %v9525_v12 = vld [vmem:[#allocation13_spill] sm:$0xff] }
 0x652   : > { %5499 = vpow2.f32 %v3408_v21  ;;  %5169 = vmatmul.mubr.msk.bf16.gmra.mrb[20].mxu0 %vm7051_vm7, %v9485_v13  ;;  %5204 = vmatprep.mubr.msk.bf16.mxu1 %vm7068_vm1, %v5005_v29  ;;  %vm9490_vm7 = vcmp.gt.f32.partialorder %v6447_v16, 0.0  ;;  %v2482_v15 = vmul.f32 1.442695, %v2455_v36  ;;  %v2457_v55 = vsub.f32 %v9511_v43, %v9510_v50  ;;  %v2643_v29 = vld [vmem:[#allocation3 + $0x130] sm:$0xff]  ;;  %v2646_v63 = vld [vmem:[#allocation3 + $0x148] sm:$0xff]  ;;  %v9528_v25 = vld [vmem:[#allocation62_spill] sm:$0xff] }
 0x653   : > { %5172 = vmatprep.mubr.msk.bf16.mxu0 %vm7068_vm1, %v9487_v33  ;;  %vm9494_vm1 = vcmp.gt.f32.partialorder %v9280_v48, 0.0  ;;  %v2468_v48 = vmul.f32 1.442695, %v2448_v6  ;;  %v2484_v35 = vmul.f32 1.442695, %v2456_v7  ;;  %v2458_v58 = vsub.f32 %v9514_v4, %v9513_v23  ;;  %v9520_v6 = vld [vmem:[#allocation26_spill] sm:$0xff] }
 0x654   : > { %v2486_v33 = vmul.f32 1.442695, %v2457_v55  ;;  %v2648_v7 = vld [vmem:[#allocation3 + $0x158] sm:$0xff]  ;;  %v2649_v50 = vld [vmem:[#allocation3 + $0x160] sm:$0xff]  ;;  %v9532_v55 = vld [vmem:[#allocation16_spill] sm:$0xff] }
 0x655   : > { %5501 = vpow2.f32 %v2468_v48  ;;  %v9521_v48 = vld [vmem:[#allocation25_spill] sm:$0xff]  ;;  %v9534_v4 = vld [vmem:[#allocation8_spill] sm:$0xff] }
 0x656   : > { %5503 = vpow2.f32 %v2472_v45  ;;  %v9522_v57 = vsub.f32 %v9520_v6, %v9521_v48 }
 0x657   : > { %v5494_v56 = vpop.eup %5493  ;;  %5505 = vpow2.f32 %v2470_v53 }
 0x658   : > { %v5496_v22 = vpop.eup %5495  ;;  %v3425_v39 = vsel %vm9488_vm0, %v5494_v56, 0.0  ;;  %5507 = vpow2.f32 %v2474_v62  ;;  %v3254_v31 = vmul.f32 1.442695, %v9522_v57  ;;  %v2647_v62 = vld [vmem:[#allocation3 + $0x150] sm:$0xff]  ;;  %v3430_v57 = vld [vmem:[#allocation3 + $0x188] sm:$0xff] }
 0x659   : > { %5205 = vmatmul.mubr.msk.bf16.gmra.mrb[24].mxu1 %vm7086_vm2, %v5008_v17  ;;  %3487 = vadd.xlane.f32.xlu0 %v3425_v39  ;;  %v3424_v11 = vsel %vm9490_vm7, %v5496_v22, 0.0  ;;  %v5011_v26 = vpack.c.bf16 %v5494_v56, %v5496_v22  ;;  %5509 = vpow2.f32 %v2476_v37  ;;  %v9515_v56 = vld [vmem:[#allocation70_spill] sm:$0xff]  ;;  %v9516_v17 = vld [vmem:[#allocation61_spill] sm:$0xff]  ;;  %v2488_v39 = vmul.f32 1.442695, %v2458_v58  ;;  %v9526_v37 = vld [vmem:[#allocation11_spill] sm:$0xff] }
 0x65a   : > { %5173 = vmatmul.mubr.msk.bf16.gmra.mrb[24].mxu0 %vm7086_vm2, %v9491_v18  ;;  %3485 = vadd.xlane.f32.xlu1 %v3424_v11  ;;  %5511 = vpow2.f32 %v2478_v2  ;;  %v2459_v22 = vsub.f32 %v9516_v17, %v9515_v56  ;;  %v3238_v10 = vsub.f32 %v9526_v37, %v9525_v12  ;;  %v9527_v2 = vld [vmem:[#allocation27_spill] sm:$0xff]  ;;  %v9535_v58 = vld [vmem:[#allocation54_spill] sm:$0xff] }
 0x65b   : > { %v5498_v19 = vpop.eup %5497  ;;  %5176 = vmatprep.mubr.msk.bf16.mxu0 %vm7104_vm14, %v9492_v9  ;;  %5208 = vmatprep.mubr.msk.bf16.mxu1 %vm7104_vm14, %v5011_v26  ;;  %5513 = vpow2.f32 %v2480_v40  ;;  %v9529_v36 = vsub.f32 %v9527_v2, %v9528_v25 }
 0x65c   : > { %v5500_v16 = vpop.eup %5499  ;;  %v3427_v30 = vsel %vm9494_vm1, %v5498_v19, 0.0  ;;  %5515 = vpow2.f32 %v2482_v15  ;;  %v3256_v43 = vmul.f32 1.442695, %v3238_v10  ;;  %v3429_v10 = vld [vmem:[#allocation3 + $0x180] sm:$0xff] }
 0x65d   : > { %3491 = vadd.xlane.f32.xlu0 %v3427_v30  ;;  %v3426_v42 = vsel %vm9495_vm6, %v5500_v16, 0.0  ;;  %v5014_v46 = vpack.c.bf16 %v5498_v19, %v5500_v16  ;;  %5517 = vpow2.f32 %v2484_v35  ;;  %v2644_v19 = vld [vmem:[#allocation3 + $0x138] sm:$0xff]  ;;  %v2645_v30 = vld [vmem:[#allocation3 + $0x140] sm:$0xff] }
 0x65e   : > { %3489 = vadd.xlane.f32.xlu1 %v3426_v42  ;;  %5519 = vpow2.f32 %v2486_v33  ;;  %v2490_v42 = vmul.f32 1.442695, %v2459_v22  ;;  %v2651_v22 = vld [vmem:[#allocation3 + $0x170] sm:$0xff] }
 0x65f   : > { %5521 = vpow2.f32 %v2488_v39 }
 0x660   : > { %5523 = vpow2.f32 %v2490_v42 }
 0x661   : > { %5209 = vmatmul.mubr.msk.bf16.gmra.mrb[28].mxu1 %vm7122_vm3, %v5014_v46  ;;  %v9518_v46 = vld [vmem:[#allocation12_spill] sm:$0xff]  ;;  %5525 = vpow2.f32 %v3254_v31 }
 0x662   : > { %5177 = vmatmul.mubr.msk.bf16.gmra.mrb[28].mxu0 %vm7122_vm3, %v9497_v59  ;;  %vm9517_vm3 = vcmask 7168   ;;  %v3236_v59 = vsub.f32 %v9519_v41, %v9518_v46 }
 0x663   : > { %vm9523_vm2 = vmmov %vm9517_vm3 }
 0x664   : > { %vm9524_vm14 = vmmov %vm9523_vm2  ;;  %v3252_v61 = vmul.f32 1.442695, %v3236_v59  ;;  %v2652_v59 = vld [vmem:[#allocation3 + $0x178] sm:$0xff] }
 0x665   : > { %vm9530_vm12 = vmmov %vm9523_vm2 }
 0x666   : > { %vm9531_vm4 = vmmov %vm9523_vm2  ;;  %5527 = vpow2.f32 %v3252_v61 }
 0x667   : > { %vm9537_vm5 = vmmov %vm9523_vm2 }
 0x668   : > { %vm9538_vm10 = vmmov %vm9523_vm2 }
 0x669   : > { %vm9544_vm9 = vmmov %vm9523_vm2 }
 0x66a   : > { %vm9545_vm13 = vmmov %vm9523_vm2 }
 0x66b   : > { %vm9551_vm11 = vmmov %vm9523_vm2 }
 0x66c   : > { %vm9552_vm8 = vmmov %vm9523_vm2 }
 0x66d   : > { %vm9558_vm15 = vmmov %vm9523_vm2 }
 0x66e   : > { %vm9559_vm0 = vmmov %vm9523_vm2 }
 0x66f   : > { %2752 = vperm.xlu1 %5292, %v7959_v14   ;;  %v5502_v14 = vpop.eup %5501  ;;  %vm9565_vm7 = vmmov %vm9559_vm0 }
 0x670   : > { %v2657_v21 = vmul.f32 %v5502_v14, %v2641_v3  ;;  %v5504_v60 = vpop.eup %5503  ;;  %vm9566_vm1 = vmmov %vm9559_vm0 }
 0x671   : > { %v5506_v54 = vpop.eup %5505  ;;  %v2659_v20 = vmul.f32 %v5504_v60, %v2643_v29  ;;  %vm9567_vm6 = vmmov %vm9559_vm0 }
 0x672   : > { %v5508_v11 = vpop.eup %5507  ;;  %v2658_v18 = vmul.f32 %v5506_v54, %v2642_v34  ;;  %v2650_v34 = vld [vmem:[#allocation3 + $0x168] sm:$0xff] }
 0x673   : > { %2762 = vperm.xlu1 %5292, %v9506_v49   ;;  %2757 = vperm.xlu0 %5291, %v9507_v5   ;;  %v5510_v9 = vpop.eup %5509  ;;  %v2660_v0 = vmul.f32 %v5508_v11, %v2644_v19  ;;  %v3260_v49 = vmul.f32 1.442695, %v9529_v36  ;;  %v9541_v19 = vld [vmem:[#allocation31_spill] sm:$0xff]  ;;  %v3433_v36 = vld [vmem:[#allocation3 + $0x1a0] sm:$0xff] }
 0x674   : > { %v5512_v27 = vpop.eup %5511  ;;  %v2661_v8 = vmul.f32 %v5510_v9, %v2645_v30 }
 0x675   : > { %v5514_v53 = vpop.eup %5513  ;;  %v2662_v5 = vmul.f32 %v5512_v27, %v2646_v63  ;;  %5529 = vpow2.f32 %v3260_v49  ;;  %v9548_v63 = vld [vmem:[#allocation34_spill] sm:$0xff] }
 0x676   : > { %v5516_v40 = vpop.eup %5515  ;;  %v2663_v28 = vmul.f32 %v5514_v53, %v2647_v62  ;;  %5531 = vpow2.f32 %v3256_v43 }
 0x677   : > { %2767 = vperm.xlu1 %5292, %v9512_v47   ;;  %2772 = vperm.xlu0 %5291, %v5502_v14   ;;  %v5518_v14 = vpop.eup %5517  ;;  %v9533_v47 = vld [vmem:[#allocation14_spill] sm:$0xff] }
 0x678   : > { %v3239_v35 = vsub.f32 %v9533_v47, %v9532_v55  ;;  %v5520_v29 = vpop.eup %5519 }
 0x679   : > { %v2678_v38 = vpop.xlane.xlu0 %2677  ;;  %v5522_v33 = vpop.eup %5521  ;;  %v2666_v30 = vmul.f32 %v5520_v29, %v2650_v34 }
 0x67a   : > { %v2705_v13 = vadd.f32 %v2678_v38, %v2657_v21  ;;  %v9536_v21 = vsub.f32 %v9534_v4, %v9535_v58  ;;  %v2664_v38 = vmul.f32 %v5516_v40, %v2648_v7  ;;  %v3258_v39 = vmul.f32 1.442695, %v3239_v35  ;;  %v5524_v42 = vpop.eup %5523  ;;  %v9555_v7 = vld [vmem:[#allocation73_spill] sm:$0xff] }
 0x67b   : > { %2777 = vperm.xlu1 %5292, %v5506_v54   ;;  %2782 = vperm.xlu0 %5291, %v5504_v60   ;;  %v2667_v41 = vmul.f32 %v5522_v33, %v2651_v22  ;;  %v2668_v62 = vmul.f32 %v5524_v42, %v2652_v59 }
 0x67c   : > { %2721 = vst.msk [vmem:[#allocation3 + $0x120] sm:$0xff] %vm9517_vm3, %v2705_v13  ;;  %v3264_v60 = vmul.f32 1.442695, %v9536_v21  ;;  %v2665_v13 = vmul.f32 %v5518_v14, %v2649_v50  ;;  %vm9571_vm3 = vmmov %vm9559_vm0 }
 0x67d   : > { %v2682_v26 = vpop.xlane.xlu0 %2681 }
 0x67e   : > { %v2707_v44 = vadd.f32 %v2682_v26, %v2659_v20  ;;  %v2680_v16 = vpop.xlane.xlu1 %2679  ;;  %v9539_v20 = vld [vmem:[#allocation19_spill] sm:$0xff]  ;;  %5533 = vpow2.f32 %v3264_v60 }
 0x67f   : > { %v2706_v1 = vadd.f32 %v2680_v16, %v2658_v18  ;;  %2787 = vperm.xlu1 %5292, %v5508_v11   ;;  %2792 = vperm.xlu0 %5291, %v5510_v9   ;;  %v9540_v11 = vld [vmem:[#allocation17_spill] sm:$0xff]  ;;  %5535 = vpow2.f32 %v3258_v39  ;;  %v9560_v60 = vld [vmem:[#allocation23_spill] sm:$0xff] }
 0x680   : > { %2723 = vst.msk [vmem:[#allocation3 + $0x130] sm:$0xff] %vm9523_vm2, %v2707_v44  ;;  %v3241_v26 = vsub.f32 %v9540_v11, %v9539_v20  ;;  %v9542_v9 = vld [vmem:[#allocation33_spill] sm:$0xff]  ;;  %vm9575_vm2 = vmmov %vm9559_vm0 }
 0x681   : > { %2722 = vst.msk [vmem:[#allocation3 + $0x128] sm:$0xff] %vm9524_vm14, %v2706_v1  ;;  %v2684_v45 = vpop.xlane.xlu0 %2683  ;;  %v9543_v44 = vsub.f32 %v9541_v19, %v9542_v9  ;;  %v5526_v1 = vpop.eup %5525  ;;  %vm9576_vm14 = vmmov %vm9559_vm0 }
 0x682   : > { %v2708_v52 = vadd.f32 %v2684_v45, %v2660_v0  ;;  %v2686_v32 = vpop.xlane.xlu1 %2685  ;;  %v3262_v31 = vmul.f32 1.442695, %v3241_v26  ;;  %v9546_v0 = vld [vmem:[#allocation18_spill] sm:$0xff]  ;;  %v5528_v61 = vpop.eup %5527  ;;  %v3446_v37 = vmul.f32 %v5526_v1, %v3430_v57  ;;  %v3432_v26 = vld [vmem:[#allocation3 + $0x198] sm:$0xff] }
 0x683   : > { %v2709_v51 = vadd.f32 %v2686_v32, %v2661_v8  ;;  %2797 = vperm.xlu1 %5292, %v5512_v27   ;;  %2802 = vperm.xlu0 %5291, %v5514_v53   ;;  %v3268_v16 = vmul.f32 1.442695, %v9543_v44  ;;  %v9547_v27 = vld [vmem:[#allocation20_spill] sm:$0xff]  ;;  %v3445_v50 = vmul.f32 %v5528_v61, %v3429_v10  ;;  %v9573_v57 = vld [vmem:[#allocation77_spill] sm:$0xff] }
 0x684   : > { %2724 = vst.msk [vmem:[#allocation3 + $0x138] sm:$0xff] %vm9530_vm12, %v2708_v52  ;;  %v3243_v45 = vsub.f32 %v9547_v27, %v9546_v0  ;;  %v9549_v53 = vld [vmem:[#allocation36_spill] sm:$0xff]  ;;  %v3434_v27 = vld [vmem:[#allocation3 + $0x1a8] sm:$0xff]  ;;  %vm9577_vm12 = vmmov %vm9559_vm0 }
 0x685   : > { %2725 = vst.msk [vmem:[#allocation3 + $0x140] sm:$0xff] %vm9531_vm4, %v2709_v51  ;;  %v2688_v24 = vpop.xlane.xlu0 %2687  ;;  %5537 = vpow2.f32 %v3268_v16  ;;  %v9550_v52 = vsub.f32 %v9548_v63, %v9549_v53  ;;  %v5530_v51 = vpop.eup %5529  ;;  %v9568_v16 = vld [vmem:[#allocation37_spill] sm:$0xff]  ;;  %vm9578_vm4 = vmmov %vm9559_vm0 }
 0x686   : > { %v2710_v3 = vadd.f32 %v2688_v24, %v2662_v5  ;;  %v2690_v15 = vpop.xlane.xlu1 %2689  ;;  %5539 = vpow2.f32 %v3262_v31  ;;  %v3266_v49 = vmul.f32 1.442695, %v3243_v45  ;;  %v9553_v5 = vld [vmem:[#allocation21_spill] sm:$0xff]  ;;  %v5532_v43 = vpop.eup %5531  ;;  %v3449_v47 = vmul.f32 %v5530_v51, %v3433_v36 }
 0x687   : > { %v2711_v23 = vadd.f32 %v2690_v15, %v2663_v28  ;;  %2807 = vperm.xlu1 %5292, %v5516_v40   ;;  %2812 = vperm.xlu0 %5291, %v5518_v14   ;;  %v3272_v32 = vmul.f32 1.442695, %v9550_v52  ;;  %v9554_v40 = vld [vmem:[#allocation22_spill] sm:$0xff]  ;;  %v9556_v14 = vld [vmem:[#allocation76_spill] sm:$0xff] }
 0x688   : > { %2726 = vst.msk [vmem:[#allocation3 + $0x148] sm:$0xff] %vm9537_vm5, %v2710_v3  ;;  %v3245_v24 = vsub.f32 %v9554_v40, %v9553_v5  ;;  %v9557_v3 = vsub.f32 %v9555_v7, %v9556_v14  ;;  %v5534_v35 = vpop.eup %5533  ;;  %v3435_v52 = vld [vmem:[#allocation3 + $0x1b0] sm:$0xff]  ;;  %v3438_v5 = vld [vmem:[#allocation3 + $0x1c8] sm:$0xff]  ;;  %v3437_v7 = vld [vmem:[#allocation3 + $0x1c0] sm:$0xff] }
 0x689   : > { %2727 = vst.msk [vmem:[#allocation3 + $0x150] sm:$0xff] %vm9538_vm10, %v2711_v23  ;;  %v2692_v54 = vpop.xlane.xlu0 %2691  ;;  %5541 = vpow2.f32 %v3272_v32  ;;  %v3436_v32 = vld [vmem:[#allocation3 + $0x1b8] sm:$0xff]  ;;  %vm9579_vm5 = vmmov %vm9559_vm0 }
 0x68a   : > { %v2712_v56 = vadd.f32 %v2692_v54, %v2664_v38  ;;  %v2694_v17 = vpop.xlane.xlu1 %2693  ;;  %v3276_v15 = vmul.f32 1.442695, %v9557_v3  ;;  %5543 = vpow2.f32 %v3266_v49  ;;  %v3270_v58 = vmul.f32 1.442695, %v3245_v24  ;;  %v9561_v38 = vld [vmem:[#allocation24_spill] sm:$0xff]  ;;  %v9562_v54 = vld [vmem:[#allocation78_spill] sm:$0xff]  ;;  %vm9580_vm10 = vmmov %vm9559_vm0 }
 0x68b   : > { %v2713_v18 = vadd.f32 %v2694_v17, %v2665_v13  ;;  %2817 = vperm.xlu1 %5292, %v5520_v29   ;;  %2822 = vperm.xlu0 %5291, %v5522_v33   ;;  %v3247_v29 = vsub.f32 %v9561_v38, %v9560_v60  ;;  %v9563_v13 = vld [vmem:[#allocation80_spill] sm:$0xff]  ;;  %v5536_v17 = vpop.eup %5535  ;;  %v3441_v60 = vld [vmem:[#allocation3 + $0x1e0] sm:$0xff] }
 0x68c   : > { %2728 = vst.msk [vmem:[#allocation3 + $0x158] sm:$0xff] %vm9544_vm9, %v2712_v56  ;;  %5545 = vpow2.f32 %v3276_v15  ;;  %v9564_v34 = vsub.f32 %v9562_v54, %v9563_v13  ;;  %v3431_v56 = vld [vmem:[#allocation3 + $0x190] sm:$0xff]  ;;  %v3448_v44 = vmul.f32 %v5536_v17, %v3432_v26  ;;  %vm9581_vm9 = vmmov %vm9559_vm0  ;;  %v3444_v13 = vld [vmem:[#allocation3 + $0x1f8] sm:$0xff] }
 0x68d   : > { %2729 = vst.msk [vmem:[#allocation3 + $0x160] sm:$0xff] %vm9545_vm13, %v2713_v18  ;;  %v2696_v46 = vpop.xlane.xlu0 %2695  ;;  %5547 = vpow2.f32 %v3270_v58  ;;  %v3447_v39 = vmul.f32 %v5532_v43, %v3431_v56  ;;  %v3274_v20 = vmul.f32 1.442695, %v3247_v29  ;;  %v3439_v15 = vld [vmem:[#allocation3 + $0x1d0] sm:$0xff]  ;;  %vm9582_vm13 = vmmov %vm9559_vm0 }
 0x68e   : > { %v2714_v6 = vadd.f32 %v2696_v46, %v2666_v30  ;;  %v2698_v48 = vpop.xlane.xlu1 %2697  ;;  %v3280_v33 = vmul.f32 1.442695, %v9564_v34  ;;  %v9569_v30 = vld [vmem:[#allocation39_spill] sm:$0xff]  ;;  %v3443_v56 = vld [vmem:[#allocation3 + $0x1f0] sm:$0xff] }
 0x68f   : > { %v2715_v8 = vadd.f32 %v2698_v48, %v2667_v41  ;;  %2827 = vperm.xlu1 %5292, %v5524_v42   ;;  %3549 = vperm.xlu0 %5291, %v5526_v1   ;;  %v5538_v22 = vpop.eup %5537  ;;  %v9570_v42 = vsub.f32 %v9568_v16, %v9569_v30  ;;  %v9572_v48 = vld [vmem:[#allocation74_spill] sm:$0xff] }
 0x690   : > { %2730 = vst.msk [vmem:[#allocation3 + $0x168] sm:$0xff] %vm9551_vm11, %v2714_v6  ;;  %5549 = vpow2.f32 %v3280_v33  ;;  %v5540_v18 = vpop.eup %5539  ;;  %v9574_v31 = vsub.f32 %v9572_v48, %v9573_v57  ;;  %v3453_v14 = vmul.f32 %v5538_v22, %v3437_v7  ;;  %vm9583_vm11 = vmmov %vm9559_vm0 }
 0x691   : > { %2731 = vst.msk [vmem:[#allocation3 + $0x170] sm:$0xff] %vm9552_vm8, %v2715_v8  ;;  %v2700_v12 = vpop.xlane.xlu0 %2699  ;;  %5551 = vpow2.f32 %v3274_v20  ;;  %v3278_v46 = vmul.f32 1.442695, %v9570_v42  ;;  %v3450_v63 = vmul.f32 %v5540_v18, %v3434_v27  ;;  %vm9584_vm8 = vmmov %vm9559_vm0 }
 0x692   : > { %v2716_v2 = vadd.f32 %v2700_v12, %v2668_v62  ;;  %v3464_v25 = vpop.xlane.xlu1 %3463  ;;  %v3282_v0 = vmul.f32 1.442695, %v9574_v31  ;;  %v3451_v12 = vmul.f32 %v5534_v35, %v3435_v52 }
 0x693   : > { %v3494_v28 = vadd.f32 %v3464_v25, %v3446_v37  ;;  %3544 = vperm.xlu1 %5292, %v5528_v61   ;;  %3564 = vperm.xlu0 %5291, %v5530_v51   ;;  %v5542_v9 = vpop.eup %5541  ;;  %5553 = vpow2.f32 %v3278_v46 }
 0x694   : > { %2732 = vst.msk [vmem:[#allocation3 + $0x178] sm:$0xff] %vm9558_vm15, %v2716_v2  ;;  %v5544_v59 = vpop.eup %5543  ;;  %5555 = vpow2.f32 %v3282_v0  ;;  %vm9585_vm15 = vmmov %vm9559_vm0 }
 0x695   : > { %3510 = vst.msk [vmem:[#allocation3 + $0x188] sm:$0xff] %vm9559_vm0, %v3494_v28  ;;  %v3462_v55 = vpop.xlane.xlu0 %3461  ;;  %v3452_v37 = vmul.f32 %v5544_v59, %v3436_v32  ;;  %v3528_v32 = vld [vmem:[#allocation4 + $0x190] sm:$0xff]  ;;  %vm9586_vm0 = vcmask 130048  }
 0x696   : > { %v3493_v23 = vadd.f32 %v3462_v55, %v3445_v50  ;;  %v3470_v4 = vpop.xlane.xlu1 %3469  ;;  %v5546_v6 = vpop.eup %5545 }
 0x697   : > { %v3497_v21 = vadd.f32 %v3470_v4, %v3449_v47  ;;  %3554 = vperm.xlu1 %5292, %v5532_v43   ;;  %3574 = vperm.xlu0 %5291, %v5534_v35   ;;  %v5548_v45 = vpop.eup %5547  ;;  %v3455_v43 = vmul.f32 %v5542_v9, %v3439_v15  ;;  %v3440_v47 = vld [vmem:[#allocation3 + $0x1d8] sm:$0xff]  ;;  %v3457_v29 = vmul.f32 %v5546_v6, %v3441_v60 }
 0x698   : > { %3509 = vst.msk [vmem:[#allocation3 + $0x180] sm:$0xff] %vm9565_vm7, %v3493_v23  ;;  %v3454_v40 = vmul.f32 %v5548_v45, %v3438_v5  ;;  %vm9587_vm7 = vmmov %vm9586_vm0 }
 0x699   : > { %3513 = vst.msk [vmem:[#allocation3 + $0x1a0] sm:$0xff] %vm9566_vm1, %v3497_v21  ;;  %v3442_v21 = vld [vmem:[#allocation3 + $0x1e8] sm:$0xff]  ;;  %vm9588_vm1 = vmmov %vm9586_vm0 }
 0x69a   : > { %v5550_v8 = vpop.eup %5549 }
 0x69b   : > { %3559 = vperm.xlu1 %5292, %v5536_v17   ;;  %3584 = vperm.xlu0 %5291, %v5538_v22   ;;  %v5552_v61 = vpop.eup %5551 }
 0x69c   : > { %v3466_v11 = vpop.xlane.xlu0 %3465  ;;  %v3456_v23 = vmul.f32 %v5552_v61, %v3440_v47 }
 0x69d   : > { %v3495_v19 = vadd.f32 %v3466_v11, %v3447_v39  ;;  %v5554_v36 = vpop.eup %5553  ;;  %v3459_v39 = vmul.f32 %v5550_v8, %v3443_v56  ;;  %v3530_v56 = vld [vmem:[#allocation4 + $0x1a0] sm:$0xff] }
 0x69e   : > { %v5556_v49 = vpop.eup %5555  ;;  %v3458_v38 = vmul.f32 %v5554_v36, %v3442_v21 }
 0x69f   : > { %3511 = vst.msk [vmem:[#allocation3 + $0x190] sm:$0xff] %vm9567_vm6, %v3495_v19  ;;  %3569 = vperm.xlu1 %5292, %v5540_v18   ;;  %3594 = vperm.xlu0 %5291, %v5542_v9   ;;  %v3460_v22 = vmul.f32 %v5556_v49, %v3444_v13  ;;  %vm9589_vm6 = vmmov %vm9586_vm0 }
 0x6a0   : > { %v3468_v41 = vpop.xlane.xlu0 %3467 }
 0x6a1   : > { %v3496_v1 = vadd.f32 %v3468_v41, %v3448_v44 }
 0x6a3   : > { %3512 = vst.msk [vmem:[#allocation3 + $0x198] sm:$0xff] %vm9571_vm3, %v3496_v1  ;;  %3579 = vperm.xlu1 %5292, %v5544_v59   ;;  %3604 = vperm.xlu0 %5291, %v5546_v6   ;;  %vm9590_vm3 = vmmov %vm9586_vm0 }
 0x6a7   : > { %3589 = vperm.xlu1 %5292, %v5548_v45   ;;  %3614 = vperm.xlu0 %5291, %v5550_v8  }
 0x6a8   : > { %v3472_v53 = vpop.xlane.xlu0 %3471 }
 0x6a9   : > { %v3498_v62 = vadd.f32 %v3472_v53, %v3450_v63 }
 0x6ab   : > { %3514 = vst.msk [vmem:[#allocation3 + $0x1a8] sm:$0xff] %vm9575_vm2, %v3498_v62  ;;  %3599 = vperm.xlu1 %5292, %v5552_v61   ;;  %v2736_v62 = vld [vmem:[#allocation4 + $0x110] sm:$0xff]  ;;  %v3526_v61 = vld [vmem:[#allocation4 + $0x180] sm:$0xff]  ;;  %vm9591_vm2 = vmmov %vm9586_vm0 }
 0x6ac   : > { %v3474_v10 = vpop.xlane.xlu1 %3473  ;;  %v3476_v51 = vpop.xlane.xlu0 %3475 }
 0x6ad   : > { %v3499_v2 = vadd.f32 %v3474_v10, %v3451_v12  ;;  %v3500_v25 = vadd.f32 %v3476_v51, %v3452_v37  ;;  %v2734_v12 = vld [vmem:[#allocation4 + $0x100] sm:$0xff]  ;;  %v3529_v37 = vld [vmem:[#allocation4 + $0x198] sm:$0xff] }
 0x6ae   : > { %v2737_v51 = vld [vmem:[#allocation4 + $0x118] sm:$0xff] }
 0x6af   : > { %3515 = vst.msk [vmem:[#allocation3 + $0x1b0] sm:$0xff] %vm9576_vm14, %v3499_v2  ;;  %3609 = vperm.xlu1 %5292, %v5554_v36   ;;  %vm9592_vm14 = vmmov %vm9586_vm0 }
 0x6b0   : > { %3516 = vst.msk [vmem:[#allocation3 + $0x1b8] sm:$0xff] %vm9577_vm12, %v3500_v25  ;;  %vm9593_vm12 = vmmov %vm9586_vm0 }
 0x6b3   : > { %3619 = vperm.xlu1 %5292, %v5556_v49   ;;  %v2735_v49 = vld [vmem:[#allocation4 + $0x108] sm:$0xff] }
 0x6b8   : > { %v3480_v24 = vpop.xlane.xlu0 %3479 }
 0x6b9   : > { %v3502_v28 = vadd.f32 %v3480_v24, %v3454_v40 }
 0x6bb   : > { %3518 = vst.msk [vmem:[#allocation3 + $0x1c8] sm:$0xff] %vm9578_vm4, %v3502_v28  ;;  %v3527_v28 = vld [vmem:[#allocation4 + $0x188] sm:$0xff]  ;;  %vm9594_vm4 = vmmov %vm9586_vm0 }
 0x6d6   : > { %v3478_v3 = vpop.xlane.xlu1 %3477 }
 0x6d7   : > { %v3501_v50 = vadd.f32 %v3478_v3, %v3453_v14 }
 0x6d9   : > { %3517 = vst.msk [vmem:[#allocation3 + $0x1c0] sm:$0xff] %vm9579_vm5, %v3501_v50  ;;  %vm9595_vm5 = vmmov %vm9586_vm0 }
 0x6da   : > { %v3482_v55 = vpop.xlane.xlu1 %3481 }
 0x6db   : > { %v3503_v35 = vadd.f32 %v3482_v55, %v3455_v43 }
 0x6dd   : > { %3519 = vst.msk [vmem:[#allocation3 + $0x1d0] sm:$0xff] %vm9580_vm10, %v3503_v35  ;;  %vm9596_vm10 = vmmov %vm9586_vm0 }
 0x6de   : > { %v3484_v4 = vpop.xlane.xlu0 %3483 }
 0x6df   : > { %v3504_v58 = vadd.f32 %v3484_v4, %v3456_v23 }
 0x6e1   : > { %3520 = vst.msk [vmem:[#allocation3 + $0x1d8] sm:$0xff] %vm9581_vm9, %v3504_v58  ;;  %vm9597_vm9 = vmmov %vm9586_vm0 }
 0x6e6   : > { %v3488_v54 = vpop.xlane.xlu0 %3487 }
 0x6e7   : > { %v3486_v34 = vpop.xlane.xlu1 %3485  ;;  %v3506_v33 = vadd.f32 %v3488_v54, %v3458_v38 }
 0x6e8   : > { %v3505_v17 = vadd.f32 %v3486_v34, %v3457_v29  ;;  %v3532_v29 = vld [vmem:[#allocation4 + $0x1b0] sm:$0xff] }
 0x6e9   : > { %3522 = vst.msk [vmem:[#allocation3 + $0x1e8] sm:$0xff] %vm9582_vm13, %v3506_v33  ;;  %v2740_v33 = vld [vmem:[#allocation4 + $0x130] sm:$0xff]  ;;  %vm9598_vm13 = vmmov %vm9586_vm0 }
 0x6ea   : > { %3521 = vst.msk [vmem:[#allocation3 + $0x1e0] sm:$0xff] %vm9583_vm11, %v3505_v17  ;;  %v3492_v20 = vpop.xlane.xlu0 %3491  ;;  %vm9599_vm11 = vmmov %vm9586_vm0 }
 0x6eb   : > { %v3490_v11 = vpop.xlane.xlu1 %3489  ;;  %v3508_v26 = vadd.f32 %v3492_v20, %v3460_v22 }
 0x6ec   : > { %v3507_v18 = vadd.f32 %v3490_v11, %v3459_v39  ;;  %v2738_v39 = vld [vmem:[#allocation4 + $0x120] sm:$0xff]  ;;  %v3533_v11 = vld [vmem:[#allocation4 + $0x1b8] sm:$0xff] }
 0x6ed   : > { %3524 = vst.msk [vmem:[#allocation3 + $0x1f8] sm:$0xff] %vm9584_vm8, %v3508_v26  ;;  %v2741_v26 = vld [vmem:[#allocation4 + $0x138] sm:$0xff]  ;;  %vm9600_vm8 = vmmov %vm9586_vm0 }
 0x6ee   : > { %3523 = vst.msk [vmem:[#allocation3 + $0x1f0] sm:$0xff] %vm9585_vm15, %v3507_v18  ;;  %vm9601_vm15 = vmmov %vm9586_vm0 }
 0x6ef   : > { %v2753_v19 = vpop.permute.xlu1 %2752 }
 0x6f0   : > { %v2830_v24 = vmul.f32 %v2753_v19, %v2734_v12 }
 0x6f2   : > { %v2758_v9 = vpop.permute.xlu0 %2757 }
 0x6f3   : > { %v2763_v44 = vpop.permute.xlu1 %2762  ;;  %v2831_v23 = vmul.f32 %v2758_v9, %v2735_v49  ;;  %v2739_v9 = vld [vmem:[#allocation4 + $0x128] sm:$0xff] }
 0x6f4   : > { %v2832_v36 = vmul.f32 %v2763_v44, %v2736_v62 }
 0x6f6   : > { %v8480_v16 = vpop.permute.xlu0 %2772 }
 0x6f7   : > { %v2768_v30 = vpop.permute.xlu1 %2767 }
 0x6f8   : > { %v2833_v50 = vmul.f32 %v2768_v30, %v2737_v51 }
 0x6fa   : > { %v8482_v42 = vpop.permute.xlu0 %2782 }
 0x6fb   : > { %v8484_v46 = vpop.permute.xlu1 %2777  ;;  %v2836_v44 = vmul.f32 %v8482_v42, %v2740_v33 }
 0x6fc   : > { %v2835_v42 = vmul.f32 %v8484_v46, %v2739_v9 }
 0x6fe   : > { %v8486_v41 = vpop.permute.xlu0 %2792 }
 0x6ff   : > { %v8488_v59 = vpop.permute.xlu1 %2787 }
 0x702   : > { %v8490_v1 = vpop.permute.xlu0 %2802 }
 0x703   : > { %v8492_v6 = vpop.permute.xlu1 %2797 }
 0x706   : > { %v8494_v48 = vpop.permute.xlu0 %2812 }
 0x707   : > { %v8496_v57 = vpop.permute.xlu1 %2807 }
 0x70a   : > { %v8498_v31 = vpop.permute.xlu0 %2822 }
 0x70b   : > { %v8500_v0 = vpop.permute.xlu1 %2817 }
 0x70e   : > { %v3550_v27 = vpop.permute.xlu0 %3549 }
 0x70f   : > { %v8502_v45 = vpop.permute.xlu1 %2827  ;;  %v3623_v38 = vmul.f32 %v3550_v27, %v3527_v28 }
 0x712   : > { %v3565_v8 = vpop.permute.xlu0 %3564 }
 0x713   : > { %v3545_v63 = vpop.permute.xlu1 %3544  ;;  %v3626_v30 = vmul.f32 %v3565_v8, %v3530_v56 }
 0x714   : > { %v3622_v5 = vmul.f32 %v3545_v63, %v3526_v61 }
 0x716   : > { %v3575_v53 = vpop.permute.xlu0 %3574 }
 0x717   : > { %v3555_v52 = vpop.permute.xlu1 %3554  ;;  %v3628_v18 = vmul.f32 %v3575_v53, %v3532_v29  ;;  %v2837_v53 = vmul.f32 %v8488_v59, %v2741_v26 }
 0x718   : > { %v3624_v2 = vmul.f32 %v3555_v52, %v3528_v32  ;;  %v2834_v52 = vmul.f32 %v8480_v16, %v2738_v39  ;;  %v3531_v32 = vld [vmem:[#allocation4 + $0x1a8] sm:$0xff] }
 0x71a   : > { %v8504_v10 = vpop.permute.xlu0 %3584 }
 0x71b   : > { %v3560_v25 = vpop.permute.xlu1 %3559 }
 0x71c   : > { %v5198_v40 = vpop.f32.mrb[16].mxu1  ;;  %v3625_v7 = vmul.f32 %v3560_v25, %v3529_v37 }
 0x71d   : > { %v5166_v14 = vpop.f32.mrb[16].mxu0  ;;  %v3769_v3 = vadd.f32 %v5198_v40, %v3624_v2  ;;  %v3704_v15 = vpop.f32.mrb[17].mxu1 }
 0x71e   : > { %v2977_v43 = vadd.f32 %v5166_v14, %v2832_v36  ;;  %v2912_v55 = vpop.f32.mrb[17].mxu0  ;;  %v3767_v47 = vadd.f32 %v3704_v15, %v3622_v5  ;;  %v5199_v35 = vpop.f32.mrb[18].mxu1  ;;  %v3534_v14 = vld [vmem:[#allocation4 + $0x1c0] sm:$0xff] }
 0x71f   : > { %3785 = vst.msk [vmem:[#allocation4 + $0x190] sm:$0xff] %vm9586_vm0, %v3769_v3  ;;  %v2975_v4 = vadd.f32 %v2912_v55, %v2830_v24  ;;  %v5167_v58 = vpop.f32.mrb[18].mxu0  ;;  %v3770_v21 = vadd.f32 %v5199_v35, %v3625_v7  ;;  %v3570_v60 = vpop.permute.xlu1 %3569  ;;  %v3536_v24 = vld [vmem:[#allocation4 + $0x1d0] sm:$0xff]  ;;  %v2742_v15 = vld [vmem:[#allocation4 + $0x140] sm:$0xff]  ;;  %v2745_v55 = vld [vmem:[#allocation4 + $0x158] sm:$0xff] }
 0x720   : > { %2993 = vst.msk [vmem:[#allocation4 + $0x110] sm:$0xff] %vm9587_vm7, %v2977_v43  ;;  %v2978_v54 = vadd.f32 %v5167_v58, %v2833_v50  ;;  %v3595_v13 = vpop.permute.xlu0 %3594  ;;  %v2915_v34 = vpop.f32.mrb[19].mxu0  ;;  %v3627_v16 = vmul.f32 %v3570_v60, %v3531_v32  ;;  %v2744_v7 = vld [vmem:[#allocation4 + $0x150] sm:$0xff]  ;;  %v3537_v43 = vld [vmem:[#allocation4 + $0x1d8] sm:$0xff]  ;;  %v3630_v58 = vmul.f32 %v8504_v10, %v3534_v14  ;;  %v2838_v29 = vmul.f32 %v8486_v41, %v2742_v15  ;;  %vm9602_vm7 = vmmov %vm9586_vm0 }
 0x721   : > { %3783 = vst.msk [vmem:[#allocation4 + $0x180] sm:$0xff] %vm9588_vm1, %v3767_v47  ;;  %v2976_v17 = vadd.f32 %v2915_v34, %v2831_v23  ;;  %v3707_v22 = vpop.f32.mrb[19].mxu1  ;;  %v3632_v47 = vmul.f32 %v3595_v13, %v3536_v24  ;;  %v2743_v23 = vld [vmem:[#allocation4 + $0x148] sm:$0xff]  ;;  %v2841_v13 = vmul.f32 %v8496_v57, %v2745_v55  ;;  %v3540_v41 = vld [vmem:[#allocation4 + $0x1f0] sm:$0xff]  ;;  %vm9603_vm1 = vmmov %vm9586_vm0 }
 0x722   : > { %2991 = vst.msk [vmem:[#allocation4 + $0x100] sm:$0xff] %vm9589_vm6, %v2975_v4  ;;  %v3768_v20 = vadd.f32 %v3707_v22, %v3623_v38  ;;  %v2840_v4 = vmul.f32 %v8490_v1, %v2744_v7  ;;  %v2839_v1 = vmul.f32 %v8492_v6, %v2743_v23  ;;  %vm9604_vm6 = vmmov %vm9586_vm0  ;;  %v2746_v32 = vld [vmem:[#allocation4 + $0x160] sm:$0xff]  ;;  %v3820_v23 = vld [vmem:[#allocation3 + $0x8] sm:$0xff] (!%p5016_p0) }
 0x723   : > { %3786 = vst.msk [vmem:[#allocation4 + $0x198] sm:$0xff] %vm9590_vm3, %v3770_v21  ;;  %v3580_v19 = vpop.permute.xlu1 %3579  ;;  %v3535_v21 = vld [vmem:[#allocation4 + $0x1c8] sm:$0xff]  ;;  %vm9605_vm3 = vmmov %vm9586_vm0  ;;  %v3819_v55 = vld [vmem:[#allocation3] sm:$0xff] (!%p5016_p0) }
 0x724   : > { %2994 = vst.msk [vmem:[#allocation4 + $0x118] sm:$0xff] %vm9591_vm2, %v2978_v54  ;;  %v8515_v27 = vpop.permute.xlu0 %3604  ;;  %v5202_v63 = vpop.f32.mrb[20].mxu1  ;;  %v3629_v62 = vmul.f32 %v3580_v19, %v3533_v11  ;;  %vm9606_vm2 = vmmov %vm9586_vm0 }
 0x725   : > { %2992 = vst.msk [vmem:[#allocation4 + $0x108] sm:$0xff] %vm9592_vm14, %v2976_v17  ;;  %v5170_v61 = vpop.f32.mrb[20].mxu0  ;;  %v3773_v12 = vadd.f32 %v5202_v63, %v3628_v18  ;;  %v3720_v37 = vpop.f32.mrb[21].mxu1  ;;  %v3538_v63 = vld [vmem:[#allocation4 + $0x1e0] sm:$0xff]  ;;  %vm9607_vm14 = vmmov %vm9586_vm0 }
 0x726   : > { %3784 = vst.msk [vmem:[#allocation4 + $0x188] sm:$0xff] %vm9593_vm12, %v3768_v20  ;;  %v2981_v51 = vadd.f32 %v5170_v61, %v2836_v44  ;;  %v2928_v2 = vpop.f32.mrb[21].mxu0  ;;  %v3771_v25 = vadd.f32 %v3720_v37, %v3626_v30  ;;  %v5203_v36 = vpop.f32.mrb[22].mxu1  ;;  %v2748_v30 = vld [vmem:[#allocation4 + $0x170] sm:$0xff]  ;;  %v2749_v61 = vld [vmem:[#allocation4 + $0x178] sm:$0xff]  ;;  %v3539_v37 = vld [vmem:[#allocation4 + $0x1e8] sm:$0xff] }
 0x727   : > { %3789 = vst.msk [vmem:[#allocation4 + $0x1b0] sm:$0xff] %vm9594_vm4, %v3773_v12  ;;  %v2979_v8 = vadd.f32 %v2928_v2, %v2834_v52  ;;  %v5171_v49 = vpop.f32.mrb[22].mxu0  ;;  %v3774_v5 = vadd.f32 %v5203_v36, %v3629_v62  ;;  %v3590_v40 = vpop.permute.xlu1 %3589  ;;  %v3541_v62 = vld [vmem:[#allocation4 + $0x1f8] sm:$0xff]  ;;  %vm9608_vm12 = vmmov %vm9586_vm0  ;;  %v2844_v2 = vmul.f32 %v8498_v31, %v2748_v30 }
 0x728   : > { %2997 = vst.msk [vmem:[#allocation4 + $0x130] sm:$0xff] %vm9595_vm5, %v2981_v51  ;;  %v2982_v28 = vadd.f32 %v5171_v49, %v2837_v53  ;;  %v2931_v59 = vpop.f32.mrb[23].mxu0  ;;  %v3723_v3 = vpop.f32.mrb[23].mxu1  ;;  %v3631_v10 = vmul.f32 %v3590_v40, %v3535_v21  ;;  %v2747_v51 = vld [vmem:[#allocation4 + $0x168] sm:$0xff]  ;;  %vm9609_vm4 = vmmov %vm9586_vm0 }
 0x729   : > { %3787 = vst.msk [vmem:[#allocation4 + $0x1a0] sm:$0xff] %vm9596_vm10, %v3771_v25  ;;  %v2980_v46 = vadd.f32 %v2931_v59, %v2835_v42  ;;  %v3772_v50 = vadd.f32 %v3723_v3, %v3627_v16  ;;  %v3615_v60 = vpop.permute.xlu0 %3614  ;;  %v3634_v25 = vmul.f32 %v8515_v27, %v3538_v63  ;;  %v2842_v42 = vmul.f32 %v8494_v48, %v2746_v32  ;;  %vm9610_vm5 = vmmov %vm9586_vm0  ;;  %v3824_v21 = vld [vmem:[#allocation3 + $0x28] sm:$0xff] (!%p5016_p0) }
 0x72a   : > { %2995 = vst.msk [vmem:[#allocation4 + $0x120] sm:$0xff] %vm9597_vm9, %v2979_v8  ;;  %v3636_v12 = vmul.f32 %v3615_v60, %v3540_v41  ;;  %v2845_v16 = vmul.f32 %v8502_v45, %v2749_v61  ;;  %vm9611_vm10 = vmmov %vm9586_vm0  ;;  %v3823_v60 = vld [vmem:[#allocation3 + $0x20] sm:$0xff] (!%p5016_p0)  ;;  %v3996_v63 = vld [vmem:[#allocation3 + $0x88] sm:$0xff] (!%p5016_p0) }
 0x72b   : > { %3790 = vst.msk [vmem:[#allocation4 + $0x1b8] sm:$0xff] %vm9598_vm13, %v3774_v5  ;;  %v3600_v35 = vpop.permute.xlu1 %3599  ;;  %vm9612_vm9 = vmmov %vm9586_vm0  ;;  %v3997_v61 = vld [vmem:[#allocation3 + $0x90] sm:$0xff] (!%p5016_p0) }
 0x72c   : > { %2998 = vst.msk [vmem:[#allocation4 + $0x138] sm:$0xff] %vm9599_vm11, %v2982_v28  ;;  %v5206_v38 = vpop.f32.mrb[24].mxu1  ;;  %v3633_v54 = vmul.f32 %v3600_v35, %v3537_v43  ;;  %vm9613_vm13 = vmmov %vm9586_vm0  ;;  %v5786_v35 = vmov (!%p5016_p0), 0  }
 0x72d   : > { %2996 = vst.msk [vmem:[#allocation4 + $0x128] sm:$0xff] %vm9600_vm8, %v2980_v46  ;;  %v5174_v34 = vpop.f32.mrb[24].mxu0  ;;  %v3777_v33 = vadd.f32 %v5206_v38, %v3632_v47  ;;  %v3736_v56 = vpop.f32.mrb[25].mxu1  ;;  %v2843_v46 = vmul.f32 %v8500_v0, %v2747_v51  ;;  %vm9614_vm11 = vmmov %vm9586_vm0  ;;  %v3821_v0 = vld [vmem:[#allocation3 + $0x10] sm:$0xff] (!%p5016_p0)  ;;  %v3822_v47 = vld [vmem:[#allocation3 + $0x18] sm:$0xff] (!%p5016_p0)  ;;  %5592 = vset.pattern.permute.xlu1 (!%p5016_p0), %v5786_v35  ;;  %5591 = vset.pattern.permute.xlu0 (!%p5016_p0), %v5786_v35 }
 0x72e   : > { %3788 = vst.msk [vmem:[#allocation4 + $0x1a8] sm:$0xff] %vm9601_vm15, %v3772_v50  ;;  %v2985_v17 = vadd.f32 %v5174_v34, %v2840_v4  ;;  %v2944_v22 = vpop.f32.mrb[25].mxu0  ;;  %v3775_v39 = vadd.f32 %v3736_v56, %v3630_v58  ;;  %v5207_v20 = vpop.f32.mrb[26].mxu1  ;;  %vm9615_vm8 = vmmov %vm9586_vm0  ;;  %v3825_v34 = vld [vmem:[#allocation3 + $0x30] sm:$0xff] (!%p5016_p0)  ;;  %v3999_v51 = vld [vmem:[#allocation3 + $0xa0] sm:$0xff] (!%p5016_p0) }
 0x72f   : > { %3793 = vst.msk [vmem:[#allocation4 + $0x1d0] sm:$0xff] %vm9586_vm0, %v3777_v33  ;;  %v2983_v11 = vadd.f32 %v2944_v22, %v2838_v29  ;;  %v5175_v26 = vpop.f32.mrb[26].mxu0  ;;  %v3778_v18 = vadd.f32 %v5207_v20, %v3633_v54  ;;  %v3610_v19 = vpop.permute.xlu1 %3609  ;;  %vm9616_vm15 = vmmov %vm9586_vm0  ;;  %vm3837_vm0 = vcmp.gt.f32.partialorder (!%p5016_p0), %v3821_v0, 0.0  ;;  %v3826_v54 = vld [vmem:[#allocation3 + $0x38] sm:$0xff] (!%p5016_p0) }
 0x730   : > { %3001 = vst.msk [vmem:[#allocation4 + $0x150] sm:$0xff] %vm9602_vm7, %v2985_v17  ;;  %v2986_v9 = vadd.f32 %v5175_v26, %v2841_v13  ;;  %v2947_v57 = vpop.f32.mrb[27].mxu0  ;;  %v3739_v44 = vpop.f32.mrb[27].mxu1  ;;  %v3635_v24 = vmul.f32 %v3610_v19, %v3539_v37  ;;  %vm3835_vm7 = vcmp.gt.f32.partialorder (!%p5016_p0), %v3819_v55, 0.0  ;;  %v3853_v4 = vsel (!%p5016_p0), %vm3837_vm0, %v3821_v0, 1.0  ;;  %v3828_v13 = vld [vmem:[#allocation3 + $0x48] sm:$0xff] (!%p5016_p0) }
 0x731   : > { %3791 = vst.msk [vmem:[#allocation4 + $0x1c0] sm:$0xff] %vm9603_vm1, %v3775_v39  ;;  %v2984_v6 = vadd.f32 %v2947_v57, %v2839_v1  ;;  %v3776_v52 = vadd.f32 %v3739_v44, %v3631_v10  ;;  %vm3838_vm1 = vcmp.gt.f32.partialorder (!%p5016_p0), %v3822_v47, 0.0  ;;  %v3851_v58 = vsel (!%p5016_p0), %vm3835_vm7, %v3819_v55, 1.0  ;;  %3895 = vperm.xlu1 (!%p5016_p0), %5592, %v3853_v4   ;;  %v3827_v17 = vld [vmem:[#allocation3 + $0x40] sm:$0xff] (!%p5016_p0)  ;;  %v3830_v20 = vld [vmem:[#allocation3 + $0x58] sm:$0xff] (!%p5016_p0)  ;;  %v3829_v1 = vld [vmem:[#allocation3 + $0x50] sm:$0xff] (!%p5016_p0) }
 0x732   : > { %2999 = vst.msk [vmem:[#allocation4 + $0x140] sm:$0xff] %vm9604_vm6, %v2983_v11  ;;  %vm3836_vm6 = vcmp.gt.f32.partialorder (!%p5016_p0), %v3820_v23, 0.0  ;;  %3885 = vperm.xlu0 (!%p5016_p0), %5591, %v3851_v58   ;;  %v3854_v38 = vsel (!%p5016_p0), %vm3838_vm1, %v3822_v47, 1.0  ;;  %v3832_v26 = vld [vmem:[#allocation3 + $0x68] sm:$0xff] (!%p5016_p0)  ;;  %v3833_v57 = vld [vmem:[#allocation3 + $0x70] sm:$0xff] (!%p5016_p0)  ;;  %vm4012_vm0 = vcmp.gt.f32.partialorder (!%p5016_p0), %v3996_v63, 0.0 }
 0x733   : > { %3794 = vst.msk [vmem:[#allocation4 + $0x1d8] sm:$0xff] %vm9605_vm3, %v3778_v18  ;;  %v3620_v53 = vpop.permute.xlu1 %3619  ;;  %v3852_v29 = vsel (!%p5016_p0), %vm3836_vm6, %v3820_v23, 1.0  ;;  %vm3840_vm3 = vcmp.gt.f32.partialorder (!%p5016_p0), %v3824_v21, 0.0  ;;  %v3831_v18 = vld [vmem:[#allocation3 + $0x60] sm:$0xff] (!%p5016_p0)  ;;  %vm4013_vm6 = vcmp.gt.f32.partialorder (!%p5016_p0), %v3997_v61, 0.0  ;;  %v4174_v35 = vld [vmem:[#allocation3 + $0x118] sm:$0xff] (!%p5016_p0) }
 0x734   : > { %3002 = vst.msk [vmem:[#allocation4 + $0x158] sm:$0xff] %vm9606_vm2, %v2986_v9  ;;  %v5210_v36 = vpop.f32.mrb[28].mxu1  ;;  %v3637_v8 = vmul.f32 %v3620_v53, %v3541_v62  ;;  %vm3839_vm2 = vcmp.gt.f32.partialorder (!%p5016_p0), %v3823_v60, 0.0  ;;  %v3856_v33 = vsel (!%p5016_p0), %vm3840_vm3, %v3824_v21, 1.0  ;;  %v3834_v9 = vld [vmem:[#allocation3 + $0x78] sm:$0xff] (!%p5016_p0)  ;;  %v4000_v53 = vld [vmem:[#allocation3 + $0xa8] sm:$0xff] (!%p5016_p0) }
 0x735   : > { %3000 = vst.msk [vmem:[#allocation4 + $0x148] sm:$0xff] %vm9607_vm14, %v2984_v6  ;;  %v5178_v49 = vpop.f32.mrb[28].mxu0  ;;  %v3781_v5 = vadd.f32 %v5210_v36, %v3636_v12  ;;  %v3752_v40 = vpop.f32.mrb[29].mxu1  ;;  %3900 = vperm.xlu1 (!%p5016_p0), %5592, %v3854_v38   ;;  %v3855_v56 = vsel (!%p5016_p0), %vm3839_vm2, %v3823_v60, 1.0  ;;  %vm3842_vm14 = vcmp.gt.f32.partialorder (!%p5016_p0), %v3826_v54, 0.0  ;;  %v3995_v6 = vld [vmem:[#allocation3 + $0x80] sm:$0xff] (!%p5016_p0) }
 0x736   : > { %3792 = vst.msk [vmem:[#allocation4 + $0x1c8] sm:$0xff] %vm9608_vm12, %v3776_v52  ;;  %v2989_v28 = vadd.f32 %v5178_v49, %v2844_v2  ;;  %v2960_v59 = vpop.f32.mrb[29].mxu0  ;;  %v3779_v7 = vadd.f32 %v3752_v40, %v3634_v25  ;;  %v5211_v14 = vpop.f32.mrb[30].mxu1  ;;  %3890 = vperm.xlu0 (!%p5016_p0), %5591, %v3852_v29   ;;  %vm3841_vm12 = vcmp.gt.f32.partialorder (!%p5016_p0), %v3825_v34, 0.0  ;;  %v3858_v22 = vsel (!%p5016_p0), %vm3842_vm14, %v3826_v54, 1.0  ;;  %v3998_v62 = vld [vmem:[#allocation3 + $0x98] sm:$0xff] (!%p5016_p0) }
 0x737   : > { %3797 = vst.msk [vmem:[#allocation4 + $0x1f0] sm:$0xff] %vm9609_vm4, %v3781_v5  ;;  %v2987_v31 = vadd.f32 %v2960_v59, %v2842_v42  ;;  %v5179_v27 = vpop.f32.mrb[30].mxu0  ;;  %v3782_v3 = vadd.f32 %v5211_v14, %v3637_v8  ;;  %v3755_v15 = vpop.f32.mrb[31].mxu1  ;;  %v3857_v39 = vsel (!%p5016_p0), %vm3841_vm12, %v3825_v34, 1.0  ;;  %vm3844_vm4 = vcmp.gt.f32.partialorder (!%p5016_p0), %v3828_v13, 0.0  ;;  %v4002_v36 = vld [vmem:[#allocation3 + $0xb8] sm:$0xff] (!%p5016_p0) }
 0x738   : > { %3005 = vst.msk [vmem:[#allocation4 + $0x170] sm:$0xff] %vm9610_vm5, %v2989_v28  ;;  %v2990_v48 = vadd.f32 %v5179_v27, %v2845_v16  ;;  %v2963_v50 = vpop.f32.mrb[31].mxu0  ;;  %v3780_v45 = vadd.f32 %v3755_v15, %v3635_v24  ;;  %3818 = sbr.rel (%p5016_p0) target bundleno = 2224 (0x8b0), region = 82  ;;  %vm3843_vm5 = vcmp.gt.f32.partialorder (!%p5016_p0), %v3827_v17, 0.0  ;;  %v3860_v10 = vsel (!%p5016_p0), %vm3844_vm4, %v3828_v13, 1.0  ;;  %v4001_v42 = vld [vmem:[#allocation3 + $0xb0] sm:$0xff] (!%p5016_p0) }
 0x739   : > { %3795 = vst.msk [vmem:[#allocation4 + $0x1e0] sm:$0xff] %vm9611_vm10, %v3779_v7  ;;  %v2988_v43 = vadd.f32 %v2963_v50, %v2843_v46  ;;  %3910 = vperm.xlu1 (!%p5016_p0), %5592, %v3856_v33   ;;  %v3859_v11 = vsel (!%p5016_p0), %vm3843_vm5, %v3827_v17, 1.0  ;;  %vm3846_vm10 = vcmp.gt.f32.partialorder (!%p5016_p0), %v3830_v20, 0.0  ;;  %vm4011_vm7 = vcmp.gt.f32.partialorder (!%p5016_p0), %v3995_v6, 0.0  ;;  %v4004_v5 = vld [vmem:[#allocation3 + $0xc8] sm:$0xff] (!%p5016_p0)  ;;  %v4003_v40 = vld [vmem:[#allocation3 + $0xc0] sm:$0xff] (!%p5016_p0) }
 0x73a   : > { %3003 = vst.msk [vmem:[#allocation4 + $0x160] sm:$0xff] %vm9612_vm9, %v2987_v31  ;;  %3905 = vperm.xlu0 (!%p5016_p0), %5591, %v3855_v56   ;;  %vm3845_vm9 = vcmp.gt.f32.partialorder (!%p5016_p0), %v3829_v1, 0.0  ;;  %v3862_v19 = vsel (!%p5016_p0), %vm3846_vm10, %v3830_v20, 1.0  ;;  %v4028_v12 = vsel (!%p5016_p0), %vm4012_vm0, %v3996_v63, 1.0  ;;  %v4027_v37 = vsel (!%p5016_p0), %vm4011_vm7, %v3995_v6, 1.0  ;;  %v4006_v28 = vld [vmem:[#allocation3 + $0xd8] sm:$0xff] (!%p5016_p0) }
 0x73b   : > { %3798 = vst.msk [vmem:[#allocation4 + $0x1f8] sm:$0xff] %vm9613_vm13, %v3782_v3  ;;  %v3861_v41 = vsel (!%p5016_p0), %vm3845_vm9, %v3829_v1, 1.0  ;;  %vm3848_vm13 = vcmp.gt.f32.partialorder (!%p5016_p0), %v3832_v26, 0.0  ;;  %vm4014_vm1 = vcmp.gt.f32.partialorder (!%p5016_p0), %v3998_v62, 0.0  ;;  %v4029_v25 = vsel (!%p5016_p0), %vm4013_vm6, %v3997_v61, 1.0  ;;  %v4005_v59 = vld [vmem:[#allocation3 + $0xd0] sm:$0xff] (!%p5016_p0) }
 0x73c   : > { %3006 = vst.msk [vmem:[#allocation4 + $0x178] sm:$0xff] %vm9614_vm11, %v2990_v48  ;;  %vm3847_vm11 = vcmp.gt.f32.partialorder (!%p5016_p0), %v3831_v18, 0.0  ;;  %v3864_v44 = vsel (!%p5016_p0), %vm3848_vm13, %v3832_v26, 1.0  ;;  %v4030_v2 = vsel (!%p5016_p0), %vm4014_vm1, %v3998_v62, 1.0  ;;  %vm4016_vm3 = vcmp.gt.f32.partialorder (!%p5016_p0), %v4000_v53, 0.0  ;;  %v4008_v46 = vld [vmem:[#allocation3 + $0xe8] sm:$0xff] (!%p5016_p0) }
 0x73d   : > { %3796 = vst.msk [vmem:[#allocation4 + $0x1e8] sm:$0xff] %vm9615_vm8, %v3780_v45  ;;  %3920 = vperm.xlu1 (!%p5016_p0), %5592, %v3858_v22   ;;  %v3863_v30 = vsel (!%p5016_p0), %vm3847_vm11, %v3831_v18, 1.0  ;;  %vm3850_vm8 = vcmp.gt.f32.partialorder (!%p5016_p0), %v3834_v9, 0.0  ;;  %vm4015_vm2 = vcmp.gt.f32.partialorder (!%p5016_p0), %v3999_v51, 0.0  ;;  %v4032_v8 = vsel (!%p5016_p0), %vm4016_vm3, %v4000_v53, 1.0  ;;  %v4007_v31 = vld [vmem:[#allocation3 + $0xe0] sm:$0xff] (!%p5016_p0) }
 0x73e   : > { %3004 = vst.msk [vmem:[#allocation4 + $0x168] sm:$0xff] %vm9616_vm15, %v2988_v43  ;;  %3915 = vperm.xlu0 (!%p5016_p0), %5591, %v3857_v39   ;;  %vm3849_vm15 = vcmp.gt.f32.partialorder (!%p5016_p0), %v3833_v57, 0.0  ;;  %v3866_v52 = vsel (!%p5016_p0), %vm3850_vm8, %v3834_v9, 1.0  ;;  %v4031_v49 = vsel (!%p5016_p0), %vm4015_vm2, %v3999_v51, 1.0  ;;  %vm4018_vm14 = vcmp.gt.f32.partialorder (!%p5016_p0), %v4002_v36, 0.0  ;;  %v4010_v15 = vld [vmem:[#allocation3 + $0xf8] sm:$0xff] (!%p5016_p0) }
 0x73f   : > { %v3865_v32 = vsel %vm3849_vm15, %v3833_v57, 1.0  ;;  %vm4017_vm12 = vcmp.gt.f32.partialorder %v4001_v42, 0.0  ;;  %v4034_v16 = vsel %vm4018_vm14, %v4002_v36, 1.0  ;;  %vm4020_vm4 = vcmp.gt.f32.partialorder %v4004_v5, 0.0  ;;  %v4009_v48 = vld [vmem:[#allocation3 + $0xf0] sm:$0xff]  ;;  %v4172_v43 = vld [vmem:[#allocation3 + $0x108] sm:$0xff] }
 0x740   : > { %v4033_v24 = vsel %vm4017_vm12, %v4001_v42, 1.0  ;;  %vm4019_vm5 = vcmp.gt.f32.partialorder %v4003_v40, 0.0  ;;  %v4036_v7 = vsel %vm4020_vm4, %v4004_v5, 1.0  ;;  %vm4022_vm10 = vcmp.gt.f32.partialorder %v4006_v28, 0.0  ;;  %v4171_v0 = vld [vmem:[#allocation3 + $0x100] sm:$0xff]  ;;  %v4173_v23 = vld [vmem:[#allocation3 + $0x110] sm:$0xff] }
 0x741   : > { %3930 = vperm.xlu1 %5592, %v3860_v10   ;;  %v4035_v14 = vsel %vm4019_vm5, %v4003_v40, 1.0  ;;  %vm4021_vm9 = vcmp.gt.f32.partialorder %v4005_v59, 0.0  ;;  %v4038_v27 = vsel %vm4022_vm10, %v4006_v28, 1.0  ;;  %vm4024_vm13 = vcmp.gt.f32.partialorder %v4008_v46, 0.0  ;;  %v4176_v21 = vld [vmem:[#allocation3 + $0x128] sm:$0xff]  ;;  %v4175_v60 = vld [vmem:[#allocation3 + $0x120] sm:$0xff] }
 0x742   : > { %3925 = vperm.xlu0 %5591, %v3859_v11   ;;  %v4037_v3 = vsel %vm4021_vm9, %v4005_v59, 1.0  ;;  %vm4023_vm11 = vcmp.gt.f32.partialorder %v4007_v31, 0.0  ;;  %v4040_v50 = vsel %vm4024_vm13, %v4008_v46, 1.0  ;;  %vm4026_vm8 = vcmp.gt.f32.partialorder %v4010_v15, 0.0  ;;  %v4178_v54 = vld [vmem:[#allocation3 + $0x138] sm:$0xff]  ;;  %v4177_v34 = vld [vmem:[#allocation3 + $0x130] sm:$0xff] }
 0x743   : > { %v4039_v45 = vsel %vm4023_vm11, %v4007_v31, 1.0  ;;  %vm4025_vm15 = vcmp.gt.f32.partialorder %v4009_v48, 0.0  ;;  %v4042_v55 = vsel %vm4026_vm8, %v4010_v15, 1.0  ;;  %vm4188_vm0 = vcmp.gt.f32.partialorder %v4172_v43, 0.0  ;;  %v4180_v13 = vld [vmem:[#allocation3 + $0x148] sm:$0xff]  ;;  %v4179_v17 = vld [vmem:[#allocation3 + $0x140] sm:$0xff] }
 0x744   : > { %v4041_v47 = vsel %vm4025_vm15, %v4009_v48, 1.0  ;;  %vm4187_vm7 = vcmp.gt.f32.partialorder %v4171_v0, 0.0  ;;  %v4204_v4 = vsel %vm4188_vm0, %v4172_v43, 1.0  ;;  %vm4190_vm1 = vcmp.gt.f32.partialorder %v4174_v35, 0.0  ;;  %v4182_v20 = vld [vmem:[#allocation3 + $0x158] sm:$0xff]  ;;  %v4181_v1 = vld [vmem:[#allocation3 + $0x150] sm:$0xff] }
 0x745   : > { %3940 = vperm.xlu1 %5592, %v3862_v19   ;;  %v4203_v58 = vsel %vm4187_vm7, %v4171_v0, 1.0  ;;  %vm4189_vm6 = vcmp.gt.f32.partialorder %v4173_v23, 0.0  ;;  %v4206_v38 = vsel %vm4190_vm1, %v4174_v35, 1.0  ;;  %vm4192_vm3 = vcmp.gt.f32.partialorder %v4176_v21, 0.0  ;;  %v4184_v26 = vld [vmem:[#allocation3 + $0x168] sm:$0xff]  ;;  %v4183_v18 = vld [vmem:[#allocation3 + $0x160] sm:$0xff] }
 0x746   : > { %3935 = vperm.xlu0 %5591, %v3861_v41   ;;  %v4205_v29 = vsel %vm4189_vm6, %v4173_v23, 1.0  ;;  %vm4191_vm2 = vcmp.gt.f32.partialorder %v4175_v60, 0.0  ;;  %v4208_v33 = vsel %vm4192_vm3, %v4176_v21, 1.0  ;;  %vm4194_vm14 = vcmp.gt.f32.partialorder %v4178_v54, 0.0  ;;  %v4186_v9 = vld [vmem:[#allocation3 + $0x178] sm:$0xff]  ;;  %v4185_v57 = vld [vmem:[#allocation3 + $0x170] sm:$0xff] }
 0x747   : > { %v4207_v56 = vsel %vm4191_vm2, %v4175_v60, 1.0  ;;  %vm4193_vm12 = vcmp.gt.f32.partialorder %v4177_v34, 0.0  ;;  %v4210_v22 = vsel %vm4194_vm14, %v4178_v54, 1.0  ;;  %vm4196_vm4 = vcmp.gt.f32.partialorder %v4180_v13, 0.0  ;;  %v4348_v63 = vld [vmem:[#allocation3 + $0x188] sm:$0xff]  ;;  %v4347_v6 = vld [vmem:[#allocation3 + $0x180] sm:$0xff] }
 0x748   : > { %v4209_v39 = vsel %vm4193_vm12, %v4177_v34, 1.0  ;;  %vm4195_vm5 = vcmp.gt.f32.partialorder %v4179_v17, 0.0  ;;  %v4212_v10 = vsel %vm4196_vm4, %v4180_v13, 1.0  ;;  %vm4198_vm10 = vcmp.gt.f32.partialorder %v4182_v20, 0.0  ;;  %v4350_v62 = vld [vmem:[#allocation3 + $0x198] sm:$0xff]  ;;  %v4349_v61 = vld [vmem:[#allocation3 + $0x190] sm:$0xff] }
 0x749   : > { %3950 = vperm.xlu1 %5592, %v3864_v44   ;;  %v4211_v11 = vsel %vm4195_vm5, %v4179_v17, 1.0  ;;  %vm4197_vm9 = vcmp.gt.f32.partialorder %v4181_v1, 0.0  ;;  %v4214_v19 = vsel %vm4198_vm10, %v4182_v20, 1.0  ;;  %vm4200_vm13 = vcmp.gt.f32.partialorder %v4184_v26, 0.0  ;;  %v4352_v53 = vld [vmem:[#allocation3 + $0x1a8] sm:$0xff]  ;;  %v4351_v51 = vld [vmem:[#allocation3 + $0x1a0] sm:$0xff] }
 0x74a   : > { %3945 = vperm.xlu0 %5591, %v3863_v30   ;;  %v4213_v41 = vsel %vm4197_vm9, %v4181_v1, 1.0  ;;  %vm4199_vm11 = vcmp.gt.f32.partialorder %v4183_v18, 0.0  ;;  %v4216_v44 = vsel %vm4200_vm13, %v4184_v26, 1.0  ;;  %vm4202_vm8 = vcmp.gt.f32.partialorder %v4186_v9, 0.0  ;;  %v4354_v36 = vld [vmem:[#allocation3 + $0x1b8] sm:$0xff]  ;;  %v4353_v42 = vld [vmem:[#allocation3 + $0x1b0] sm:$0xff] }
 0x74b   : > { %v4215_v30 = vsel %vm4199_vm11, %v4183_v18, 1.0  ;;  %vm4201_vm15 = vcmp.gt.f32.partialorder %v4185_v57, 0.0  ;;  %vm4364_vm0 = vcmp.gt.f32.partialorder %v4348_v63, 0.0  ;;  %vm4363_vm7 = vcmp.gt.f32.partialorder %v4347_v6, 0.0  ;;  %v4356_v5 = vld [vmem:[#allocation3 + $0x1c8] sm:$0xff]  ;;  %v4355_v40 = vld [vmem:[#allocation3 + $0x1c0] sm:$0xff] }
 0x74c   : > { %vm4366_vm1 = vcmp.gt.f32.partialorder %v4350_v62, 0.0  ;;  %vm4365_vm6 = vcmp.gt.f32.partialorder %v4349_v61, 0.0  ;;  %vm4368_vm3 = vcmp.gt.f32.partialorder %v4352_v53, 0.0  ;;  %vm4367_vm2 = vcmp.gt.f32.partialorder %v4351_v51, 0.0  ;;  %v4358_v28 = vld [vmem:[#allocation3 + $0x1d8] sm:$0xff]  ;;  %v4357_v59 = vld [vmem:[#allocation3 + $0x1d0] sm:$0xff] }
 0x74d   : > { %3960 = vperm.xlu1 %5592, %v3866_v52   ;;  %v4218_v52 = vsel %vm4202_vm8, %v4186_v9, 1.0  ;;  %vm4370_vm14 = vcmp.gt.f32.partialorder %v4354_v36, 0.0  ;;  %vm4369_vm12 = vcmp.gt.f32.partialorder %v4353_v42, 0.0  ;;  %vm4372_vm4 = vcmp.gt.f32.partialorder %v4356_v5, 0.0  ;;  %v4360_v46 = vld [vmem:[#allocation3 + $0x1e8] sm:$0xff]  ;;  %v4359_v31 = vld [vmem:[#allocation3 + $0x1e0] sm:$0xff] }
 0x74e   : > { %3955 = vperm.xlu0 %5591, %v3865_v32   ;;  %v4217_v32 = vsel %vm4201_vm15, %v4185_v57, 1.0  ;;  %vm4371_vm5 = vcmp.gt.f32.partialorder %v4355_v40, 0.0  ;;  %vm4374_vm10 = vcmp.gt.f32.partialorder %v4358_v28, 0.0  ;;  %vm4373_vm9 = vcmp.gt.f32.partialorder %v4357_v59, 0.0  ;;  %v4362_v15 = vld [vmem:[#allocation3 + $0x1f8] sm:$0xff]  ;;  %v4361_v48 = vld [vmem:[#allocation3 + $0x1f0] sm:$0xff] }
 0x74f   : > { %vm4376_vm13 = vcmp.gt.f32.partialorder %v4360_v46, 0.0  ;;  %vm4375_vm11 = vcmp.gt.f32.partialorder %v4359_v31, 0.0  ;;  %vm4378_vm8 = vcmp.gt.f32.partialorder %v4362_v15, 0.0  ;;  %vm4377_vm15 = vcmp.gt.f32.partialorder %v4361_v48, 0.0  ;;  %v4044_v26 = vld [vmem:[#allocation4 + $0x88] sm:$0xff]  ;;  %v4043_v18 = vld [vmem:[#allocation4 + $0x80] sm:$0xff] }
 0x750   : > { %v4394_v43 = vsel %vm4378_vm8, %v4362_v15, 1.0  ;;  %v4393_v0 = vsel %vm4377_vm15, %v4361_v48, 1.0 }
 0x751   : > { %4066 = vperm.xlu1 %5592, %v4028_v12   ;;  %v4380_v12 = vsel %vm4364_vm0, %v4348_v63, 1.0  ;;  %v4046_v63 = vld [vmem:[#allocation4 + $0x98] sm:$0xff]  ;;  %vm4731_vm0 = vcmask 261120  }
 0x752   : > { %4061 = vperm.xlu0 %5591, %v4027_v37   ;;  %v4379_v37 = vsel %vm4363_vm7, %v4347_v6, 1.0  ;;  %v4045_v6 = vld [vmem:[#allocation4 + $0x90] sm:$0xff]  ;;  %vm4748_vm7 = vcmask 392192  }
 0x755   : > { %4076 = vperm.xlu1 %5592, %v4030_v2   ;;  %v4382_v2 = vsel %vm4366_vm1, %v4350_v62, 1.0  ;;  %vm9617_vm1 = vcmask 130048  }
 0x756   : > { %4071 = vperm.xlu0 %5591, %v4029_v25   ;;  %v4381_v25 = vsel %vm4365_vm6, %v4349_v61, 1.0  ;;  %vm4765_vm6 = vcmask 523264   ;;  %vm9628_vm8 = vmmov %vm9617_vm1 }
 0x757   : > { %vm9629_vm15 = vmmov %vm9617_vm1 }
 0x759   : > { %4086 = vperm.xlu1 %5592, %v4032_v8   ;;  %v4384_v8 = vsel %vm4368_vm3, %v4352_v53, 1.0  ;;  %v4048_v53 = vld [vmem:[#allocation4 + $0xa8] sm:$0xff]  ;;  %vm9618_vm3 = vmmov %vm9617_vm1 }
 0x75a   : > { %4081 = vperm.xlu0 %5591, %v4031_v49   ;;  %v4383_v49 = vsel %vm4367_vm2, %v4351_v51, 1.0  ;;  %v4047_v51 = vld [vmem:[#allocation4 + $0xa0] sm:$0xff]  ;;  %vm9619_vm2 = vmmov %vm9617_vm1 }
 0x75d   : > { %4096 = vperm.xlu1 %5592, %v4034_v16   ;;  %v4386_v16 = vsel %vm4370_vm14, %v4354_v36, 1.0  ;;  %vm9620_vm14 = vmmov %vm9617_vm1 }
 0x75e   : > { %4091 = vperm.xlu0 %5591, %v4033_v24   ;;  %v4385_v24 = vsel %vm4369_vm12, %v4353_v42, 1.0  ;;  %vm9621_vm12 = vmmov %vm9617_vm1 }
 0x761   : > { %4106 = vperm.xlu1 %5592, %v4036_v7   ;;  %v4388_v7 = vsel %vm4372_vm4, %v4356_v5, 1.0  ;;  %v4050_v5 = vld [vmem:[#allocation4 + $0xb8] sm:$0xff]  ;;  %vm9622_vm4 = vmmov %vm9617_vm1 }
 0x762   : > { %4101 = vperm.xlu0 %5591, %v4035_v14   ;;  %v4387_v14 = vsel %vm4371_vm5, %v4355_v40, 1.0  ;;  %v4049_v40 = vld [vmem:[#allocation4 + $0xb0] sm:$0xff]  ;;  %vm9623_vm5 = vmmov %vm9617_vm1 }
 0x765   : > { %4116 = vperm.xlu1 %5592, %v4038_v27   ;;  %v4390_v27 = vsel %vm4374_vm10, %v4358_v28, 1.0  ;;  %vm9624_vm10 = vmmov %vm9617_vm1 }
 0x766   : > { %4111 = vperm.xlu0 %5591, %v4037_v3   ;;  %v4389_v3 = vsel %vm4373_vm9, %v4357_v59, 1.0  ;;  %vm9625_vm9 = vmmov %vm9617_vm1 }
 0x769   : > { %4126 = vperm.xlu1 %5592, %v4040_v50   ;;  %v4392_v50 = vsel %vm4376_vm13, %v4360_v46, 1.0  ;;  %v4052_v46 = vld [vmem:[#allocation4 + $0xc8] sm:$0xff]  ;;  %vm9626_vm13 = vmmov %vm9617_vm1 }
 0x76a   : > { %4121 = vperm.xlu0 %5591, %v4039_v45   ;;  %v4391_v45 = vsel %vm4375_vm11, %v4359_v31, 1.0  ;;  %v4051_v31 = vld [vmem:[#allocation4 + $0xc0] sm:$0xff]  ;;  %vm9627_vm11 = vmmov %vm9617_vm1 }
 0x76d   : > { %4136 = vperm.xlu1 %5592, %v4042_v55  }
 0x76e   : > { %4131 = vperm.xlu0 %5591, %v4041_v47  }
 0x771   : > { %4242 = vperm.xlu1 %5592, %v4204_v4  }
 0x772   : > { %4237 = vperm.xlu0 %5591, %v4203_v58  }
 0x775   : > { %4252 = vperm.xlu1 %5592, %v4206_v38  }
 0x776   : > { %4247 = vperm.xlu0 %5591, %v4205_v29  }
 0x779   : > { %4262 = vperm.xlu1 %5592, %v4208_v33  }
 0x77a   : > { %4257 = vperm.xlu0 %5591, %v4207_v56  }
 0x77d   : > { %4272 = vperm.xlu1 %5592, %v4210_v22  }
 0x77e   : > { %4267 = vperm.xlu0 %5591, %v4209_v39  }
 0x781   : > { %4282 = vperm.xlu1 %5592, %v4212_v10  }
 0x782   : > { %4277 = vperm.xlu0 %5591, %v4211_v11  }
 0x785   : > { %4292 = vperm.xlu1 %5592, %v4214_v19  }
 0x786   : > { %4287 = vperm.xlu0 %5591, %v4213_v41  }
 0x789   : > { %4302 = vperm.xlu1 %5592, %v4216_v44  }
 0x78a   : > { %4297 = vperm.xlu0 %5591, %v4215_v30  }
 0x78d   : > { %4312 = vperm.xlu1 %5592, %v4218_v52  }
 0x78e   : > { %4307 = vperm.xlu0 %5591, %v4217_v32  }
 0x791   : > { %4418 = vperm.xlu1 %5592, %v4380_v12  }
 0x792   : > { %4413 = vperm.xlu0 %5591, %v4379_v37  }
 0x795   : > { %4428 = vperm.xlu1 %5592, %v4382_v2  }
 0x796   : > { %4423 = vperm.xlu0 %5591, %v4381_v25  }
 0x799   : > { %4438 = vperm.xlu1 %5592, %v4384_v8  }
 0x79a   : > { %4433 = vperm.xlu0 %5591, %v4383_v49  }
 0x79d   : > { %4448 = vperm.xlu1 %5592, %v4386_v16  }
 0x79e   : > { %4443 = vperm.xlu0 %5591, %v4385_v24  }
 0x7a1   : > { %4458 = vperm.xlu1 %5592, %v4388_v7  }
 0x7a2   : > { %4453 = vperm.xlu0 %5591, %v4387_v14  }
 0x7a5   : > { %4468 = vperm.xlu1 %5592, %v4390_v27  }
 0x7a6   : > { %4463 = vperm.xlu0 %5591, %v4389_v3  }
 0x7a9   : > { %4478 = vperm.xlu1 %5592, %v4392_v50  }
 0x7aa   : > { %4473 = vperm.xlu0 %5591, %v4391_v45  }
 0x7ad   : > { %4488 = vperm.xlu1 %5592, %v4394_v43   ;;  %v4054_v43 = vld [vmem:[#allocation4 + $0xd8] sm:$0xff] }
 0x7ae   : > { %4483 = vperm.xlu0 %5591, %v4393_v0   ;;  %v4053_v0 = vld [vmem:[#allocation4 + $0xd0] sm:$0xff] }
 0x7b0   : > { %v8555_v55 = vpop.permute.xlu1 %3895 }
 0x7b1   : > { %v8557_v47 = vpop.permute.xlu0 %3885 }
 0x7b4   : > { %v8559_v35 = vpop.permute.xlu1 %3900 }
 0x7b5   : > { %v8561_v23 = vpop.permute.xlu0 %3890 }
 0x7b8   : > { %v8563_v4 = vpop.permute.xlu1 %3910 }
 0x7b9   : > { %v8565_v58 = vpop.permute.xlu0 %3905 }
 0x7bc   : > { %v8567_v21 = vpop.permute.xlu1 %3920 }
 0x7bd   : > { %v8569_v60 = vpop.permute.xlu0 %3915 }
 0x7c0   : > { %v8571_v38 = vpop.permute.xlu1 %3930 }
 0x7c1   : > { %v8573_v29 = vpop.permute.xlu0 %3925 }
 0x7c4   : > { %v8575_v54 = vpop.permute.xlu1 %3940 }
 0x7c5   : > { %v8577_v34 = vpop.permute.xlu0 %3935 }
 0x7c8   : > { %v8579_v33 = vpop.permute.xlu1 %3950 }
 0x7c9   : > { %v8581_v56 = vpop.permute.xlu0 %3945 }
 0x7cc   : > { %v8583_v13 = vpop.permute.xlu1 %3960 }
 0x7cd   : > { %v8585_v17 = vpop.permute.xlu0 %3955 }
 0x7d0   : > { %v4067_v22 = vpop.permute.xlu1 %4066 }
 0x7d1   : > { %v4062_v39 = vpop.permute.xlu0 %4061  ;;  %5593 = vrcp.f32 %v4067_v22 }
 0x7d2   : > { %5595 = vrcp.f32 %v4062_v39 }
 0x7d4   : > { %v4077_v20 = vpop.permute.xlu1 %4076 }
 0x7d5   : > { %v4072_v1 = vpop.permute.xlu0 %4071  ;;  %5597 = vrcp.f32 %v4077_v20 }
 0x7d6   : > { %5599 = vrcp.f32 %v4072_v1 }
 0x7d8   : > { %v4087_v10 = vpop.permute.xlu1 %4086 }
 0x7d9   : > { %v4082_v11 = vpop.permute.xlu0 %4081  ;;  %5601 = vrcp.f32 %v4087_v10 }
 0x7da   : > { %5603 = vrcp.f32 %v4082_v11 }
 0x7db   : > { %v5594_v19 = vpop.eup %5593 }
 0x7dc   : > { %v5596_v41 = vpop.eup %5595  ;;  %v4097_v9 = vpop.permute.xlu1 %4096  ;;  %v4142_v44 = vmul.f32 %v5594_v19, %v4044_v26  ;;  %v4056_v26 = vld [vmem:[#allocation4 + $0xe8] sm:$0xff] }
 0x7dd   : > { %v4092_v57 = vpop.permute.xlu0 %4091  ;;  %5605 = vrcp.f32 %v4097_v9  ;;  %v4140_v30 = vmul.f32 %v5596_v41, %v4043_v18  ;;  %v4055_v18 = vld [vmem:[#allocation4 + $0xe0] sm:$0xff] }
 0x7de   : > { %5607 = vrcp.f32 %v4092_v57  ;;  %4541 = vrot.lane.b32.xlu1 %v4142_v44, %s5787_s17 }
 0x7df   : > { %v5598_v52 = vpop.eup %5597  ;;  %4539 = vrot.lane.b32.xlu0 %v4140_v30, %s5787_s17 }
 0x7e0   : > { %v5600_v32 = vpop.eup %5599  ;;  %v4107_v62 = vpop.permute.xlu1 %4106  ;;  %v4146_v12 = vmul.f32 %v5598_v52, %v4046_v63  ;;  %v4058_v63 = vld [vmem:[#allocation4 + $0xf8] sm:$0xff] }
 0x7e1   : > { %v4102_v61 = vpop.permute.xlu0 %4101  ;;  %5609 = vrcp.f32 %v4107_v62  ;;  %v4144_v37 = vmul.f32 %v5600_v32, %v4045_v6  ;;  %v4057_v6 = vld [vmem:[#allocation4 + $0xf0] sm:$0xff] }
 0x7e2   : > { %5611 = vrcp.f32 %v4102_v61  ;;  %4545 = vrot.lane.b32.xlu1 %v4146_v12, %s5787_s17 }
 0x7e3   : > { %v5602_v2 = vpop.eup %5601  ;;  %4543 = vrot.lane.b32.xlu0 %v4144_v37, %s5787_s17 }
 0x7e4   : > { %v5604_v25 = vpop.eup %5603  ;;  %v4117_v36 = vpop.permute.xlu1 %4116  ;;  %v4150_v8 = vmul.f32 %v5602_v2, %v4048_v53  ;;  %v4220_v53 = vld [vmem:[#allocation4 + $0x108] sm:$0xff] }
 0x7e5   : > { %v4112_v42 = vpop.permute.xlu0 %4111  ;;  %5613 = vrcp.f32 %v4117_v36  ;;  %v4148_v49 = vmul.f32 %v5604_v25, %v4047_v51  ;;  %v4219_v51 = vld [vmem:[#allocation4 + $0x100] sm:$0xff] }
 0x7e6   : > { %5615 = vrcp.f32 %v4112_v42  ;;  %4549 = vrot.lane.b32.xlu1 %v4150_v8, %s5787_s17 }
 0x7e7   : > { %v5606_v16 = vpop.eup %5605  ;;  %4547 = vrot.lane.b32.xlu0 %v4148_v49, %s5787_s17 }
 0x7e8   : > { %v5608_v24 = vpop.eup %5607  ;;  %v4127_v28 = vpop.permute.xlu1 %4126  ;;  %v4154_v7 = vmul.f32 %v5606_v16, %v4050_v5  ;;  %v4222_v5 = vld [vmem:[#allocation4 + $0x118] sm:$0xff] }
 0x7e9   : > { %v4122_v59 = vpop.permute.xlu0 %4121  ;;  %5617 = vrcp.f32 %v4127_v28  ;;  %v4152_v14 = vmul.f32 %v5608_v24, %v4049_v40  ;;  %v4221_v40 = vld [vmem:[#allocation4 + $0x110] sm:$0xff] }
 0x7ea   : > { %5619 = vrcp.f32 %v4122_v59  ;;  %4553 = vrot.lane.b32.xlu1 %v4154_v7, %s5787_s17 }
 0x7eb   : > { %v5610_v27 = vpop.eup %5609  ;;  %4551 = vrot.lane.b32.xlu0 %v4152_v14, %s5787_s17 }
 0x7ec   : > { %v5612_v3 = vpop.eup %5611  ;;  %v4137_v15 = vpop.permute.xlu1 %4136  ;;  %v4158_v50 = vmul.f32 %v5610_v27, %v4052_v46  ;;  %v4224_v46 = vld [vmem:[#allocation4 + $0x128] sm:$0xff] }
 0x7ed   : > { %v4132_v48 = vpop.permute.xlu0 %4131  ;;  %5621 = vrcp.f32 %v4137_v15  ;;  %v4156_v45 = vmul.f32 %v5612_v3, %v4051_v31  ;;  %v4223_v31 = vld [vmem:[#allocation4 + $0x120] sm:$0xff] }
 0x7ee   : > { %5623 = vrcp.f32 %v4132_v48  ;;  %4557 = vrot.lane.b32.xlu1 %v4158_v50, %s5787_s17 }
 0x7ef   : > { %v5614_v22 = vpop.eup %5613  ;;  %4555 = vrot.lane.b32.xlu0 %v4156_v45, %s5787_s17 }
 0x7f0   : > { %v5616_v39 = vpop.eup %5615  ;;  %v4243_v20 = vpop.permute.xlu1 %4242  ;;  %v4162_v10 = vmul.f32 %v5614_v22, %v4054_v43  ;;  %v4226_v43 = vld [vmem:[#allocation4 + $0x138] sm:$0xff] }
 0x7f1   : > { %v4238_v1 = vpop.permute.xlu0 %4237  ;;  %5625 = vrcp.f32 %v4243_v20  ;;  %v4160_v11 = vmul.f32 %v5616_v39, %v4053_v0  ;;  %v4225_v0 = vld [vmem:[#allocation4 + $0x130] sm:$0xff] }
 0x7f2   : > { %5627 = vrcp.f32 %v4238_v1  ;;  %4561 = vrot.lane.b32.xlu1 %v4162_v10, %s5787_s17 }
 0x7f3   : > { %v5618_v19 = vpop.eup %5617  ;;  %4559 = vrot.lane.b32.xlu0 %v4160_v11, %s5787_s17 }
 0x7f4   : > { %v5620_v41 = vpop.eup %5619  ;;  %v4253_v9 = vpop.permute.xlu1 %4252  ;;  %v4166_v44 = vmul.f32 %v5618_v19, %v4056_v26  ;;  %v4228_v26 = vld [vmem:[#allocation4 + $0x148] sm:$0xff] }
 0x7f5   : > { %v4248_v57 = vpop.permute.xlu0 %4247  ;;  %5629 = vrcp.f32 %v4253_v9  ;;  %v4164_v30 = vmul.f32 %v5620_v41, %v4055_v18  ;;  %v4227_v18 = vld [vmem:[#allocation4 + $0x140] sm:$0xff] }
 0x7f6   : > { %5631 = vrcp.f32 %v4248_v57  ;;  %4565 = vrot.lane.b32.xlu1 %v4166_v44, %s5787_s17 }
 0x7f7   : > { %v5622_v52 = vpop.eup %5621  ;;  %4563 = vrot.lane.b32.xlu0 %v4164_v30, %s5787_s17 }
 0x7f8   : > { %v5624_v32 = vpop.eup %5623  ;;  %v4263_v62 = vpop.permute.xlu1 %4262  ;;  %v4170_v12 = vmul.f32 %v5622_v52, %v4058_v63  ;;  %v4230_v63 = vld [vmem:[#allocation4 + $0x158] sm:$0xff] }
 0x7f9   : > { %v4258_v61 = vpop.permute.xlu0 %4257  ;;  %5633 = vrcp.f32 %v4263_v62  ;;  %v4168_v37 = vmul.f32 %v5624_v32, %v4057_v6  ;;  %v4229_v6 = vld [vmem:[#allocation4 + $0x150] sm:$0xff] }
 0x7fa   : > { %5635 = vrcp.f32 %v4258_v61  ;;  %4569 = vrot.lane.b32.xlu1 %v4170_v12, %s5787_s17 }
 0x7fb   : > { %v5626_v2 = vpop.eup %5625  ;;  %4567 = vrot.lane.b32.xlu0 %v4168_v37, %s5787_s17 }
 0x7fc   : > { %v5628_v25 = vpop.eup %5627  ;;  %v4273_v36 = vpop.permute.xlu1 %4272  ;;  %v4318_v8 = vmul.f32 %v5626_v2, %v4220_v53  ;;  %v4232_v53 = vld [vmem:[#allocation4 + $0x168] sm:$0xff] }
 0x7fd   : > { %v4268_v42 = vpop.permute.xlu0 %4267  ;;  %5637 = vrcp.f32 %v4273_v36  ;;  %v4316_v49 = vmul.f32 %v5628_v25, %v4219_v51  ;;  %v4231_v51 = vld [vmem:[#allocation4 + $0x160] sm:$0xff] }
 0x7fe   : > { %5639 = vrcp.f32 %v4268_v42  ;;  %4605 = vrot.lane.b32.xlu1 %v4318_v8, %s5788_s27 }
 0x7ff   : > { %v5630_v16 = vpop.eup %5629  ;;  %4603 = vrot.lane.b32.xlu0 %v4316_v49, %s5788_s27 }
 0x800   : > { %v5632_v24 = vpop.eup %5631  ;;  %v4283_v28 = vpop.permute.xlu1 %4282  ;;  %v4322_v7 = vmul.f32 %v5630_v16, %v4222_v5  ;;  %v4234_v5 = vld [vmem:[#allocation4 + $0x178] sm:$0xff] }
 0x801   : > { %v4278_v59 = vpop.permute.xlu0 %4277  ;;  %5641 = vrcp.f32 %v4283_v28  ;;  %v4320_v14 = vmul.f32 %v5632_v24, %v4221_v40  ;;  %v4233_v40 = vld [vmem:[#allocation4 + $0x170] sm:$0xff] }
 0x802   : > { %5643 = vrcp.f32 %v4278_v59  ;;  %4609 = vrot.lane.b32.xlu1 %v4322_v7, %s5788_s27 }
 0x803   : > { %v5634_v27 = vpop.eup %5633  ;;  %4607 = vrot.lane.b32.xlu0 %v4320_v14, %s5788_s27 }
 0x804   : > { %v5636_v3 = vpop.eup %5635  ;;  %v4293_v15 = vpop.permute.xlu1 %4292  ;;  %v4326_v50 = vmul.f32 %v5634_v27, %v4224_v46  ;;  %v4396_v46 = vld [vmem:[#allocation4 + $0x188] sm:$0xff] }
 0x805   : > { %v4288_v48 = vpop.permute.xlu0 %4287  ;;  %5645 = vrcp.f32 %v4293_v15  ;;  %v4324_v45 = vmul.f32 %v5636_v3, %v4223_v31  ;;  %v4395_v31 = vld [vmem:[#allocation4 + $0x180] sm:$0xff] }
 0x806   : > { %5647 = vrcp.f32 %v4288_v48  ;;  %4613 = vrot.lane.b32.xlu1 %v4326_v50, %s5788_s27 }
 0x807   : > { %v5638_v22 = vpop.eup %5637  ;;  %4611 = vrot.lane.b32.xlu0 %v4324_v45, %s5788_s27 }
 0x808   : > { %v5640_v39 = vpop.eup %5639  ;;  %v4303_v20 = vpop.permute.xlu1 %4302  ;;  %v4330_v10 = vmul.f32 %v5638_v22, %v4226_v43  ;;  %v4398_v43 = vld [vmem:[#allocation4 + $0x198] sm:$0xff] }
 0x809   : > { %v4298_v1 = vpop.permute.xlu0 %4297  ;;  %5649 = vrcp.f32 %v4303_v20  ;;  %v4328_v11 = vmul.f32 %v5640_v39, %v4225_v0  ;;  %v4397_v0 = vld [vmem:[#allocation4 + $0x190] sm:$0xff] }
 0x80a   : > { %5651 = vrcp.f32 %v4298_v1  ;;  %4617 = vrot.lane.b32.xlu1 %v4330_v10, %s5788_s27 }
 0x80b   : > { %v5642_v19 = vpop.eup %5641  ;;  %4615 = vrot.lane.b32.xlu0 %v4328_v11, %s5788_s27 }
 0x80c   : > { %v5644_v41 = vpop.eup %5643  ;;  %v4313_v9 = vpop.permute.xlu1 %4312  ;;  %v4334_v44 = vmul.f32 %v5642_v19, %v4228_v26  ;;  %v4400_v26 = vld [vmem:[#allocation4 + $0x1a8] sm:$0xff] }
 0x80d   : > { %v4308_v57 = vpop.permute.xlu0 %4307  ;;  %5653 = vrcp.f32 %v4313_v9  ;;  %v4332_v30 = vmul.f32 %v5644_v41, %v4227_v18  ;;  %v4399_v18 = vld [vmem:[#allocation4 + $0x1a0] sm:$0xff] }
 0x80e   : > { %5655 = vrcp.f32 %v4308_v57  ;;  %4621 = vrot.lane.b32.xlu1 %v4334_v44, %s5788_s27 }
 0x80f   : > { %v5646_v52 = vpop.eup %5645  ;;  %4619 = vrot.lane.b32.xlu0 %v4332_v30, %s5788_s27 }
 0x810   : > { %v5648_v32 = vpop.eup %5647  ;;  %v4419_v62 = vpop.permute.xlu1 %4418  ;;  %v4338_v12 = vmul.f32 %v5646_v52, %v4230_v63  ;;  %v4402_v63 = vld [vmem:[#allocation4 + $0x1b8] sm:$0xff] }
 0x811   : > { %v4414_v61 = vpop.permute.xlu0 %4413  ;;  %5657 = vrcp.f32 %v4419_v62  ;;  %v4336_v37 = vmul.f32 %v5648_v32, %v4229_v6  ;;  %v4401_v6 = vld [vmem:[#allocation4 + $0x1b0] sm:$0xff] }
 0x812   : > { %5659 = vrcp.f32 %v4414_v61  ;;  %4625 = vrot.lane.b32.xlu1 %v4338_v12, %s5788_s27 }
 0x813   : > { %v5650_v2 = vpop.eup %5649  ;;  %4623 = vrot.lane.b32.xlu0 %v4336_v37, %s5788_s27 }
 0x814   : > { %v5652_v25 = vpop.eup %5651  ;;  %v4429_v36 = vpop.permute.xlu1 %4428  ;;  %v4342_v8 = vmul.f32 %v5650_v2, %v4232_v53  ;;  %v4404_v53 = vld [vmem:[#allocation4 + $0x1c8] sm:$0xff] }
 0x815   : > { %v4424_v42 = vpop.permute.xlu0 %4423  ;;  %5661 = vrcp.f32 %v4429_v36  ;;  %v4340_v49 = vmul.f32 %v5652_v25, %v4231_v51  ;;  %v4403_v51 = vld [vmem:[#allocation4 + $0x1c0] sm:$0xff] }
 0x816   : > { %5663 = vrcp.f32 %v4424_v42  ;;  %4629 = vrot.lane.b32.xlu1 %v4342_v8, %s5788_s27 }
 0x817   : > { %v5654_v16 = vpop.eup %5653  ;;  %4627 = vrot.lane.b32.xlu0 %v4340_v49, %s5788_s27 }
 0x818   : > { %v5656_v24 = vpop.eup %5655  ;;  %v4439_v28 = vpop.permute.xlu1 %4438  ;;  %v4346_v7 = vmul.f32 %v5654_v16, %v4234_v5  ;;  %v4406_v5 = vld [vmem:[#allocation4 + $0x1d8] sm:$0xff] }
 0x819   : > { %v4434_v59 = vpop.permute.xlu0 %4433  ;;  %5665 = vrcp.f32 %v4439_v28  ;;  %v4344_v14 = vmul.f32 %v5656_v24, %v4233_v40  ;;  %v4405_v40 = vld [vmem:[#allocation4 + $0x1d0] sm:$0xff] }
 0x81a   : > { %5667 = vrcp.f32 %v4434_v59  ;;  %4633 = vrot.lane.b32.xlu1 %v4346_v7, %s5788_s27  ;;  %v4408_v7 = vld [vmem:[#allocation4 + $0x1e8] sm:$0xff] }
 0x81b   : > { %v5658_v27 = vpop.eup %5657  ;;  %4631 = vrot.lane.b32.xlu0 %v4344_v14, %s5788_s27  ;;  %v4407_v14 = vld [vmem:[#allocation4 + $0x1e0] sm:$0xff] }
 0x81c   : > { %v5660_v3 = vpop.eup %5659  ;;  %v4449_v15 = vpop.permute.xlu1 %4448  ;;  %v4494_v50 = vmul.f32 %v5658_v27, %v4396_v46 }
 0x81d   : > { %v4444_v48 = vpop.permute.xlu0 %4443  ;;  %5669 = vrcp.f32 %v4449_v15  ;;  %v4492_v45 = vmul.f32 %v5660_v3, %v4395_v31  ;;  %v4410_v15 = vld [vmem:[#allocation4 + $0x1f8] sm:$0xff] }
 0x81e   : > { %5671 = vrcp.f32 %v4444_v48  ;;  %4669 = vrot.lane.b32.xlu1 %v4494_v50, %s5789_s29  ;;  %v4409_v48 = vld [vmem:[#allocation4 + $0x1f0] sm:$0xff] }
 0x81f   : > { %v5662_v22 = vpop.eup %5661  ;;  %4667 = vrot.lane.b32.xlu0 %v4492_v45, %s5789_s29 }
 0x820   : > { %v5664_v39 = vpop.eup %5663  ;;  %v4459_v20 = vpop.permute.xlu1 %4458  ;;  %v4498_v10 = vmul.f32 %v5662_v22, %v4398_v43 }
 0x821   : > { %v4454_v1 = vpop.permute.xlu0 %4453  ;;  %5673 = vrcp.f32 %v4459_v20  ;;  %v4496_v11 = vmul.f32 %v5664_v39, %v4397_v0 }
 0x822   : > { %5675 = vrcp.f32 %v4454_v1  ;;  %4673 = vrot.lane.b32.xlu1 %v4498_v10, %s5789_s29 }
 0x823   : > { %v5666_v19 = vpop.eup %5665  ;;  %4671 = vrot.lane.b32.xlu0 %v4496_v11, %s5789_s29 }
 0x824   : > { %v5668_v41 = vpop.eup %5667  ;;  %v4469_v9 = vpop.permute.xlu1 %4468  ;;  %v4502_v44 = vmul.f32 %v5666_v19, %v4400_v26 }
 0x825   : > { %v4464_v57 = vpop.permute.xlu0 %4463  ;;  %5677 = vrcp.f32 %v4469_v9  ;;  %v4500_v30 = vmul.f32 %v5668_v41, %v4399_v18 }
 0x826   : > { %5679 = vrcp.f32 %v4464_v57  ;;  %4677 = vrot.lane.b32.xlu1 %v4502_v44, %s5789_s29 }
 0x827   : > { %v5670_v52 = vpop.eup %5669  ;;  %4675 = vrot.lane.b32.xlu0 %v4500_v30, %s5789_s29 }
 0x828   : > { %v5672_v32 = vpop.eup %5671  ;;  %v4479_v62 = vpop.permute.xlu1 %4478  ;;  %v4506_v12 = vmul.f32 %v5670_v52, %v4402_v63 }
 0x829   : > { %v4474_v61 = vpop.permute.xlu0 %4473  ;;  %5681 = vrcp.f32 %v4479_v62  ;;  %v4504_v37 = vmul.f32 %v5672_v32, %v4401_v6 }
 0x82a   : > { %5683 = vrcp.f32 %v4474_v61  ;;  %4681 = vrot.lane.b32.xlu1 %v4506_v12, %s5789_s29 }
 0x82b   : > { %v5674_v2 = vpop.eup %5673  ;;  %4679 = vrot.lane.b32.xlu0 %v4504_v37, %s5789_s29 }
 0x82c   : > { %v5676_v25 = vpop.eup %5675  ;;  %v4489_v36 = vpop.permute.xlu1 %4488  ;;  %v4510_v8 = vmul.f32 %v5674_v2, %v4404_v53 }
 0x82d   : > { %v4484_v42 = vpop.permute.xlu0 %4483  ;;  %5685 = vrcp.f32 %v4489_v36  ;;  %v4508_v49 = vmul.f32 %v5676_v25, %v4403_v51 }
 0x82e   : > { %5687 = vrcp.f32 %v4484_v42  ;;  %4685 = vrot.lane.b32.xlu1 %v4510_v8, %s5789_s29 }
 0x82f   : > { %v5678_v16 = vpop.eup %5677  ;;  %4683 = vrot.lane.b32.xlu0 %v4508_v49, %s5789_s29  ;;  %5689 = vrcp.f32 %v8561_v23 }
 0x830   : > { %v5680_v24 = vpop.eup %5679  ;;  %v4514_v28 = vmul.f32 %v5678_v16, %v4406_v5  ;;  %5691 = vrcp.f32 %v8557_v47  ;;  %v3868_v47 = vld [vmem:[#allocation4 + $0x8] sm:$0xff] }
 0x831   : > { %v4512_v59 = vmul.f32 %v5680_v24, %v4405_v40  ;;  %5693 = vrcp.f32 %v8559_v35  ;;  %v3867_v40 = vld [vmem:[#allocation4] sm:$0xff] }
 0x832   : > { %4689 = vrot.lane.b32.xlu1 %v4514_v28, %s5789_s29  ;;  %5695 = vrcp.f32 %v8555_v55  ;;  %v3870_v28 = vld [vmem:[#allocation4 + $0x18] sm:$0xff] }
 0x833   : > { %v5682_v46 = vpop.eup %5681  ;;  %4687 = vrot.lane.b32.xlu0 %v4512_v59, %s5789_s29  ;;  %5697 = vrcp.f32 %v8563_v4 }
 0x834   : > { %v5684_v31 = vpop.eup %5683  ;;  %v4518_v27 = vmul.f32 %v5682_v46, %v4408_v7  ;;  %5699 = vrcp.f32 %v8565_v58  ;;  %v3869_v7 = vld [vmem:[#allocation4 + $0x10] sm:$0xff] }
 0x835   : > { %v4516_v3 = vmul.f32 %v5684_v31, %v4407_v14  ;;  %5701 = vrcp.f32 %v8567_v21 }
 0x836   : > { %4693 = vrot.lane.b32.xlu1 %v4518_v27, %s5789_s29  ;;  %5703 = vrcp.f32 %v8569_v60 }
 0x837   : > { %v5686_v50 = vpop.eup %5685  ;;  %4691 = vrot.lane.b32.xlu0 %v4516_v3, %s5789_s29  ;;  %5705 = vrcp.f32 %v8571_v38 }
 0x838   : > { %v5688_v45 = vpop.eup %5687  ;;  %v4522_v43 = vmul.f32 %v5686_v50, %v4410_v15  ;;  %5707 = vrcp.f32 %v8573_v29  ;;  %v3872_v50 = vld [vmem:[#allocation4 + $0x28] sm:$0xff] }
 0x839   : > { %v4520_v0 = vmul.f32 %v5688_v45, %v4409_v48  ;;  %v5690_v49 = vpop.eup %5689  ;;  %5709 = vrcp.f32 %v8575_v54 }
 0x83a   : > { %4697 = vrot.lane.b32.xlu1 %v4522_v43, %s5789_s29  ;;  %v5692_v5 = vpop.eup %5691  ;;  %v3966_v55 = vmul.f32 %v5690_v49, %v3868_v47  ;;  %5711 = vrcp.f32 %v8577_v34 }
 0x83b   : > { %4695 = vrot.lane.b32.xlu0 %v4520_v0, %s5789_s29  ;;  %v5694_v4 = vpop.eup %5693  ;;  %v3964_v24 = vmul.f32 %v5692_v5, %v3867_v40  ;;  %v3871_v0 = vld [vmem:[#allocation4 + $0x20] sm:$0xff]  ;;  %v3874_v40 = vld [vmem:[#allocation4 + $0x38] sm:$0xff]  ;;  %5713 = vrcp.f32 %v8579_v33  ;;  %v3876_v33 = vld [vmem:[#allocation4 + $0x48] sm:$0xff] }
 0x83c   : > { %v5696_v58 = vpop.eup %5695  ;;  %v3970_v46 = vmul.f32 %v5694_v4, %v3870_v28  ;;  %5715 = vrcp.f32 %v8581_v56  ;;  %v3875_v56 = vld [vmem:[#allocation4 + $0x40] sm:$0xff] }
 0x83d   : > { %v5698_v15 = vpop.eup %5697  ;;  %v3968_v48 = vmul.f32 %v5696_v58, %v3869_v7  ;;  %5717 = vrcp.f32 %v8583_v13  ;;  %v3878_v13 = vld [vmem:[#allocation4 + $0x58] sm:$0xff] }
 0x83e   : > { %v5700_v45 = vpop.eup %5699  ;;  %5719 = vrcp.f32 %v8585_v17  ;;  %v3877_v17 = vld [vmem:[#allocation4 + $0x50] sm:$0xff] }
 0x83f   : > { %v5702_v47 = vpop.eup %5701  ;;  %v3972_v5 = vmul.f32 %v5700_v45, %v3871_v0 }
 0x850   : > { %v4542_v22 = vpop.permute.xlu1 %4541 }
 0x851   : > { %v4540_v39 = vpop.permute.xlu0 %4539  ;;  %v4716_v59 = vsel %vm9617_vm1, %v3966_v55, %v4542_v22  ;;  %v3873_v55 = vld [vmem:[#allocation4 + $0x30] sm:$0xff] }
 0x852   : > { %v4715_v21 = vsel %vm9618_vm3, %v3964_v24, %v4540_v39  ;;  %v3978_v24 = vmul.f32 %v5702_v47, %v3874_v40  ;;  %vm9630_vm3 = vmmov %vm9617_vm1 }
 0x854   : > { %v8635_v20 = vpop.permute.xlu1 %4545 }
 0x855   : > { %v8637_v1 = vpop.permute.xlu0 %4543  ;;  %v4718_v43 = vsel %vm9619_vm2, %v3970_v46, %v8635_v20  ;;  %vm9631_vm2 = vmmov %vm9617_vm1 }
 0x856   : > { %v4717_v29 = vsel %vm9620_vm14, %v3968_v48, %v8637_v1  ;;  %v5704_v1 = vpop.eup %5703 }
 0x857   : > { %v3976_v7 = vmul.f32 %v5704_v1, %v3873_v55 }
 0x858   : > { %v8639_v10 = vpop.permute.xlu1 %4549 }
 0x859   : > { %v8641_v11 = vpop.permute.xlu0 %4547 }
 0x85a   : > { %v4719_v34 = vsel %vm9622_vm4, %v3972_v5, %v8641_v11 }
 0x85c   : > { %v8643_v26 = vpop.permute.xlu1 %4553 }
 0x85d   : > { %v8645_v18 = vpop.permute.xlu0 %4551 }
 0x860   : > { %v8647_v19 = vpop.permute.xlu1 %4557 }
 0x861   : > { %v8649_v41 = vpop.permute.xlu0 %4555 }
 0x864   : > { %v8651_v9 = vpop.permute.xlu1 %4561 }
 0x865   : > { %v8653_v57 = vpop.permute.xlu0 %4559 }
 0x868   : > { %v8655_v44 = vpop.permute.xlu1 %4565 }
 0x869   : > { %v8657_v30 = vpop.permute.xlu0 %4563 }
 0x86c   : > { %v8659_v63 = vpop.permute.xlu1 %4569 }
 0x86d   : > { %v8661_v6 = vpop.permute.xlu0 %4567 }
 0x870   : > { %v4606_v52 = vpop.permute.xlu1 %4605 }
 0x871   : > { %v4604_v32 = vpop.permute.xlu0 %4603  ;;  %v4733_v60 = vsel %vm4731_vm0, %v4716_v59, %v4606_v52  ;;  %v3974_v52 = vmul.f32 %v5698_v15, %v3872_v50  ;;  %v5706_v59 = vpop.eup %5705 }
 0x872   : > { %v4732_v31 = vsel %vm4731_vm0, %v4715_v21, %v4604_v32  ;;  %v5708_v21 = vpop.eup %5707  ;;  %v3982_v46 = vmul.f32 %v5706_v59, %v3876_v33 }
 0x873   : > { %v3980_v15 = vmul.f32 %v5708_v21, %v3875_v56 }
 0x874   : > { %v4610_v62 = vpop.permute.xlu1 %4609 }
 0x875   : > { %v4608_v61 = vpop.permute.xlu0 %4607  ;;  %v4735_v22 = vsel %vm4731_vm0, %v4718_v43, %v4610_v62  ;;  %v4720_v62 = vsel %vm9621_vm12, %v3974_v52, %v8639_v10 }
 0x876   : > { %v4734_v32 = vsel %vm4731_vm0, %v4717_v29, %v4608_v61 }
 0x878   : > { %v8663_v12 = vpop.permute.xlu1 %4613 }
 0x879   : > { %v8665_v37 = vpop.permute.xlu0 %4611  ;;  %v4737_v61 = vsel %vm4731_vm0, %v4720_v62, %v8663_v12  ;;  %v4722_v12 = vsel %vm9623_vm5, %v3978_v24, %v8643_v26  ;;  %v3882_v62 = vld [vmem:[#allocation4 + $0x78] sm:$0xff] }
 0x87a   : > { %v4736_v28 = vsel %vm4731_vm0, %v4719_v34, %v8665_v37  ;;  %v4721_v37 = vsel %vm9624_vm10, %v3976_v7, %v8645_v18  ;;  %v3881_v34 = vld [vmem:[#allocation4 + $0x70] sm:$0xff] }
 0x87c   : > { %v8667_v53 = vpop.permute.xlu1 %4617 }
 0x87d   : > { %v8669_v51 = vpop.permute.xlu0 %4615 }
 0x880   : > { %v8672_v2 = vpop.permute.xlu1 %4621 }
 0x881   : > { %v8675_v25 = vpop.permute.xlu0 %4619 }
 0x884   : > { %v8678_v36 = vpop.permute.xlu1 %4625 }
 0x885   : > { %v8681_v42 = vpop.permute.xlu0 %4623 }
 0x888   : > { %v8684_v8 = vpop.permute.xlu1 %4629 }
 0x889   : > { %v8687_v23 = vpop.permute.xlu0 %4627 }
 0x88c   : > { %v8690_v35 = vpop.permute.xlu1 %4633 }
 0x88d   : > { %v8693_v16 = vpop.permute.xlu0 %4631 }
 0x890   : > { %v4670_v14 = vpop.permute.xlu1 %4669 }
 0x891   : > { %v4750_v27 = vsel %vm4748_vm7, %v4733_v60, %v4670_v14  ;;  %v4668_v3 = vpop.permute.xlu0 %4667  ;;  %v4739_v60 = vsel %vm4731_vm0, %v4722_v12, %v8667_v53  ;;  %v4724_v53 = vsel %vm9625_vm9, %v3982_v46, %v8647_v19 }
 0x892   : > { %4767 = vst.msk [vmem:[%s5900_s13 + $0x8] sm:$0xff] %vm4765_vm6, %v4750_v27  ;;  %v4749_v38 = vsel %vm4748_vm7, %v4732_v31, %v4668_v3  ;;  %v4738_v31 = vsel %vm4731_vm0, %v4721_v37, %v8669_v51  ;;  %v5710_v3 = vpop.eup %5709  ;;  %v4723_v51 = vsel %vm9626_vm13, %v3980_v15, %v8649_v41  ;;  %v4741_v50 = vsel %vm4731_vm0, %v4724_v53, %v8672_v2 }
 0x893   : > { %4766 = vst.msk [vmem:[%s5900_s13] sm:$0xff] %vm4765_vm6, %v4749_v38  ;;  %v5712_v48 = vpop.eup %5711  ;;  %v3986_v45 = vmul.f32 %v5710_v3, %v3878_v13  ;;  %v4740_v43 = vsel %vm4731_vm0, %v4723_v51, %v8675_v25 }
 0x894   : > { %v4674_v39 = vpop.permute.xlu1 %4673  ;;  %v3984_v19 = vmul.f32 %v5712_v48, %v3877_v17 }
 0x895   : > { %v4752_v49 = vsel %vm4748_vm7, %v4735_v22, %v4674_v39  ;;  %v4672_v20 = vpop.permute.xlu0 %4671  ;;  %v5714_v22 = vpop.eup %5713  ;;  %v3880_v39 = vld [vmem:[#allocation4 + $0x68] sm:$0xff]  ;;  %v4726_v2 = vsel %vm9627_vm11, %v3986_v45, %v8651_v9 }
 0x896   : > { %4769 = vst.msk [vmem:[%s5900_s13 + $0x18] sm:$0xff] %vm4765_vm6, %v4752_v49  ;;  %v4751_v54 = vsel %vm4748_vm7, %v4734_v32, %v4672_v20  ;;  %v5716_v41 = vpop.eup %5715  ;;  %v3879_v32 = vld [vmem:[#allocation4 + $0x60] sm:$0xff]  ;;  %v4725_v25 = vsel %vm9628_vm8, %v3984_v19, %v8653_v57  ;;  %v4743_v49 = vsel %vm4731_vm0, %v4726_v2, %v8678_v36  ;;  %v3990_v47 = vmul.f32 %v5714_v22, %v3880_v39 }
 0x897   : > { %4768 = vst.msk [vmem:[%s5900_s13 + $0x10] sm:$0xff] %vm4765_vm6, %v4751_v54  ;;  %v4742_v5 = vsel %vm4731_vm0, %v4725_v25, %v8681_v42  ;;  %v5718_v1 = vpop.eup %5717  ;;  %v3988_v9 = vmul.f32 %v5716_v41, %v3879_v32 }
 0x898   : > { %v4678_v4 = vpop.permute.xlu1 %4677  ;;  %v5720_v57 = vpop.eup %5719  ;;  %v4728_v36 = vsel %vm9629_vm15, %v3990_v47, %v8655_v44  ;;  %v3994_v24 = vmul.f32 %v5718_v1, %v3882_v62 }
 0x899   : > { %v4754_v10 = vsel %vm4748_vm7, %v4737_v61, %v4678_v4  ;;  %v4676_v58 = vpop.permute.xlu0 %4675  ;;  %v4727_v42 = vsel %vm9617_vm1, %v3988_v9, %v8657_v30  ;;  %v4745_v61 = vsel %vm4731_vm0, %v4728_v36, %v8684_v8  ;;  %v3992_v44 = vmul.f32 %v5720_v57, %v3881_v34 }
 0x89a   : > { %4771 = vst.msk [vmem:[%s5900_s13 + $0x28] sm:$0xff] %vm4765_vm6, %v4754_v10  ;;  %v4753_v11 = vsel %vm4748_vm7, %v4736_v28, %v4676_v58  ;;  %v4744_v28 = vsel %vm4731_vm0, %v4727_v42, %v8687_v23  ;;  %v4730_v30 = vsel %vm9630_vm3, %v3994_v24, %v8659_v63 }
 0x89b   : > { %4770 = vst.msk [vmem:[%s5900_s13 + $0x20] sm:$0xff] %vm4765_vm6, %v4753_v11  ;;  %v4729_v8 = vsel %vm9631_vm2, %v3992_v44, %v8661_v6  ;;  %v4747_v23 = vsel %vm4731_vm0, %v4730_v30, %v8690_v35 }
 0x89c   : > { %v4682_v14 = vpop.permute.xlu1 %4681  ;;  %v4746_v33 = vsel %vm4731_vm0, %v4729_v8, %v8693_v16 }
 0x89d   : > { %v4756_v26 = vsel %vm4748_vm7, %v4739_v60, %v4682_v14  ;;  %v4680_v27 = vpop.permute.xlu0 %4679 }
 0x89e   : > { %4773 = vst.msk [vmem:[%s5900_s13 + $0x38] sm:$0xff] %vm4765_vm6, %v4756_v26  ;;  %v4755_v18 = vsel %vm4748_vm7, %v4738_v31, %v4680_v27 }
 0x89f   : > { %4772 = vst.msk [vmem:[%s5900_s13 + $0x30] sm:$0xff] %vm4765_vm6, %v4755_v18 }
 0x8a0   : > { %v4686_v38 = vpop.permute.xlu1 %4685 }
 0x8a1   : > { %v4758_v0 = vsel %vm4748_vm7, %v4741_v50, %v4686_v38  ;;  %v4684_v29 = vpop.permute.xlu0 %4683 }
 0x8a2   : > { %4775 = vst.msk [vmem:[%s5900_s13 + $0x48] sm:$0xff] %vm4765_vm6, %v4758_v0  ;;  %v4757_v52 = vsel %vm4748_vm7, %v4740_v43, %v4684_v29 }
 0x8a3   : > { %4774 = vst.msk [vmem:[%s5900_s13 + $0x40] sm:$0xff] %vm4765_vm6, %v4757_v52 }
 0x8a4   : > { %v4690_v20 = vpop.permute.xlu1 %4689 }
 0x8a5   : > { %v4760_v40 = vsel %vm4748_vm7, %v4743_v49, %v4690_v20  ;;  %v4688_v54 = vpop.permute.xlu0 %4687 }
 0x8a6   : > { %4777 = vst.msk [vmem:[%s5900_s13 + $0x58] sm:$0xff] %vm4765_vm6, %v4760_v40  ;;  %v4759_v55 = vsel %vm4748_vm7, %v4742_v5, %v4688_v54 }
 0x8a7   : > { %4776 = vst.msk [vmem:[%s5900_s13 + $0x50] sm:$0xff] %vm4765_vm6, %v4759_v55 }
 0x8a8   : > { %v4694_v4 = vpop.permute.xlu1 %4693 }
 0x8a9   : > { %v4762_v10 = vsel %vm4748_vm7, %v4745_v61, %v4694_v4  ;;  %v4692_v58 = vpop.permute.xlu0 %4691 }
 0x8aa   : > { %4779 = vst.msk [vmem:[%s5900_s13 + $0x68] sm:$0xff] %vm4765_vm6, %v4762_v10  ;;  %v4761_v59 = vsel %vm4748_vm7, %v4744_v28, %v4692_v58 }
 0x8ab   : > { %4778 = vst.msk [vmem:[%s5900_s13 + $0x60] sm:$0xff] %vm4765_vm6, %v4761_v59 }
 0x8ac   : > { %v4698_v7 = vpop.permute.xlu1 %4697 }
 0x8ad   : > { %v4764_v11 = vsel %vm4748_vm7, %v4747_v23, %v4698_v7  ;;  %v4696_v21 = vpop.permute.xlu0 %4695 }
 0x8ae   : > { %4781 = vst.msk [vmem:[%s5900_s13 + $0x78] sm:$0xff] %vm4765_vm6, %v4764_v11  ;;  %v4763_v12 = vsel %vm4748_vm7, %v4746_v33, %v4696_v21 }
 0x8af   : > { %4780 = vst.msk [vmem:[%s5900_s13 + $0x70] sm:$0xff] %vm4765_vm6, %v4763_v12 }
 0x8b0 PF: > { %s14_s21 = sadd.s32 1, %s5775_s21   ;;  %s9632_s15 = smov %s5755_s16 }
 0x8b1   : > { %p11_p1 = scmp.ge.s32.totalorder %s14_s21, 6   ;;  %s9633_s16 = smov %s5866_s28 }
 0x8b2   : > { %s9634_s17 = smov %s5767_s19  ;;  %s9635_s18 = smov %s5771_s20 }
 0x8b3   : > { %s9636_s19 = smov %s9639_s22  ;;  %s9637_s20 = smov %s9643_s23 }
 0x8b4   :  { %13 = sbr.rel (!%p11_p1) target bundleno = 4 (0x4), region = 135 }

</bundles_post_ra>
